<compile_context>
chip_gen: v6e
topology: v6e:2x2x1
jax: 0.10.0
libtpu: 0.0.40
codegen_flags: <defaults>
</compile_context>

<pallas_src>
import numpy as np
import jax
import jax.numpy as jnp
from jax import lax
from jax.experimental import pallas as pl
from jax.experimental.pallas import tpu as pltpu

ROWS, COLS, CIN, CMID, CHEAD, POLICY = 6, 7, 3, 64, 32, 7
HP, WP = ROWS + 2, COLS + 2          # zero-padded spatial grid (8 x 9)
PPAD = HP * WP                       # 72 padded positions per image (multiple of 8)
CH2 = 2 * CHEAD                      # merged policy+value head channels (64)
VDIM = 64                            # value_fc1 output size
MAX_OFF = WP + 1                     # largest 3x3 tap row offset (in positions)

# Interior positions never read taps outside their own image's 72 rows, so roll
# wrap-around can only touch border rows (which are masked to zero every layer).
assert (1 * WP + 1) - MAX_OFF >= 0
assert (ROWS * WP + COLS) + MAX_OFF < PPAD


# ------------------------------- Pallas kernel ------------------------------ #

def c4_kernel(x_ref, imask_ref, w_in_ref, b_in_ref,
              rb_w1_ref, rb_s1_ref, rb_t1_ref,
              rb_w2_ref, rb_s2_ref, rb_t2_ref,
              w_head_ref, b_head_ref, w_fc_ref, b_fc_ref,
              w_v2_ref, b_v2_ref, out_ref):
    R = x_ref.shape[0]                      # 72 * B_blk
    Bb = out_ref.shape[0]                   # B_blk

    # hoisted interior-mask broadcast (JAX does not CSE broadcast_in_dim)
    mask = jnp.broadcast_to(imask_ref[...], (R, CMID))

    def conv3x3(x, wcat):
        """x: (R, Ci) f32 with zero border rows; wcat: (9*Ci, Co) bf16 -> (R, Co) f32."""
        taps = []
        for ky in range(3):
            for kx in range(3):
                off = ((ky - 1) * WP + (kx - 1)) * Bb        # tap[r] = x[r + off]
                t = x if off == 0 else pltpu.roll(x, (-off) % R, axis=0)
                taps.append(t.astype(jnp.bfloat16))
        patches = jnp.concatenate(taps, axis=1)              # (R, 9*Ci) bf16
        return jnp.dot(patches, wcat, preferred_element_type=jnp.float32)

    # input conv + bias + ReLU; re-zero border rows (zero-padding invariant)
    x = conv3x3(x_ref[...], w_in_ref[...]) + b_in_ref[...]
    x = jnp.maximum(x, 0.0) * mask

    # 3 residual blocks, inference BN folded to per-channel scale/shift
    for i in range(3):
        h = conv3x3(x, rb_w1_ref[i]) * rb_s1_ref[i] + rb_t1_ref[i]
        h = jnp.maximum(h, 0.0) * mask
        h = conv3x3(h, rb_w2_ref[i]) * rb_s2_ref[i] + rb_t2_ref[i]
        x = jnp.maximum(h + x, 0.0) * mask

    # merged 1x1 head convs: lanes [0,32) policy features, [32,64) value features
    hv = jnp.dot(x.astype(jnp.bfloat16), w_head_ref[...],
                 preferred_element_type=jnp.float32) + b_head_ref[...]
    hv = jnp.maximum(hv, 0.0).astype(jnp.bfloat16)            # (R, 64) bf16

    # flatten interior positions -> (B_blk, 2688); rows for a fixed position are
    # contiguous (spatial-major layout), so each piece is one static slice.
    pieces = []
    for y in range(ROWS):
        for xx in range(COLS):
            p = (y + 1) * WP + (xx + 1)
            pieces.append(hv[p * Bb:(p + 1) * Bb, :])
    flat = jnp.concatenate(pieces, axis=1)                     # (B_blk, 2688) bf16
    # TODO(synk): replace with batch-major rows + a single reshape-flatten once the
    #             Mosaic sublane->lane reshape path is guaranteed to lower.

    # merged policy FC (7 cols) + value FC1 (64 cols) in one matmul
    fc = jnp.dot(flat, w_fc_ref[...],
                 preferred_element_type=jnp.float32) + b_fc_ref[...]   # (B_blk, 71)
    logits = fc[:, :POLICY]
    vh = jnp.maximum(fc[:, POLICY:POLICY + VDIM], 0.0)

    # softmax over 7 moves (exp + approx reciprocal run on the EUP slot)
    m = jnp.max(logits, axis=1, keepdims=True)
    e = jnp.exp(logits - m)
    probs = e * pl.reciprocal(jnp.sum(e, axis=1, keepdims=True), approx=True)

    # value FC2 (64 -> 1) as a VPU multiply + lane reduce, then tanh
    v = jnp.sum(vh * w_v2_ref[...], axis=1, keepdims=True) + b_v2_ref[...]
    v = jnp.tanh(v)

    # single lane-dense output: lanes 0..6 policy, lane 7 value
    out_ref[...] = jnp.concatenate([probs, v], axis=1)


# ------------------------------ glue / wrapper ----------------------------- #

def _pick_block_b(batch):
    if batch <= 32:
        return batch
    for cand in (32, 16, 8):
        if batch % cand == 0:
            return cand
    return batch


@jax.jit
def connect4_forward(x_nchw, kp):
    B = x_nchw.shape[0]
    Bb = _pick_block_b(B)
    nb = B // Bb
    R_blk = PPAD * Bb

    # NCHW -> per-block rows ordered (spatial, batch), with zero spatial padding
    x = jnp.transpose(x_nchw.astype(jnp.float32), (0, 2, 3, 1))      # (B, H, W, C)
    x = jnp.pad(x, ((0, 0), (1, 1), (1, 1), (0, 0)))                 # (B, Hp, Wp, C)
    x = x.reshape(nb, Bb, PPAD, CIN).transpose(0, 2, 1, 3)           # (nb, PPAD, Bb, C)
    x2 = x.reshape(nb * R_blk, CIN)

    # interior-row mask for one block (compile-time constant, grid-invariant)
    im = np.zeros((HP, WP), np.float32)
    im[1:1 + ROWS, 1:1 + COLS] = 1.0
    imask = jnp.asarray(np.repeat(im.reshape(PPAD, 1), Bb, axis=0))  # (R_blk, 1)

    def resident(a):   # same block every grid step -> stays VMEM-resident
        nd = a.ndim
        return pl.BlockSpec(a.shape, lambda i, _nd=nd: (0,) * _nd)

    weights = (kp['w_in'], kp['b_in'],
               kp['rb_w1'], kp['rb_s1'], kp['rb_t1'],
               kp['rb_w2'], kp['rb_s2'], kp['rb_t2'],
               kp['w_head'], kp['b_head'], kp['w_fc'], kp['b_fc'],
               kp['w_v2'], kp['b_v2'])

    out = pl.pallas_call(
        c4_kernel,
        out_shape=jax.ShapeDtypeStruct((B, POLICY + 1), jnp.float32),
        grid=(nb,),
        in_specs=[pl.BlockSpec((R_blk, CIN), lambda i: (i, 0)),
                  pl.BlockSpec((R_blk, 1), lambda i: (0, 0))]
                 + [resident(w) for w in weights],
        out_specs=pl.BlockSpec((Bb, POLICY + 1), lambda i: (i, 0)),
        compiler_params=pltpu.CompilerParams(
            dimension_semantics=("parallel",)),
    )(x2, imask, *weights)

    return out[:, :POLICY], out[:, POLICY:POLICY + 1]


# --------------------------- parameter generation -------------------------- #

def init_torch_params(key):
    """Deterministic synthetic parameters in the PyTorch layouts."""
    ks = iter(jax.random.split(key, 64))

    def nrm(shape, scale):
        return scale * jax.random.normal(next(ks), shape, dtype=jnp.float32)

    def conv_w(co, ci, k):
        return nrm((co, ci, k, k), 1.0 / np.sqrt(ci * k * k))

    p = {'conv_in_w': conv_w(CMID, CIN, 3), 'conv_in_b': nrm((CMID,), 0.05), 'rb': []}
    for _ in range(3):
        p['rb'].append({
            'w1': conv_w(CMID, CMID, 3), 'b1': nrm((CMID,), 0.05),
            'g1': 1.0 + nrm((CMID,), 0.1), 'be1': nrm((CMID,), 0.1),
            'm1': nrm((CMID,), 0.1), 'v1': 1.0 + jnp.abs(nrm((CMID,), 0.1)),
            'w2': conv_w(CMID, CMID, 3), 'b2': nrm((CMID,), 0.05),
            'g2': 1.0 + nrm((CMID,), 0.1), 'be2': nrm((CMID,), 0.1),
            'm2': nrm((CMID,), 0.1), 'v2': 1.0 + jnp.abs(nrm((CMID,), 0.1)),
        })
    F = CHEAD * ROWS * COLS
    p['pconv_w'] = conv_w(CHEAD, CMID, 1); p['pconv_b'] = nrm((CHEAD,), 0.05)
    p['pfc_w'] = nrm((POLICY, F), 1.0 / np.sqrt(F)); p['pfc_b'] = nrm((POLICY,), 0.05)
    p['vconv_w'] = conv_w(CHEAD, CMID, 1); p['vconv_b'] = nrm((CHEAD,), 0.05)
    p['vfc1_w'] = nrm((VDIM, F), 1.0 / np.sqrt(F)); p['vfc1_b'] = nrm((VDIM,), 0.05)
    p['vfc2_w'] = nrm((1, VDIM), 1.0 / 8.0); p['vfc2_b'] = nrm((1,), 0.05)
    return p


def to_kernel_params(tp):
    """Re-layout torch params for the kernel; fold BN (inference) + conv bias;
    merge head convs / head FCs; cast matmul weights to bf16."""
    eps = 1e-5

    def tapcat(w):  # (Co, Ci, 3, 3) -> (9*Ci, Co) bf16, taps ordered (ky, kx)
        co, ci = w.shape[0], w.shape[1]
        return jnp.transpose(w, (2, 3, 1, 0)).reshape(9 * ci, co).astype(jnp.bfloat16)

    def fold(g, be, m, v, conv_b):
        s = g / jnp.sqrt(v + eps)
        t = be + s * (conv_b - m)
        return s.reshape(1, -1), t.reshape(1, -1)

    kp = {'w_in': tapcat(tp['conv_in_w']),
          'b_in': tp['conv_in_b'].reshape(1, -1)}
    w1s, s1s, t1s, w2s, s2s, t2s = [], [], [], [], [], []
    for blk in tp['rb']:
        w1s.append(tapcat(blk['w1']))
        s, t = fold(blk['g1'], blk['be1'], blk['m1'], blk['v1'], blk['b1'])
        s1s.append(s); t1s.append(t)
        w2s.append(tapcat(blk['w2']))
        s, t = fold(blk['g2'], blk['be2'], blk['m2'], blk['v2'], blk['b2'])
        s2s.append(s); t2s.append(t)
    kp['rb_w1'] = jnp.stack(w1s); kp['rb_s1'] = jnp.stack(s1s); kp['rb_t1'] = jnp.stack(t1s)
    kp['rb_w2'] = jnp.stack(w2s); kp['rb_s2'] = jnp.stack(s2s); kp['rb_t2'] = jnp.stack(t2s)

    # merged 1x1 heads: lanes [0,32) policy, [32,64) value
    pw = tp['pconv_w'][:, :, 0, 0].T                      # (64, 32)
    vw = tp['vconv_w'][:, :, 0, 0].T                      # (64, 32)
    kp['w_head'] = jnp.concatenate([pw, vw], axis=1).astype(jnp.bfloat16)    # (64, 64)
    kp['b_head'] = jnp.concatenate([tp['pconv_b'], tp['vconv_b']]).reshape(1, -1)

    # merged FC over flat index (p, ch) with p = y*COLS+x, ch in [0,64)
    # PyTorch flatten is (c, h, w)-major; permute weights to match kernel layout.
    a = jnp.transpose(tp['pfc_w'].reshape(POLICY, CHEAD, ROWS, COLS), (2, 3, 1, 0))
    a = jnp.pad(a, ((0, 0), (0, 0), (0, CHEAD), (0, 0)))          # zeros for value lanes
    a = a.reshape(ROWS * COLS * CH2, POLICY)
    b = jnp.transpose(tp['vfc1_w'].reshape(VDIM, CHEAD, ROWS, COLS), (2, 3, 1, 0))
    b = jnp.pad(b, ((0, 0), (0, 0), (CHEAD, 0), (0, 0)))          # zeros for policy lanes
    b = b.reshape(ROWS * COLS * CH2, VDIM)
    kp['w_fc'] = jnp.concatenate([a, b], axis=1).astype(jnp.bfloat16)        # (2688, 71)
    kp['b_fc'] = jnp.concatenate([tp['pfc_b'], tp['vfc1_b']]).reshape(1, -1)

    kp['w_v2'] = tp['vfc2_w'].reshape(1, VDIM)            # f32, used as VPU reduce
    kp['b_v2'] = tp['vfc2_b'].reshape(1, 1)
    return kp


# ------------------------------ JAX reference ------------------------------ #

def reference_forward(x, tp):
    def conv(x, w, b, padding):
        y = lax.conv_general_dilated(x, w, (1, 1), padding,
                                     dimension_numbers=('NCHW', 'OIHW', 'NCHW'))
        return y + b[None, :, None, None]

    def bn(y, g, be, m, v):
        return (g[None, :, None, None] * (y - m[None, :, None, None])
                / jnp.sqrt(v[None, :, None, None] + 1e-5) + be[None, :, None, None])

    x = jax.nn.relu(conv(x, tp['conv_in_w'], tp['conv_in_b'], 'SAME'))
    for blk in tp['rb']:
        res = x
        h = jax.nn.relu(bn(conv(x, blk['w1'], blk['b1'], 'SAME'),
                           blk['g1'], blk['be1'], blk['m1'], blk['v1']))
        h = bn(conv(h, blk['w2'], blk['b2'], 'SAME'),
               blk['g2'], blk['be2'], blk['m2'], blk['v2'])
        x = jax.nn.relu(h + res)
    p = jax.nn.relu(conv(x, tp['pconv_w'], tp['pconv_b'], 'VALID'))
    p = p.reshape(p.shape[0], -1) @ tp['pfc_w'].T + tp['pfc_b']
    p = jax.nn.softmax(p, axis=1)
    v = jax.nn.relu(conv(x, tp['vconv_w'], tp['vconv_b'], 'VALID'))
    v = jax.nn.relu(v.reshape(v.shape[0], -1) @ tp['vfc1_w'].T + tp['vfc1_b'])
    v = jnp.tanh(v @ tp['vfc2_w'].T + tp['vfc2_b'])
    return p, v


if __name__ == "__main__":
    B = 2
    x = jax.random.normal(jax.random.PRNGKey(0), (B, CIN, ROWS, COLS), dtype=jnp.float32)
    tp = init_torch_params(jax.random.PRNGKey(42))
    kp = to_kernel_params(tp)

    policy, value = connect4_forward(x, kp)
    jax.block_until_ready((policy, value))

    ref_p, ref_v = reference_forward(x, tp)
    np.testing.assert_allclose(np.asarray(policy), np.asarray(ref_p), rtol=2e-2, atol=2e-2)
    np.testing.assert_allclose(np.asarray(value), np.asarray(ref_v), rtol=2e-2, atol=2e-2)
    assert policy.shape == (B, POLICY) and value.shape == (B, 1)
    print("KERNEL_OK")
</pallas_src>

<mosaic_0001>
module attributes {stable_mosaic.version = 11 : i64} {
  func.func @c4_kernel(%arg0: i32, %arg1: memref<144x3xf32, #tpu.memory_space<vmem>>, %arg2: memref<144x1xf32, #tpu.memory_space<vmem>>, %arg3: memref<27x64xbf16, #tpu.memory_space<vmem>>, %arg4: memref<1x64xf32, #tpu.memory_space<vmem>>, %arg5: memref<3x576x64xbf16, #tpu.memory_space<vmem>>, %arg6: memref<3x1x64xf32, #tpu.memory_space<vmem>>, %arg7: memref<3x1x64xf32, #tpu.memory_space<vmem>>, %arg8: memref<3x576x64xbf16, #tpu.memory_space<vmem>>, %arg9: memref<3x1x64xf32, #tpu.memory_space<vmem>>, %arg10: memref<3x1x64xf32, #tpu.memory_space<vmem>>, %arg11: memref<64x64xbf16, #tpu.memory_space<vmem>>, %arg12: memref<1x64xf32, #tpu.memory_space<vmem>>, %arg13: memref<2688x71xbf16, #tpu.memory_space<vmem>>, %arg14: memref<1x71xf32, #tpu.memory_space<vmem>>, %arg15: memref<1x64xf32, #tpu.memory_space<vmem>>, %arg16: memref<1x1xf32, #tpu.memory_space<vmem>>, %arg17: memref<2x8xf32, #tpu.memory_space<vmem>>) attributes {dimension_semantics = [#tpu.dimension_semantics<parallel>], iteration_bounds = array<i64: 1>, scalar_prefetch = 0 : i64, scratch_operands = 0 : i64, tpu.core_type = #tpu.core_type<tc>, window_params = [{transform_indices = @transform_0, window_bounds = array<i64: 144, 3>}, {pipeline_mode = #tpu.pipeline_mode<synchronous>, transform_indices = @transform_1, window_bounds = array<i64: 144, 1>}, {pipeline_mode = #tpu.pipeline_mode<synchronous>, transform_indices = @transform_2, window_bounds = array<i64: 27, 64>}, {pipeline_mode = #tpu.pipeline_mode<synchronous>, transform_indices = @transform_3, window_bounds = array<i64: 1, 64>}, {pipeline_mode = #tpu.pipeline_mode<synchronous>, transform_indices = @transform_4, window_bounds = array<i64: 3, 576, 64>}, {pipeline_mode = #tpu.pipeline_mode<synchronous>, transform_indices = @transform_5, window_bounds = array<i64: 3, 1, 64>}, {pipeline_mode = #tpu.pipeline_mode<synchronous>, transform_indices = @transform_6, window_bounds = array<i64: 3, 1, 64>}, {pipeline_mode = #tpu.pipeline_mode<synchronous>, transform_indices = @transform_7, window_bounds = array<i64: 3, 576, 64>}, {pipeline_mode = #tpu.pipeline_mode<synchronous>, transform_indices = @transform_8, window_bounds = array<i64: 3, 1, 64>}, {pipeline_mode = #tpu.pipeline_mode<synchronous>, transform_indices = @transform_9, window_bounds = array<i64: 3, 1, 64>}, {pipeline_mode = #tpu.pipeline_mode<synchronous>, transform_indices = @transform_10, window_bounds = array<i64: 64, 64>}, {pipeline_mode = #tpu.pipeline_mode<synchronous>, transform_indices = @transform_11, window_bounds = array<i64: 1, 64>}, {pipeline_mode = #tpu.pipeline_mode<synchronous>, transform_indices = @transform_12, window_bounds = array<i64: 2688, 71>}, {pipeline_mode = #tpu.pipeline_mode<synchronous>, transform_indices = @transform_13, window_bounds = array<i64: 1, 71>}, {pipeline_mode = #tpu.pipeline_mode<synchronous>, transform_indices = @transform_14, window_bounds = array<i64: 1, 64>}, {pipeline_mode = #tpu.pipeline_mode<synchronous>, transform_indices = @transform_15, window_bounds = array<i64: 1, 1>}, {transform_indices = @transform_16, window_bounds = array<i64: 2, 8>}]} {
    %c0 = arith.constant 0 : index
    %c0_0 = arith.constant 0 : index
    %0 = vector.load %arg2[%c0, %c0_0] : memref<144x1xf32, #tpu.memory_space<vmem>>, vector<144x1xf32>
    %1 = vector.shape_cast %0 : vector<144x1xf32> to vector<144x1xf32>
    %2 = vector.broadcast %1 : vector<144x1xf32> to vector<144x64xf32>
    %c0_1 = arith.constant 0 : index
    %c0_2 = arith.constant 0 : index
    %3 = vector.load %arg1[%c0_1, %c0_2] : memref<144x3xf32, #tpu.memory_space<vmem>>, vector<144x3xf32>
    %c0_3 = arith.constant 0 : index
    %c0_4 = arith.constant 0 : index
    %4 = vector.load %arg3[%c0_3, %c0_4] : memref<27x64xbf16, #tpu.memory_space<vmem>>, vector<27x64xbf16>
    %c20_i32 = arith.constant 20 : i32
    %5 = tpu.dynamic_rotate %3 by %c20_i32 dim 0 : vector<144x3xf32>, i32 -> vector<144x3xf32>
    %6 = arith.truncf %5 : vector<144x3xf32> to vector<144x3xbf16>
    %c18_i32 = arith.constant 18 : i32
    %7 = tpu.dynamic_rotate %3 by %c18_i32 dim 0 : vector<144x3xf32>, i32 -> vector<144x3xf32>
    %8 = arith.truncf %7 : vector<144x3xf32> to vector<144x3xbf16>
    %c16_i32 = arith.constant 16 : i32
    %9 = tpu.dynamic_rotate %3 by %c16_i32 dim 0 : vector<144x3xf32>, i32 -> vector<144x3xf32>
    %10 = arith.truncf %9 : vector<144x3xf32> to vector<144x3xbf16>
    %c2_i32 = arith.constant 2 : i32
    %11 = tpu.dynamic_rotate %3 by %c2_i32 dim 0 : vector<144x3xf32>, i32 -> vector<144x3xf32>
    %12 = arith.truncf %11 : vector<144x3xf32> to vector<144x3xbf16>
    %13 = arith.truncf %3 : vector<144x3xf32> to vector<144x3xbf16>
    %c142_i32 = arith.constant 142 : i32
    %14 = tpu.dynamic_rotate %3 by %c142_i32 dim 0 : vector<144x3xf32>, i32 -> vector<144x3xf32>
    %15 = arith.truncf %14 : vector<144x3xf32> to vector<144x3xbf16>
    %c128_i32 = arith.constant 128 : i32
    %16 = tpu.dynamic_rotate %3 by %c128_i32 dim 0 : vector<144x3xf32>, i32 -> vector<144x3xf32>
    %17 = arith.truncf %16 : vector<144x3xf32> to vector<144x3xbf16>
    %c126_i32 = arith.constant 126 : i32
    %18 = tpu.dynamic_rotate %3 by %c126_i32 dim 0 : vector<144x3xf32>, i32 -> vector<144x3xf32>
    %19 = arith.truncf %18 : vector<144x3xf32> to vector<144x3xbf16>
    %c124_i32 = arith.constant 124 : i32
    %20 = tpu.dynamic_rotate %3 by %c124_i32 dim 0 : vector<144x3xf32>, i32 -> vector<144x3xf32>
    %21 = arith.truncf %20 : vector<144x3xf32> to vector<144x3xbf16>
    %22 = tpu.concatenate %6, %8, %10, %12, %13, %15, %17, %19, %21 in 1 : vector<144x3xbf16>, vector<144x3xbf16>, vector<144x3xbf16>, vector<144x3xbf16>, vector<144x3xbf16>, vector<144x3xbf16>, vector<144x3xbf16>, vector<144x3xbf16>, vector<144x3xbf16> -> vector<144x27xbf16>
    %cst = arith.constant dense<0.000000e+00> : vector<144x64xf32>
    %23 = tpu.matmul %22, %4, %cst {dimension_numbers = #tpu.dot_dimension_numbers<[1], [0], [0], [1], [0, 0, 1, 1], [], []>} : vector<144x27xbf16>, vector<27x64xbf16>, vector<144x64xf32> -> vector<144x64xf32>
    %c0_5 = arith.constant 0 : index
    %c0_6 = arith.constant 0 : index
    %24 = vector.load %arg4[%c0_5, %c0_6] : memref<1x64xf32, #tpu.memory_space<vmem>>, vector<1x64xf32>
    %25 = vector.broadcast %24 : vector<1x64xf32> to vector<144x64xf32>
    %26 = arith.addf %23, %25 : vector<144x64xf32>
    %cst_7 = arith.constant 0.000000e+00 : f32
    %27 = vector.broadcast %cst_7 : f32 to vector<144x64xf32>
    %28 = arith.maximumf %26, %27 : vector<144x64xf32>
    %29 = arith.mulf %28, %2 : vector<144x64xf32>
    %c0_8 = arith.constant 0 : index
    %c0_9 = arith.constant 0 : index
    %c0_10 = arith.constant 0 : index
    %30 = vector.load %arg5[%c0_8, %c0_9, %c0_10] : memref<3x576x64xbf16, #tpu.memory_space<vmem>>, vector<1x576x64xbf16>
    %31 = vector.shape_cast %30 : vector<1x576x64xbf16> to vector<576x64xbf16>
    %c20_i32_11 = arith.constant 20 : i32
    %32 = tpu.dynamic_rotate %29 by %c20_i32_11 dim 0 : vector<144x64xf32>, i32 -> vector<144x64xf32>
    %33 = arith.truncf %32 : vector<144x64xf32> to vector<144x64xbf16>
    %c18_i32_12 = arith.constant 18 : i32
    %34 = tpu.dynamic_rotate %29 by %c18_i32_12 dim 0 : vector<144x64xf32>, i32 -> vector<144x64xf32>
    %35 = arith.truncf %34 : vector<144x64xf32> to vector<144x64xbf16>
    %c16_i32_13 = arith.constant 16 : i32
    %36 = tpu.dynamic_rotate %29 by %c16_i32_13 dim 0 : vector<144x64xf32>, i32 -> vector<144x64xf32>
    %37 = arith.truncf %36 : vector<144x64xf32> to vector<144x64xbf16>
    %c2_i32_14 = arith.constant 2 : i32
    %38 = tpu.dynamic_rotate %29 by %c2_i32_14 dim 0 : vector<144x64xf32>, i32 -> vector<144x64xf32>
    %39 = arith.truncf %38 : vector<144x64xf32> to vector<144x64xbf16>
    %40 = arith.truncf %29 : vector<144x64xf32> to vector<144x64xbf16>
    %c142_i32_15 = arith.constant 142 : i32
    %41 = tpu.dynamic_rotate %29 by %c142_i32_15 dim 0 : vector<144x64xf32>, i32 -> vector<144x64xf32>
    %42 = arith.truncf %41 : vector<144x64xf32> to vector<144x64xbf16>
    %c128_i32_16 = arith.constant 128 : i32
    %43 = tpu.dynamic_rotate %29 by %c128_i32_16 dim 0 : vector<144x64xf32>, i32 -> vector<144x64xf32>
    %44 = arith.truncf %43 : vector<144x64xf32> to vector<144x64xbf16>
    %c126_i32_17 = arith.constant 126 : i32
    %45 = tpu.dynamic_rotate %29 by %c126_i32_17 dim 0 : vector<144x64xf32>, i32 -> vector<144x64xf32>
    %46 = arith.truncf %45 : vector<144x64xf32> to vector<144x64xbf16>
    %c124_i32_18 = arith.constant 124 : i32
    %47 = tpu.dynamic_rotate %29 by %c124_i32_18 dim 0 : vector<144x64xf32>, i32 -> vector<144x64xf32>
    %48 = arith.truncf %47 : vector<144x64xf32> to vector<144x64xbf16>
    %49 = tpu.concatenate %33, %35, %37, %39, %40, %42, %44, %46, %48 in 1 : vector<144x64xbf16>, vector<144x64xbf16>, vector<144x64xbf16>, vector<144x64xbf16>, vector<144x64xbf16>, vector<144x64xbf16>, vector<144x64xbf16>, vector<144x64xbf16>, vector<144x64xbf16> -> vector<144x576xbf16>
    %cst_19 = arith.constant dense<0.000000e+00> : vector<144x64xf32>
    %50 = tpu.matmul %49, %31, %cst_19 {dimension_numbers = #tpu.dot_dimension_numbers<[1], [0], [0], [1], [0, 0, 1, 1], [], []>} : vector<144x576xbf16>, vector<576x64xbf16>, vector<144x64xf32> -> vector<144x64xf32>
    %c0_20 = arith.constant 0 : index
    %c0_21 = arith.constant 0 : index
    %c0_22 = arith.constant 0 : index
    %51 = vector.load %arg6[%c0_20, %c0_21, %c0_22] : memref<3x1x64xf32, #tpu.memory_space<vmem>>, vector<1x1x64xf32>
    %52 = vector.shape_cast %51 : vector<1x1x64xf32> to vector<1x64xf32>
    %53 = vector.broadcast %52 : vector<1x64xf32> to vector<144x64xf32>
    %54 = arith.mulf %50, %53 : vector<144x64xf32>
    %c0_23 = arith.constant 0 : index
    %c0_24 = arith.constant 0 : index
    %c0_25 = arith.constant 0 : index
    %55 = vector.load %arg7[%c0_23, %c0_24, %c0_25] : memref<3x1x64xf32, #tpu.memory_space<vmem>>, vector<1x1x64xf32>
    %56 = vector.shape_cast %55 : vector<1x1x64xf32> to vector<1x64xf32>
    %57 = vector.broadcast %56 : vector<1x64xf32> to vector<144x64xf32>
    %58 = arith.addf %54, %57 : vector<144x64xf32>
    %cst_26 = arith.constant 0.000000e+00 : f32
    %59 = vector.broadcast %cst_26 : f32 to vector<144x64xf32>
    %60 = arith.maximumf %58, %59 : vector<144x64xf32>
    %61 = arith.mulf %60, %2 : vector<144x64xf32>
    %c0_27 = arith.constant 0 : index
    %c0_28 = arith.constant 0 : index
    %c0_29 = arith.constant 0 : index
    %62 = vector.load %arg8[%c0_27, %c0_28, %c0_29] : memref<3x576x64xbf16, #tpu.memory_space<vmem>>, vector<1x576x64xbf16>
    %63 = vector.shape_cast %62 : vector<1x576x64xbf16> to vector<576x64xbf16>
    %c20_i32_30 = arith.constant 20 : i32
    %64 = tpu.dynamic_rotate %61 by %c20_i32_30 dim 0 : vector<144x64xf32>, i32 -> vector<144x64xf32>
    %65 = arith.truncf %64 : vector<144x64xf32> to vector<144x64xbf16>
    %c18_i32_31 = arith.constant 18 : i32
    %66 = tpu.dynamic_rotate %61 by %c18_i32_31 dim 0 : vector<144x64xf32>, i32 -> vector<144x64xf32>
    %67 = arith.truncf %66 : vector<144x64xf32> to vector<144x64xbf16>
    %c16_i32_32 = arith.constant 16 : i32
    %68 = tpu.dynamic_rotate %61 by %c16_i32_32 dim 0 : vector<144x64xf32>, i32 -> vector<144x64xf32>
    %69 = arith.truncf %68 : vector<144x64xf32> to vector<144x64xbf16>
    %c2_i32_33 = arith.constant 2 : i32
    %70 = tpu.dynamic_rotate %61 by %c2_i32_33 dim 0 : vector<144x64xf32>, i32 -> vector<144x64xf32>
    %71 = arith.truncf %70 : vector<144x64xf32> to vector<144x64xbf16>
    %72 = arith.truncf %61 : vector<144x64xf32> to vector<144x64xbf16>
    %c142_i32_34 = arith.constant 142 : i32
    %73 = tpu.dynamic_rotate %61 by %c142_i32_34 dim 0 : vector<144x64xf32>, i32 -> vector<144x64xf32>
    %74 = arith.truncf %73 : vector<144x64xf32> to vector<144x64xbf16>
    %c128_i32_35 = arith.constant 128 : i32
    %75 = tpu.dynamic_rotate %61 by %c128_i32_35 dim 0 : vector<144x64xf32>, i32 -> vector<144x64xf32>
    %76 = arith.truncf %75 : vector<144x64xf32> to vector<144x64xbf16>
    %c126_i32_36 = arith.constant 126 : i32
    %77 = tpu.dynamic_rotate %61 by %c126_i32_36 dim 0 : vector<144x64xf32>, i32 -> vector<144x64xf32>
    %78 = arith.truncf %77 : vector<144x64xf32> to vector<144x64xbf16>
    %c124_i32_37 = arith.constant 124 : i32
    %79 = tpu.dynamic_rotate %61 by %c124_i32_37 dim 0 : vector<144x64xf32>, i32 -> vector<144x64xf32>
    %80 = arith.truncf %79 : vector<144x64xf32> to vector<144x64xbf16>
    %81 = tpu.concatenate %65, %67, %69, %71, %72, %74, %76, %78, %80 in 1 : vector<144x64xbf16>, vector<144x64xbf16>, vector<144x64xbf16>, vector<144x64xbf16>, vector<144x64xbf16>, vector<144x64xbf16>, vector<144x64xbf16>, vector<144x64xbf16>, vector<144x64xbf16> -> vector<144x576xbf16>
    %cst_38 = arith.constant dense<0.000000e+00> : vector<144x64xf32>
    %82 = tpu.matmul %81, %63, %cst_38 {dimension_numbers = #tpu.dot_dimension_numbers<[1], [0], [0], [1], [0, 0, 1, 1], [], []>} : vector<144x576xbf16>, vector<576x64xbf16>, vector<144x64xf32> -> vector<144x64xf32>
    %c0_39 = arith.constant 0 : index
    %c0_40 = arith.constant 0 : index
    %c0_41 = arith.constant 0 : index
    %83 = vector.load %arg9[%c0_39, %c0_40, %c0_41] : memref<3x1x64xf32, #tpu.memory_space<vmem>>, vector<1x1x64xf32>
    %84 = vector.shape_cast %83 : vector<1x1x64xf32> to vector<1x64xf32>
    %85 = vector.broadcast %84 : vector<1x64xf32> to vector<144x64xf32>
    %86 = arith.mulf %82, %85 : vector<144x64xf32>
    %c0_42 = arith.constant 0 : index
    %c0_43 = arith.constant 0 : index
    %c0_44 = arith.constant 0 : index
    %87 = vector.load %arg10[%c0_42, %c0_43, %c0_44] : memref<3x1x64xf32, #tpu.memory_space<vmem>>, vector<1x1x64xf32>
    %88 = vector.shape_cast %87 : vector<1x1x64xf32> to vector<1x64xf32>
    %89 = vector.broadcast %88 : vector<1x64xf32> to vector<144x64xf32>
    %90 = arith.addf %86, %89 : vector<144x64xf32>
    %91 = arith.addf %90, %29 : vector<144x64xf32>
    %cst_45 = arith.constant 0.000000e+00 : f32
    %92 = vector.broadcast %cst_45 : f32 to vector<144x64xf32>
    %93 = arith.maximumf %91, %92 : vector<144x64xf32>
    %94 = arith.mulf %93, %2 : vector<144x64xf32>
    %c1 = arith.constant 1 : index
    %c0_46 = arith.constant 0 : index
    %c0_47 = arith.constant 0 : index
    %95 = vector.load %arg5[%c1, %c0_46, %c0_47] : memref<3x576x64xbf16, #tpu.memory_space<vmem>>, vector<1x576x64xbf16>
    %96 = vector.shape_cast %95 : vector<1x576x64xbf16> to vector<576x64xbf16>
    %c20_i32_48 = arith.constant 20 : i32
    %97 = tpu.dynamic_rotate %94 by %c20_i32_48 dim 0 : vector<144x64xf32>, i32 -> vector<144x64xf32>
    %98 = arith.truncf %97 : vector<144x64xf32> to vector<144x64xbf16>
    %c18_i32_49 = arith.constant 18 : i32
    %99 = tpu.dynamic_rotate %94 by %c18_i32_49 dim 0 : vector<144x64xf32>, i32 -> vector<144x64xf32>
    %100 = arith.truncf %99 : vector<144x64xf32> to vector<144x64xbf16>
    %c16_i32_50 = arith.constant 16 : i32
    %101 = tpu.dynamic_rotate %94 by %c16_i32_50 dim 0 : vector<144x64xf32>, i32 -> vector<144x64xf32>
    %102 = arith.truncf %101 : vector<144x64xf32> to vector<144x64xbf16>
    %c2_i32_51 = arith.constant 2 : i32
    %103 = tpu.dynamic_rotate %94 by %c2_i32_51 dim 0 : vector<144x64xf32>, i32 -> vector<144x64xf32>
    %104 = arith.truncf %103 : vector<144x64xf32> to vector<144x64xbf16>
    %105 = arith.truncf %94 : vector<144x64xf32> to vector<144x64xbf16>
    %c142_i32_52 = arith.constant 142 : i32
    %106 = tpu.dynamic_rotate %94 by %c142_i32_52 dim 0 : vector<144x64xf32>, i32 -> vector<144x64xf32>
    %107 = arith.truncf %106 : vector<144x64xf32> to vector<144x64xbf16>
    %c128_i32_53 = arith.constant 128 : i32
    %108 = tpu.dynamic_rotate %94 by %c128_i32_53 dim 0 : vector<144x64xf32>, i32 -> vector<144x64xf32>
    %109 = arith.truncf %108 : vector<144x64xf32> to vector<144x64xbf16>
    %c126_i32_54 = arith.constant 126 : i32
    %110 = tpu.dynamic_rotate %94 by %c126_i32_54 dim 0 : vector<144x64xf32>, i32 -> vector<144x64xf32>
    %111 = arith.truncf %110 : vector<144x64xf32> to vector<144x64xbf16>
    %c124_i32_55 = arith.constant 124 : i32
    %112 = tpu.dynamic_rotate %94 by %c124_i32_55 dim 0 : vector<144x64xf32>, i32 -> vector<144x64xf32>
    %113 = arith.truncf %112 : vector<144x64xf32> to vector<144x64xbf16>
    %114 = tpu.concatenate %98, %100, %102, %104, %105, %107, %109, %111, %113 in 1 : vector<144x64xbf16>, vector<144x64xbf16>, vector<144x64xbf16>, vector<144x64xbf16>, vector<144x64xbf16>, vector<144x64xbf16>, vector<144x64xbf16>, vector<144x64xbf16>, vector<144x64xbf16> -> vector<144x576xbf16>
    %cst_56 = arith.constant dense<0.000000e+00> : vector<144x64xf32>
    %115 = tpu.matmul %114, %96, %cst_56 {dimension_numbers = #tpu.dot_dimension_numbers<[1], [0], [0], [1], [0, 0, 1, 1], [], []>} : vector<144x576xbf16>, vector<576x64xbf16>, vector<144x64xf32> -> vector<144x64xf32>
    %c1_57 = arith.constant 1 : index
    %c0_58 = arith.constant 0 : index
    %c0_59 = arith.constant 0 : index
    %116 = vector.load %arg6[%c1_57, %c0_58, %c0_59] : memref<3x1x64xf32, #tpu.memory_space<vmem>>, vector<1x1x64xf32>
    %117 = vector.shape_cast %116 : vector<1x1x64xf32> to vector<1x64xf32>
    %118 = vector.broadcast %117 : vector<1x64xf32> to vector<144x64xf32>
    %119 = arith.mulf %115, %118 : vector<144x64xf32>
    %c1_60 = arith.constant 1 : index
    %c0_61 = arith.constant 0 : index
    %c0_62 = arith.constant 0 : index
    %120 = vector.load %arg7[%c1_60, %c0_61, %c0_62] : memref<3x1x64xf32, #tpu.memory_space<vmem>>, vector<1x1x64xf32>
    %121 = vector.shape_cast %120 : vector<1x1x64xf32> to vector<1x64xf32>
    %122 = vector.broadcast %121 : vector<1x64xf32> to vector<144x64xf32>
    %123 = arith.addf %119, %122 : vector<144x64xf32>
    %cst_63 = arith.constant 0.000000e+00 : f32
    %124 = vector.broadcast %cst_63 : f32 to vector<144x64xf32>
    %125 = arith.maximumf %123, %124 : vector<144x64xf32>
    %126 = arith.mulf %125, %2 : vector<144x64xf32>
    %c1_64 = arith.constant 1 : index
    %c0_65 = arith.constant 0 : index
    %c0_66 = arith.constant 0 : index
    %127 = vector.load %arg8[%c1_64, %c0_65, %c0_66] : memref<3x576x64xbf16, #tpu.memory_space<vmem>>, vector<1x576x64xbf16>
    %128 = vector.shape_cast %127 : vector<1x576x64xbf16> to vector<576x64xbf16>
    %c20_i32_67 = arith.constant 20 : i32
    %129 = tpu.dynamic_rotate %126 by %c20_i32_67 dim 0 : vector<144x64xf32>, i32 -> vector<144x64xf32>
    %130 = arith.truncf %129 : vector<144x64xf32> to vector<144x64xbf16>
    %c18_i32_68 = arith.constant 18 : i32
    %131 = tpu.dynamic_rotate %126 by %c18_i32_68 dim 0 : vector<144x64xf32>, i32 -> vector<144x64xf32>
    %132 = arith.truncf %131 : vector<144x64xf32> to vector<144x64xbf16>
    %c16_i32_69 = arith.constant 16 : i32
    %133 = tpu.dynamic_rotate %126 by %c16_i32_69 dim 0 : vector<144x64xf32>, i32 -> vector<144x64xf32>
    %134 = arith.truncf %133 : vector<144x64xf32> to vector<144x64xbf16>
    %c2_i32_70 = arith.constant 2 : i32
    %135 = tpu.dynamic_rotate %126 by %c2_i32_70 dim 0 : vector<144x64xf32>, i32 -> vector<144x64xf32>
    %136 = arith.truncf %135 : vector<144x64xf32> to vector<144x64xbf16>
    %137 = arith.truncf %126 : vector<144x64xf32> to vector<144x64xbf16>
    %c142_i32_71 = arith.constant 142 : i32
    %138 = tpu.dynamic_rotate %126 by %c142_i32_71 dim 0 : vector<144x64xf32>, i32 -> vector<144x64xf32>
    %139 = arith.truncf %138 : vector<144x64xf32> to vector<144x64xbf16>
    %c128_i32_72 = arith.constant 128 : i32
    %140 = tpu.dynamic_rotate %126 by %c128_i32_72 dim 0 : vector<144x64xf32>, i32 -> vector<144x64xf32>
    %141 = arith.truncf %140 : vector<144x64xf32> to vector<144x64xbf16>
    %c126_i32_73 = arith.constant 126 : i32
    %142 = tpu.dynamic_rotate %126 by %c126_i32_73 dim 0 : vector<144x64xf32>, i32 -> vector<144x64xf32>
    %143 = arith.truncf %142 : vector<144x64xf32> to vector<144x64xbf16>
    %c124_i32_74 = arith.constant 124 : i32
    %144 = tpu.dynamic_rotate %126 by %c124_i32_74 dim 0 : vector<144x64xf32>, i32 -> vector<144x64xf32>
    %145 = arith.truncf %144 : vector<144x64xf32> to vector<144x64xbf16>
    %146 = tpu.concatenate %130, %132, %134, %136, %137, %139, %141, %143, %145 in 1 : vector<144x64xbf16>, vector<144x64xbf16>, vector<144x64xbf16>, vector<144x64xbf16>, vector<144x64xbf16>, vector<144x64xbf16>, vector<144x64xbf16>, vector<144x64xbf16>, vector<144x64xbf16> -> vector<144x576xbf16>
    %cst_75 = arith.constant dense<0.000000e+00> : vector<144x64xf32>
    %147 = tpu.matmul %146, %128, %cst_75 {dimension_numbers = #tpu.dot_dimension_numbers<[1], [0], [0], [1], [0, 0, 1, 1], [], []>} : vector<144x576xbf16>, vector<576x64xbf16>, vector<144x64xf32> -> vector<144x64xf32>
    %c1_76 = arith.constant 1 : index
    %c0_77 = arith.constant 0 : index
    %c0_78 = arith.constant 0 : index
    %148 = vector.load %arg9[%c1_76, %c0_77, %c0_78] : memref<3x1x64xf32, #tpu.memory_space<vmem>>, vector<1x1x64xf32>
    %149 = vector.shape_cast %148 : vector<1x1x64xf32> to vector<1x64xf32>
    %150 = vector.broadcast %149 : vector<1x64xf32> to vector<144x64xf32>
    %151 = arith.mulf %147, %150 : vector<144x64xf32>
    %c1_79 = arith.constant 1 : index
    %c0_80 = arith.constant 0 : index
    %c0_81 = arith.constant 0 : index
    %152 = vector.load %arg10[%c1_79, %c0_80, %c0_81] : memref<3x1x64xf32, #tpu.memory_space<vmem>>, vector<1x1x64xf32>
    %153 = vector.shape_cast %152 : vector<1x1x64xf32> to vector<1x64xf32>
    %154 = vector.broadcast %153 : vector<1x64xf32> to vector<144x64xf32>
    %155 = arith.addf %151, %154 : vector<144x64xf32>
    %156 = arith.addf %155, %94 : vector<144x64xf32>
    %cst_82 = arith.constant 0.000000e+00 : f32
    %157 = vector.broadcast %cst_82 : f32 to vector<144x64xf32>
    %158 = arith.maximumf %156, %157 : vector<144x64xf32>
    %159 = arith.mulf %158, %2 : vector<144x64xf32>
    %c2 = arith.constant 2 : index
    %c0_83 = arith.constant 0 : index
    %c0_84 = arith.constant 0 : index
    %160 = vector.load %arg5[%c2, %c0_83, %c0_84] : memref<3x576x64xbf16, #tpu.memory_space<vmem>>, vector<1x576x64xbf16>
    %161 = vector.shape_cast %160 : vector<1x576x64xbf16> to vector<576x64xbf16>
    %c20_i32_85 = arith.constant 20 : i32
    %162 = tpu.dynamic_rotate %159 by %c20_i32_85 dim 0 : vector<144x64xf32>, i32 -> vector<144x64xf32>
    %163 = arith.truncf %162 : vector<144x64xf32> to vector<144x64xbf16>
    %c18_i32_86 = arith.constant 18 : i32
    %164 = tpu.dynamic_rotate %159 by %c18_i32_86 dim 0 : vector<144x64xf32>, i32 -> vector<144x64xf32>
    %165 = arith.truncf %164 : vector<144x64xf32> to vector<144x64xbf16>
    %c16_i32_87 = arith.constant 16 : i32
    %166 = tpu.dynamic_rotate %159 by %c16_i32_87 dim 0 : vector<144x64xf32>, i32 -> vector<144x64xf32>
    %167 = arith.truncf %166 : vector<144x64xf32> to vector<144x64xbf16>
    %c2_i32_88 = arith.constant 2 : i32
    %168 = tpu.dynamic_rotate %159 by %c2_i32_88 dim 0 : vector<144x64xf32>, i32 -> vector<144x64xf32>
    %169 = arith.truncf %168 : vector<144x64xf32> to vector<144x64xbf16>
    %170 = arith.truncf %159 : vector<144x64xf32> to vector<144x64xbf16>
    %c142_i32_89 = arith.constant 142 : i32
    %171 = tpu.dynamic_rotate %159 by %c142_i32_89 dim 0 : vector<144x64xf32>, i32 -> vector<144x64xf32>
    %172 = arith.truncf %171 : vector<144x64xf32> to vector<144x64xbf16>
    %c128_i32_90 = arith.constant 128 : i32
    %173 = tpu.dynamic_rotate %159 by %c128_i32_90 dim 0 : vector<144x64xf32>, i32 -> vector<144x64xf32>
    %174 = arith.truncf %173 : vector<144x64xf32> to vector<144x64xbf16>
    %c126_i32_91 = arith.constant 126 : i32
    %175 = tpu.dynamic_rotate %159 by %c126_i32_91 dim 0 : vector<144x64xf32>, i32 -> vector<144x64xf32>
    %176 = arith.truncf %175 : vector<144x64xf32> to vector<144x64xbf16>
    %c124_i32_92 = arith.constant 124 : i32
    %177 = tpu.dynamic_rotate %159 by %c124_i32_92 dim 0 : vector<144x64xf32>, i32 -> vector<144x64xf32>
    %178 = arith.truncf %177 : vector<144x64xf32> to vector<144x64xbf16>
    %179 = tpu.concatenate %163, %165, %167, %169, %170, %172, %174, %176, %178 in 1 : vector<144x64xbf16>, vector<144x64xbf16>, vector<144x64xbf16>, vector<144x64xbf16>, vector<144x64xbf16>, vector<144x64xbf16>, vector<144x64xbf16>, vector<144x64xbf16>, vector<144x64xbf16> -> vector<144x576xbf16>
    %cst_93 = arith.constant dense<0.000000e+00> : vector<144x64xf32>
    %180 = tpu.matmul %179, %161, %cst_93 {dimension_numbers = #tpu.dot_dimension_numbers<[1], [0], [0], [1], [0, 0, 1, 1], [], []>} : vector<144x576xbf16>, vector<576x64xbf16>, vector<144x64xf32> -> vector<144x64xf32>
    %c2_94 = arith.constant 2 : index
    %c0_95 = arith.constant 0 : index
    %c0_96 = arith.constant 0 : index
    %181 = vector.load %arg6[%c2_94, %c0_95, %c0_96] : memref<3x1x64xf32, #tpu.memory_space<vmem>>, vector<1x1x64xf32>
    %182 = vector.shape_cast %181 : vector<1x1x64xf32> to vector<1x64xf32>
    %183 = vector.broadcast %182 : vector<1x64xf32> to vector<144x64xf32>
    %184 = arith.mulf %180, %183 : vector<144x64xf32>
    %c2_97 = arith.constant 2 : index
    %c0_98 = arith.constant 0 : index
    %c0_99 = arith.constant 0 : index
    %185 = vector.load %arg7[%c2_97, %c0_98, %c0_99] : memref<3x1x64xf32, #tpu.memory_space<vmem>>, vector<1x1x64xf32>
    %186 = vector.shape_cast %185 : vector<1x1x64xf32> to vector<1x64xf32>
    %187 = vector.broadcast %186 : vector<1x64xf32> to vector<144x64xf32>
    %188 = arith.addf %184, %187 : vector<144x64xf32>
    %cst_100 = arith.constant 0.000000e+00 : f32
    %189 = vector.broadcast %cst_100 : f32 to vector<144x64xf32>
    %190 = arith.maximumf %188, %189 : vector<144x64xf32>
    %191 = arith.mulf %190, %2 : vector<144x64xf32>
    %c2_101 = arith.constant 2 : index
    %c0_102 = arith.constant 0 : index
    %c0_103 = arith.constant 0 : index
    %192 = vector.load %arg8[%c2_101, %c0_102, %c0_103] : memref<3x576x64xbf16, #tpu.memory_space<vmem>>, vector<1x576x64xbf16>
    %193 = vector.shape_cast %192 : vector<1x576x64xbf16> to vector<576x64xbf16>
    %c20_i32_104 = arith.constant 20 : i32
    %194 = tpu.dynamic_rotate %191 by %c20_i32_104 dim 0 : vector<144x64xf32>, i32 -> vector<144x64xf32>
    %195 = arith.truncf %194 : vector<144x64xf32> to vector<144x64xbf16>
    %c18_i32_105 = arith.constant 18 : i32
    %196 = tpu.dynamic_rotate %191 by %c18_i32_105 dim 0 : vector<144x64xf32>, i32 -> vector<144x64xf32>
    %197 = arith.truncf %196 : vector<144x64xf32> to vector<144x64xbf16>
    %c16_i32_106 = arith.constant 16 : i32
    %198 = tpu.dynamic_rotate %191 by %c16_i32_106 dim 0 : vector<144x64xf32>, i32 -> vector<144x64xf32>
    %199 = arith.truncf %198 : vector<144x64xf32> to vector<144x64xbf16>
    %c2_i32_107 = arith.constant 2 : i32
    %200 = tpu.dynamic_rotate %191 by %c2_i32_107 dim 0 : vector<144x64xf32>, i32 -> vector<144x64xf32>
    %201 = arith.truncf %200 : vector<144x64xf32> to vector<144x64xbf16>
    %202 = arith.truncf %191 : vector<144x64xf32> to vector<144x64xbf16>
    %c142_i32_108 = arith.constant 142 : i32
    %203 = tpu.dynamic_rotate %191 by %c142_i32_108 dim 0 : vector<144x64xf32>, i32 -> vector<144x64xf32>
    %204 = arith.truncf %203 : vector<144x64xf32> to vector<144x64xbf16>
    %c128_i32_109 = arith.constant 128 : i32
    %205 = tpu.dynamic_rotate %191 by %c128_i32_109 dim 0 : vector<144x64xf32>, i32 -> vector<144x64xf32>
    %206 = arith.truncf %205 : vector<144x64xf32> to vector<144x64xbf16>
    %c126_i32_110 = arith.constant 126 : i32
    %207 = tpu.dynamic_rotate %191 by %c126_i32_110 dim 0 : vector<144x64xf32>, i32 -> vector<144x64xf32>
    %208 = arith.truncf %207 : vector<144x64xf32> to vector<144x64xbf16>
    %c124_i32_111 = arith.constant 124 : i32
    %209 = tpu.dynamic_rotate %191 by %c124_i32_111 dim 0 : vector<144x64xf32>, i32 -> vector<144x64xf32>
    %210 = arith.truncf %209 : vector<144x64xf32> to vector<144x64xbf16>
    %211 = tpu.concatenate %195, %197, %199, %201, %202, %204, %206, %208, %210 in 1 : vector<144x64xbf16>, vector<144x64xbf16>, vector<144x64xbf16>, vector<144x64xbf16>, vector<144x64xbf16>, vector<144x64xbf16>, vector<144x64xbf16>, vector<144x64xbf16>, vector<144x64xbf16> -> vector<144x576xbf16>
    %cst_112 = arith.constant dense<0.000000e+00> : vector<144x64xf32>
    %212 = tpu.matmul %211, %193, %cst_112 {dimension_numbers = #tpu.dot_dimension_numbers<[1], [0], [0], [1], [0, 0, 1, 1], [], []>} : vector<144x576xbf16>, vector<576x64xbf16>, vector<144x64xf32> -> vector<144x64xf32>
    %c2_113 = arith.constant 2 : index
    %c0_114 = arith.constant 0 : index
    %c0_115 = arith.constant 0 : index
    %213 = vector.load %arg9[%c2_113, %c0_114, %c0_115] : memref<3x1x64xf32, #tpu.memory_space<vmem>>, vector<1x1x64xf32>
    %214 = vector.shape_cast %213 : vector<1x1x64xf32> to vector<1x64xf32>
    %215 = vector.broadcast %214 : vector<1x64xf32> to vector<144x64xf32>
    %216 = arith.mulf %212, %215 : vector<144x64xf32>
    %c2_116 = arith.constant 2 : index
    %c0_117 = arith.constant 0 : index
    %c0_118 = arith.constant 0 : index
    %217 = vector.load %arg10[%c2_116, %c0_117, %c0_118] : memref<3x1x64xf32, #tpu.memory_space<vmem>>, vector<1x1x64xf32>
    %218 = vector.shape_cast %217 : vector<1x1x64xf32> to vector<1x64xf32>
    %219 = vector.broadcast %218 : vector<1x64xf32> to vector<144x64xf32>
    %220 = arith.addf %216, %219 : vector<144x64xf32>
    %221 = arith.addf %220, %159 : vector<144x64xf32>
    %cst_119 = arith.constant 0.000000e+00 : f32
    %222 = vector.broadcast %cst_119 : f32 to vector<144x64xf32>
    %223 = arith.maximumf %221, %222 : vector<144x64xf32>
    %224 = arith.mulf %223, %2 : vector<144x64xf32>
    %225 = arith.truncf %224 : vector<144x64xf32> to vector<144x64xbf16>
    %c0_120 = arith.constant 0 : index
    %c0_121 = arith.constant 0 : index
    %226 = vector.load %arg11[%c0_120, %c0_121] : memref<64x64xbf16, #tpu.memory_space<vmem>>, vector<64x64xbf16>
    %cst_122 = arith.constant dense<0.000000e+00> : vector<144x64xf32>
    %227 = tpu.matmul %225, %226, %cst_122 {dimension_numbers = #tpu.dot_dimension_numbers<[1], [0], [0], [1], [0, 0, 1, 1], [], []>} : vector<144x64xbf16>, vector<64x64xbf16>, vector<144x64xf32> -> vector<144x64xf32>
    %c0_123 = arith.constant 0 : index
    %c0_124 = arith.constant 0 : index
    %228 = vector.load %arg12[%c0_123, %c0_124] : memref<1x64xf32, #tpu.memory_space<vmem>>, vector<1x64xf32>
    %229 = vector.broadcast %228 : vector<1x64xf32> to vector<144x64xf32>
    %230 = arith.addf %227, %229 : vector<144x64xf32>
    %cst_125 = arith.constant 0.000000e+00 : f32
    %231 = vector.broadcast %cst_125 : f32 to vector<144x64xf32>
    %232 = arith.maximumf %230, %231 : vector<144x64xf32>
    %233 = arith.truncf %232 : vector<144x64xf32> to vector<144x64xbf16>
    %234 = vector.extract_strided_slice %233 {offsets = [20, 0], sizes = [2, 64], strides = [1, 1]} : vector<144x64xbf16> to vector<2x64xbf16>
    %235 = vector.extract_strided_slice %233 {offsets = [22, 0], sizes = [2, 64], strides = [1, 1]} : vector<144x64xbf16> to vector<2x64xbf16>
    %236 = vector.extract_strided_slice %233 {offsets = [24, 0], sizes = [2, 64], strides = [1, 1]} : vector<144x64xbf16> to vector<2x64xbf16>
    %237 = vector.extract_strided_slice %233 {offsets = [26, 0], sizes = [2, 64], strides = [1, 1]} : vector<144x64xbf16> to vector<2x64xbf16>
    %238 = vector.extract_strided_slice %233 {offsets = [28, 0], sizes = [2, 64], strides = [1, 1]} : vector<144x64xbf16> to vector<2x64xbf16>
    %239 = vector.extract_strided_slice %233 {offsets = [30, 0], sizes = [2, 64], strides = [1, 1]} : vector<144x64xbf16> to vector<2x64xbf16>
    %240 = vector.extract_strided_slice %233 {offsets = [32, 0], sizes = [2, 64], strides = [1, 1]} : vector<144x64xbf16> to vector<2x64xbf16>
    %241 = vector.extract_strided_slice %233 {offsets = [38, 0], sizes = [2, 64], strides = [1, 1]} : vector<144x64xbf16> to vector<2x64xbf16>
    %242 = vector.extract_strided_slice %233 {offsets = [40, 0], sizes = [2, 64], strides = [1, 1]} : vector<144x64xbf16> to vector<2x64xbf16>
    %243 = vector.extract_strided_slice %233 {offsets = [42, 0], sizes = [2, 64], strides = [1, 1]} : vector<144x64xbf16> to vector<2x64xbf16>
    %244 = vector.extract_strided_slice %233 {offsets = [44, 0], sizes = [2, 64], strides = [1, 1]} : vector<144x64xbf16> to vector<2x64xbf16>
    %245 = vector.extract_strided_slice %233 {offsets = [46, 0], sizes = [2, 64], strides = [1, 1]} : vector<144x64xbf16> to vector<2x64xbf16>
    %246 = vector.extract_strided_slice %233 {offsets = [48, 0], sizes = [2, 64], strides = [1, 1]} : vector<144x64xbf16> to vector<2x64xbf16>
    %247 = vector.extract_strided_slice %233 {offsets = [50, 0], sizes = [2, 64], strides = [1, 1]} : vector<144x64xbf16> to vector<2x64xbf16>
    %248 = vector.extract_strided_slice %233 {offsets = [56, 0], sizes = [2, 64], strides = [1, 1]} : vector<144x64xbf16> to vector<2x64xbf16>
    %249 = vector.extract_strided_slice %233 {offsets = [58, 0], sizes = [2, 64], strides = [1, 1]} : vector<144x64xbf16> to vector<2x64xbf16>
    %250 = vector.extract_strided_slice %233 {offsets = [60, 0], sizes = [2, 64], strides = [1, 1]} : vector<144x64xbf16> to vector<2x64xbf16>
    %251 = vector.extract_strided_slice %233 {offsets = [62, 0], sizes = [2, 64], strides = [1, 1]} : vector<144x64xbf16> to vector<2x64xbf16>
    %252 = vector.extract_strided_slice %233 {offsets = [64, 0], sizes = [2, 64], strides = [1, 1]} : vector<144x64xbf16> to vector<2x64xbf16>
    %253 = vector.extract_strided_slice %233 {offsets = [66, 0], sizes = [2, 64], strides = [1, 1]} : vector<144x64xbf16> to vector<2x64xbf16>
    %254 = vector.extract_strided_slice %233 {offsets = [68, 0], sizes = [2, 64], strides = [1, 1]} : vector<144x64xbf16> to vector<2x64xbf16>
    %255 = vector.extract_strided_slice %233 {offsets = [74, 0], sizes = [2, 64], strides = [1, 1]} : vector<144x64xbf16> to vector<2x64xbf16>
    %256 = vector.extract_strided_slice %233 {offsets = [76, 0], sizes = [2, 64], strides = [1, 1]} : vector<144x64xbf16> to vector<2x64xbf16>
    %257 = vector.extract_strided_slice %233 {offsets = [78, 0], sizes = [2, 64], strides = [1, 1]} : vector<144x64xbf16> to vector<2x64xbf16>
    %258 = vector.extract_strided_slice %233 {offsets = [80, 0], sizes = [2, 64], strides = [1, 1]} : vector<144x64xbf16> to vector<2x64xbf16>
    %259 = vector.extract_strided_slice %233 {offsets = [82, 0], sizes = [2, 64], strides = [1, 1]} : vector<144x64xbf16> to vector<2x64xbf16>
    %260 = vector.extract_strided_slice %233 {offsets = [84, 0], sizes = [2, 64], strides = [1, 1]} : vector<144x64xbf16> to vector<2x64xbf16>
    %261 = vector.extract_strided_slice %233 {offsets = [86, 0], sizes = [2, 64], strides = [1, 1]} : vector<144x64xbf16> to vector<2x64xbf16>
    %262 = vector.extract_strided_slice %233 {offsets = [92, 0], sizes = [2, 64], strides = [1, 1]} : vector<144x64xbf16> to vector<2x64xbf16>
    %263 = vector.extract_strided_slice %233 {offsets = [94, 0], sizes = [2, 64], strides = [1, 1]} : vector<144x64xbf16> to vector<2x64xbf16>
    %264 = vector.extract_strided_slice %233 {offsets = [96, 0], sizes = [2, 64], strides = [1, 1]} : vector<144x64xbf16> to vector<2x64xbf16>
    %265 = vector.extract_strided_slice %233 {offsets = [98, 0], sizes = [2, 64], strides = [1, 1]} : vector<144x64xbf16> to vector<2x64xbf16>
    %266 = vector.extract_strided_slice %233 {offsets = [100, 0], sizes = [2, 64], strides = [1, 1]} : vector<144x64xbf16> to vector<2x64xbf16>
    %267 = vector.extract_strided_slice %233 {offsets = [102, 0], sizes = [2, 64], strides = [1, 1]} : vector<144x64xbf16> to vector<2x64xbf16>
    %268 = vector.extract_strided_slice %233 {offsets = [104, 0], sizes = [2, 64], strides = [1, 1]} : vector<144x64xbf16> to vector<2x64xbf16>
    %269 = vector.extract_strided_slice %233 {offsets = [110, 0], sizes = [2, 64], strides = [1, 1]} : vector<144x64xbf16> to vector<2x64xbf16>
    %270 = vector.extract_strided_slice %233 {offsets = [112, 0], sizes = [2, 64], strides = [1, 1]} : vector<144x64xbf16> to vector<2x64xbf16>
    %271 = vector.extract_strided_slice %233 {offsets = [114, 0], sizes = [2, 64], strides = [1, 1]} : vector<144x64xbf16> to vector<2x64xbf16>
    %272 = vector.extract_strided_slice %233 {offsets = [116, 0], sizes = [2, 64], strides = [1, 1]} : vector<144x64xbf16> to vector<2x64xbf16>
    %273 = vector.extract_strided_slice %233 {offsets = [118, 0], sizes = [2, 64], strides = [1, 1]} : vector<144x64xbf16> to vector<2x64xbf16>
    %274 = vector.extract_strided_slice %233 {offsets = [120, 0], sizes = [2, 64], strides = [1, 1]} : vector<144x64xbf16> to vector<2x64xbf16>
    %275 = vector.extract_strided_slice %233 {offsets = [122, 0], sizes = [2, 64], strides = [1, 1]} : vector<144x64xbf16> to vector<2x64xbf16>
    %276 = tpu.concatenate %234, %235, %236, %237, %238, %239, %240, %241, %242, %243, %244, %245, %246, %247, %248, %249 in 1 : vector<2x64xbf16>, vector<2x64xbf16>, vector<2x64xbf16>, vector<2x64xbf16>, vector<2x64xbf16>, vector<2x64xbf16>, vector<2x64xbf16>, vector<2x64xbf16>, vector<2x64xbf16>, vector<2x64xbf16>, vector<2x64xbf16>, vector<2x64xbf16>, vector<2x64xbf16>, vector<2x64xbf16>, vector<2x64xbf16>, vector<2x64xbf16> -> vector<2x1024xbf16>
    %277 = tpu.concatenate %250, %251, %252, %253, %254, %255, %256, %257, %258, %259, %260, %261, %262, %263, %264, %265 in 1 : vector<2x64xbf16>, vector<2x64xbf16>, vector<2x64xbf16>, vector<2x64xbf16>, vector<2x64xbf16>, vector<2x64xbf16>, vector<2x64xbf16>, vector<2x64xbf16>, vector<2x64xbf16>, vector<2x64xbf16>, vector<2x64xbf16>, vector<2x64xbf16>, vector<2x64xbf16>, vector<2x64xbf16>, vector<2x64xbf16>, vector<2x64xbf16> -> vector<2x1024xbf16>
    %278 = tpu.concatenate %266, %267, %268, %269, %270, %271, %272, %273, %274, %275 in 1 : vector<2x64xbf16>, vector<2x64xbf16>, vector<2x64xbf16>, vector<2x64xbf16>, vector<2x64xbf16>, vector<2x64xbf16>, vector<2x64xbf16>, vector<2x64xbf16>, vector<2x64xbf16>, vector<2x64xbf16> -> vector<2x640xbf16>
    %279 = tpu.concatenate %276, %277, %278 in 1 : vector<2x1024xbf16>, vector<2x1024xbf16>, vector<2x640xbf16> -> vector<2x2688xbf16>
    %c0_126 = arith.constant 0 : index
    %c0_127 = arith.constant 0 : index
    %280 = vector.load %arg13[%c0_126, %c0_127] : memref<2688x71xbf16, #tpu.memory_space<vmem>>, vector<2688x71xbf16>
    %cst_128 = arith.constant dense<0.000000e+00> : vector<2x71xf32>
    %281 = tpu.matmul %279, %280, %cst_128 {dimension_numbers = #tpu.dot_dimension_numbers<[1], [0], [0], [1], [0, 0, 1, 1], [], []>} : vector<2x2688xbf16>, vector<2688x71xbf16>, vector<2x71xf32> -> vector<2x71xf32>
    %c0_129 = arith.constant 0 : index
    %c0_130 = arith.constant 0 : index
    %282 = vector.load %arg14[%c0_129, %c0_130] : memref<1x71xf32, #tpu.memory_space<vmem>>, vector<1x71xf32>
    %283 = vector.broadcast %282 : vector<1x71xf32> to vector<2x71xf32>
    %284 = arith.addf %281, %283 : vector<2x71xf32>
    %285 = vector.extract_strided_slice %284 {offsets = [0, 0], sizes = [2, 7], strides = [1, 1]} : vector<2x71xf32> to vector<2x7xf32>
    %286 = vector.extract_strided_slice %284 {offsets = [0, 7], sizes = [2, 64], strides = [1, 1]} : vector<2x71xf32> to vector<2x64xf32>
    %cst_131 = arith.constant 0.000000e+00 : f32
    %287 = vector.broadcast %cst_131 : f32 to vector<2x64xf32>
    %288 = arith.maximumf %286, %287 : vector<2x64xf32>
    %cst_132 = arith.constant dense<0xFF800000> : vector<2xf32>
    %289 = vector.multi_reduction <maximumf>, %285, %cst_132 [1] : vector<2x7xf32> to vector<2xf32>
    %290 = vector.shape_cast %289 : vector<2xf32> to vector<2x1xf32>
    %291 = vector.broadcast %290 : vector<2x1xf32> to vector<2x7xf32>
    %292 = arith.subf %285, %291 : vector<2x7xf32>
    %293 = math.exp %292 : vector<2x7xf32>
    %cst_133 = arith.constant dense<0.000000e+00> : vector<2xf32>
    %294 = vector.multi_reduction <add>, %293, %cst_133 [1] : vector<2x7xf32> to vector<2xf32>
    %295 = vector.shape_cast %294 : vector<2xf32> to vector<2x1xf32>
    %296 = tpu.reciprocal %295 {approx = true} : vector<2x1xf32> -> vector<2x1xf32>
    %297 = vector.broadcast %296 : vector<2x1xf32> to vector<2x7xf32>
    %298 = arith.mulf %293, %297 : vector<2x7xf32>
    %c0_134 = arith.constant 0 : index
    %c0_135 = arith.constant 0 : index
    %299 = vector.load %arg15[%c0_134, %c0_135] : memref<1x64xf32, #tpu.memory_space<vmem>>, vector<1x64xf32>
    %300 = vector.broadcast %299 : vector<1x64xf32> to vector<2x64xf32>
    %301 = arith.mulf %288, %300 : vector<2x64xf32>
    %cst_136 = arith.constant dense<0.000000e+00> : vector<2xf32>
    %302 = vector.multi_reduction <add>, %301, %cst_136 [1] : vector<2x64xf32> to vector<2xf32>
    %303 = vector.shape_cast %302 : vector<2xf32> to vector<2x1xf32>
    %c0_137 = arith.constant 0 : index
    %c0_138 = arith.constant 0 : index
    %304 = vector.load %arg16[%c0_137, %c0_138] : memref<1x1xf32, #tpu.memory_space<vmem>>, vector<1x1xf32>
    %305 = vector.broadcast %304 : vector<1x1xf32> to vector<2x1xf32>
    %306 = arith.addf %303, %305 : vector<2x1xf32>
    %307 = math.tanh %306 : vector<2x1xf32>
    %308 = tpu.concatenate %298, %307 in 1 : vector<2x7xf32>, vector<2x1xf32> -> vector<2x8xf32>
    %c0_139 = arith.constant 0 : index
    %c0_140 = arith.constant 0 : index
    %309 = vector.load %arg17[%c0_139, %c0_140] : memref<2x8xf32, #tpu.memory_space<vmem>>, vector<2x8xf32>
    tpu.vector_store %arg17[%c0_139, %c0_140], %308 {strides = array<i32>} : memref<2x8xf32, #tpu.memory_space<vmem>>, vector<2x8xf32>,
    return
  }
  func.func @transform_0(%arg0: i32) -> (i32, i32) {
    %c0_i32 = arith.constant 0 : i32
    %c0_i32_0 = arith.constant 0 : i32
    return %arg0, %c0_i32 : i32, i32
  }
  func.func @transform_1(%arg0: i32) -> (i32, i32) {
    %c0_i32 = arith.constant 0 : i32
    %c0_i32_0 = arith.constant 0 : i32
    %c0_i32_1 = arith.constant 0 : i32
    return %c0_i32, %c0_i32_0 : i32, i32
  }
  func.func @transform_2(%arg0: i32) -> (i32, i32) {
    %c0_i32 = arith.constant 0 : i32
    %c0_i32_0 = arith.constant 0 : i32
    %c0_i32_1 = arith.constant 0 : i32
    return %c0_i32, %c0_i32_0 : i32, i32
  }
  func.func @transform_3(%arg0: i32) -> (i32, i32) {
    %c0_i32 = arith.constant 0 : i32
    %c0_i32_0 = arith.constant 0 : i32
    %c0_i32_1 = arith.constant 0 : i32
    return %c0_i32, %c0_i32_0 : i32, i32
  }
  func.func @transform_4(%arg0: i32) -> (i32, i32, i32) {
    %c0_i32 = arith.constant 0 : i32
    %c0_i32_0 = arith.constant 0 : i32
    %c0_i32_1 = arith.constant 0 : i32
    %c0_i32_2 = arith.constant 0 : i32
    return %c0_i32, %c0_i32_0, %c0_i32_1 : i32, i32, i32
  }
  func.func @transform_5(%arg0: i32) -> (i32, i32, i32) {
    %c0_i32 = arith.constant 0 : i32
    %c0_i32_0 = arith.constant 0 : i32
    %c0_i32_1 = arith.constant 0 : i32
    %c0_i32_2 = arith.constant 0 : i32
    return %c0_i32, %c0_i32_0, %c0_i32_1 : i32, i32, i32
  }
  func.func @transform_6(%arg0: i32) -> (i32, i32, i32) {
    %c0_i32 = arith.constant 0 : i32
    %c0_i32_0 = arith.constant 0 : i32
    %c0_i32_1 = arith.constant 0 : i32
    %c0_i32_2 = arith.constant 0 : i32
    return %c0_i32, %c0_i32_0, %c0_i32_1 : i32, i32, i32
  }
  func.func @transform_7(%arg0: i32) -> (i32, i32, i32) {
    %c0_i32 = arith.constant 0 : i32
    %c0_i32_0 = arith.constant 0 : i32
    %c0_i32_1 = arith.constant 0 : i32
    %c0_i32_2 = arith.constant 0 : i32
    return %c0_i32, %c0_i32_0, %c0_i32_1 : i32, i32, i32
  }
  func.func @transform_8(%arg0: i32) -> (i32, i32, i32) {
    %c0_i32 = arith.constant 0 : i32
    %c0_i32_0 = arith.constant 0 : i32
    %c0_i32_1 = arith.constant 0 : i32
    %c0_i32_2 = arith.constant 0 : i32
    return %c0_i32, %c0_i32_0, %c0_i32_1 : i32, i32, i32
  }
  func.func @transform_9(%arg0: i32) -> (i32, i32, i32) {
    %c0_i32 = arith.constant 0 : i32
    %c0_i32_0 = arith.constant 0 : i32
    %c0_i32_1 = arith.constant 0 : i32
    %c0_i32_2 = arith.constant 0 : i32
    return %c0_i32, %c0_i32_0, %c0_i32_1 : i32, i32, i32
  }
  func.func @transform_10(%arg0: i32) -> (i32, i32) {
    %c0_i32 = arith.constant 0 : i32
    %c0_i32_0 = arith.constant 0 : i32
    %c0_i32_1 = arith.constant 0 : i32
    return %c0_i32, %c0_i32_0 : i32, i32
  }
  func.func @transform_11(%arg0: i32) -> (i32, i32) {
    %c0_i32 = arith.constant 0 : i32
    %c0_i32_0 = arith.constant 0 : i32
    %c0_i32_1 = arith.constant 0 : i32
    return %c0_i32, %c0_i32_0 : i32, i32
  }
  func.func @transform_12(%arg0: i32) -> (i32, i32) {
    %c0_i32 = arith.constant 0 : i32
    %c0_i32_0 = arith.constant 0 : i32
    %c0_i32_1 = arith.constant 0 : i32
    return %c0_i32, %c0_i32_0 : i32, i32
  }
  func.func @transform_13(%arg0: i32) -> (i32, i32) {
    %c0_i32 = arith.constant 0 : i32
    %c0_i32_0 = arith.constant 0 : i32
    %c0_i32_1 = arith.constant 0 : i32
    return %c0_i32, %c0_i32_0 : i32, i32
  }
  func.func @transform_14(%arg0: i32) -> (i32, i32) {
    %c0_i32 = arith.constant 0 : i32
    %c0_i32_0 = arith.constant 0 : i32
    %c0_i32_1 = arith.constant 0 : i32
    return %c0_i32, %c0_i32_0 : i32, i32
  }
  func.func @transform_15(%arg0: i32) -> (i32, i32) {
    %c0_i32 = arith.constant 0 : i32
    %c0_i32_0 = arith.constant 0 : i32
    %c0_i32_1 = arith.constant 0 : i32
    return %c0_i32, %c0_i32_0 : i32, i32
  }
  func.func @transform_16(%arg0: i32) -> (i32, i32) {
    %c0_i32 = arith.constant 0 : i32
    %c0_i32_0 = arith.constant 0 : i32
    return %arg0, %c0_i32 : i32, i32
  }
}

</mosaic_0001>

<bundles_post_ra>
// kernel: connect4_forward.1
= control target key start
LH: loop header
LB: loop body
LE: loop exit
PB: predicated region body
PF: predicated region fallthrough
CT: control target
= control target key end

     0   :  { %v204_v0 = vlaneseq  ;;  %v18311_v4 = vmov 0.0   ;;  %s12008_s21 = smov 6   ;;  %s12009_s25 = smov 12   ;;  %vm722_vm3 = vcmask 1044480   ;;  %vm723_vm4 = vcmask 1045504   ;;  %s18291_s0 = inlined_call_operand.vmem [shape: f32[144,3], index: 0, kind: input, shape index: {}]   ;;  %s18292_s2 = inlined_call_operand.vmem [shape: bf16[27,64], index: 2, kind: input, shape index: {}]   ;;  %s18293_s1 = inlined_call_operand.vmem [shape: f32[144,1], index: 1, kind: input, shape index: {}]   ;;  %s18294_s4 = inlined_call_operand.vmem [shape: bf16[3,576,64], index: 4, kind: input, shape index: {}]   ;;  %s18295_s3 = inlined_call_operand.vmem [shape: f32[1,64], index: 3, kind: input, shape index: {}]   ;;  %s18296_s7 = inlined_call_operand.vmem [shape: bf16[3,576,64], index: 7, kind: input, shape index: {}]   ;;  %s18297_s5 = inlined_call_operand.vmem [shape: f32[3,1,64], index: 5, kind: input, shape index: {}]   ;;  %s18298_s6 = inlined_call_operand.vmem [shape: f32[3,1,64], index: 6, kind: input, shape index: {}]   ;;  %s18299_s8 = inlined_call_operand.vmem [shape: f32[3,1,64], index: 8, kind: input, shape index: {}]   ;;  %s18300_s9 = inlined_call_operand.vmem [shape: f32[3,1,64], index: 9, kind: input, shape index: {}]   ;;  %s18301_s10 = inlined_call_operand.vmem [shape: bf16[64,64], index: 10, kind: input, shape index: {}]   ;;  %s18302_s12 = inlined_call_operand.vmem [shape: bf16[2688,71], index: 12, kind: input, shape index: {}]   ;;  %s18303_s11 = inlined_call_operand.vmem [shape: f32[1,64], index: 11, kind: input, shape index: {}]   ;;  %s18304_s14 = inlined_call_operand.vmem [shape: f32[1,64], index: 14, kind: input, shape index: {}]   ;;  %s18305_s13 = inlined_call_operand.vmem [shape: f32[1,71], index: 13, kind: input, shape index: {}]   ;;  %s18306_s15 = inlined_call_operand.<no memory space> [shape: f32[1,1], index: 15, kind: input, shape index: {}]   ;;  %s18307_s16 = inlined_call_operand.vmem [shape: f32[2,8], index: 16, kind: output, shape index: {}]  }
   0x1   :  { %18508 = sst [smem:[#allocation51_spill]] %s18291_s0  ;;  %11226 = vmatprep.subr.bf16.mxu0 %v18311_v4  ;;  %s12010_s26 = smov 3   ;;  %vm12017_vm5 = vmmov 0   ;;  %vm524_vm6 = vcmask 23552   ;;  %vm552_vm7 = vcmask 48128   ;;  %vm571_vm8 = vcmask 72704  }
   0x2   :  { %s18509_s23 = sld [smem:[#allocation51_spill]]  ;;  %v12137_v8 = vshrl.u32 %v204_v0, 7  ;;  %s12011_s27 = smov 18   ;;  %11230 = vmatprep.mubr.msk.bf16.mxu0 %vm12017_vm5, %v18311_v4  ;;  %vm590_vm9 = vcmask 97280   ;;  %vm609_vm10 = vcmask 121856   ;;  %vm628_vm11 = vcmask 146432  }
   0x3   :  { %s12012_s17 = smov 15   ;;  %s12013_s18 = smov 9   ;;  %vm647_vm12 = vcmask 171008   ;;  %vm666_vm13 = vcmask 195584   ;;  %vm703_vm14 = vcmask 220160   ;;  %vm1149_vm15 = vcmask 523264  }
   0x4   :  { %18510 = vst [vmem:[#allocation3_spill] sm:$0xff] %v12137_v8  ;;  %vm252_vm0 = vcmp.lt.s32.totalorder %v12137_v8, 2  ;;  %vm307_vm1 = vcmp.lt.s32.totalorder %v12137_v8, 6  ;;  %vm206_vm2 = vcmp.lt.s32.totalorder %v12137_v8, 4  ;;  %s12014_s22 = smov 21   ;;  %s12015_s29 = smov 24  }
   0x5   :  { %s12019_s30 = smov 64  }
   0x8   :  { %v12110_v1 = vld [vmem:[%s18509_s23 + $0x80] sm:$0xff]  ;;  %v12115_v2 = vld [vmem:[%s18509_s23 + $0x88] sm:$0xff]  ;;  %v12135_v7 = vld [vmem:[%s18509_s23 + $0x78] sm:$0xff] }
   0x9   :  { %v12120_v3 = vld [vmem:[%s18509_s23] sm:$0xff]  ;;  %v12125_v5 = vpack.c.bf16 %v12115_v2, %v12110_v1  ;;  %v12130_v6 = vld [vmem:[%s18509_s23 + $0x8] sm:$0xff]  ;;  %v250_v9 = vrot.slane %v12110_v1, 6  ;;  %v251_v10 = vrot.slane %v12115_v2, 6  ;;  %v12144_v11 = vld [vmem:[%s18509_s23 + $0x10] sm:$0xff]  ;;  %v249_v13 = vrot.slane %v12135_v7, 6 }
   0xa   :  { %v12148_v12 = vpack.c.bf16 %v12130_v6, %v12120_v3  ;;  %v12154_v14 = vld [vmem:[%s18509_s23 + $0x18] sm:$0xff]  ;;  %v289_v15 = vrot.slane %v12120_v3, 2  ;;  %v290_v16 = vrot.slane %v12130_v6, 2  ;;  %v291_v18 = vrot.slane %v12144_v11, 2  ;;  %v12170_v19 = vld [vmem:[%s18509_s23 + $0x20] sm:$0xff]  ;;  %v12215_v38 = vld [vmem:[%s18509_s23 + $0x28] sm:$0xff] }
   0xb   :  { %380 = vrot.lane.b32.xlu0 %v12125_v5, %s12008_s21  ;;  %v12163_v17 = vpack.c.bf16 %v12154_v14, %v12144_v11  ;;  %v253_v20 = vsel %vm252_vm0, %v250_v9, %v251_v10  ;;  %v254_v21 = vsel %vm252_vm0, %v249_v13, %v250_v9  ;;  %v234_v23 = vrot.slane %v12120_v3, 6  ;;  %v12230_v41 = vld [vmem:[%s18509_s23 + $0x30] sm:$0xff]  ;;  %v12243_v47 = vld [vmem:[%s18509_s23 + $0x38] sm:$0xff]  ;;  %v12256_v51 = vld [vmem:[%s18509_s23 + $0x40] sm:$0xff] }
   0xc   :  { %416 = vrot.lane.b32.xlu1 %v12148_v12, %s12009_s25  ;;  %v324_v22 = vsel %vm307_vm1, %v289_v15, %v290_v16  ;;  %v12185_v24 = vpack.c.bf16 %v253_v20, %v254_v21  ;;  %v323_v25 = vsel %vm307_vm1, %v290_v16, %v291_v18  ;;  %v235_v26 = vrot.slane %v12130_v6, 6  ;;  %v12275_v57 = vld [vmem:[%s18509_s23 + $0x48] sm:$0xff]  ;;  %v12284_v61 = vld [vmem:[%s18509_s23 + $0x50] sm:$0xff]  ;;  %v12294_v9 = vld [vmem:[%s18509_s23 + $0x58] sm:$0xff] }
   0xd   :  { %v292_v27 = vrot.slane %v12154_v14, 2  ;;  %v270_v28 = vsel %vm252_vm0, %v251_v10, %v234_v23  ;;  %v293_v29 = vrot.slane %v12170_v19, 2  ;;  %v188_v30 = vrot.slane %v12144_v11, 4 }
   0xe   :  { %v12197_v31 = vpack.c.bf16 %v323_v25, %v324_v22  ;;  %v269_v32 = vsel %vm252_vm0, %v234_v23, %v235_v26  ;;  %v189_v33 = vrot.slane %v12154_v14, 4  ;;  %v190_v34 = vrot.slane %v12170_v19, 4 }
   0xf   :  { %353 = vrot.lane.b32.xlu0 %v12185_v24, %s12010_s26  ;;  %v272_v35 = vpack.c.bf16 %v269_v32, %v270_v28  ;;  %v321_v36 = vsel %vm307_vm1, %v292_v27, %v293_v29  ;;  %v322_v37 = vsel %vm307_vm1, %v291_v18, %v292_v27  ;;  %v191_v43 = vrot.slane %v12215_v38, 4  ;;  %v12308_v18 = vld [vmem:[%s18509_s23 + $0x60] sm:$0xff]  ;;  %v12334_v32 = vld [vmem:[%s18509_s23 + $0x68] sm:$0xff] }
  0x10   :  { %461 = vrot.lane.b32.xlu1 %v12163_v17, %s12011_s27  ;;  %v12219_v39 = vsel %vm206_vm2, %v189_v33, %v190_v34  ;;  %v12225_v40 = vsel %vm206_vm2, %v188_v30, %v189_v33  ;;  %v327_v42 = vpack.c.bf16 %v321_v36, %v322_v37  ;;  %v236_v45 = vrot.slane %v12144_v11, 6 }
  0x11   :  { %v335_v44 = vpack.c.bf16 %v12219_v39, %v12225_v40  ;;  %v237_v46 = vrot.slane %v12154_v14, 6  ;;  %v192_v48 = vrot.slane %v12230_v41, 4  ;;  %v12248_v49 = vsel %vm206_vm2, %v190_v34, %v191_v43 }
  0x12   :  { %v228_v50 = vpack.c.bf16 %v12248_v49, %v12219_v39  ;;  %v193_v52 = vrot.slane %v12243_v47, 4  ;;  %v268_v54 = vsel %vm252_vm0, %v235_v26, %v236_v45  ;;  %v194_v58 = vrot.slane %v12256_v51, 4  ;;  %v68_v39 = vld [vmem:[%s18293_s1 + $0x60] sm:$0xff] }
  0x13   :  { %443 = vrot.lane.b32.xlu0 %v12197_v31, %s12012_s17  ;;  %v267_v53 = vsel %vm252_vm0, %v236_v45, %v237_v46  ;;  %v12266_v55 = vsel %vm206_vm2, %v191_v43, %v192_v48  ;;  %v294_v62 = vrot.slane %v12215_v38, 2  ;;  %v295_v63 = vrot.slane %v12230_v41, 2 }
  0x14   :  { %398 = vrot.lane.b32.xlu1 %v272_v35, %s12013_s18  ;;  %v12270_v56 = vsel %vm206_vm2, %v192_v48, %v193_v52  ;;  %v273_v60 = vpack.c.bf16 %v267_v53, %v268_v54  ;;  %v195_v0 = vrot.slane %v12275_v57, 4  ;;  %v12298_v10 = vsel %vm206_vm2, %v193_v52, %v194_v58 }
  0x15   :  { %v196_v14 = vrot.slane %v12284_v61, 4  ;;  %v12317_v21 = vpack.c.bf16 %v12215_v38, %v12170_v19  ;;  %v319_v22 = vsel %vm307_vm1, %v294_v62, %v295_v63  ;;  %v320_v23 = vsel %vm307_vm1, %v293_v29, %v294_v62 }
  0x16   :  { %v12303_v16 = vsel %vm206_vm2, %v194_v58, %v195_v0  ;;  %v197_v25 = vrot.slane %v12294_v9, 4  ;;  %v238_v26 = vrot.slane %v12170_v19, 6  ;;  %v239_v27 = vrot.slane %v12215_v38, 6  ;;  %v12347_v19 = vld [vmem:[%s18509_s23 + $0x70] sm:$0xff] }
  0x17   :  { %479 = vrot.lane.b32.xlu0 %v327_v42, %s12014_s22  ;;  %v198_v28 = vrot.slane %v12308_v18, 4  ;;  %v12338_v33 = vsel %vm206_vm2, %v195_v0, %v196_v14  ;;  %v12350_v34 = vpack.c.bf16 %v319_v22, %v320_v23  ;;  %v336_v36 = vpack.c.bf16 %v12266_v55, %v12248_v49 }
  0x18   :  { %506 = vrot.lane.b32.xlu1 %v335_v44, %s12015_s29  ;;  %v12342_v29 = vsel %vm206_vm2, %v196_v14, %v197_v25  ;;  %v199_v37 = vrot.slane %v12334_v32, 4  ;;  %v265_v43 = vsel %vm252_vm0, %v238_v26, %v239_v27  ;;  %v303_v45 = vrot.slane %v12347_v19, 2 }
  0x19   :  { %v12367_v44 = vsel %vm206_vm2, %v197_v25, %v198_v28  ;;  %v200_v48 = vrot.slane %v12347_v19, 4  ;;  %v12377_v53 = vpack.c.bf16 %v12135_v7, %v12347_v19  ;;  %v304_v54 = vrot.slane %v12135_v7, 2 }
  0x1a   :  { %v12373_v52 = vsel %vm206_vm2, %v198_v28, %v199_v37  ;;  %v297_v0 = vrot.slane %v12256_v51, 2  ;;  %v305_v14 = vrot.slane %v12110_v1, 2  ;;  %v247_v23 = vrot.slane %v12334_v32, 6 }
  0x1b   :  { %355 = vrot.lane.b32.xlu0 %v272_v35, %s12010_s26  ;;  %v310_v22 = vsel %vm307_vm1, %v303_v45, %v304_v54  ;;  %v201_v25 = vrot.slane %v12135_v7, 4  ;;  %v248_v28 = vrot.slane %v12347_v19, 6  ;;  %v306_v20 = vrot.slane %v12115_v2, 2 }
  0x1c   :  { %382 = vrot.lane.b32.xlu1 %v12148_v12, %s12008_s21  ;;  %v186_v59 = vrot.slane %v12120_v3, 4  ;;  %v187_v3 = vrot.slane %v12130_v6, 4  ;;  %v285_v38 = vpack.c.bf16 %v12275_v57, %v12256_v51 }
  0x1d   :  { %v256_v7 = vsel %vm252_vm0, %v247_v23, %v248_v28 }
  0x1e   :  { %v12495_v6 = vsel %vm206_vm2, %v187_v3, %v188_v30 }
  0x1f   :  { %400 = vrot.lane.b32.xlu0 %v273_v60, %s12013_s18 }
  0x20   :  { %418 = vrot.lane.b32.xlu1 %v12163_v17, %s12009_s25 }
  0x23   :  { %445 = vrot.lane.b32.xlu0 %v327_v42, %s12012_s17  ;;  %v266_v42 = vsel %vm252_vm0, %v237_v46, %v238_v26  ;;  %v296_v46 = vrot.slane %v12243_v47, 2  ;;  %v202_v26 = vrot.slane %v12110_v1, 4  ;;  %v12414_v1 = vsel %vm206_vm2, %v200_v48, %v201_v25 }
  0x24   :  { %463 = vrot.lane.b32.xlu1 %v12317_v21, %s12011_s27  ;;  %v12386_v62 = vpack.c.bf16 %v265_v43, %v266_v42  ;;  %v309_v43 = vsel %vm307_vm1, %v304_v54, %v305_v14  ;;  %v203_v42 = vrot.slane %v12115_v2, 4  ;;  %v11611_v54 = vld [vmem:[%s18292_s2 + $0x8] sm:$0x3f]  }
  0x25   :  { %v12406_v58 = vpack.c.bf16 %v309_v43, %v310_v22  ;;  %v12410_v35 = vsel %vm206_vm2, %v201_v25, %v202_v26  ;;  %v12016_v25 = vmov 65535   ;;  %v318_v2 = vsel %vm307_vm1, %v295_v63, %v296_v46  ;;  %v11612_v63 = vld [vmem:[%s18292_s2] sm:$0xff]  }
  0x26   :  { %v341_v22 = vpack.c.bf16 %v12410_v35, %v12414_v1  ;;  %v724_v43 = vsel %vm722_vm3, 4294967295, %v12016_v25  ;;  %v325_v25 = vsel %vm307_vm1, %v306_v20, %v289_v15  ;;  %vm9266_vm3 = vcmask 58368  }
  0x27   :  { %481 = vrot.lane.b32.xlu0 %v12350_v34, %s12014_s22 }
  0x28   :  { %508 = vrot.lane.b32.xlu1 %v336_v36, %s12015_s29  ;;  %v12400_v36 = vsel %vm206_vm2, %v199_v37, %v200_v48  ;;  %v255_v37 = vsel %vm252_vm0, %v248_v28, %v249_v13  ;;  %v12435_v13 = vsel %vm206_vm2, %v202_v26, %v203_v42  ;;  %v284_v26 = vpack.c.bf16 %v12243_v47, %v12230_v41 }
  0x29   :  { %v12437_v48 = vpack.c.bf16 %v255_v37, %v256_v7  ;;  %v317_v28 = vsel %vm307_vm1, %v296_v46, %v297_v0  ;;  %v308_v7 = vsel %vm307_vm1, %v305_v14, %v306_v20  ;;  %v240_v20 = vrot.slane %v12230_v41, 6 }
  0x2a   :  { %v329_v15 = vpack.c.bf16 %v317_v28, %v318_v2  ;;  %v337_v46 = vpack.c.bf16 %v12298_v10, %v12270_v56  ;;  %v241_v14 = vrot.slane %v12243_v47, 6  ;;  %v298_v28 = vrot.slane %v12275_v57, 2 }
  0x2b   :  { %357 = vrot.lane.b32.xlu0 %v273_v60, %s12010_s26  ;;  %v725_v60 = vsel %vm723_vm4, %v724_v43, 0  ;;  %v12467_v43 = vsel %vm206_vm2, %v203_v42, %v186_v59  ;;  %v12489_v42 = vsel %vm206_vm2, %v186_v59, %v187_v3  ;;  %v264_v30 = vsel %vm252_vm0, %v239_v27, %v240_v20 }
  0x2c   :  { %384 = vrot.lane.b32.xlu1 %v12163_v17, %s12008_s21  ;;  %v225_v17 = vpack.c.bf16 %v12435_v13, %v12410_v35  ;;  %v727_v37 = vand.u32 %v11611_v54, %v725_v60  ;;  %v12469_v54 = vpack.c.bf16 %v325_v25, %v308_v7  ;;  %v342_v60 = vpack.c.bf16 %v12467_v43, %v12435_v13 }
  0x2d   :  { %v226_v41 = vpack.c.bf16 %v12489_v42, %v12467_v43  ;;  %v343_v47 = vpack.c.bf16 %v12495_v6, %v12489_v42  ;;  %v263_v11 = vsel %vm252_vm0, %v240_v20, %v241_v14  ;;  %v338_v2 = vpack.c.bf16 %v12338_v33, %v12303_v16  ;;  %v71_v42 = vld [vmem:[%s18293_s1 + $0x78] sm:$0xff] }
  0x2e   :  { %11227 = vmatpush3.bf16.msra.mxu0 %v727_v37  ;;  %v275_v59 = vpack.c.bf16 %v263_v11, %v264_v30  ;;  %v299_v37 = vrot.slane %v12284_v61, 2  ;;  %v242_v7 = vrot.slane %v12256_v51, 6  ;;  %v243_v25 = vrot.slane %v12275_v57, 6 }
  0x2f   :  { %402 = vrot.lane.b32.xlu0 %v12386_v62, %s12013_s18  ;;  %11228 = vmatprep.subr.bf16.mxu0 %v18311_v4  ;;  %v301_v51 = vrot.slane %v12308_v18, 2  ;;  %v286_v57 = vpack.c.bf16 %v12294_v9, %v12284_v61  ;;  %v244_v11 = vrot.slane %v12284_v61, 6  ;;  %v245_v30 = vrot.slane %v12294_v9, 6 }
  0x30   :  { %420 = vrot.lane.b32.xlu1 %v12317_v21, %s12009_s25  ;;  %v315_v27 = vsel %vm307_vm1, %v298_v28, %v299_v37  ;;  %v302_v61 = vrot.slane %v12334_v32, 2 }
  0x32   :  { %11229 = vmatpush3.bf16.msra.mxu0 %v11612_v63  ;;  %v261_v63 = vsel %vm252_vm0, %v242_v7, %v243_v25 }
  0x33   :  { %447 = vrot.lane.b32.xlu0 %v12350_v34, %s12012_s17  ;;  %v227_v34 = vpack.c.bf16 %v12225_v40, %v12495_v6  ;;  %v60_v40 = vld [vmem:[%s18293_s1 + $0x20] sm:$0xff] }
  0x34   :  { %465 = vrot.lane.b32.xlu1 %v284_v26, %s12011_s27 }
  0x37   :  { %483 = vrot.lane.b32.xlu0 %v329_v15, %s12014_s22 }
  0x38   :  { %510 = vrot.lane.b32.xlu1 %v337_v46, %s12015_s29 }
  0x3b   :  { %359 = vrot.lane.b32.xlu0 %v12386_v62, %s12010_s26  ;;  %v316_v62 = vsel %vm307_vm1, %v297_v0, %v298_v28  ;;  %v262_v0 = vsel %vm252_vm0, %v241_v14, %v242_v7  ;;  %v339_v14 = vpack.c.bf16 %v12367_v44, %v12342_v29  ;;  %v259_v28 = vsel %vm252_vm0, %v244_v11, %v245_v30 }
  0x3c   :  { %386 = vrot.lane.b32.xlu1 %v12317_v21, %s12008_s21  ;;  %v330_v21 = vpack.c.bf16 %v315_v27, %v316_v62  ;;  %v276_v3 = vpack.c.bf16 %v261_v63, %v262_v0  ;;  %v311_v62 = vsel %vm307_vm1, %v302_v61, %v303_v45  ;;  %v246_v7 = vrot.slane %v12308_v18, 6 }
  0x3e   :  { %v257_v19 = vsel %vm252_vm0, %v246_v7, %v247_v23  ;;  %v258_v45 = vsel %vm252_vm0, %v245_v30, %v246_v7  ;;  %v72_v7 = vld [vmem:[%s18293_s1 + $0x80] sm:$0xff] }
  0x3f   :  { %404 = vrot.lane.b32.xlu0 %v275_v59, %s12013_s18 }
  0x40   :  { %422 = vrot.lane.b32.xlu1 %v284_v26, %s12009_s25 }
  0x43   :  { %449 = vrot.lane.b32.xlu0 %v329_v15, %s12012_s17  ;;  %v300_v15 = vrot.slane %v12294_v9, 2  ;;  %v287_v9 = vpack.c.bf16 %v12334_v32, %v12308_v18 }
  0x44   :  { %467 = vrot.lane.b32.xlu1 %v285_v38, %s12011_s27 }
  0x45   :  { %v313_v20 = vsel %vm307_vm1, %v300_v15, %v301_v51  ;;  %v314_v46 = vsel %vm307_vm1, %v299_v37, %v300_v15  ;;  %v260_v37 = vsel %vm252_vm0, %v243_v25, %v244_v11  ;;  %v278_v25 = vpack.c.bf16 %v257_v19, %v258_v45 }
  0x46   :  { %v277_v27 = vpack.c.bf16 %v259_v28, %v260_v37  ;;  %v57_v28 = vld [vmem:[%s18293_s1 + $0x8] sm:$0xff] }
  0x47   :  { %485 = vrot.lane.b32.xlu0 %v330_v21, %s12014_s22 }
  0x48   :  { %512 = vrot.lane.b32.xlu1 %v338_v2, %s12015_s29  ;;  %v340_v2 = vpack.c.bf16 %v12400_v36, %v12373_v52 }
  0x4b   :  { %361 = vrot.lane.b32.xlu0 %v275_v59, %s12010_s26  ;;  %v12018_v59 = vmov 0  }
  0x4c   :  { %388 = vrot.lane.b32.xlu1 %v284_v26, %s12008_s21  ;;  %v331_v26 = vpack.c.bf16 %v313_v20, %v314_v46  ;;  %11609 = vset.pattern.permute.xlu0 %v12018_v59 }
  0x4d   :  { %11610 = vset.pattern.permute.xlu1 %v12018_v59 }
  0x4f   :  { %406 = vrot.lane.b32.xlu0 %v276_v3, %s12013_s18 }
  0x50   :  { %424 = vrot.lane.b32.xlu1 %v285_v38, %s12009_s25 }
  0x53   :  { %451 = vrot.lane.b32.xlu0 %v330_v21, %s12012_s17  ;;  %v312_v21 = vsel %vm307_vm1, %v301_v51, %v302_v61  ;;  %v73_v61 = vld [vmem:[%s18293_s1 + $0x88] sm:$0xff] }
  0x54   :  { %469 = vrot.lane.b32.xlu1 %v286_v57, %s12011_s27 }
  0x57   :  { %487 = vrot.lane.b32.xlu0 %v331_v26, %s12014_s22 }
  0x58   :  { %514 = vrot.lane.b32.xlu1 %v339_v14, %s12015_s29 }
  0x5b   :  { %363 = vrot.lane.b32.xlu0 %v276_v3, %s12010_s26 }
  0x5c   :  { %390 = vrot.lane.b32.xlu1 %v285_v38, %s12008_s21  ;;  %v332_v38 = vpack.c.bf16 %v311_v62, %v312_v21  ;;  %v58_v21 = vld [vmem:[%s18293_s1 + $0x10] sm:$0xff] }
  0x5f   :  { %408 = vrot.lane.b32.xlu0 %v277_v27, %s12013_s18 }
  0x60   :  { %426 = vrot.lane.b32.xlu1 %v286_v57, %s12009_s25 }
  0x63   :  { %453 = vrot.lane.b32.xlu0 %v331_v26, %s12012_s17 }
  0x64   :  { %471 = vrot.lane.b32.xlu1 %v287_v9, %s12011_s27 }
  0x67   :  { %489 = vrot.lane.b32.xlu0 %v332_v38, %s12014_s22 }
  0x68   :  { %516 = vrot.lane.b32.xlu1 %v340_v2, %s12015_s29 }
  0x6b   :  { %365 = vrot.lane.b32.xlu0 %v277_v27, %s12010_s26 }
  0x6c   :  { %392 = vrot.lane.b32.xlu1 %v286_v57, %s12008_s21 }
  0x6f   :  { %410 = vrot.lane.b32.xlu0 %v278_v25, %s12013_s18 }
  0x70   :  { %428 = vrot.lane.b32.xlu1 %v287_v9, %s12009_s25 }
  0x73   :  { %455 = vrot.lane.b32.xlu0 %v332_v38, %s12012_s17 }
  0x74   :  { %473 = vrot.lane.b32.xlu1 %v12377_v53, %s12011_s27 }
  0x77   :  { %491 = vrot.lane.b32.xlu0 %v12406_v58, %s12014_s22 }
  0x78   :  { %518 = vrot.lane.b32.xlu1 %v341_v22, %s12015_s29 }
  0x7b   :  { %367 = vrot.lane.b32.xlu0 %v278_v25, %s12010_s26  ;;  %v59_v25 = vld [vmem:[%s18293_s1 + $0x18] sm:$0xff] }
  0x7c   :  { %394 = vrot.lane.b32.xlu1 %v287_v9, %s12008_s21 }
  0x7d   :  { %v381_v18 = vpop.permute.xlu0 %380 }
  0x7e   :  { %v417_v32 = vpop.permute.xlu1 %416 }
  0x7f   :  { %412 = vrot.lane.b32.xlu0 %v12437_v48, %s12013_s18 }
  0x80   :  { %430 = vrot.lane.b32.xlu1 %v12377_v53, %s12009_s25 }
  0x81   :  { %v354_v23 = vpop.permute.xlu0 %353 }
  0x82   :  { %v462_v63 = vpop.permute.xlu1 %461  ;;  %v527_v22 = vsel %vm524_vm6, %v225_v17, %v354_v23  ;;  %v62_v23 = vld [vmem:[%s18293_s1 + $0x30] sm:$0xff] }
  0x83   :  { %457 = vrot.lane.b32.xlu0 %v12406_v58, %s12012_s17  ;;  %v554_v3 = vsel %vm552_vm7, %v527_v22, %v381_v18 }
  0x84   :  { %475 = vrot.lane.b32.xlu1 %v12125_v5, %s12011_s27 }
  0x85   :  { %v444_v0 = vpop.permute.xlu0 %443 }
  0x86   :  { %v399_v15 = vpop.permute.xlu1 %398 }
  0x87   :  { %v573_v51 = vsel %vm571_vm8, %v554_v3, %v399_v15  ;;  %493 = vrot.lane.b32.xlu0 %v12469_v54, %s12014_s22 }
  0x88   :  { %v592_v35 = vsel %vm590_vm9, %v573_v51, %v417_v32  ;;  %520 = vrot.lane.b32.xlu1 %v342_v60, %s12015_s29 }
  0x89   :  { %v480_v58 = vpop.permute.xlu0 %479  ;;  %v611_v17 = vsel %vm609_vm10, %v592_v35, %v444_v0  ;;  %v61_v0 = vld [vmem:[%s18293_s1 + $0x28] sm:$0xff]  ;;  %v64_v35 = vld [vmem:[%s18293_s1 + $0x40] sm:$0xff] }
  0x8a   :  { %v630_v57 = vsel %vm628_vm11, %v611_v17, %v462_v63  ;;  %v507_v20 = vpop.permute.xlu1 %506  ;;  %v63_v17 = vld [vmem:[%s18293_s1 + $0x38] sm:$0xff] }
  0x8b   :  { %v649_v46 = vsel %vm647_vm12, %v630_v57, %v480_v58  ;;  %369 = vrot.lane.b32.xlu0 %v12437_v48, %s12010_s26 }
  0x8c   :  { %v668_v26 = vsel %vm666_vm13, %v649_v46, %v507_v20  ;;  %396 = vrot.lane.b32.xlu1 %v12377_v53, %s12008_s21  ;;  %v66_v46 = vld [vmem:[%s18293_s1 + $0x50] sm:$0xff] }
  0x8d   :  { %11231 = vmatmul.mubr.msk.bf16.vlgmr.msra.gmra.mxu0 %vm703_vm14, %v668_v26  ;;  %v356_v13 = vpop.permute.xlu0 %355 }
  0x8e   :  { %v530_v60 = vsel %vm524_vm6, %v226_v41, %v356_v13  ;;  %v383_v14 = vpop.permute.xlu1 %382  ;;  %11234 = vmatprep.mubr.msk.bf16.mxu0 %vm12017_vm5, %v18311_v4 }
  0x8f   :  { %414 = vrot.lane.b32.xlu0 %v12185_v24, %s12013_s18  ;;  %v556_v53 = vsel %vm552_vm7, %v530_v60, %v383_v14  ;;  %v65_v60 = vld [vmem:[%s18293_s1 + $0x48] sm:$0xff] }
  0x90   :  { %432 = vrot.lane.b32.xlu1 %v12125_v5, %s12009_s25  ;;  %v56_v5 = vld [vmem:[%s18293_s1] sm:$0xff] }
  0x91   :  { %v401_v48 = vpop.permute.xlu0 %400 }
  0x92   :  { %v575_v11 = vsel %vm571_vm8, %v556_v53, %v401_v48  ;;  %v419_v30 = vpop.permute.xlu1 %418  ;;  %v67_v48 = vld [vmem:[%s18293_s1 + $0x58] sm:$0xff] }
  0x93   :  { %459 = vrot.lane.b32.xlu0 %v12469_v54, %s12012_s17  ;;  %v594_v43 = vsel %vm590_vm9, %v575_v11, %v419_v30 }
  0x94   :  { %477 = vrot.lane.b32.xlu1 %v12148_v12, %s12011_s27 }
  0x95   :  { %v446_v41 = vpop.permute.xlu0 %445 }
  0x96   :  { %v613_v24 = vsel %vm609_vm10, %v594_v43, %v446_v41  ;;  %v464_v59 = vpop.permute.xlu1 %463  ;;  %v70_v43 = vld [vmem:[%s18293_s1 + $0x70] sm:$0xff] }
  0x97   :  { %495 = vrot.lane.b32.xlu0 %v12197_v31, %s12014_s22  ;;  %v632_v12 = vsel %vm628_vm11, %v613_v24, %v464_v59  ;;  %v69_v59 = vld [vmem:[%s18293_s1 + $0x68] sm:$0xff] }
  0x98   :  { %522 = vrot.lane.b32.xlu1 %v343_v47, %s12015_s29 }
  0x99   :  { %v482_v54 = vpop.permute.xlu0 %481 }
  0x9a   :  { %v651_v37 = vsel %vm647_vm12, %v632_v12, %v482_v54  ;;  %v509_v27 = vpop.permute.xlu1 %508 }
  0x9b   :  { %v670_v31 = vsel %vm666_vm13, %v651_v37, %v509_v27  ;;  %76 = vperm.xlu0 %11609, %v56_v5   ;;  %v18511_v37 = vpack.c.bf16 %v12270_v56, %v12266_v55 }
  0x9c   :  { %11235 = vmatmul.mubr.msk.bf16.gmra.mxu0 %vm703_vm14, %v670_v31  ;;  %81 = vperm.xlu1 %11610, %v57_v28  }
  0x9d   :  { %v358_v47 = vpop.permute.xlu0 %357  ;;  %11238 = vmatprep.mubr.msk.bf16.mxu0 %vm12017_vm5, %v18311_v4 }
  0x9e   :  { %v533_v9 = vsel %vm524_vm6, %v227_v34, %v358_v47  ;;  %v385_v62 = vpop.permute.xlu1 %384 }
  0x9f   :  { %151 = vperm.xlu0 %11609, %v71_v42   ;;  %v558_v38 = vsel %vm552_vm7, %v533_v9, %v385_v62 }
  0xa0   :  { %161 = vperm.xlu1 %11610, %v73_v61  }
  0xa1   :  { %v403_v2 = vpop.permute.xlu0 %402 }
  0xa2   :  { %v577_v19 = vsel %vm571_vm8, %v558_v38, %v403_v2  ;;  %v421_v45 = vpop.permute.xlu1 %420 }
  0xa3   :  { %86 = vperm.xlu0 %11609, %v58_v21   ;;  %v596_v6 = vsel %vm590_vm9, %v577_v19, %v421_v45 }
  0xa4   :  { %156 = vperm.xlu1 %11610, %v72_v7  }
  0xa5   :  { %v448_v34 = vpop.permute.xlu0 %447 }
  0xa6   :  { %v615_v18 = vsel %vm609_vm10, %v596_v6, %v448_v34  ;;  %v466_v32 = vpop.permute.xlu1 %465  ;;  %v18512_v6 = vpack.c.bf16 %v12303_v16, %v12298_v10 }
  0xa7   :  { %96 = vperm.xlu0 %11609, %v60_v40   ;;  %v634_v63 = vsel %vm628_vm11, %v615_v18, %v466_v32 }
  0xa8   :  { %91 = vperm.xlu1 %11610, %v59_v25  }
  0xa9   :  { %v484_v22 = vpop.permute.xlu0 %483 }
  0xaa   :  { %v653_v3 = vsel %vm647_vm12, %v634_v63, %v484_v22  ;;  %v511_v15 = vpop.permute.xlu1 %510 }
  0xab   :  { %v672_v51 = vsel %vm666_vm13, %v653_v3, %v511_v15  ;;  %106 = vperm.xlu0 %11609, %v62_v23  }
  0xac   :  { %11239 = vmatmul.mubr.msk.bf16.gmra.mxu0 %vm703_vm14, %v672_v51  ;;  %101 = vperm.xlu1 %11610, %v61_v0  }
  0xad   :  { %v360_v58 = vpop.permute.xlu0 %359  ;;  %11242 = vmatprep.mubr.msk.bf16.mxu0 %vm12017_vm5, %v18311_v4 }
  0xae   :  { %v536_v57 = vsel %vm524_vm6, %v228_v50, %v360_v58  ;;  %v387_v20 = vpop.permute.xlu1 %386 }
  0xaf   :  { %116 = vperm.xlu0 %11609, %v64_v35   ;;  %v560_v26 = vsel %vm552_vm7, %v536_v57, %v387_v20  ;;  %v18513_v57 = vpack.c.bf16 %v12342_v29, %v12338_v33 }
  0xb0   :  { %111 = vperm.xlu1 %11610, %v63_v17  }
  0xb1   :  { %v405_v13 = vpop.permute.xlu0 %404 }
  0xb2   :  { %v579_v14 = vsel %vm571_vm8, %v560_v26, %v405_v13  ;;  %v423_v53 = vpop.permute.xlu1 %422 }
  0xb3   :  { %126 = vperm.xlu0 %11609, %v66_v46   ;;  %v598_v49 = vsel %vm590_vm9, %v579_v14, %v423_v53 }
  0xb4   :  { %121 = vperm.xlu1 %11610, %v65_v60  }
  0xb5   :  { %v450_v50 = vpop.permute.xlu0 %449 }
  0xb6   :  { %v617_v11 = vsel %vm609_vm10, %v598_v49, %v450_v50  ;;  %v468_v30 = vpop.permute.xlu1 %467 }
  0xb7   :  { %136 = vperm.xlu0 %11609, %v68_v39   ;;  %v636_v41 = vsel %vm628_vm11, %v617_v11, %v468_v30 }
  0xb8   :  { %131 = vperm.xlu1 %11610, %v67_v48  }
  0xb9   :  { %v486_v24 = vpop.permute.xlu0 %485 }
  0xba   :  { %v655_v5 = vsel %vm647_vm12, %v636_v41, %v486_v24  ;;  %v513_v12 = vpop.permute.xlu1 %512  ;;  %v18514_v41 = vpack.c.bf16 %v12373_v52, %v12367_v44 }
  0xbb   :  { %v674_v54 = vsel %vm666_vm13, %v655_v5, %v513_v12  ;;  %146 = vperm.xlu0 %11609, %v70_v43  }
  0xbc   :  { %11243 = vmatmul.mubr.msk.bf16.gmra.mxu0 %vm703_vm14, %v674_v54  ;;  %141 = vperm.xlu1 %11610, %v69_v59  }
  0xbd   :  { %v362_v28 = vpop.permute.xlu0 %361  ;;  %11246 = vmatprep.mubr.msk.bf16.mxu0 %vm12017_vm5, %v18311_v4 }
  0xbe   :  { %v539_v27 = vsel %vm524_vm6, %v18511_v37, %v362_v28  ;;  %v389_v31 = vpop.permute.xlu1 %388 }
  0xbf   :  { %v562_v42 = vsel %vm552_vm7, %v539_v27, %v389_v31 }
  0xc1   :  { %v407_v47 = vpop.permute.xlu0 %406 }
  0xc2   :  { %v581_v61 = vsel %vm571_vm8, %v562_v42, %v407_v47  ;;  %v425_v9 = vpop.permute.xlu1 %424 }
  0xc3   :  { %v600_v62 = vsel %vm590_vm9, %v581_v61, %v425_v9 }
  0xc5   :  { %v452_v21 = vpop.permute.xlu0 %451 }
  0xc6   :  { %v619_v38 = vsel %vm609_vm10, %v600_v62, %v452_v21  ;;  %v470_v2 = vpop.permute.xlu1 %469  ;;  %v18515_v21 = vpack.c.bf16 %v12414_v1, %v12400_v36 }
  0xc7   :  { %v638_v7 = vsel %vm628_vm11, %v619_v38, %v470_v2 }
  0xc9   :  { %v488_v19 = vpop.permute.xlu0 %487 }
  0xca   :  { %v657_v55 = vsel %vm647_vm12, %v638_v7, %v488_v19  ;;  %v515_v56 = vpop.permute.xlu1 %514 }
  0xcb   :  { %v676_v45 = vsel %vm666_vm13, %v657_v55, %v515_v56 }
  0xcc   :  { %11247 = vmatmul.mubr.msk.bf16.gmra.mxu0 %vm703_vm14, %v676_v45 }
  0xcd   :  { %v364_v40 = vpop.permute.xlu0 %363  ;;  %11250 = vmatprep.mubr.msk.bf16.mxu0 %vm12017_vm5, %v18311_v4 }
  0xce   :  { %v542_v34 = vsel %vm524_vm6, %v18512_v6, %v364_v40  ;;  %v391_v25 = vpop.permute.xlu1 %390 }
  0xcf   :  { %v564_v18 = vsel %vm552_vm7, %v542_v34, %v391_v25 }
  0xd1   :  { %v409_v32 = vpop.permute.xlu0 %408 }
  0xd2   :  { %v583_v23 = vsel %vm571_vm8, %v564_v18, %v409_v32  ;;  %v427_v63 = vpop.permute.xlu1 %426 }
  0xd3   :  { %v602_v22 = vsel %vm590_vm9, %v583_v23, %v427_v63 }
  0xd5   :  { %v454_v0 = vpop.permute.xlu0 %453 }
  0xd6   :  { %v621_v3 = vsel %vm609_vm10, %v602_v22, %v454_v0  ;;  %v472_v15 = vpop.permute.xlu1 %471 }
  0xd7   :  { %v640_v51 = vsel %vm628_vm11, %v621_v3, %v472_v15 }
  0xd9   :  { %v490_v35 = vpop.permute.xlu0 %489 }
  0xda   :  { %v659_v10 = vsel %vm647_vm12, %v640_v51, %v490_v35  ;;  %v517_v16 = vpop.permute.xlu1 %516 }
  0xdb   :  { %v678_v58 = vsel %vm666_vm13, %v659_v10, %v517_v16 }
  0xdc   :  { %11251 = vmatmul.mubr.msk.bf16.gmra.mxu0 %vm703_vm14, %v678_v58 }
  0xdd   :  { %v366_v17 = vpop.permute.xlu0 %365  ;;  %11254 = vmatprep.mubr.msk.bf16.mxu0 %vm12017_vm5, %v18311_v4 }
  0xde   :  { %v545_v20 = vsel %vm524_vm6, %v18513_v57, %v366_v17  ;;  %v393_v46 = vpop.permute.xlu1 %392 }
  0xdf   :  { %v566_v26 = vsel %vm552_vm7, %v545_v20, %v393_v46  ;;  %v11613_v20 = vld [vmem:[%s18294_s4 + $0x78] sm:$0xff]  }
  0xe0   :  { %10066 = vmatprep.subr.bf16.mxu1 %v11613_v20 }
  0xe1   :  { %v411_v13 = vpop.permute.xlu0 %410 }
  0xe2   :  { %v585_v60 = vsel %vm571_vm8, %v566_v26, %v411_v13  ;;  %v429_v14 = vpop.permute.xlu1 %428  ;;  %v11614_v26 = vld [vmem:[%s18294_s4 + $0x38] sm:$0xff]   ;;  %v11615_v13 = vld [vmem:[%s18294_s4 + $0x70] sm:$0xff]  }
  0xe3   :  { %v604_v53 = vsel %vm590_vm9, %v585_v60, %v429_v14  ;;  %10067 = vmatpush3.bf16.msra.mxu1 %v11614_v26  ;;  %v11616_v14 = vld [vmem:[%s18294_s4 + $0x30] sm:$0xff]  }
  0xe4   :  { %10068 = vmatprep.subr.bf16.mxu1 %v11615_v13 }
  0xe5   :  { %v456_v39 = vpop.permute.xlu0 %455 }
  0xe6   :  { %v623_v49 = vsel %vm609_vm10, %v604_v53, %v456_v39  ;;  %v474_v50 = vpop.permute.xlu1 %473  ;;  %v11617_v53 = vld [vmem:[%s18294_s4 + $0x68] sm:$0xff]  }
  0xe7   :  { %v642_v48 = vsel %vm628_vm11, %v623_v49, %v474_v50  ;;  %v11618_v49 = vld [vmem:[%s18294_s4 + $0x28] sm:$0xff]   ;;  %10069 = vmatpush3.bf16.msra.mxu1 %v11616_v14  ;;  %v11619_v50 = vld [vmem:[%s18294_s4 + $0x60] sm:$0xff]  }
  0xe8   :  { %10070 = vmatprep.subr.bf16.mxu1 %v11617_v53 }
  0xe9   :  { %v492_v11 = vpop.permute.xlu0 %491 }
  0xea   :  { %v661_v33 = vsel %vm647_vm12, %v642_v48, %v492_v11  ;;  %v519_v29 = vpop.permute.xlu1 %518  ;;  %v11620_v48 = vld [vmem:[%s18294_s4 + $0x20] sm:$0xff]   ;;  %v11621_v11 = vld [vmem:[%s18294_s4 + $0x58] sm:$0xff]  }
  0xeb   :  { %v680_v30 = vsel %vm666_vm13, %v661_v33, %v519_v29  ;;  %10071 = vmatpush3.bf16.msra.mxu1 %v11618_v49  ;;  %v11624_v33 = vld [vmem:[%s18294_s4 + $0xf8] sm:$0xff]  }
  0xec   :  { %11255 = vmatmul.mubr.msk.bf16.gmra.mxu0 %vm703_vm14, %v680_v30  ;;  %10072 = vmatprep.subr.bf16.mxu1 %v11619_v50  ;;  %v11622_v29 = vld [vmem:[%s18294_s4 + $0x18] sm:$0xff]  }
  0xed   :  { %v368_v43 = vpop.permute.xlu0 %367  ;;  %11258 = vmatprep.mubr.msk.bf16.mxu0 %vm12017_vm5, %v18311_v4  ;;  %10136 = vmatprep.subr.bf16.mxu0 %v11624_v33  ;;  %v11626_v30 = vld [vmem:[%s18294_s4 + $0xb8] sm:$0xff]  }
  0xee   :  { %v548_v24 = vsel %vm524_vm6, %v18514_v41, %v368_v43  ;;  %v395_v59 = vpop.permute.xlu1 %394  ;;  %v11623_v41 = vld [vmem:[%s18294_s4 + $0x50] sm:$0xff]   ;;  %10137 = vmatpush3.bf16.msra.mxu0 %v11626_v30 }
  0xef   :  { %v568_v5 = vsel %vm552_vm7, %v548_v24, %v395_v59  ;;  %10073 = vmatpush3.bf16.msra.mxu1 %v11620_v48  ;;  %v11628_v24 = vld [vmem:[%s18294_s4 + $0xf0] sm:$0xff]  }
  0xf0   :  { %10074 = vmatprep.subr.bf16.mxu1 %v11621_v11  ;;  %10138 = vmatprep.subr.bf16.mxu0 %v11628_v24 }
  0xf1   :  { %v413_v12 = vpop.permute.xlu0 %412 }
  0xf2   :  { %v587_v54 = vsel %vm571_vm8, %v568_v5, %v413_v12  ;;  %v431_v28 = vpop.permute.xlu1 %430  ;;  %v11625_v5 = vld [vmem:[%s18294_s4 + $0x10] sm:$0xff]  }
  0xf3   :  { %v606_v37 = vsel %vm590_vm9, %v587_v54, %v431_v28  ;;  %v11630_v12 = vld [vmem:[%s18294_s4 + $0xb0] sm:$0xff]   ;;  %10075 = vmatpush3.bf16.msra.mxu1 %v11622_v29  ;;  %v11627_v28 = vld [vmem:[%s18294_s4 + $0x48] sm:$0xff]  }
  0xf4   :  { %10076 = vmatprep.subr.bf16.mxu1 %v11623_v41  ;;  %10139 = vmatpush3.bf16.msra.mxu0 %v11630_v12 }
  0xf5   :  { %v458_v27 = vpop.permute.xlu0 %457 }
  0xf6   :  { %v625_v31 = vsel %vm609_vm10, %v606_v37, %v458_v27  ;;  %v476_v42 = vpop.permute.xlu1 %475  ;;  %v11632_v37 = vld [vmem:[%s18294_s4 + $0xe8] sm:$0xff]  }
  0xf7   :  { %v644_v47 = vsel %vm628_vm11, %v625_v31, %v476_v42  ;;  %v11629_v31 = vld [vmem:[%s18294_s4 + $0x8] sm:$0xff]   ;;  %v11631_v42 = vld [vmem:[%s18294_s4 + $0x40] sm:$0xff]   ;;  %10140 = vmatprep.subr.bf16.mxu0 %v11632_v37  ;;  %10077 = vmatpush3.bf16.msra.mxu1 %v11625_v5 }
  0xf8   :  { %10078 = vmatprep.subr.bf16.mxu1 %v11627_v28 }
  0xf9   :  { %v494_v61 = vpop.permute.xlu0 %493 }
  0xfa   :  { %v663_v44 = vsel %vm647_vm12, %v644_v47, %v494_v61  ;;  %v521_v52 = vpop.permute.xlu1 %520  ;;  %v11634_v47 = vld [vmem:[%s18294_s4 + $0xa8] sm:$0xff]   ;;  %v11633_v61 = vld [vmem:[%s18294_s4] sm:$0xff]  }
  0xfb   :  { %v682_v9 = vsel %vm666_vm13, %v663_v44, %v521_v52  ;;  %10141 = vmatpush3.bf16.msra.mxu0 %v11634_v47  ;;  %10079 = vmatpush3.bf16.msra.mxu1 %v11629_v31 }
  0xfc   :  { %11259 = vmatmul.mubr.msk.bf16.gmra.mxu0 %vm703_vm14, %v682_v9  ;;  %10080 = vmatprep.subr.bf16.mxu1 %v11631_v42  ;;  %v12906_v9 = vld [vmem:[%s18295_s3] ss:$0 sm:$0xff] }
  0xfd   :  { %v370_v62 = vpop.permute.xlu0 %369  ;;  %11262 = vmatprep.mubr.msk.bf16.mxu0 %vm12017_vm5, %v18311_v4 }
  0xfe   :  { %v551_v38 = vsel %vm524_vm6, %v18515_v21, %v370_v62  ;;  %v397_v2 = vpop.permute.xlu1 %396 }
  0xff   :  { %v570_v7 = vsel %vm552_vm7, %v551_v38, %v397_v2  ;;  %10081 = vmatpush3.bf16.msra.mxu1 %v11633_v61 }
 0x100   :  { %11266 = vmatprep.subr.bf16.mxu1 %v18311_v4 }
 0x101   :  { %v415_v19 = vpop.permute.xlu0 %414 }
 0x102   :  { %v589_v55 = vsel %vm571_vm8, %v570_v7, %v415_v19  ;;  %v433_v56 = vpop.permute.xlu1 %432 }
 0x103   :  { %v608_v45 = vsel %vm590_vm9, %v589_v55, %v433_v56 }
 0x105   :  { %v460_v40 = vpop.permute.xlu0 %459 }
 0x106   :  { %v627_v6 = vsel %vm609_vm10, %v608_v45, %v460_v40  ;;  %v478_v34 = vpop.permute.xlu1 %477 }
 0x107   :  { %v646_v25 = vsel %vm628_vm11, %v627_v6, %v478_v34 }
 0x109   :  { %v496_v18 = vpop.permute.xlu0 %495 }
 0x10a   :  { %v665_v36 = vsel %vm647_vm12, %v646_v25, %v496_v18  ;;  %v523_v1 = vpop.permute.xlu1 %522 }
 0x10b   :  { %v684_v32 = vsel %vm666_vm13, %v665_v36, %v523_v1 }
 0x10c   :  { %11263 = vmatmul.mubr.msk.bf16.gmra.mxu0 %vm703_vm14, %v684_v32 }
 0x116   :  { %v12912_v7 = vpop.permute.xlu0 %76 }
 0x117   :  { %18516 = vst [vmem:[#allocation4_spill] sm:$0xff] %v12912_v7  ;;  %v12923_v34 = vpop.permute.xlu1 %81 }
 0x118   :  { %18519 = vst [vmem:[#allocation7_spill] sm:$0xff] %v12923_v34 }
 0x11a   :  { %v12918_v56 = vpop.permute.xlu0 %151 }
 0x11b   :  { %18517 = vst [vmem:[#allocation5_spill] sm:$0xff] %v12918_v56  ;;  %v12930_v1 = vpop.permute.xlu1 %161 }
 0x11c   :  { %18521 = vst [vmem:[#allocation9_spill] sm:$0xff] %v12930_v1 }
 0x11f   :  { %v12943_v20 = vpop.permute.xlu1 %156 }
 0x120   :  { %18524 = vst [vmem:[#allocation12_spill] sm:$0xff] %v12943_v20 }
 0x123   :  { %v12952_v14 = vpop.permute.xlu1 %91 }
 0x124   :  { %18527 = vst [vmem:[#allocation15_spill] sm:$0xff] %v12952_v14 }
 0x14d   :  { %v12814_v23 = vpop.f32.mrf.mxu0 }
 0x14e   :  { %v764_v38 = vadd.f32 %v12906_v9, %v12814_v23 }
 0x14f   :  { %v11232_v63 = vpop.f32.mrf.mxu0 }
 0x150   :  { %v834_v2 = vmax.f32 %v764_v38, 0.0 }
 0x151   :  { %v12816_v22 = vpop.f32.mrf.mxu0 }
 0x152   :  { %v767_v19 = vadd.f32 %v12906_v9, %v12816_v22  ;;  %v12921_v40 = vmul.f32 %v834_v2, %v12912_v7  ;;  %v12937_v22 = vpop.permute.xlu0 %86 }
 0x153   :  { %v11233_v0 = vpop.f32.mrf.mxu0  ;;  %18522 = vst [vmem:[#allocation10_spill] sm:$0xff] %v12937_v22 }
 0x154   :  { %18518 = vst [vmem:[#allocation6_spill] sm:$0xff] %v12921_v40  ;;  %v835_v6 = vmax.f32 %v767_v19, 0.0  ;;  %v987_v63 = vrot.slane %v12921_v40, 6 }
 0x156   :  { %v12928_v36 = vmul.f32 %v835_v6, %v12923_v34 }
 0x158   :  { %18520 = vst [vmem:[#allocation8_spill] sm:$0xff] %v12928_v36 }
 0x15c   :  { %v12818_v3 = vpop.f32.mrf.mxu0 }
 0x15d   :  { %v772_v32 = vadd.f32 %v12906_v9, %v12818_v3 }
 0x15e   :  { %v11236_v15 = vpop.f32.mrf.mxu0 }
 0x15f   :  { %v836_v0 = vmax.f32 %v772_v32, 0.0 }
 0x160   :  { %v12820_v51 = vpop.f32.mrf.mxu0 }
 0x161   :  { %v775_v23 = vadd.f32 %v12906_v9, %v12820_v51 }
 0x162   :  { %v11237_v35 = vpop.f32.mrf.mxu0 }
 0x163   :  { %v837_v15 = vmax.f32 %v775_v23, 0.0  ;;  %v988_v35 = vrot.slane %v12928_v36, 6 }
 0x165   :  { %v12960_v11 = vmul.f32 %v837_v15, %v12952_v14  ;;  %v11636_v15 = vld [vmem:[%s18294_s4 + $0xa0] sm:$0xff]  }
 0x167   :  { %18529 = vst [vmem:[#allocation17_spill] sm:$0xff] %v12960_v11  ;;  %v990_v12 = vrot.slane %v12960_v11, 6 }
 0x16c   :  { %v12822_v10 = vpop.f32.mrf.mxu0 }
 0x16d   :  { %v780_v3 = vadd.f32 %v12906_v9, %v12822_v10 }
 0x16e   :  { %v11240_v16 = vpop.f32.mrf.mxu0 }
 0x16f   :  { %v942_v16 = vrot.slane %v12921_v40, 4  ;;  %v838_v53 = vmax.f32 %v780_v3, 0.0 }
 0x170   :  { %v12824_v58 = vpop.f32.mrf.mxu0 }
 0x172   :  { %v11241_v17 = vpop.f32.mrf.mxu0 }
 0x173   :  { %v12941_v17 = vpop.permute.xlu0 %96 }
 0x174   :  { %18523 = vst [vmem:[#allocation11_spill] sm:$0xff] %v12941_v17  ;;  %v12963_v10 = vmul.f32 %v838_v53, %v12941_v17 }
 0x176   :  { %18530 = vst [vmem:[#allocation18_spill] sm:$0xff] %v12963_v10  ;;  %v991_v28 = vrot.slane %v12963_v10, 6 }
 0x177   :  { %v12950_v51 = vpop.permute.xlu0 %106 }
 0x178   :  { %18526 = vst [vmem:[#allocation14_spill] sm:$0xff] %v12950_v51 }
 0x17b   :  { %v12957_v50 = vpop.permute.xlu0 %116 }
 0x17c   :  { %v12826_v57 = vpop.f32.mrf.mxu0  ;;  %18528 = vst [vmem:[#allocation16_spill] sm:$0xff] %v12957_v50 }
 0x17d   :  { %v788_v31 = vadd.f32 %v12906_v9, %v12826_v57 }
 0x17e   :  { %v11244_v46 = vpop.f32.mrf.mxu0 }
 0x17f   :  { %v12946_v46 = vmul.f32 %v836_v0, %v12937_v22  ;;  %v12967_v24 = vpop.permute.xlu0 %126  ;;  %v840_v19 = vmax.f32 %v788_v31, 0.0 }
 0x180   :  { %v12837_v60 = vpop.f32.mrf.mxu0  ;;  %18531 = vst [vmem:[#allocation19_spill] sm:$0xff] %v12967_v24 }
 0x181   :  { %18525 = vst [vmem:[#allocation13_spill] sm:$0xff] %v12946_v46  ;;  %v989_v49 = vrot.slane %v12946_v46, 6  ;;  %v791_v47 = vadd.f32 %v12906_v9, %v12837_v60  ;;  %v11635_v60 = vld [vmem:[%s18294_s4 + $0xe0] sm:$0xff]  }
 0x182   :  { %v11245_v39 = vpop.f32.mrf.mxu0  ;;  %10142 = vmatprep.subr.bf16.mxu0 %v11635_v60  ;;  %v11640_v60 = vld [vmem:[%s18294_s4 + $0xd0] sm:$0xff]  }
 0x183   :  { %v783_v39 = vadd.f32 %v12906_v9, %v12824_v58  ;;  %v12969_v58 = vpop.permute.xlu1 %101  ;;  %v12973_v37 = vpop.permute.xlu0 %136  ;;  %v841_v32 = vmax.f32 %v791_v47, 0.0  ;;  %10143 = vmatpush3.bf16.msra.mxu0 %v11636_v15 }
 0x184   :  { %18532 = vst [vmem:[#allocation20_spill] sm:$0xff] %v12969_v58  ;;  %18533 = vst [vmem:[#allocation21_spill] sm:$0xff] %v12973_v37 }
 0x185   :  { %v839_v29 = vmax.f32 %v783_v39, 0.0 }
 0x187   :  { %v12980_v42 = vpop.permute.xlu1 %111  ;;  %v12984_v61 = vpop.permute.xlu0 %146 }
 0x188   :  { %18535 = vst [vmem:[#allocation23_spill] sm:$0xff] %v12980_v42  ;;  %18536 = vst [vmem:[#allocation24_spill] sm:$0xff] %v12984_v61 }
 0x18b   :  { %v13001_v23 = vpop.permute.xlu1 %121 }
 0x18c   :  { %v12866_v43 = vpop.f32.mrf.mxu0  ;;  %18539 = vst [vmem:[#allocation27_spill] sm:$0xff] %v13001_v23 }
 0x18e   :  { %v11248_v59 = vpop.f32.mrf.mxu0 }
 0x18f   :  { %v13028_v31 = vpop.permute.xlu1 %131 }
 0x190   :  { %v12880_v54 = vpop.f32.mrf.mxu0  ;;  %18541 = vst [vmem:[#allocation29_spill] sm:$0xff] %v13028_v31 }
 0x192   :  { %v11249_v27 = vpop.f32.mrf.mxu0 }
 0x193   :  { %v12976_v27 = vmul.f32 %v839_v29, %v12969_v58 }
 0x195   :  { %18534 = vst [vmem:[#allocation22_spill] sm:$0xff] %v12976_v27  ;;  %v992_v57 = vrot.slane %v12976_v27, 6 }
 0x19c   :  { %v12900_v44 = vpop.f32.mrf.mxu0 }
 0x19e   :  { %v11252_v52 = vpop.f32.mrf.mxu0 }
 0x1a0   :  { %v12908_v62 = vpop.f32.mrf.mxu0 }
 0x1a1   :  { %v807_v39 = vadd.f32 %v12906_v9, %v12908_v62 }
 0x1a2   :  { %v11253_v21 = vpop.f32.mrf.mxu0 }
 0x1a3   :  { %v799_v21 = vadd.f32 %v12906_v9, %v12880_v54  ;;  %v796_v54 = vadd.f32 %v12906_v9, %v12866_v43 }
 0x1a5   :  { %v843_v3 = vmax.f32 %v799_v21, 0.0 }
 0x1ac   :  { %v12916_v55 = vpop.f32.mrf.mxu0 }
 0x1ad   :  { %v812_v47 = vadd.f32 %v12906_v9, %v12916_v55  ;;  %v13056_v55 = vmul.f32 %v841_v32, %v12980_v42 }
 0x1ae   :  { %v11256_v45 = vpop.f32.mrf.mxu0 }
 0x1af   :  { %18543 = vst [vmem:[#allocation31_spill] sm:$0xff] %v13056_v55 }
 0x1b0   :  { %v12925_v25 = vpop.f32.mrf.mxu0 }
 0x1b2   :  { %v11257_v18 = vpop.f32.mrf.mxu0 }
 0x1bc   :  { %v819_v26 = vpop.f32.mrf.mxu0 }
 0x1bd   :  { %v820_v30 = vadd.f32 %v12906_v9, %v819_v26 }
 0x1be   :  { %v11260_v13 = vpop.f32.mrf.mxu0 }
 0x1bf   :  { %v848_v59 = vmax.f32 %v820_v30, 0.0 }
 0x1c0   :  { %v822_v48 = vpop.f32.mrf.mxu0 }
 0x1c1   :  { %v823_v41 = vadd.f32 %v12906_v9, %v822_v48  ;;  %v12994_v6 = vmul.f32 %v848_v59, %v12984_v61  ;;  %v1021_v48 = vsel %vm252_vm0, %v987_v63, %v988_v35  ;;  %v842_v59 = vmax.f32 %v796_v54, 0.0 }
 0x1c2   :  { %v11261_v33 = vpop.f32.mrf.mxu0 }
 0x1c3   :  { %v849_v5 = vmax.f32 %v823_v41, 0.0  ;;  %18538 = vst [vmem:[#allocation26_spill] sm:$0xff] %v12994_v6  ;;  %v815_v33 = vadd.f32 %v12906_v9, %v12925_v25  ;;  %v11638_v41 = vld [vmem:[%s18294_s4 + $0xd8] sm:$0xff]   ;;  %v18309_v62 = vrot.slane %v12994_v6, 4  ;;  %v1019_v25 = vsel %vm252_vm0, %v989_v49, %v990_v12 }
 0x1c4   :  { %10144 = vmatprep.subr.bf16.mxu0 %v11638_v41 }
 0x1c5   :  { %v12989_v38 = vmul.f32 %v849_v5, %v12918_v56  ;;  %v804_v5 = vadd.f32 %v12906_v9, %v12900_v44 }
 0x1c7   :  { %18537 = vst [vmem:[#allocation25_spill] sm:$0xff] %v12989_v38  ;;  %v957_v53 = vrot.slane %v12989_v38, 4 }
 0x1cc   :  { %v827_v52 = vpop.f32.mrf.mxu0 }
 0x1cd   :  { %v828_v2 = vadd.f32 %v12906_v9, %v827_v52  ;;  %v11639_v52 = vld [vmem:[%s18294_s4 + $0x98] sm:$0xff]  }
 0x1ce   :  { %v11264_v45 = vpop.f32.mrf.mxu0  ;;  %10145 = vmatpush3.bf16.msra.mxu0 %v11639_v52 }
 0x1cf   :  { %v850_v18 = vmax.f32 %v828_v2, 0.0  ;;  %v13059_v45 = vmul.f32 %v843_v3, %v13001_v23  ;;  %v13073_v3 = vmul.f32 %v842_v59, %v12957_v50  ;;  %10146 = vmatprep.subr.bf16.mxu0 %v11640_v60 }
 0x1d0   :  { %v830_v0 = vpop.f32.mrf.mxu0 }
 0x1d1   :  { %v13007_v26 = vmul.f32 %v850_v18, %v12943_v20  ;;  %v831_v13 = vadd.f32 %v12906_v9, %v830_v0  ;;  %v13053_v9 = vsel %vm206_vm2, %v18309_v62, %v957_v53  ;;  %18544 = vst [vmem:[#allocation32_spill] sm:$0xff] %v13059_v45  ;;  %v845_v18 = vmax.f32 %v807_v39, 0.0  ;;  %18546 = vst [vmem:[#allocation34_spill] sm:$0xff] %v13073_v3 }
 0x1d2   :  { %v11265_v43 = vpop.f32.mrf.mxu0  ;;  %v847_v0 = vmax.f32 %v815_v33, 0.0  ;;  %v844_v39 = vmax.f32 %v804_v5, 0.0  ;;  %v1017_v33 = vsel %vm252_vm0, %v991_v28, %v992_v57  ;;  %v11641_v5 = vld [vmem:[%s18294_s4 + $0x90] sm:$0xff]   ;;  %v996_v62 = vrot.slane %v13059_v45, 6 }
 0x1d3   :  { %18540 = vst [vmem:[#allocation28_spill] sm:$0xff] %v13007_v26  ;;  %v851_v29 = vmax.f32 %v831_v13, 0.0  ;;  %v958_v30 = vrot.slane %v13007_v26, 4  ;;  %v1003_v44 = vrot.slane %v13007_v26, 6  ;;  %v1002_v13 = vrot.slane %v12989_v38, 6  ;;  %v13075_v43 = vpop.permute.xlu1 %141  ;;  %10147 = vmatpush3.bf16.msra.mxu0 %v11641_v5 }
 0x1d4   :  { %18547 = vst [vmem:[#allocation35_spill] sm:$0xff] %v13075_v43 }
 0x1d5   :  { %v13042_v21 = vmul.f32 %v851_v29, %v12930_v1  ;;  %v13047_v2 = vsel %vm206_vm2, %v957_v53, %v958_v30  ;;  %v13070_v53 = vmul.f32 %v840_v19, %v12950_v51  ;;  %v846_v29 = vmax.f32 %v812_v47, 0.0 }
 0x1d6   :  { %v1006_v59 = vsel %vm252_vm0, %v1002_v13, %v1003_v44  ;;  %v994_v47 = vrot.slane %v13056_v55, 6 }
 0x1d7   :  { %18542 = vst [vmem:[#allocation30_spill] sm:$0xff] %v13042_v21  ;;  %v1004_v15 = vrot.slane %v13042_v21, 6  ;;  %v959_v32 = vrot.slane %v13042_v21, 4  ;;  %18545 = vst [vmem:[#allocation33_spill] sm:$0xff] %v13070_v53 }
 0x1d9   :  { %v1022_v19 = vsel %vm252_vm0, %v1004_v15, %v987_v63  ;;  %v1005_v41 = vsel %vm252_vm0, %v1003_v44, %v1004_v15  ;;  %v13099_v54 = vsel %vm206_vm2, %v958_v30, %v959_v32  ;;  %v11642_v63 = vld [vmem:[%s18294_s4 + $0xc8] sm:$0xff]   ;;  %v13105_v15 = vmul.f32 %v845_v18, %v13028_v31 }
 0x1da   :  { %v1024_v52 = vpack.c.bf16 %v1021_v48, %v1022_v19  ;;  %v1023_v60 = vpack.c.bf16 %v1005_v41, %v1006_v59  ;;  %v13108_v44 = vmul.f32 %v847_v0, %v13075_v43  ;;  %v13115_v48 = vsel %vm206_vm2, %v959_v32, %v942_v16  ;;  %v11643_v30 = vld [vmem:[%s18294_s4 + $0x88] sm:$0xff]   ;;  %10148 = vmatprep.subr.bf16.mxu0 %v11642_v63 }
 0x1db   :  { %18548 = vst [vmem:[#allocation36_spill] sm:$0xff] %v13105_v15  ;;  %v1020_v18 = vsel %vm252_vm0, %v988_v35, %v989_v49  ;;  %v1018_v0 = vsel %vm252_vm0, %v990_v12, %v991_v28  ;;  %v13137_v19 = vmul.f32 %v844_v39, %v12967_v24  ;;  %v13140_v41 = vmul.f32 %v846_v29, %v12973_v37  ;;  %v11644_v12 = vld [vmem:[%s18294_s4 + $0xc0] sm:$0xff]   ;;  %v11663_v37 = vld [vmem:[%s18296_s7 + $0xf8] sm:$0xff]  }
 0x1dc   :  { %18549 = vst [vmem:[#allocation37_spill] sm:$0xff] %v13108_v44  ;;  %1106 = vrot.lane.b32.xlu1 %v1024_v52, %s12019_s30  ;;  %1104 = vrot.lane.b32.xlu0 %v1023_v60, %s12019_s30  ;;  %v993_v59 = vrot.slane %v13070_v53, 6  ;;  %v995_v35 = vrot.slane %v13073_v3, 6  ;;  %v1025_v49 = vpack.c.bf16 %v1019_v25, %v1020_v18  ;;  %v1026_v5 = vpack.c.bf16 %v1017_v33, %v1018_v0 }
 0x1dd   :  { %18550 = vst [vmem:[#allocation38_spill] sm:$0xff] %v13137_v19  ;;  %18551 = vst [vmem:[#allocation39_spill] sm:$0xff] %v13140_v41  ;;  %v998_v29 = vrot.slane %v13105_v15, 6  ;;  %v1000_v52 = vrot.slane %v13108_v44, 6  ;;  %10149 = vmatpush3.bf16.msra.mxu0 %v11643_v30  ;;  %v997_v60 = vrot.slane %v13137_v19, 6  ;;  %v999_v63 = vrot.slane %v13140_v41, 6 }
 0x1de   :  { %v1015_v28 = vsel %vm252_vm0, %v993_v59, %v994_v47  ;;  %v1013_v39 = vsel %vm252_vm0, %v995_v35, %v996_v62  ;;  %v1016_v25 = vsel %vm252_vm0, %v992_v57, %v993_v59  ;;  %v1014_v33 = vsel %vm252_vm0, %v994_v47, %v995_v35  ;;  %10150 = vmatprep.subr.bf16.mxu0 %v11644_v12  ;;  %v11645_v30 = vld [vmem:[%s18294_s4 + $0x80] sm:$0xff]  }
 0x1df   :  { %v1027_v18 = vpack.c.bf16 %v1015_v28, %v1016_v25  ;;  %v1028_v0 = vpack.c.bf16 %v1013_v39, %v1014_v33  ;;  %v1009_v57 = vsel %vm252_vm0, %v999_v63, %v1000_v52  ;;  %v1045_v59 = vrot.slane %v12963_v10, 2 }
 0x1e0   :  { %1108 = vrot.lane.b32.xlu1 %v1025_v49, %s12019_s30  ;;  %1110 = vrot.lane.b32.xlu0 %v1026_v5, %s12019_s30  ;;  %v1011_v49 = vsel %vm252_vm0, %v997_v60, %v998_v29  ;;  %v1012_v47 = vsel %vm252_vm0, %v996_v62, %v997_v60  ;;  %v1010_v35 = vsel %vm252_vm0, %v998_v29, %v999_v63  ;;  %v1001_v5 = vrot.slane %v12994_v6, 6 }
 0x1e1   :  { %10151 = vmatpush3.bf16.msra.mxu0 %v11645_v30  ;;  %v1044_v12 = vrot.slane %v12960_v11, 2  ;;  %v1029_v28 = vpack.c.bf16 %v1011_v49, %v1012_v47  ;;  %v1030_v39 = vpack.c.bf16 %v1009_v57, %v1010_v35  ;;  %v1043_v33 = vrot.slane %v12946_v46, 2 }
 0x1e2   :  { %v1007_v25 = vsel %vm252_vm0, %v1001_v5, %v1002_v13  ;;  %v1047_v62 = vrot.slane %v13070_v53, 2  ;;  %v1008_v29 = vsel %vm252_vm0, %v1000_v52, %v1001_v5  ;;  %v1042_v63 = vrot.slane %v12928_v36, 2 }
 0x1e3   :  { %v1072_v30 = vsel %vm307_vm1, %v1044_v12, %v1045_v59  ;;  %v1073_v60 = vsel %vm307_vm1, %v1043_v33, %v1044_v12  ;;  %v1046_v13 = vrot.slane %v12976_v27, 2  ;;  %v1041_v49 = vrot.slane %v12921_v40, 2 }
 0x1e4   :  { %1112 = vrot.lane.b32.xlu1 %v1027_v18, %s12019_s30  ;;  %1114 = vrot.lane.b32.xlu0 %v1028_v0, %s12019_s30  ;;  %v1031_v18 = vpack.c.bf16 %v1007_v25, %v1008_v29  ;;  %v1078_v0 = vpack.c.bf16 %v1072_v30, %v1073_v60  ;;  %v1074_v57 = vsel %vm307_vm1, %v1042_v63, %v1043_v33  ;;  %v1049_v35 = vrot.slane %v13073_v3, 2 }
 0x1e5   :  { %v1070_v47 = vsel %vm307_vm1, %v1046_v13, %v1047_v62  ;;  %v1051_v52 = vrot.slane %v13137_v19, 2  ;;  %v1075_v5 = vsel %vm307_vm1, %v1041_v49, %v1042_v63  ;;  %v1071_v12 = vsel %vm307_vm1, %v1045_v59, %v1046_v13 }
 0x1e6   :  { %v1077_v25 = vpack.c.bf16 %v1074_v57, %v1075_v5  ;;  %v1079_v33 = vpack.c.bf16 %v1070_v47, %v1071_v12  ;;  %v1053_v60 = vrot.slane %v13140_v41, 2  ;;  %v1052_v13 = vrot.slane %v13105_v15, 2 }
 0x1e7   :  { %v1035_v32 = vpack.c.bf16 %v12976_v27, %v12963_v10 }
 0x1e8   :  { %1116 = vrot.lane.b32.xlu1 %v1029_v28, %s12019_s30  ;;  %1118 = vrot.lane.b32.xlu0 %v1030_v39, %s12019_s30  ;;  %v1048_v28 = vrot.slane %v13056_v55, 2  ;;  %v1050_v39 = vrot.slane %v13059_v45, 2  ;;  %v1064_v5 = vsel %vm307_vm1, %v1052_v13, %v1053_v60 }
 0x1ea   :  { %v1068_v30 = vsel %vm307_vm1, %v1048_v28, %v1049_v35  ;;  %v1066_v29 = vsel %vm307_vm1, %v1050_v39, %v1051_v52  ;;  %v1069_v59 = vsel %vm307_vm1, %v1047_v62, %v1048_v28  ;;  %v1067_v63 = vsel %vm307_vm1, %v1049_v35, %v1050_v39 }
 0x1eb   :  { %v1080_v57 = vpack.c.bf16 %v1068_v30, %v1069_v59  ;;  %v1081_v47 = vpack.c.bf16 %v1066_v29, %v1067_v63  ;;  %v1065_v62 = vsel %vm307_vm1, %v1051_v52, %v1052_v13  ;;  %v1056_v28 = vrot.slane %v12989_v38, 2 }
 0x1ec   :  { %1120 = vrot.lane.b32.xlu1 %v1031_v18, %s12019_s30  ;;  %1133 = vrot.lane.b32.xlu0 %v1078_v0, %s12019_s30  ;;  %v1055_v18 = vrot.slane %v12994_v6, 2  ;;  %v1054_v0 = vrot.slane %v13108_v44, 2  ;;  %v1082_v39 = vpack.c.bf16 %v1064_v5, %v1065_v62 }
 0x1ee   :  { %v1062_v12 = vsel %vm307_vm1, %v1054_v0, %v1055_v18  ;;  %v1063_v35 = vsel %vm307_vm1, %v1053_v60, %v1054_v0  ;;  %v1061_v52 = vsel %vm307_vm1, %v1055_v18, %v1056_v28  ;;  %v13251_v0 = vpack.c.bf16 %v13042_v21, %v13007_v26  ;;  %v11637_v18 = vld [vmem:[%s18294_s4 + $0x118] sm:$0xff]  }
 0x1ef   :  { %v1083_v30 = vpack.c.bf16 %v1062_v12, %v1063_v35 }
 0x1f0   :  { %1131 = vrot.lane.b32.xlu1 %v1077_v25, %s12019_s30  ;;  %1135 = vrot.lane.b32.xlu0 %v1079_v33, %s12019_s30  ;;  %v1057_v25 = vrot.slane %v13007_v26, 2  ;;  %v1058_v33 = vrot.slane %v13042_v21, 2  ;;  %v947_v21 = vrot.slane %v12976_v27, 4  ;;  %v11649_v27 = vld [vmem:[%s18296_s7 + $0x78] sm:$0xff]  }
 0x1f1   :  { %10219 = vmatprep.subr.bf16.mxu0 %v11649_v27 }
 0x1f2   :  { %v1060_v29 = vsel %vm307_vm1, %v1056_v28, %v1057_v25  ;;  %v1059_v59 = vsel %vm307_vm1, %v1057_v25, %v1058_v33  ;;  %v1076_v63 = vsel %vm307_vm1, %v1058_v33, %v1041_v49  ;;  %v978_v49 = vpack.c.bf16 %v13099_v54, %v13047_v2  ;;  %v11646_v28 = vld [vmem:[%s18294_s4 + $0x110] sm:$0xff]  }
 0x1f3   :  { %v1084_v60 = vpack.c.bf16 %v1060_v29, %v1061_v52  ;;  %v1085_v13 = vpack.c.bf16 %v1076_v63, %v1059_v59  ;;  %v1033_v25 = vpack.c.bf16 %v12928_v36, %v12921_v40  ;;  %v943_v33 = vrot.slane %v12928_v36, 4  ;;  %v11647_v52 = vld [vmem:[%s18294_s4 + $0x108] sm:$0xff]  }
 0x1f4   :  { %1137 = vrot.lane.b32.xlu1 %v1080_v57, %s12019_s30  ;;  %1139 = vrot.lane.b32.xlu0 %v1081_v47, %s12019_s30 }
 0x1f8   :  { %1141 = vrot.lane.b32.xlu1 %v1082_v39, %s12019_s30  ;;  %1143 = vrot.lane.b32.xlu0 %v1083_v30, %s12019_s30  ;;  %v13276_v30 = vsel %vm206_vm2, %v942_v16, %v943_v33 }
 0x1f9   :  { %v979_v63 = vpack.c.bf16 %v13276_v30, %v13115_v48 }
 0x1fc   :  { %1145 = vrot.lane.b32.xlu1 %v1084_v60, %s12019_s30  ;;  %1147 = vrot.lane.b32.xlu0 %v1085_v13, %s12019_s30  ;;  %v1034_v60 = vpack.c.bf16 %v12960_v11, %v12946_v46  ;;  %v945_v13 = vrot.slane %v12960_v11, 4 }
 0x24e   :  { %v1107_v57 = vpop.permute.xlu1 %1106  ;;  %v13255_v47 = vpop.permute.xlu0 %1104 }
 0x24f   :  { %v1187_v5 = vsel %vm1149_vm15, %v13251_v0, %v1107_v57  ;;  %v1152_v12 = vsel %vm1149_vm15, %v978_v49, %v13255_v47  ;;  %v1156_v16 = vsel %vm1149_vm15, %v979_v63, %v1107_v57 }
 0x250   :  { %1515 = vmatprep.mubr.bf16.mxu1 %v1187_v5 }
 0x251   :  { %1516 = vmatmul.mubr.bf16.vlgmr.msra.gmra.mxu1 %v1152_v12 }
 0x252   :  { %11267 = vmatpush3.bf16.msra.mxu1 %v11637_v18  ;;  %v1109_v62 = vpop.permute.xlu1 %1108  ;;  %v1111_v35 = vpop.permute.xlu0 %1110  ;;  %v944_v18 = vrot.slane %v12946_v46, 4  ;;  %v11653_v46 = vld [vmem:[%s18296_s7 + $0x68] sm:$0xff]  }
 0x253   :  { %v1190_v39 = vsel %vm1149_vm15, %v1033_v25, %v1109_v62  ;;  %11268 = vmatprep.subr.bf16.mxu1 %v18311_v4  ;;  %v1193_v49 = vsel %vm1149_vm15, %v1034_v60, %v1111_v35 }
 0x254   :  { %1523 = vmatprep.mubr.bf16.mxu1 %v1190_v39  ;;  %v13301_v39 = vsel %vm206_vm2, %v944_v18, %v945_v13  ;;  %v13306_v57 = vsel %vm206_vm2, %v943_v33, %v944_v18  ;;  %v946_v18 = vrot.slane %v12963_v10, 4  ;;  %v11652_v10 = vld [vmem:[%s18296_s7 + $0x30] sm:$0xff]  }
 0x256   :  { %v1113_v29 = vpop.permute.xlu1 %1112  ;;  %v13278_v59 = vpop.permute.xlu0 %1114  ;;  %11269 = vmatpush3.bf16.msra.mxu1 %v11646_v28  ;;  %v11648_v28 = vld [vmem:[%s18294_s4 + $0x100] sm:$0xff]  }
 0x257   :  { %11270 = vmatprep.subr.bf16.mxu1 %v18311_v4  ;;  %v1196_v33 = vsel %vm1149_vm15, %v1035_v32, %v1113_v29 }
 0x259   :  { %1524 = vmatmul.mubr.bf16.gmra.mxu1 %v1156_v16 }
 0x25a   :  { %v13292_v5 = vpop.permute.xlu1 %1116  ;;  %v13294_v12 = vpop.permute.xlu0 %1118  ;;  %1531 = vmatprep.mubr.bf16.mxu1 %v1193_v49  ;;  %11271 = vmatpush3.bf16.msra.mxu1 %v11647_v52  ;;  %v980_v52 = vpack.c.bf16 %v13301_v39, %v13306_v57 }
 0x25b   :  { %11272 = vmatprep.subr.bf16.mxu1 %v18311_v4 }
 0x25c   :  { %v1160_v4 = vsel %vm1149_vm15, %v980_v52, %v1109_v62 }
 0x25e   :  { %v13308_v63 = vpop.permute.xlu1 %1120  ;;  %v1134_v16 = vpop.permute.xlu0 %1133  ;;  %11273 = vmatpush3.bf16.msra.mxu1 %v11648_v28 }
 0x25f   :  { %v1217_v49 = vsel %vm1149_vm15, %v1034_v60, %v1134_v16  ;;  %v13325_v16 = vsel %vm206_vm2, %v946_v18, %v947_v21  ;;  %10289 = vmatprep.subr.bf16.mxu1 %v11663_v37  ;;  %v11667_v37 = vld [vmem:[%s18296_s7 + $0xf0] sm:$0xff]  }
 0x260   :  { %1620 = vmatprep.mubr.bf16.mxu0 %v1217_v49 }
 0x261   :  { %1532 = vmatmul.mubr.bf16.gmra.mxu1 %v1160_v4  ;;  %v13330_v4 = vsel %vm206_vm2, %v945_v13, %v946_v18 }
 0x262   :  { %v1132_v26 = vpop.permute.xlu1 %1131  ;;  %v1136_v11 = vpop.permute.xlu0 %1135  ;;  %1539 = vmatprep.mubr.bf16.mxu1 %v1196_v33  ;;  %v981_v62 = vpack.c.bf16 %v13325_v16, %v13330_v4  ;;  %v948_v33 = vrot.slane %v13070_v53, 4 }
 0x263   :  { %v13320_v28 = vsel %vm1149_vm15, %v1033_v25, %v1132_v26  ;;  %v1220_v60 = vsel %vm1149_vm15, %v1035_v32, %v1136_v11  ;;  %v1036_v26 = vpack.c.bf16 %v13056_v55, %v13070_v53  ;;  %v949_v25 = vrot.slane %v13056_v55, 4 }
 0x264   :  { %1621 = vmatmul.mubr.bf16.vlgmr.msra.gmra.mxu0 %v13320_v28  ;;  %v1164_v11 = vsel %vm1149_vm15, %v981_v62, %v1111_v35  ;;  %v13348_v55 = vsel %vm206_vm2, %v947_v21, %v948_v33  ;;  %v1037_v62 = vpack.c.bf16 %v13059_v45, %v13073_v3 }
 0x265   :  { %1628 = vmatprep.mubr.bf16.mxu0 %v1220_v60  ;;  %v1199_v52 = vsel %vm1149_vm15, %v1036_v26, %v13278_v59  ;;  %v13343_v13 = vsel %vm206_vm2, %v948_v33, %v949_v25 }
 0x266   :  { %v1138_v32 = vpop.permute.xlu1 %1137  ;;  %v982_v35 = vpack.c.bf16 %v13343_v13, %v13348_v55  ;;  %v1140_v53 = vpop.permute.xlu0 %1139 }
 0x267   :  { %v1223_v18 = vsel %vm1149_vm15, %v1036_v26, %v1138_v32  ;;  %v950_v26 = vrot.slane %v13073_v3, 4  ;;  %v1226_v32 = vsel %vm1149_vm15, %v1037_v62, %v1140_v53  ;;  %v952_v53 = vrot.slane %v13137_v19, 4 }
 0x269   :  { %1540 = vmatmul.mubr.bf16.gmra.mxu1 %v1164_v11  ;;  %v951_v11 = vrot.slane %v13059_v45, 4  ;;  %v969_v33 = vsel %vm206_vm2, %v949_v25, %v950_v26 }
 0x26a   :  { %1547 = vmatprep.mubr.bf16.mxu1 %v1199_v52  ;;  %v1168_v52 = vsel %vm1149_vm15, %v982_v35, %v1113_v29  ;;  %v1038_v35 = vpack.c.bf16 %v13105_v15, %v13137_v19  ;;  %v1142_v3 = vpop.permute.xlu1 %1141 }
 0x26b   :  { %v13361_v21 = vsel %vm206_vm2, %v950_v26, %v951_v11  ;;  %v967_v26 = vsel %vm206_vm2, %v951_v11, %v952_v53 }
 0x26c   :  { %1629 = vmatmul.mubr.bf16.gmra.mxu0 %v1217_v49  ;;  %v1202_v49 = vsel %vm1149_vm15, %v1037_v62, %v13292_v5  ;;  %v983_v29 = vpack.c.bf16 %v13361_v21, %v969_v33  ;;  %v1229_v62 = vsel %vm1149_vm15, %v1038_v35, %v1142_v3  ;;  %v954_v3 = vrot.slane %v13140_v41, 4 }
 0x26d   :  { %1636 = vmatprep.mubr.bf16.mxu0 %v1223_v18 }
 0x271   :  { %1548 = vmatmul.mubr.bf16.gmra.mxu1 %v1168_v52  ;;  %v953_v52 = vrot.slane %v13105_v15, 4 }
 0x272   :  { %1555 = vmatprep.mubr.bf16.mxu1 %v1202_v49  ;;  %v1172_v49 = vsel %vm1149_vm15, %v983_v29, %v13278_v59  ;;  %v1039_v59 = vpack.c.bf16 %v13108_v44, %v13140_v41  ;;  %v955_v29 = vrot.slane %v13108_v44, 4 }
 0x273   :  { %v966_v25 = vsel %vm206_vm2, %v952_v53, %v953_v52  ;;  %v965_v53 = vsel %vm206_vm2, %v953_v52, %v954_v3 }
 0x274   :  { %1637 = vmatmul.mubr.bf16.gmra.mxu0 %v1220_v60  ;;  %v1205_v60 = vsel %vm1149_vm15, %v1038_v35, %v13294_v12  ;;  %v984_v15 = vpack.c.bf16 %v966_v25, %v967_v26  ;;  %v964_v11 = vsel %vm206_vm2, %v954_v3, %v955_v29  ;;  %v18553_v3 = vmov 0.0  }
 0x275   :  { %1644 = vmatprep.mubr.bf16.mxu0 %v1226_v32  ;;  %v985_v19 = vpack.c.bf16 %v964_v11, %v965_v53 }
 0x279   :  { %1556 = vmatmul.mubr.bf16.gmra.mxu1 %v1172_v49  ;;  %v1176_v49 = vsel %vm1149_vm15, %v984_v15, %v13292_v5  ;;  %v1040_v15 = vpack.c.bf16 %v12989_v38, %v12994_v6  ;;  %v1180_v5 = vsel %vm1149_vm15, %v985_v19, %v13294_v12 }
 0x27a   :  { %1563 = vmatprep.mubr.bf16.mxu1 %v1205_v60  ;;  %v1144_v60 = vpop.permute.xlu0 %1143 }
 0x27b   :  { %v1232_v35 = vsel %vm1149_vm15, %v1039_v59, %v1144_v60 }
 0x27c   :  { %1645 = vmatmul.mubr.bf16.gmra.mxu0 %v1223_v18  ;;  %v1208_v18 = vsel %vm1149_vm15, %v1039_v59, %v13308_v63  ;;  %v18552_v59 = vrot.slane %v12994_v6, 4 }
 0x27d   :  { %1652 = vmatprep.mubr.bf16.mxu0 %v1229_v62 }
 0x27e   :  { %v963_v52 = vsel %vm206_vm2, %v955_v29, %v18552_v59  ;;  %v1148_v12 = vpop.permute.xlu0 %1147 }
 0x27f   :  { %v986_v60 = vpack.c.bf16 %v13053_v9, %v963_v52 }
 0x281   :  { %1564 = vmatmul.mubr.bf16.gmra.mxu1 %v1176_v49  ;;  %v1146_v49 = vpop.permute.xlu1 %1145  ;;  %v1184_v19 = vsel %vm1149_vm15, %v986_v60, %v13308_v63  ;;  %v1087_v63 = vpack.c.bf16 %v13348_v55, %v13325_v16  ;;  %v1090_v55 = vpack.c.bf16 %v965_v53, %v966_v25  ;;  %v18554_v16 = vpack.c.bf16 %v13047_v2, %v13053_v9 }
 0x282   :  { %1571 = vmatprep.mubr.bf16.mxu1 %v1208_v18  ;;  %v1211_v18 = vsel %vm1149_vm15, %v1040_v15, %v13255_v47  ;;  %v1238_v47 = vsel %vm1149_vm15, %v13251_v0, %v1148_v12  ;;  %v1088_v0 = vpack.c.bf16 %v969_v33, %v13343_v13  ;;  %v1094_v13 = vpack.c.bf16 %v13306_v57, %v13276_v30 }
 0x284   :  { %1653 = vmatmul.mubr.bf16.gmra.mxu0 %v1226_v32  ;;  %v1235_v32 = vsel %vm1149_vm15, %v1040_v15, %v1146_v49 }
 0x285   :  { %1660 = vmatprep.mubr.bf16.mxu0 %v1232_v35 }
 0x289   :  { %1572 = vmatmul.mubr.bf16.gmra.mxu1 %v1180_v5 }
 0x28a   :  { %1579 = vmatprep.mubr.bf16.mxu1 %v1211_v18 }
 0x28c   :  { %1661 = vmatmul.mubr.bf16.gmra.mxu0 %v1229_v62  ;;  %v1086_v62 = vpack.c.bf16 %v13330_v4, %v13301_v39  ;;  %v1089_v39 = vpack.c.bf16 %v967_v26, %v13361_v21  ;;  %v18555_v4 = vpack.c.bf16 %v13115_v48, %v13099_v54 }
 0x28d   :  { %1668 = vmatprep.mubr.bf16.mxu0 %v1235_v32 }
 0x291   :  { %1580 = vmatmul.mubr.bf16.gmra.mxu1 %v1184_v19 }
 0x292   :  { %11274 = vmatprep.mubr.msk.bf16.mxu1 %vm12017_vm5, %v18553_v3 }
 0x294   :  { %1669 = vmatmul.mubr.bf16.gmra.mxu0 %v1232_v35 }
 0x295   :  { %1676 = vmatprep.mubr.bf16.mxu0 %v1238_v47 }
 0x299   :  { %11275 = vmatmul.mubr.msk.bf16.vlgmr.msra.gmra.mxu1 %vm1149_vm15, %v1086_v62 }
 0x29a   :  { %11278 = vmatprep.mubr.msk.bf16.mxu1 %vm12017_vm5, %v18553_v3 }
 0x29c   :  { %1677 = vmatmul.mubr.bf16.gmra.mxu0 %v1235_v32 }
 0x29d   :  { %1684 = vmatprep.mubr.bf16.mxu0 %v13320_v28  ;;  %v1091_v28 = vpack.c.bf16 %v963_v52, %v964_v11 }
 0x2a1   :  { %11279 = vmatmul.mubr.msk.bf16.gmra.mxu1 %vm1149_vm15, %v1087_v63 }
 0x2a2   :  { %11282 = vmatprep.mubr.msk.bf16.mxu1 %vm12017_vm5, %v18553_v3 }
 0x2a4   :  { %1685 = vmatmul.mubr.bf16.gmra.mxu0 %v1238_v47 }
 0x2a9   :  { %11283 = vmatmul.mubr.msk.bf16.gmra.mxu1 %vm1149_vm15, %v1088_v0 }
 0x2aa   :  { %11286 = vmatprep.mubr.msk.bf16.mxu1 %vm12017_vm5, %v18553_v3 }
 0x2b1   :  { %11287 = vmatmul.mubr.msk.bf16.gmra.mxu1 %vm1149_vm15, %v1089_v39 }
 0x2b2   :  { %11290 = vmatprep.mubr.msk.bf16.mxu1 %vm12017_vm5, %v18553_v3 }
 0x2b9   :  { %11291 = vmatmul.mubr.msk.bf16.gmra.mxu1 %vm1149_vm15, %v1090_v55 }
 0x2ba   :  { %11294 = vmatprep.mubr.msk.bf16.mxu1 %vm12017_vm5, %v18553_v3 }
 0x2c1   :  { %11295 = vmatmul.mubr.msk.bf16.gmra.mxu1 %vm1149_vm15, %v1091_v28 }
 0x2c2   :  { %11298 = vmatprep.mubr.msk.bf16.mxu1 %vm12017_vm5, %v18553_v3 }
 0x2c9   :  { %11299 = vmatmul.mubr.msk.bf16.gmra.mxu1 %vm1149_vm15, %v18554_v16 }
 0x2ca   :  { %11302 = vmatprep.mubr.msk.bf16.mxu1 %vm12017_vm5, %v18553_v3 }
 0x2d1   :  { %11303 = vmatmul.mubr.msk.bf16.gmra.mxu1 %vm1149_vm15, %v18555_v4 }
 0x2d2   :  { %11306 = vmatprep.mubr.msk.bf16.mxu1 %vm12017_vm5, %v18553_v3 }
 0x2d9   :  { %11307 = vmatmul.mubr.msk.bf16.gmra.mxu1 %vm1149_vm15, %v1094_v13 }
 0x311   :  { %v10082_v21 = vpop.f32.mrf.mxu1 }
 0x313   :  { %v10083_v2 = vpop.f32.mrf.mxu1 }
 0x314   :  { %v10084_v9 = vadd.f32 %v10083_v2, %v10082_v21 }
 0x315   :  { %v10085_v33 = vpop.f32.mrf.mxu1 }
 0x317   :  { %v10086_v25 = vpop.f32.mrf.mxu1 }
 0x318   :  { %v10087_v19 = vadd.f32 %v10086_v25, %v10085_v33 }
 0x319   :  { %v10088_v26 = vpop.f32.mrf.mxu1 }
 0x31b   :  { %v10089_v29 = vpop.f32.mrf.mxu1 }
 0x31c   :  { %v10090_v11 = vadd.f32 %v10089_v29, %v10088_v26 }
 0x31d   :  { %v13451_v35 = vpop.f32.mrf.mxu1 }
 0x31f   :  { %v13453_v54 = vpop.f32.mrf.mxu1 }
 0x321   :  { %v10094_v48 = vpop.f32.mrf.mxu1 }
 0x323   :  { %v10095_v53 = vpop.f32.mrf.mxu1 }
 0x324   :  { %v13455_v15 = vadd.f32 %v10095_v53, %v10094_v48  ;;  %v10152_v5 = vpop.f32.mrf.mxu0 }
 0x325   :  { %v13457_v30 = vpop.f32.mrf.mxu1 }
 0x326   :  { %v10153_v57 = vpop.f32.mrf.mxu0 }
 0x327   :  { %v10154_v49 = vadd.f32 %v10153_v57, %v10152_v5  ;;  %v13459_v18 = vpop.f32.mrf.mxu1 }
 0x328   :  { %v10155_v32 = vpop.f32.mrf.mxu0 }
 0x329   :  { %v10100_v59 = vpop.f32.mrf.mxu1  ;;  %v13461_v52 = vadd.f32 %v10154_v49, %v10084_v9 }
 0x32a   :  { %v10156_v60 = vpop.f32.mrf.mxu0 }
 0x32b   :  { %v10157_v12 = vadd.f32 %v10156_v60, %v10155_v32  ;;  %v10101_v47 = vpop.f32.mrf.mxu1 }
 0x32c   :  { %v13463_v62 = vadd.f32 %v10101_v47, %v10100_v59  ;;  %v10158_v63 = vpop.f32.mrf.mxu0 }
 0x32d   :  { %v13465_v0 = vpop.f32.mrf.mxu1  ;;  %v13467_v39 = vadd.f32 %v10157_v12, %v10087_v19 }
 0x32e   :  { %v10159_v55 = vpop.f32.mrf.mxu0 }
 0x32f   :  { %v10160_v28 = vadd.f32 %v10159_v55, %v10158_v63  ;;  %v13469_v16 = vpop.f32.mrf.mxu1 }
 0x330   :  { %v13471_v4 = vpop.f32.mrf.mxu0 }
 0x331   :  { %v10106_v13 = vpop.f32.mrf.mxu1  ;;  %v13473_v21 = vadd.f32 %v10160_v28, %v10090_v11 }
 0x332   :  { %v13475_v2 = vpop.f32.mrf.mxu0 }
 0x333   :  { %v10107_v9 = vpop.f32.mrf.mxu1 }
 0x334   :  { %v13477_v33 = vadd.f32 %v10107_v9, %v10106_v13  ;;  %v13479_v25 = vpop.f32.mrf.mxu0 }
 0x335   :  { %v13481_v26 = vpop.f32.mrf.mxu1 }
 0x336   :  { %v13483_v29 = vpop.f32.mrf.mxu0 }
 0x337   :  { %v13485_v48 = vpop.f32.mrf.mxu1 }
 0x338   :  { %v13487_v53 = vpop.f32.mrf.mxu0 }
 0x339   :  { %v10112_v5 = vpop.f32.mrf.mxu1 }
 0x33a   :  { %v13489_v57 = vpop.f32.mrf.mxu0 }
 0x33b   :  { %v10113_v11 = vpop.f32.mrf.mxu1 }
 0x33c   :  { %v13491_v49 = vadd.f32 %v10113_v11, %v10112_v5  ;;  %v13493_v32 = vpop.f32.mrf.mxu0 }
 0x33d   :  { %v13495_v59 = vpop.f32.mrf.mxu1 }
 0x33e   :  { %v13497_v60 = vpop.f32.mrf.mxu0 }
 0x33f   :  { %v13499_v19 = vpop.f32.mrf.mxu1 }
 0x340   :  { %v13501_v12 = vpop.f32.mrf.mxu0 }
 0x341   :  { %v10118_v47 = vpop.f32.mrf.mxu1 }
 0x342   :  { %v13503_v55 = vpop.f32.mrf.mxu0 }
 0x343   :  { %v10119_v63 = vpop.f32.mrf.mxu1 }
 0x344   :  { %v13505_v28 = vadd.f32 %v10119_v63, %v10118_v47  ;;  %v13511_v5 = vpop.f32.mrf.mxu0  ;;  %v11650_v63 = vld [vmem:[%s18296_s7 + $0x38] sm:$0xff]  }
 0x345   :  { %v13507_v13 = vpop.f32.mrf.mxu1  ;;  %10220 = vmatpush3.bf16.msra.mxu0 %v11650_v63  ;;  %v11654_v63 = vld [vmem:[%s18296_s7 + $0x28] sm:$0xff]  }
 0x346   :  { %v13513_v44 = vpop.f32.mrf.mxu0 }
 0x347   :  { %v13509_v9 = vpop.f32.mrf.mxu1 }
 0x348   :  { %v13527_v6 = vpop.f32.mrf.mxu0 }
 0x349   :  { %v10124_v11 = vpop.f32.mrf.mxu1 }
 0x34a   :  { %v13538_v40 = vpop.f32.mrf.mxu0 }
 0x34b   :  { %v10125_v41 = vpop.f32.mrf.mxu1 }
 0x34c   :  { %v13515_v45 = vadd.f32 %v10125_v41, %v10124_v11  ;;  %v11651_v41 = vld [vmem:[%s18296_s7 + $0x70] sm:$0xff]   ;;  %v13552_v56 = vpop.f32.mrf.mxu0 }
 0x34d   :  { %v13517_v38 = vpop.f32.mrf.mxu1  ;;  %10221 = vmatprep.subr.bf16.mxu0 %v11651_v41  ;;  %v11655_v41 = vld [vmem:[%s18296_s7 + $0x60] sm:$0xff]  }
 0x34e   :  { %18556 = vst [vmem:[#allocation40_spill] sm:$0xff] %v13515_v45  ;;  %10222 = vmatpush3.bf16.msra.mxu0 %v11652_v10  ;;  %v13562_v10 = vld [vmem:[%s18298_s6] ss:$0 sm:$0xff] }
 0x34f   :  { %v13522_v47 = vpop.f32.mrf.mxu1  ;;  %10223 = vmatprep.subr.bf16.mxu0 %v11653_v46  ;;  %v11656_v46 = vld [vmem:[%s18296_s7 + $0x20] sm:$0xff]  }
 0x350   :  { %18557 = vst [vmem:[#allocation41_spill] sm:$0xff] %v13522_v47 }
 0x351   :  { %v10130_v11 = vpop.f32.mrf.mxu1 }
 0x352   :  { %10224 = vmatpush3.bf16.msra.mxu0 %v11654_v63 }
 0x353   :  { %v10131_v36 = vpop.f32.mrf.mxu1  ;;  %10225 = vmatprep.subr.bf16.mxu0 %v11655_v41 }
 0x354   :  { %v13540_v1 = vadd.f32 %v10131_v36, %v10130_v11  ;;  %v13557_v36 = vld [vmem:[%s18297_s5] ss:$0 sm:$0xff] }
 0x355   :  { %v13542_v27 = vpop.f32.mrf.mxu1 }
 0x356   :  { %18558 = vst [vmem:[#allocation42_spill] sm:$0xff] %v13540_v1  ;;  %18559 = vst [vmem:[#allocation43_spill] sm:$0xff] %v13542_v27  ;;  %v11657_v1 = vld [vmem:[%s18296_s7 + $0x58] sm:$0xff]   ;;  %v13574_v27 = vpop.f32.mrf.mxu0  ;;  %10226 = vmatpush3.bf16.msra.mxu0 %v11656_v46  ;;  %v11660_v46 = vld [vmem:[%s18296_s7 + $0x10] sm:$0xff]  }
 0x357   :  { %v13550_v20 = vpop.f32.mrf.mxu1  ;;  %10227 = vmatprep.subr.bf16.mxu0 %v11657_v1  ;;  %v11661_v1 = vld [vmem:[%s18296_s7 + $0x48] sm:$0xff]  }
 0x358   :  { %18560 = vst [vmem:[#allocation44_spill] sm:$0xff] %v13550_v20  ;;  %v11658_v20 = vld [vmem:[%s18296_s7 + $0x18] sm:$0xff]   ;;  %v13593_v47 = vpop.f32.mrf.mxu0 }
 0x359   :  { %v1727_v11 = vpop.f32.mrf.mxu1 }
 0x35a   :  { %v1728_v61 = vadd.f32 %v1727_v11, %v13461_v52  ;;  %v11664_v52 = vld [vmem:[%s18296_s7 + $0xb8] sm:$0xff]   ;;  %v11659_v11 = vld [vmem:[%s18296_s7 + $0x50] sm:$0xff]   ;;  %10228 = vmatpush3.bf16.msra.mxu0 %v11658_v20  ;;  %v10166_v20 = vadd.f32 %v13483_v29, %v13479_v25  ;;  %v11665_v29 = vld [vmem:[%s18296_s7 + $0x40] sm:$0xff]  }
 0x35b   :  { %v11276_v43 = vpop.f32.mrf.mxu1  ;;  %10290 = vmatpush3.bf16.msra.mxu1 %v11664_v52  ;;  %10229 = vmatprep.subr.bf16.mxu0 %v11659_v11  ;;  %v13623_v11 = vpop.f32.mrf.mxu0 }
 0x35c   :  { %v1805_v63 = vmul.f32 %v13557_v36, %v1728_v61  ;;  %v10163_v61 = vadd.f32 %v13475_v2, %v13471_v4  ;;  %v11668_v4 = vld [vmem:[%s18296_s7 + $0xb0] sm:$0xff]   ;;  %10291 = vmatprep.subr.bf16.mxu1 %v11667_v37 }
 0x35d   :  { %v1730_v45 = vpop.f32.mrf.mxu1 }
 0x35e   :  { %v1830_v43 = vadd.f32 %v13562_v10, %v1805_v63  ;;  %v1731_v41 = vadd.f32 %v1730_v45, %v13467_v39  ;;  %10230 = vmatpush3.bf16.msra.mxu0 %v11660_v46 }
 0x35f   :  { %v11277_v31 = vpop.f32.mrf.mxu1  ;;  %10292 = vmatpush3.bf16.msra.mxu1 %v11668_v4  ;;  %10231 = vmatprep.subr.bf16.mxu0 %v11661_v1  ;;  %v11666_v1 = vld [vmem:[%s18296_s7] sm:$0xff]  }
 0x360   :  { %v1848_v63 = vmax.f32 %v1830_v43, 0.0  ;;  %v1806_v45 = vmul.f32 %v13557_v36, %v1731_v41  ;;  %v10093_v31 = vadd.f32 %v13453_v54, %v13451_v35  ;;  %v11669_v41 = vld [vmem:[%s18296_s7 + $0xe8] sm:$0xff]  }
 0x361   :  { %v1735_v39 = vpop.f32.mrf.mxu1  ;;  %10293 = vmatprep.subr.bf16.mxu1 %v11669_v41 }
 0x362   :  { %v13608_v2 = vmul.f32 %v1848_v63, %v12912_v7  ;;  %v1831_v52 = vadd.f32 %v13562_v10, %v1806_v45  ;;  %v1736_v43 = vadd.f32 %v1735_v39, %v13473_v21  ;;  %v1634_v54 = vadd.f32 %v10163_v61, %v10093_v31  ;;  %v11662_v63 = vld [vmem:[%s18296_s7 + $0x8] sm:$0xff]   ;;  %v13638_v7 = vpop.f32.mrf.mxu0 }
 0x363   :  { %v11280_v35 = vpop.f32.mrf.mxu1  ;;  %v11670_v21 = vld [vmem:[%s18296_s7 + $0xa8] sm:$0xff]   ;;  %v1639_v39 = vadd.f32 %v10166_v20, %v13455_v15  ;;  %10232 = vmatpush3.bf16.msra.mxu0 %v11662_v63 }
 0x364   :  { %v1849_v45 = vmax.f32 %v1831_v52, 0.0  ;;  %v1807_v37 = vmul.f32 %v13557_v36, %v1736_v43  ;;  %v10099_v52 = vadd.f32 %v13459_v18, %v13457_v30  ;;  %v10169_v43 = vadd.f32 %v13489_v57, %v13487_v53  ;;  %10294 = vmatpush3.bf16.msra.mxu1 %v11670_v21  ;;  %10233 = vmatprep.subr.bf16.mxu0 %v11665_v29 }
 0x365   :  { %v1738_v61 = vpop.f32.mrf.mxu1  ;;  %v10172_v30 = vadd.f32 %v13497_v60, %v13493_v32  ;;  %v18348_v15 = vrot.slane %v13608_v2, 4  ;;  %v10175_v32 = vadd.f32 %v13503_v55, %v13501_v12 }
 0x366   :  { %v1867_v31 = vmul.f32 %v1849_v45, %v12923_v34  ;;  %v1832_v4 = vadd.f32 %v13562_v10, %v1807_v37  ;;  %v1739_v35 = vadd.f32 %v1738_v61, %v1634_v54  ;;  %v18561_v37 = vrot.slane %v13608_v2, 6 }
 0x367   :  { %v11281_v25 = vpop.f32.mrf.mxu1  ;;  %v1642_v63 = vadd.f32 %v10169_v43, %v10099_v52  ;;  %v18562_v61 = vrot.slane %v13608_v2, 2  ;;  %v10105_v52 = vadd.f32 %v13469_v16, %v13465_v0  ;;  %10234 = vmatpush3.bf16.msra.mxu0 %v11666_v1 }
 0x368   :  { %v1850_v41 = vmax.f32 %v1832_v4, 0.0  ;;  %v1808_v46 = vmul.f32 %v13557_v36, %v1739_v35  ;;  %v2002_v45 = vrot.slane %v1867_v31, 6  ;;  %v2056_v34 = vrot.slane %v1867_v31, 2  ;;  %v13672_v4 = vpop.f32.mrf.mxu0  ;;  %11310 = vmatprep.subr.bf16.mxu0 %v18553_v3 }
 0x369   :  { %v1743_v18 = vpop.f32.mrf.mxu1  ;;  %v13647_v53 = vpack.c.bf16 %v1867_v31, %v13608_v2  ;;  %v1957_v57 = vrot.slane %v1867_v31, 4  ;;  %v1650_v16 = vadd.f32 %v10175_v32, %v10105_v52 }
 0x36a   :  { %v1868_v20 = vmul.f32 %v1850_v41, %v12937_v22  ;;  %v1833_v54 = vadd.f32 %v13562_v10, %v1808_v46  ;;  %v1744_v21 = vadd.f32 %v1743_v18, %v1639_v39  ;;  %v13656_v25 = vsel %vm252_vm0, %v18561_v37, %v2002_v45 }
 0x36b   :  { %v11284_v60 = vpop.f32.mrf.mxu1  ;;  %v13664_v31 = vsel %vm307_vm1, %v18562_v61, %v2056_v34  ;;  %v13670_v39 = vsel %vm206_vm2, %v18348_v15, %v1957_v57  ;;  %v1647_v41 = vadd.f32 %v10172_v30, %v13463_v62  ;;  %v13695_v30 = vpop.f32.mrf.mxu0 }
 0x36c   :  { %v1851_v29 = vmax.f32 %v1833_v54, 0.0  ;;  %v1809_v35 = vmul.f32 %v13557_v36, %v1744_v21  ;;  %v2003_v12 = vrot.slane %v1868_v20, 6  ;;  %v2057_v55 = vrot.slane %v1868_v20, 2 }
 0x36d   :  { %v1746_v43 = vpop.f32.mrf.mxu1  ;;  %v1958_v46 = vrot.slane %v1868_v20, 4  ;;  %v10178_v21 = vadd.f32 %v13513_v44, %v13511_v5 }
 0x36e   :  { %v1869_v18 = vmul.f32 %v1851_v29, %v12952_v14  ;;  %v1834_v37 = vadd.f32 %v13562_v10, %v1809_v35  ;;  %v1747_v60 = vadd.f32 %v1746_v43, %v1642_v63  ;;  %v13682_v54 = vsel %vm252_vm0, %v2002_v45, %v2003_v12  ;;  %v18571_v14 = vld [vmem:[#allocation40_spill] sm:$0xff] }
 0x36f   :  { %v11285_v0 = vpop.f32.mrf.mxu1  ;;  %v13689_v62 = vsel %vm307_vm1, %v2056_v34, %v2057_v55  ;;  %v13693_v1 = vsel %vm206_vm2, %v1957_v57, %v1958_v46 }
 0x370   :  { %v1852_v63 = vmax.f32 %v1834_v37, 0.0  ;;  %v1810_v45 = vmul.f32 %v13557_v36, %v1747_v60  ;;  %v2004_v61 = vrot.slane %v1869_v18, 6  ;;  %v2058_v29 = vrot.slane %v1869_v18, 2 }
 0x371   :  { %v1751_v35 = vpop.f32.mrf.mxu1  ;;  %v13700_v5 = vpack.c.bf16 %v1869_v18, %v1868_v20  ;;  %v1959_v32 = vrot.slane %v1869_v18, 4  ;;  %v10181_v60 = vadd.f32 %v13538_v40, %v13527_v6  ;;  %v10111_v40 = vadd.f32 %v13485_v48, %v13481_v26 }
 0x372   :  { %v1870_v57 = vmul.f32 %v1852_v63, %v12941_v17  ;;  %v1835_v52 = vadd.f32 %v13562_v10, %v1810_v45  ;;  %v1752_v43 = vadd.f32 %v1751_v35, %v1647_v41  ;;  %v13708_v37 = vsel %vm252_vm0, %v2003_v12, %v2004_v61  ;;  %v13722_v41 = vpop.f32.mrf.mxu0 }
 0x373   :  { %v11288_v0 = vpop.f32.mrf.mxu1  ;;  %v13716_v18 = vsel %vm307_vm1, %v2057_v55, %v2058_v29  ;;  %v13720_v63 = vsel %vm206_vm2, %v1958_v46, %v1959_v32  ;;  %v1658_v48 = vadd.f32 %v10181_v60, %v10111_v40 }
 0x374   :  { %v1853_v45 = vmax.f32 %v1835_v52, 0.0  ;;  %v1811_v12 = vmul.f32 %v13557_v36, %v1752_v43  ;;  %v2005_v35 = vrot.slane %v1870_v57, 6  ;;  %v2059_v34 = vrot.slane %v1870_v57, 2 }
 0x375   :  { %v1754_v6 = vpop.f32.mrf.mxu1  ;;  %v1655_v0 = vadd.f32 %v10178_v21, %v13477_v33  ;;  %v1960_v44 = vrot.slane %v1870_v57, 4  ;;  %v10184_v43 = vadd.f32 %v13574_v27, %v13552_v56 }
 0x376   :  { %v1871_v46 = vmul.f32 %v1853_v45, %v12969_v58  ;;  %v1836_v20 = vadd.f32 %v13562_v10, %v1811_v12  ;;  %v1755_v15 = vadd.f32 %v1754_v6, %v1650_v16  ;;  %v13734_v52 = vsel %vm252_vm0, %v2004_v61, %v2005_v35  ;;  %v13746_v45 = vpop.f32.mrf.mxu0 }
 0x377   :  { %v11289_v26 = vpop.f32.mrf.mxu1  ;;  %v13740_v33 = vsel %vm307_vm1, %v2058_v29, %v2059_v34  ;;  %v13744_v21 = vsel %vm206_vm2, %v1959_v32, %v1960_v44 }
 0x378   :  { %v1854_v16 = vmax.f32 %v1836_v20, 0.0  ;;  %v1812_v12 = vmul.f32 %v13557_v36, %v1755_v15  ;;  %v2006_v61 = vrot.slane %v1871_v46, 6  ;;  %v2060_v27 = vrot.slane %v1871_v46, 2 }
 0x379   :  { %v1759_v56 = vpop.f32.mrf.mxu1  ;;  %v13751_v60 = vpack.c.bf16 %v1871_v46, %v1870_v57  ;;  %v1961_v40 = vrot.slane %v1871_v46, 4  ;;  %v10187_v20 = vadd.f32 %v13623_v11, %v13593_v47  ;;  %v10117_v47 = vadd.f32 %v13499_v19, %v13495_v59 }
 0x37a   :  { %v1872_v32 = vmul.f32 %v1854_v16, %v12950_v51  ;;  %v1837_v26 = vadd.f32 %v13562_v10, %v1812_v12  ;;  %v1760_v55 = vadd.f32 %v1759_v56, %v1655_v0  ;;  %v13759_v15 = vsel %vm252_vm0, %v2005_v35, %v2006_v61  ;;  %v10195_v0 = vpop.f32.mrf.mxu0 }
 0x37b   :  { %v11292_v6 = vpop.f32.mrf.mxu1  ;;  %v13767_v46 = vsel %vm307_vm1, %v2059_v34, %v2060_v27  ;;  %v13771_v16 = vsel %vm206_vm2, %v1960_v44, %v1961_v40  ;;  %v1666_v19 = vadd.f32 %v10187_v20, %v10117_v47 }
 0x37c   :  { %v1855_v12 = vmax.f32 %v1837_v26, 0.0  ;;  %v1813_v35 = vmul.f32 %v13557_v36, %v1760_v55  ;;  %v2007_v56 = vrot.slane %v1872_v32, 6  ;;  %v2061_v29 = vrot.slane %v1872_v32, 2 }
 0x37d   :  { %v1762_v11 = vpop.f32.mrf.mxu1  ;;  %v1663_v6 = vadd.f32 %v10184_v43, %v13491_v49  ;;  %v1962_v57 = vrot.slane %v1872_v32, 4  ;;  %v10190_v26 = vadd.f32 %v13672_v4, %v13638_v7 }
 0x37e   :  { %v1873_v51 = vmul.f32 %v1855_v12, %v12980_v42  ;;  %v1838_v44 = vadd.f32 %v13562_v10, %v1813_v35  ;;  %v1763_v58 = vadd.f32 %v1762_v11, %v1658_v48  ;;  %v13783_v55 = vsel %vm252_vm0, %v2006_v61, %v2007_v56  ;;  %v10197_v12 = vpop.f32.mrf.mxu0 }
 0x37f   :  { %v11293_v59 = vpop.f32.mrf.mxu1  ;;  %v13789_v49 = vsel %vm307_vm1, %v2060_v27, %v2061_v29  ;;  %v13793_v43 = vsel %vm206_vm2, %v1961_v40, %v1962_v57 }
 0x380   :  { %18563 = vst [vmem:[#allocation45_spill] sm:$0xff] %v13793_v43  ;;  %v1856_v35 = vmax.f32 %v1838_v44, 0.0  ;;  %v1814_v48 = vmul.f32 %v13557_v36, %v1763_v58  ;;  %v2008_v11 = vrot.slane %v1873_v51, 6  ;;  %v2062_v7 = vrot.slane %v1873_v51, 2 }
 0x381   :  { %v1767_v34 = vpop.f32.mrf.mxu1  ;;  %v13798_v4 = vpack.c.bf16 %v1873_v51, %v1872_v32  ;;  %v1963_v20 = vrot.slane %v1873_v51, 4  ;;  %v10193_v44 = vadd.f32 %v13722_v41, %v13695_v30  ;;  %v10123_v30 = vadd.f32 %v13509_v9, %v13507_v13 }
 0x382   :  { %v1874_v47 = vmul.f32 %v1856_v35, %v12957_v50  ;;  %v1839_v40 = vadd.f32 %v13562_v10, %v1814_v48  ;;  %v1768_v59 = vadd.f32 %v1767_v34, %v1663_v6  ;;  %v13806_v58 = vsel %vm252_vm0, %v2007_v56, %v2008_v11  ;;  %v10198_v6 = vpop.f32.mrf.mxu0 }
 0x383   :  { %18564 = vst [vmem:[#allocation46_spill] sm:$0xff] %v13798_v4  ;;  %v11296_v61 = vpop.f32.mrf.mxu1  ;;  %v13814_v51 = vsel %vm307_vm1, %v2061_v29, %v2062_v7  ;;  %v13818_v35 = vsel %vm206_vm2, %v1962_v57, %v1963_v20  ;;  %v1674_v13 = vadd.f32 %v10193_v44, %v10123_v30 }
 0x384   :  { %18565 = vst [vmem:[#allocation47_spill] sm:$0xff] %v13818_v35  ;;  %v1857_v34 = vmax.f32 %v1839_v40, 0.0  ;;  %v1815_v56 = vmul.f32 %v13557_v36, %v1768_v59  ;;  %v2009_v48 = vrot.slane %v1874_v47, 6  ;;  %v2063_v27 = vrot.slane %v1874_v47, 2  ;;  %v18577_v35 = vld [vmem:[#allocation42_spill] sm:$0xff] }
 0x385   :  { %v1770_v41 = vpop.f32.mrf.mxu1  ;;  %v1671_v61 = vadd.f32 %v10190_v26, %v13505_v28  ;;  %v1964_v32 = vrot.slane %v1874_v47, 4  ;;  %v10196_v59 = vadd.f32 %v10195_v0, %v13746_v45  ;;  %v10200_v26 = vpop.f32.mrf.mxu0 }
 0x386   :  { %v1875_v50 = vmul.f32 %v1857_v34, %v13001_v23  ;;  %v1840_v57 = vadd.f32 %v13562_v10, %v1815_v56  ;;  %v1771_v42 = vadd.f32 %v1770_v41, %v1666_v19  ;;  %v13830_v40 = vsel %vm252_vm0, %v2008_v11, %v2009_v48 }
 0x387   :  { %v11297_v17 = vpop.f32.mrf.mxu1  ;;  %v13835_v28 = vsel %vm307_vm1, %v2062_v7, %v2063_v27  ;;  %v13839_v9 = vsel %vm206_vm2, %v1963_v20, %v1964_v32  ;;  %v1679_v22 = vadd.f32 %v10196_v59, %v18571_v14 }
 0x388   :  { %18566 = vst [vmem:[#allocation48_spill] sm:$0xff] %v13839_v9  ;;  %v1858_v34 = vmax.f32 %v1840_v57, 0.0  ;;  %v1816_v19 = vmul.f32 %v13557_v36, %v1771_v42  ;;  %v2010_v56 = vrot.slane %v1875_v50, 6  ;;  %v2064_v41 = vrot.slane %v1875_v50, 2 }
 0x389   :  { %v1775_v11 = vpop.f32.mrf.mxu1  ;;  %v13844_v17 = vpack.c.bf16 %v1875_v50, %v1874_v47  ;;  %v1965_v0 = vrot.slane %v1875_v50, 4  ;;  %v10199_v57 = vadd.f32 %v10198_v6, %v10197_v12  ;;  %v18569_v12 = vld [vmem:[#allocation41_spill] sm:$0xff] }
 0x38a   :  { %v1876_v44 = vmul.f32 %v1858_v34, %v12967_v24  ;;  %v1841_v20 = vadd.f32 %v13562_v10, %v1816_v19  ;;  %v1776_v30 = vadd.f32 %v1775_v11, %v1671_v61  ;;  %v13852_v42 = vsel %vm252_vm0, %v2009_v48, %v2010_v56  ;;  %v10201_v34 = vpop.f32.mrf.mxu0 }
 0x38b   :  { %18567 = vst [vmem:[#allocation49_spill] sm:$0xff] %v13844_v17  ;;  %v11300_v29 = vpop.f32.mrf.mxu1  ;;  %v13858_v50 = vsel %vm307_vm1, %v2063_v27, %v2064_v41  ;;  %v13862_v47 = vsel %vm206_vm2, %v1964_v32, %v1965_v0  ;;  %v10129_v6 = vadd.f32 %v18569_v12, %v13517_v38  ;;  %v18570_v27 = vld [vmem:[#allocation29_spill] sm:$0xff] }
 0x38c   :  { %18568 = vst [vmem:[#allocation50_spill] sm:$0xff] %v13862_v47  ;;  %v1859_v19 = vmax.f32 %v1841_v20, 0.0  ;;  %v1817_v61 = vmul.f32 %v13557_v36, %v1776_v30  ;;  %v2011_v11 = vrot.slane %v1876_v44, 6  ;;  %v2065_v48 = vrot.slane %v1876_v44, 2 }
 0x38d   :  { %v1778_v29 = vpop.f32.mrf.mxu1  ;;  %v1966_v45 = vrot.slane %v1876_v44, 4  ;;  %v1682_v17 = vadd.f32 %v10199_v57, %v10129_v6  ;;  %v18573_v57 = vld [vmem:[#allocation21_spill] sm:$0xff] }
 0x38e   :  { %v1877_v24 = vmul.f32 %v1859_v19, %v18570_v27  ;;  %v1842_v23 = vadd.f32 %v13562_v10, %v1817_v61  ;;  %v1779_v32 = vadd.f32 %v1778_v29, %v1674_v13  ;;  %v13873_v20 = vsel %vm252_vm0, %v2010_v56, %v2011_v11  ;;  %v10203_v19 = vpop.f32.mrf.mxu0 }
 0x38f   :  { %v11301_v30 = vpop.f32.mrf.mxu1  ;;  %v13878_v38 = vsel %vm307_vm1, %v2064_v41, %v2065_v48  ;;  %v13882_v12 = vsel %vm206_vm2, %v1965_v0, %v1966_v45  ;;  %v18574_v41 = vld [vmem:[#allocation43_spill] sm:$0xff] }
 0x390   :  { %v1860_v7 = vmax.f32 %v1842_v23, 0.0  ;;  %v1818_v13 = vmul.f32 %v13557_v36, %v1779_v32  ;;  %v2012_v61 = vrot.slane %v1877_v24, 6  ;;  %v2066_v30 = vrot.slane %v1877_v24, 2 }
 0x391   :  { %v1783_v29 = vpop.f32.mrf.mxu1  ;;  %v13887_v14 = vpack.c.bf16 %v1877_v24, %v1876_v44  ;;  %v1967_v59 = vrot.slane %v1877_v24, 4  ;;  %v10202_v32 = vadd.f32 %v10201_v34, %v10200_v26  ;;  %v18575_v26 = vld [vmem:[#allocation44_spill] sm:$0xff] }
 0x392   :  { %v1878_v6 = vmul.f32 %v1860_v7, %v18573_v57  ;;  %v1843_v0 = vadd.f32 %v13562_v10, %v1818_v13  ;;  %v1784_v27 = vadd.f32 %v1783_v29, %v1679_v22  ;;  %v13895_v23 = vsel %vm252_vm0, %v2011_v11, %v2012_v61  ;;  %v10204_v7 = vpop.f32.mrf.mxu0 }
 0x393   :  { %18572 = vst [vmem:[#allocation41_spill] sm:$0xff] %v13887_v14  ;;  %v11304_v9 = vpop.f32.mrf.mxu1  ;;  %v13901_v24 = vsel %vm307_vm1, %v2065_v48, %v2066_v30  ;;  %v13905_v44 = vsel %vm206_vm2, %v1966_v45, %v1967_v59  ;;  %v18576_v48 = vld [vmem:[#allocation35_spill] sm:$0xff]  ;;  %v1687_v4 = vadd.f32 %v10202_v32, %v18577_v35 }
 0x394   :  { %v1861_v13 = vmax.f32 %v1843_v0, 0.0  ;;  %v1819_v22 = vmul.f32 %v13557_v36, %v1784_v27  ;;  %v2013_v29 = vrot.slane %v1878_v6, 6  ;;  %v2067_v11 = vrot.slane %v1878_v6, 2 }
 0x395   :  { %v10135_v9 = vadd.f32 %v18575_v26, %v18574_v41  ;;  %v1786_v34 = vpop.f32.mrf.mxu1  ;;  %v1968_v57 = vrot.slane %v1878_v6, 4  ;;  %v10205_v27 = vadd.f32 %v10204_v7, %v10203_v19 }
 0x396   :  { %v1879_v14 = vmul.f32 %v1861_v13, %v18576_v48  ;;  %v1844_v47 = vadd.f32 %v13562_v10, %v1819_v22  ;;  %v1787_v45 = vadd.f32 %v1786_v34, %v1682_v17  ;;  %v13916_v0 = vsel %vm252_vm0, %v2012_v61, %v2013_v29 }
 0x397   :  { %v11305_v43 = vpop.f32.mrf.mxu1  ;;  %v13921_v41 = vsel %vm307_vm1, %v2066_v30, %v2067_v11  ;;  %v13925_v26 = vsel %vm206_vm2, %v1967_v59, %v1968_v57  ;;  %v18579_v30 = vld [vmem:[#allocation24_spill] sm:$0xff]  ;;  %v1690_v48 = vadd.f32 %v10205_v27, %v10135_v9 }
 0x398   :  { %18578 = vst [vmem:[#allocation40_spill] sm:$0xff] %v13925_v26  ;;  %v1862_v13 = vmax.f32 %v1844_v47, 0.0  ;;  %v1820_v22 = vmul.f32 %v13557_v36, %v1787_v45  ;;  %v2014_v17 = vrot.slane %v1879_v14, 6  ;;  %v2068_v34 = vrot.slane %v1879_v14, 2 }
 0x399   :  { %v1791_v56 = vpop.f32.mrf.mxu1  ;;  %v13930_v43 = vpack.c.bf16 %v1879_v14, %v1878_v6  ;;  %v1969_v35 = vrot.slane %v1879_v14, 4 }
 0x39a   :  { %v1880_v32 = vmul.f32 %v1862_v13, %v18579_v30  ;;  %v1845_v59 = vadd.f32 %v13562_v10, %v1820_v22  ;;  %v1792_v7 = vadd.f32 %v1791_v56, %v1687_v4  ;;  %v13938_v47 = vsel %vm252_vm0, %v2013_v29, %v2014_v17 }
 0x39b   :  { %v11308_v45 = vpop.f32.mrf.mxu1  ;;  %v13944_v14 = vsel %vm307_vm1, %v2067_v11, %v2068_v34  ;;  %v13948_v6 = vsel %vm206_vm2, %v1968_v57, %v1969_v35 }
 0x39c   :  { %v1863_v13 = vmax.f32 %v1845_v59, 0.0  ;;  %v1821_v4 = vmul.f32 %v13557_v36, %v1792_v7  ;;  %v2015_v56 = vrot.slane %v1880_v32, 6  ;;  %v2069_v22 = vrot.slane %v1880_v32, 2  ;;  %v18580_v45 = vld [vmem:[#allocation5_spill] sm:$0xff] }
 0x39d   :  { %v1794_v29 = vpop.f32.mrf.mxu1  ;;  %v1970_v27 = vrot.slane %v1880_v32, 4 }
 0x39e   :  { %v1881_v61 = vmul.f32 %v1863_v13, %v18580_v45  ;;  %v1846_v19 = vadd.f32 %v13562_v10, %v1821_v4  ;;  %v1795_v11 = vadd.f32 %v1794_v29, %v1690_v48  ;;  %v13957_v30 = vsel %vm252_vm0, %v2014_v17, %v2015_v56  ;;  %v11671_v17 = vld [vmem:[%s18296_s7 + $0xe0] sm:$0xff]  }
 0x39f   :  { %v11309_v57 = vpop.f32.mrf.mxu1  ;;  %v13961_v59 = vsel %vm307_vm1, %v2068_v34, %v2069_v22  ;;  %v13965_v7 = vsel %vm206_vm2, %v1969_v35, %v1970_v27  ;;  %v18583_v35 = vld [vmem:[#allocation12_spill] sm:$0xff]  ;;  %10295 = vmatprep.subr.bf16.mxu1 %v11671_v17  ;;  %v18584_v17 = vld [vmem:[#allocation9_spill] sm:$0xff] }
 0x3a0   :  { %18581 = vst [vmem:[#allocation43_spill] sm:$0xff] %v13965_v7  ;;  %v1864_v9 = vmax.f32 %v1846_v19, 0.0  ;;  %v1822_v26 = vmul.f32 %v13557_v36, %v1795_v11  ;;  %v2016_v13 = vrot.slane %v1881_v61, 6  ;;  %v2070_v4 = vrot.slane %v1881_v61, 2  ;;  %v11672_v11 = vld [vmem:[%s18296_s7 + $0xa0] sm:$0xff]  }
 0x3a1   :  { %v1971_v29 = vrot.slane %v1881_v61, 4  ;;  %v13973_v57 = vpack.c.bf16 %v1881_v61, %v1880_v32  ;;  %10296 = vmatpush3.bf16.msra.mxu1 %v11672_v11 }
 0x3a2   :  { %v1882_v45 = vmul.f32 %v1864_v9, %v18583_v35  ;;  %v1847_v19 = vadd.f32 %v13562_v10, %v1822_v26  ;;  %v2021_v36 = vsel %vm252_vm0, %v2015_v56, %v2016_v13  ;;  %v13987_v61 = vsel %vm307_vm1, %v2069_v22, %v2070_v4  ;;  %v11674_v56 = vld [vmem:[%s18296_s7 + $0xd8] sm:$0xff]  }
 0x3a3   :  { %18582 = vst [vmem:[#allocation44_spill] sm:$0xff] %v13973_v57  ;;  %v2045_v48 = vpack.c.bf16 %v2021_v36, %v13957_v30  ;;  %v13991_v32 = vsel %vm206_vm2, %v1970_v27, %v1971_v29  ;;  %v11675_v30 = vld [vmem:[%s18296_s7 + $0x98] sm:$0xff]   ;;  %10297 = vmatprep.subr.bf16.mxu1 %v11674_v56  ;;  %v11676_v57 = vld [vmem:[%s18296_s7 + $0xd0] sm:$0xff]  }
 0x3a4   :  { %v1865_v9 = vmax.f32 %v1847_v19, 0.0  ;;  %v2017_v10 = vrot.slane %v1882_v45, 6  ;;  %v2071_v26 = vrot.slane %v1882_v45, 2  ;;  %v1972_v34 = vrot.slane %v1882_v45, 4 }
 0x3a5   :  { %10298 = vmatpush3.bf16.msra.mxu1 %v11675_v30 }
 0x3a6   :  { %v1883_v36 = vmul.f32 %v1865_v9, %v18584_v17  ;;  %v2020_v27 = vsel %vm252_vm0, %v2016_v13, %v2017_v10  ;;  %v2074_v19 = vsel %vm307_vm1, %v2070_v4, %v2071_v26  ;;  %v14008_v11 = vsel %vm206_vm2, %v1971_v29, %v1972_v34  ;;  %10299 = vmatprep.subr.bf16.mxu1 %v11676_v57 }
 0x3a7   :  { %v2098_v35 = vpack.c.bf16 %v2074_v19, %v13987_v61  ;;  %v18585_v29 = vrot.slane %v13608_v2, 6  ;;  %v18586_v19 = vrot.slane %v13608_v2, 2 }
 0x3a8   :  { %v2018_v22 = vrot.slane %v1883_v36, 6  ;;  %v2072_v17 = vrot.slane %v1883_v36, 2  ;;  %v1973_v13 = vrot.slane %v1883_v36, 4  ;;  %v14016_v7 = vpack.c.bf16 %v1883_v36, %v1882_v45  ;;  %v11677_v45 = vld [vmem:[%s18296_s7 + $0x90] sm:$0xff]  }
 0x3a9   :  { %10300 = vmatpush3.bf16.msra.mxu1 %v11677_v45  ;;  %v18601_v45 = vpack.c.bf16 %v13720_v63, %v13693_v1 }
 0x3aa   :  { %v2019_v4 = vsel %vm252_vm0, %v2017_v10, %v2018_v22  ;;  %v2036_v61 = vsel %vm252_vm0, %v2018_v22, %v18585_v29  ;;  %v2073_v56 = vsel %vm307_vm1, %v2071_v26, %v2072_v17  ;;  %v2090_v9 = vsel %vm307_vm1, %v2072_v17, %v18586_v19  ;;  %v11678_v26 = vld [vmem:[%s18296_s7 + $0xc8] sm:$0xff]   ;;  %v11681_v29 = vld [vmem:[%s18296_s7 + $0x80] sm:$0xff]  }
 0x3ab   :  { %v2037_v57 = vpack.c.bf16 %v2019_v4, %v2020_v27  ;;  %v2038_v10 = vpack.c.bf16 %v13656_v25, %v2036_v61  ;;  %v2099_v30 = vpack.c.bf16 %v2090_v9, %v2073_v56  ;;  %v14036_v36 = vsel %vm206_vm2, %v1972_v34, %v1973_v13  ;;  %v11679_v22 = vld [vmem:[%s18296_s7 + $0x88] sm:$0xff]   ;;  %10301 = vmatprep.subr.bf16.mxu1 %v11678_v26 }
 0x3ac   :  { %v1992_v17 = vpack.c.bf16 %v14036_v36, %v14008_v11  ;;  %v18587_v27 = vrot.slane %v13608_v2, 4  ;;  %v11680_v2 = vld [vmem:[%s18296_s7 + $0xc0] sm:$0xff]   ;;  %v18589_v4 = vpack.c.bf16 %v13708_v37, %v13682_v54  ;;  %v18590_v61 = vpack.c.bf16 %v13852_v42, %v13830_v40 }
 0x3ad   :  { %2118 = vrot.lane.b32.xlu0 %v2037_v57, %s12019_s30  ;;  %2120 = vrot.lane.b32.xlu1 %v2038_v10, %s12019_s30  ;;  %v18592_v54 = vpack.c.bf16 %v13938_v47, %v13916_v0  ;;  %v18593_v37 = vpack.c.bf16 %v13895_v23, %v13873_v20  ;;  %v18597_v40 = vpack.c.bf16 %v13878_v38, %v13858_v50  ;;  %v11682_v20 = vld [vmem:[%s18296_s7 + $0x110] sm:$0xff]   ;;  %v11683_v0 = vld [vmem:[%s18296_s7 + $0x108] sm:$0xff]  }
 0x3ae   :  { %v14050_v25 = vsel %vm206_vm2, %v1973_v13, %v18587_v27  ;;  %10302 = vmatpush3.bf16.msra.mxu1 %v11679_v22  ;;  %v18588_v13 = vpack.c.bf16 %v13759_v15, %v13734_v52  ;;  %v18591_v52 = vpack.c.bf16 %v13806_v58, %v13783_v55  ;;  %v18594_v15 = vpack.c.bf16 %v13740_v33, %v13716_v18 }
 0x3af   :  { %v1993_v34 = vpack.c.bf16 %v13670_v39, %v14050_v25  ;;  %v2107_v9 = vpack.c.bf16 %v14050_v25, %v14036_v36  ;;  %10303 = vmatprep.subr.bf16.mxu1 %v11680_v2  ;;  %v18595_v55 = vpack.c.bf16 %v13789_v49, %v13767_v46  ;;  %v18596_v58 = vpack.c.bf16 %v13689_v62, %v13664_v31  ;;  %v11673_v49 = vld [vmem:[%s18296_s7 + $0x118] sm:$0xff]  }
 0x3b0   :  { %v18598_v18 = vpack.c.bf16 %v13835_v28, %v13814_v51  ;;  %v18599_v33 = vpack.c.bf16 %v13961_v59, %v13944_v14  ;;  %v18600_v31 = vpack.c.bf16 %v13921_v41, %v13901_v24  ;;  %v18603_v2 = vld [vmem:[#allocation46_spill] sm:$0xff] }
 0x3b1   :  { %2124 = vrot.lane.b32.xlu0 %v18588_v13, %s12019_s30  ;;  %2122 = vrot.lane.b32.xlu1 %v18589_v4, %s12019_s30  ;;  %v18604_v4 = vld [vmem:[#allocation47_spill] sm:$0xff] }
 0x3b2   :  { %10304 = vmatpush3.bf16.msra.mxu1 %v11681_v29 }
 0x3b5   :  { %2128 = vrot.lane.b32.xlu0 %v18590_v61, %s12019_s30  ;;  %2126 = vrot.lane.b32.xlu1 %v18591_v52, %s12019_s30 }
 0x3b9   :  { %2132 = vrot.lane.b32.xlu0 %v18592_v54, %s12019_s30  ;;  %2130 = vrot.lane.b32.xlu1 %v18593_v37, %s12019_s30  ;;  %v18607_v54 = vld [vmem:[#allocation49_spill] sm:$0xff] }
 0x3bd   :  { %2147 = vrot.lane.b32.xlu0 %v18594_v15, %s12019_s30  ;;  %2134 = vrot.lane.b32.xlu1 %v2045_v48, %s12019_s30  ;;  %v11684_v48 = vld [vmem:[%s18296_s7 + $0x100] sm:$0xff]  }
 0x3c1   :  { %2149 = vrot.lane.b32.xlu0 %v18595_v55, %s12019_s30  ;;  %2145 = vrot.lane.b32.xlu1 %v18596_v58, %s12019_s30  ;;  %v18608_v55 = vld [vmem:[#allocation50_spill] sm:$0xff]  ;;  %v18609_v58 = vld [vmem:[#allocation48_spill] sm:$0xff] }
 0x3c5   :  { %2153 = vrot.lane.b32.xlu0 %v18597_v40, %s12019_s30  ;;  %2151 = vrot.lane.b32.xlu1 %v18598_v18, %s12019_s30  ;;  %v18610_v40 = vpack.c.bf16 %v18608_v55, %v18609_v58 }
 0x3c9   :  { %2157 = vrot.lane.b32.xlu0 %v18599_v33, %s12019_s30  ;;  %2155 = vrot.lane.b32.xlu1 %v18600_v31, %s12019_s30  ;;  %v18611_v31 = vld [vmem:[#allocation41_spill] sm:$0xff] }
 0x3cd   :  { %2161 = vrot.lane.b32.xlu0 %v2099_v30, %s12019_s30  ;;  %2159 = vrot.lane.b32.xlu1 %v2098_v35, %s12019_s30 }
 0x41f   :  { %v14119_v62 = vpop.permute.xlu0 %2118  ;;  %v2121_v46 = vpop.permute.xlu1 %2120 }
 0x420   :  { %v2165_v51 = vsel %vm1149_vm15, %v1992_v17, %v14119_v62  ;;  %v2200_v28 = vsel %vm1149_vm15, %v14016_v7, %v2121_v46  ;;  %v2169_v41 = vsel %vm1149_vm15, %v1993_v34, %v2121_v46 }
 0x421   :  { %2528 = vmatprep.mubr.bf16.mxu0 %v2200_v28 }
 0x422   :  { %2529 = vmatmul.mubr.bf16.vlgmr.msra.gmra.mxu0 %v2165_v51  ;;  %v18612_v51 = vpack.c.bf16 %v13905_v44, %v13882_v12 }
 0x423   :  { %11311 = vmatpush3.bf16.msra.mxu0 %v11673_v49  ;;  %v2125_v42 = vpop.permute.xlu0 %2124  ;;  %v2123_v50 = vpop.permute.xlu1 %2122 }
 0x424   :  { %v2203_v38 = vsel %vm1149_vm15, %v13647_v53, %v2123_v50  ;;  %11312 = vmatprep.subr.bf16.mxu0 %v18553_v3  ;;  %v2206_v47 = vsel %vm1149_vm15, %v13700_v5, %v2125_v42  ;;  %v2173_v57 = vsel %vm1149_vm15, %v18601_v45, %v2123_v50 }
 0x425   :  { %2536 = vmatprep.mubr.bf16.mxu0 %v2203_v38  ;;  %v18613_v38 = vld [vmem:[#allocation40_spill] sm:$0xff] }
 0x427   :  { %v2129_v23 = vpop.permute.xlu0 %2128  ;;  %v2127_v24 = vpop.permute.xlu1 %2126  ;;  %11313 = vmatpush3.bf16.msra.mxu0 %v11682_v20 }
 0x428   :  { %11314 = vmatprep.subr.bf16.mxu0 %v18553_v3  ;;  %v2209_v10 = vsel %vm1149_vm15, %v13751_v60, %v2127_v24  ;;  %v2212_v13 = vsel %vm1149_vm15, %v18603_v2, %v2129_v23  ;;  %v2185_v18 = vsel %vm1149_vm15, %v18610_v40, %v2129_v23  ;;  %v18614_v23 = vpack.c.bf16 %v13948_v6, %v18613_v38 }
 0x42a   :  { %2537 = vmatmul.mubr.bf16.gmra.mxu0 %v2169_v41  ;;  %v18615_v41 = vld [vmem:[#allocation44_spill] sm:$0xff] }
 0x42b   :  { %v2133_v14 = vpop.permute.xlu0 %2132  ;;  %v2131_v59 = vpop.permute.xlu1 %2130  ;;  %2544 = vmatprep.mubr.bf16.mxu0 %v2206_v47  ;;  %11315 = vmatpush3.bf16.msra.mxu0 %v11683_v0  ;;  %v2224_v47 = vsel %vm1149_vm15, %v18615_v41, %v14119_v62 }
 0x42c   :  { %11316 = vmatprep.subr.bf16.mxu0 %v18553_v3  ;;  %v2215_v37 = vsel %vm1149_vm15, %v18607_v54, %v2131_v59  ;;  %v2218_v46 = vsel %vm1149_vm15, %v18611_v31, %v2133_v14  ;;  %v2189_v28 = vsel %vm1149_vm15, %v18612_v51, %v2131_v59 }
 0x42f   :  { %v2148_v35 = vpop.permute.xlu0 %2147  ;;  %v2135_v56 = vpop.permute.xlu1 %2134  ;;  %11317 = vmatpush3.bf16.msra.mxu0 %v11684_v48 }
 0x430   :  { %v2230_v19 = vsel %vm1149_vm15, %v13700_v5, %v2148_v35  ;;  %v18602_v5 = vpack.c.bf16 %v13771_v16, %v13744_v21  ;;  %v2221_v50 = vsel %vm1149_vm15, %v13930_v43, %v2135_v56 }
 0x431   :  { %2633 = vmatprep.mubr.bf16.mxu1 %v2230_v19 }
 0x432   :  { %2545 = vmatmul.mubr.bf16.gmra.mxu0 %v2173_v57  ;;  %v2177_v27 = vsel %vm1149_vm15, %v18602_v5, %v2125_v42 }
 0x433   :  { %v2150_v30 = vpop.permute.xlu0 %2149  ;;  %v2146_v26 = vpop.permute.xlu1 %2145  ;;  %2552 = vmatprep.mubr.bf16.mxu0 %v2209_v10 }
 0x434   :  { %v2227_v22 = vsel %vm1149_vm15, %v13647_v53, %v2146_v26  ;;  %v2233_v17 = vsel %vm1149_vm15, %v13751_v60, %v2150_v30  ;;  %v18605_v60 = vld [vmem:[#allocation45_spill] sm:$0xff] }
 0x435   :  { %2634 = vmatmul.mubr.bf16.vlgmr.msra.gmra.mxu1 %v2227_v22  ;;  %v18606_v29 = vpack.c.bf16 %v18604_v4, %v18605_v60 }
 0x436   :  { %2641 = vmatprep.mubr.bf16.mxu1 %v2233_v17 }
 0x437   :  { %v2152_v34 = vpop.permute.xlu1 %2151  ;;  %v2181_v61 = vsel %vm1149_vm15, %v18606_v29, %v2127_v24  ;;  %v2154_v52 = vpop.permute.xlu0 %2153  ;;  %v2193_v24 = vsel %vm1149_vm15, %v18614_v23, %v2133_v14  ;;  %v18618_v14 = vpack.c.bf16 %v13744_v21, %v13720_v63  ;;  %v18621_v63 = vpack.c.bf16 %v13882_v12, %v18608_v55 }
 0x438   :  { %v2236_v53 = vsel %vm1149_vm15, %v18603_v2, %v2152_v34  ;;  %v2239_v15 = vsel %vm1149_vm15, %v18607_v54, %v2154_v52  ;;  %v18622_v21 = vpack.c.bf16 %v18613_v38, %v13905_v44  ;;  %v18624_v12 = vpack.c.bf16 %v14008_v11, %v13991_v32 }
 0x439   :  { %v18625_v44 = vpack.c.bf16 %v13693_v1, %v13670_v39 }
 0x43a   :  { %2553 = vmatmul.mubr.bf16.gmra.mxu0 %v2177_v27 }
 0x43b   :  { %2560 = vmatprep.mubr.bf16.mxu0 %v2212_v13  ;;  %v2156_v33 = vpop.permute.xlu1 %2155  ;;  %v2158_v42 = vpop.permute.xlu0 %2157 }
 0x43c   :  { %v2242_v49 = vsel %vm1149_vm15, %v18611_v31, %v2156_v33  ;;  %v2245_v20 = vsel %vm1149_vm15, %v13930_v43, %v2158_v42  ;;  %v18616_v43 = vld [vmem:[#allocation43_spill] sm:$0xff] }
 0x43d   :  { %2642 = vmatmul.mubr.bf16.gmra.mxu1 %v2230_v19  ;;  %v18617_v48 = vpack.c.bf16 %v13991_v32, %v18616_v43 }
 0x43e   :  { %2649 = vmatprep.mubr.bf16.mxu1 %v2236_v53 }
 0x43f   :  { %v2160_v0 = vpop.permute.xlu1 %2159  ;;  %v2197_v35 = vsel %vm1149_vm15, %v18617_v48, %v2135_v56  ;;  %v2162_v19 = vpop.permute.xlu0 %2161  ;;  %v18619_v56 = vpack.c.bf16 %v18605_v60, %v13771_v16  ;;  %v18623_v16 = vpack.c.bf16 %v18616_v43, %v13948_v6 }
 0x440   :  { %v2248_v59 = vsel %vm1149_vm15, %v18615_v41, %v2160_v0  ;;  %v2251_v62 = vsel %vm1149_vm15, %v14016_v7, %v2162_v19  ;;  %v18620_v7 = vpack.c.bf16 %v18609_v58, %v18604_v4 }
 0x442   :  { %2561 = vmatmul.mubr.bf16.gmra.mxu0 %v2181_v61 }
 0x443   :  { %2568 = vmatprep.mubr.bf16.mxu0 %v2215_v37 }
 0x445   :  { %2650 = vmatmul.mubr.bf16.gmra.mxu1 %v2233_v17 }
 0x446   :  { %2657 = vmatprep.mubr.bf16.mxu1 %v2239_v15 }
 0x44a   :  { %2569 = vmatmul.mubr.bf16.gmra.mxu0 %v2185_v18 }
 0x44b   :  { %2576 = vmatprep.mubr.bf16.mxu0 %v2218_v46 }
 0x44d   :  { %2658 = vmatmul.mubr.bf16.gmra.mxu1 %v2236_v53 }
 0x44e   :  { %2665 = vmatprep.mubr.bf16.mxu1 %v2242_v49 }
 0x452   :  { %2577 = vmatmul.mubr.bf16.gmra.mxu0 %v2189_v28 }
 0x453   :  { %2584 = vmatprep.mubr.bf16.mxu0 %v2221_v50 }
 0x455   :  { %2666 = vmatmul.mubr.bf16.gmra.mxu1 %v2239_v15 }
 0x456   :  { %2673 = vmatprep.mubr.bf16.mxu1 %v2245_v20 }
 0x45a   :  { %2585 = vmatmul.mubr.bf16.gmra.mxu0 %v2193_v24 }
 0x45b   :  { %2592 = vmatprep.mubr.bf16.mxu0 %v2224_v47 }
 0x45d   :  { %2674 = vmatmul.mubr.bf16.gmra.mxu1 %v2242_v49 }
 0x45e   :  { %2681 = vmatprep.mubr.bf16.mxu1 %v2248_v59 }
 0x462   :  { %2593 = vmatmul.mubr.bf16.gmra.mxu0 %v2197_v35 }
 0x463   :  { %11318 = vmatprep.mubr.msk.bf16.mxu0 %vm12017_vm5, %v18553_v3 }
 0x465   :  { %2682 = vmatmul.mubr.bf16.gmra.mxu1 %v2245_v20 }
 0x466   :  { %2689 = vmatprep.mubr.bf16.mxu1 %v2251_v62 }
 0x46a   :  { %11319 = vmatmul.mubr.msk.bf16.vlgmr.msra.gmra.mxu0 %vm1149_vm15, %v18618_v14 }
 0x46b   :  { %11322 = vmatprep.mubr.msk.bf16.mxu0 %vm12017_vm5, %v18553_v3 }
 0x46d   :  { %2690 = vmatmul.mubr.bf16.gmra.mxu1 %v2248_v59 }
 0x46e   :  { %2697 = vmatprep.mubr.bf16.mxu1 %v2227_v22 }
 0x472   :  { %11323 = vmatmul.mubr.msk.bf16.gmra.mxu0 %vm1149_vm15, %v18619_v56 }
 0x473   :  { %11326 = vmatprep.mubr.msk.bf16.mxu0 %vm12017_vm5, %v18553_v3 }
 0x475   :  { %2698 = vmatmul.mubr.bf16.gmra.mxu1 %v2251_v62 }
 0x47a   :  { %11327 = vmatmul.mubr.msk.bf16.gmra.mxu0 %vm1149_vm15, %v18620_v7 }
 0x47b   :  { %11330 = vmatprep.mubr.msk.bf16.mxu0 %vm12017_vm5, %v18553_v3 }
 0x482   :  { %11331 = vmatmul.mubr.msk.bf16.gmra.mxu0 %vm1149_vm15, %v18621_v63 }
 0x483   :  { %11334 = vmatprep.mubr.msk.bf16.mxu0 %vm12017_vm5, %v18553_v3 }
 0x48a   :  { %11335 = vmatmul.mubr.msk.bf16.gmra.mxu0 %vm1149_vm15, %v18622_v21 }
 0x48b   :  { %11338 = vmatprep.mubr.msk.bf16.mxu0 %vm12017_vm5, %v18553_v3 }
 0x492   :  { %11339 = vmatmul.mubr.msk.bf16.gmra.mxu0 %vm1149_vm15, %v18623_v16 }
 0x493   :  { %11342 = vmatprep.mubr.msk.bf16.mxu0 %vm12017_vm5, %v18553_v3 }
 0x49a   :  { %11343 = vmatmul.mubr.msk.bf16.gmra.mxu0 %vm1149_vm15, %v18624_v12 }
 0x49b   :  { %11346 = vmatprep.mubr.msk.bf16.mxu0 %vm12017_vm5, %v18553_v3 }
 0x4a2   :  { %11347 = vmatmul.mubr.msk.bf16.gmra.mxu0 %vm1149_vm15, %v2107_v9 }
 0x4a3   :  { %11350 = vmatprep.mubr.msk.bf16.mxu0 %vm12017_vm5, %v18553_v3 }
 0x4aa   :  { %11351 = vmatmul.mubr.msk.bf16.gmra.mxu0 %vm1149_vm15, %v18625_v44 }
 0x4e2   :  { %v10235_v6 = vpop.f32.mrf.mxu0 }
 0x4e4   :  { %v10236_v32 = vpop.f32.mrf.mxu0 }
 0x4e5   :  { %v10237_v11 = vadd.f32 %v10236_v32, %v10235_v6 }
 0x4e6   :  { %v10238_v45 = vpop.f32.mrf.mxu0 }
 0x4e8   :  { %v10239_v57 = vpop.f32.mrf.mxu0 }
 0x4e9   :  { %v10240_v60 = vadd.f32 %v10239_v57, %v10238_v45  ;;  %v11685_v57 = vld [vmem:[%s18294_s4 + $0x198] sm:$0xff]  }
 0x4ea   :  { %v10241_v10 = vpop.f32.mrf.mxu0  ;;  %10372 = vmatprep.subr.bf16.mxu1 %v11685_v57  ;;  %v11693_v57 = vld [vmem:[%s18294_s4 + $0x178] sm:$0xff]  }
 0x4ec   :  { %v10242_v30 = vpop.f32.mrf.mxu0 }
 0x4ed   :  { %v10243_v26 = vadd.f32 %v10242_v30, %v10241_v10  ;;  %v11686_v10 = vld [vmem:[%s18294_s4 + $0x158] sm:$0xff]   ;;  %v11687_v30 = vld [vmem:[%s18294_s4 + $0x190] sm:$0xff]  }
 0x4ee   :  { %v14258_v22 = vpop.f32.mrf.mxu0  ;;  %10373 = vmatpush3.bf16.msra.mxu1 %v11686_v10 }
 0x4ef   :  { %10374 = vmatprep.subr.bf16.mxu1 %v11687_v30  ;;  %v14399_v30 = vld [vmem:[%s18300_s9] ss:$0 sm:$0xff] }
 0x4f0   :  { %v14260_v36 = vpop.f32.mrf.mxu0 }
 0x4f2   :  { %v10247_v25 = vpop.f32.mrf.mxu0 }
 0x4f4   :  { %v10248_v9 = vpop.f32.mrf.mxu0 }
 0x4f5   :  { %v14262_v17 = vadd.f32 %v10248_v9, %v10247_v25  ;;  %v10305_v5 = vpop.f32.mrf.mxu1  ;;  %v11688_v9 = vld [vmem:[%s18294_s4 + $0x150] sm:$0xff]  }
 0x4f6   :  { %v14264_v39 = vpop.f32.mrf.mxu0  ;;  %10375 = vmatpush3.bf16.msra.mxu1 %v11688_v9 }
 0x4f7   :  { %v10306_v1 = vpop.f32.mrf.mxu1 }
 0x4f8   :  { %v10307_v27 = vadd.f32 %v10306_v1, %v10305_v5  ;;  %v14266_v34 = vpop.f32.mrf.mxu0  ;;  %v11689_v1 = vld [vmem:[%s18294_s4 + $0x188] sm:$0xff]  }
 0x4f9   :  { %v10308_v2 = vpop.f32.mrf.mxu1  ;;  %10376 = vmatprep.subr.bf16.mxu1 %v11689_v1 }
 0x4fa   :  { %v10253_v13 = vpop.f32.mrf.mxu0  ;;  %v14268_v53 = vadd.f32 %v10307_v27, %v10237_v11  ;;  %v11699_v27 = vld [vmem:[%s18294_s4 + $0x218] sm:$0xff]  }
 0x4fb   :  { %v10309_v4 = vpop.f32.mrf.mxu1  ;;  %10442 = vmatprep.subr.bf16.mxu0 %v11699_v27  ;;  %v11695_v27 = vld [vmem:[%s18294_s4 + $0x170] sm:$0xff]  }
 0x4fc   :  { %v10310_v29 = vadd.f32 %v10309_v4, %v10308_v2  ;;  %v10254_v61 = vpop.f32.mrf.mxu0  ;;  %v11700_v4 = vld [vmem:[%s18294_s4 + $0x1d8] sm:$0xff]  }
 0x4fd   :  { %v14270_v52 = vadd.f32 %v10254_v61, %v10253_v13  ;;  %v10311_v54 = vpop.f32.mrf.mxu1  ;;  %v11690_v61 = vld [vmem:[%s18294_s4 + $0x148] sm:$0xff]   ;;  %10443 = vmatpush3.bf16.msra.mxu0 %v11700_v4 }
 0x4fe   :  { %v14272_v37 = vpop.f32.mrf.mxu0  ;;  %v14274_v15 = vadd.f32 %v10310_v29, %v10240_v60  ;;  %v11703_v29 = vld [vmem:[%s18294_s4 + $0x210] sm:$0xff]   ;;  %10377 = vmatpush3.bf16.msra.mxu1 %v11690_v61 }
 0x4ff   :  { %v10312_v55 = vpop.f32.mrf.mxu1  ;;  %10444 = vmatprep.subr.bf16.mxu0 %v11703_v29 }
 0x500   :  { %v10313_v58 = vadd.f32 %v10312_v55, %v10311_v54  ;;  %v14276_v40 = vpop.f32.mrf.mxu0  ;;  %v11704_v54 = vld [vmem:[%s18294_s4 + $0x1d0] sm:$0xff]  }
 0x501   :  { %v14278_v18 = vpop.f32.mrf.mxu1  ;;  %10445 = vmatpush3.bf16.msra.mxu0 %v11704_v54 }
 0x502   :  { %v10259_v33 = vpop.f32.mrf.mxu0  ;;  %v14280_v31 = vadd.f32 %v10313_v58, %v10243_v26  ;;  %v11691_v58 = vld [vmem:[%s18294_s4 + $0x180] sm:$0xff]  }
 0x503   :  { %v14282_v46 = vpop.f32.mrf.mxu1  ;;  %10378 = vmatprep.subr.bf16.mxu1 %v11691_v58 }
 0x504   :  { %v10260_v49 = vpop.f32.mrf.mxu0 }
 0x505   :  { %v14284_v51 = vadd.f32 %v10260_v49, %v10259_v33  ;;  %v14286_v28 = vpop.f32.mrf.mxu1  ;;  %v11705_v33 = vld [vmem:[%s18294_s4 + $0x208] sm:$0xff]  }
 0x506   :  { %v14288_v42 = vpop.f32.mrf.mxu0  ;;  %10446 = vmatprep.subr.bf16.mxu0 %v11705_v33  ;;  %v11696_v33 = vld [vmem:[%s18294_s4 + $0x130] sm:$0xff]  }
 0x507   :  { %v14290_v50 = vpop.f32.mrf.mxu1 }
 0x508   :  { %v14292_v20 = vpop.f32.mrf.mxu0 }
 0x509   :  { %v14294_v38 = vpop.f32.mrf.mxu1 }
 0x50a   :  { %v10265_v23 = vpop.f32.mrf.mxu0 }
 0x50b   :  { %v14296_v24 = vpop.f32.mrf.mxu1 }
 0x50c   :  { %v10266_v0 = vpop.f32.mrf.mxu0 }
 0x50d   :  { %v14298_v41 = vadd.f32 %v10266_v0, %v10265_v23  ;;  %v14300_v47 = vpop.f32.mrf.mxu1  ;;  %v14381_v0 = vld [vmem:[%s18299_s8] ss:$0 sm:$0xff] }
 0x50e   :  { %v14302_v59 = vpop.f32.mrf.mxu0 }
 0x50f   :  { %v14304_v43 = vpop.f32.mrf.mxu1 }
 0x510   :  { %v14306_v48 = vpop.f32.mrf.mxu0 }
 0x511   :  { %v14308_v35 = vpop.f32.mrf.mxu1 }
 0x512   :  { %v10271_v19 = vpop.f32.mrf.mxu0 }
 0x513   :  { %v14310_v62 = vpop.f32.mrf.mxu1 }
 0x514   :  { %v10272_v14 = vpop.f32.mrf.mxu0 }
 0x515   :  { %v14312_v56 = vadd.f32 %v10272_v14, %v10271_v19  ;;  %v14314_v7 = vpop.f32.mrf.mxu1  ;;  %v11692_v14 = vld [vmem:[%s18294_s4 + $0x140] sm:$0xff]  }
 0x516   :  { %v14316_v63 = vpop.f32.mrf.mxu0  ;;  %10379 = vmatpush3.bf16.msra.mxu1 %v11692_v14 }
 0x517   :  { %18626 = vst [vmem:[#allocation42_spill] sm:$0xff] %v14312_v56  ;;  %v14320_v16 = vpop.f32.mrf.mxu1  ;;  %10380 = vmatprep.subr.bf16.mxu1 %v11693_v57  ;;  %v18629_v57 = vld [vmem:[#allocation8_spill] sm:$0xff] }
 0x518   :  { %v14318_v21 = vpop.f32.mrf.mxu0 }
 0x519   :  { %v14322_v6 = vpop.f32.mrf.mxu1 }
 0x51a   :  { %v10277_v12 = vpop.f32.mrf.mxu0 }
 0x51b   :  { %v14339_v26 = vpop.f32.mrf.mxu1 }
 0x51c   :  { %v10278_v44 = vpop.f32.mrf.mxu0 }
 0x51d   :  { %v14324_v32 = vadd.f32 %v10278_v44, %v10277_v12  ;;  %v14350_v2 = vpop.f32.mrf.mxu1  ;;  %v11706_v12 = vld [vmem:[%s18294_s4 + $0x1c8] sm:$0xff]  }
 0x51e   :  { %v14326_v11 = vpop.f32.mrf.mxu0  ;;  %10447 = vmatpush3.bf16.msra.mxu0 %v11706_v12  ;;  %v18628_v12 = vld [vmem:[#allocation6_spill] sm:$0xff] }
 0x51f   :  { %v14376_v49 = vpop.f32.mrf.mxu1 }
 0x520   :  { %v14328_v45 = vpop.f32.mrf.mxu0 }
 0x521   :  { %v14393_v10 = vpop.f32.mrf.mxu1 }
 0x522   :  { %v10283_v25 = vpop.f32.mrf.mxu0 }
 0x523   :  { %v14408_v4 = vpop.f32.mrf.mxu1 }
 0x524   :  { %v10284_v5 = vpop.f32.mrf.mxu0 }
 0x525   :  { %v14352_v13 = vadd.f32 %v10284_v5, %v10283_v25  ;;  %v11694_v5 = vld [vmem:[%s18294_s4 + $0x138] sm:$0xff]   ;;  %v14420_v14 = vpop.f32.mrf.mxu1 }
 0x526   :  { %v14357_v60 = vpop.f32.mrf.mxu0  ;;  %10381 = vmatpush3.bf16.msra.mxu1 %v11694_v5 }
 0x527   :  { %18627 = vst [vmem:[#allocation46_spill] sm:$0xff] %v14352_v13  ;;  %10382 = vmatprep.subr.bf16.mxu1 %v11695_v27 }
 0x528   :  { %v14368_v55 = vpop.f32.mrf.mxu0 }
 0x52a   :  { %v2740_v23 = vpop.f32.mrf.mxu0  ;;  %10383 = vmatpush3.bf16.msra.mxu1 %v11696_v33 }
 0x52b   :  { %v2741_v19 = vadd.f32 %v2740_v23, %v14268_v53 }
 0x52c   :  { %v11320_v44 = vpop.f32.mrf.mxu0 }
 0x52d   :  { %v2818_v53 = vmul.f32 %v14381_v0, %v2741_v19  ;;  %v11697_v19 = vld [vmem:[%s18294_s4 + $0x168] sm:$0xff]  }
 0x52e   :  { %v2743_v25 = vpop.f32.mrf.mxu0  ;;  %10384 = vmatprep.subr.bf16.mxu1 %v11697_v19 }
 0x52f   :  { %v2744_v9 = vadd.f32 %v2743_v25, %v14274_v15  ;;  %v2843_v29 = vadd.f32 %v14399_v30, %v2818_v53 }
 0x530   :  { %v11321_v1 = vpop.f32.mrf.mxu0 }
 0x531   :  { %v2819_v61 = vmul.f32 %v14381_v0, %v2744_v9  ;;  %v2861_v44 = vadd.f32 %v2843_v29, %v18628_v12  ;;  %v11698_v1 = vld [vmem:[%s18294_s4 + $0x128] sm:$0xff]   ;;  %v14432_v29 = vpop.f32.mrf.mxu1 }
 0x532   :  { %v2748_v54 = vpop.f32.mrf.mxu0  ;;  %v18631_v12 = vld [vmem:[#allocation7_spill] sm:$0xff]  ;;  %10385 = vmatpush3.bf16.msra.mxu1 %v11698_v1 }
 0x533   :  { %v2844_v15 = vadd.f32 %v14399_v30, %v2819_v61  ;;  %v2749_v58 = vadd.f32 %v2748_v54, %v14280_v31  ;;  %v11701_v61 = vld [vmem:[%s18294_s4 + $0x160] sm:$0xff]   ;;  %v2879_v54 = vmax.f32 %v2861_v44, 0.0 }
 0x534   :  { %v11324_v23 = vpop.f32.mrf.mxu0  ;;  %10386 = vmatprep.subr.bf16.mxu1 %v11701_v61  ;;  %v18635_v44 = vld [vmem:[#allocation10_spill] sm:$0xff] }
 0x535   :  { %v2862_v53 = vadd.f32 %v2844_v15, %v18629_v57  ;;  %v2820_v25 = vmul.f32 %v14381_v0, %v2749_v58  ;;  %v18630_v15 = vld [vmem:[#allocation13_spill] sm:$0xff] }
 0x536   :  { %v2751_v31 = vpop.f32.mrf.mxu0 }
 0x537   :  { %v2880_v9 = vmax.f32 %v2862_v53, 0.0  ;;  %v2845_v5 = vadd.f32 %v14399_v30, %v2820_v25  ;;  %v11702_v53 = vld [vmem:[%s18294_s4 + $0x120] sm:$0xff]   ;;  %v14441_v25 = vpop.f32.mrf.mxu1 }
 0x538   :  { %v11325_v27 = vpop.f32.mrf.mxu0  ;;  %10387 = vmatpush3.bf16.msra.mxu1 %v11702_v53 }
 0x539   :  { %v2863_v58 = vadd.f32 %v2845_v5, %v18630_v15  ;;  %v14436_v57 = vmul.f32 %v2880_v9, %v18631_v12  ;;  %v18633_v27 = vld [vmem:[#allocation4_spill] sm:$0xff]  ;;  %11354 = vmatprep.subr.bf16.mxu1 %v18553_v3 }
 0x53a   :  { %v2756_v23 = vpop.f32.mrf.mxu0  ;;  %v14444_v13 = vmul.f32 %v2879_v54, %v18633_v27 }
 0x53b   :  { %18632 = vst [vmem:[#allocation47_spill] sm:$0xff] %v14436_v57  ;;  %v2881_v33 = vmax.f32 %v2863_v58, 0.0  ;;  %v2989_v9 = vrot.slane %v14436_v57, 4  ;;  %v14452_v58 = vpop.f32.mrf.mxu1 }
 0x53c   :  { %v11328_v19 = vpop.f32.mrf.mxu0  ;;  %18634 = vst [vmem:[#allocation45_spill] sm:$0xff] %v14444_v13  ;;  %v18391_v61 = vrot.slane %v14444_v13, 4 }
 0x53d   :  { %v14447_v56 = vmul.f32 %v2881_v33, %v18635_v44  ;;  %v10347_v44 = vpop.f32.mrf.mxu1 }
 0x53e   :  { %v2759_v5 = vpop.f32.mrf.mxu0  ;;  %v14467_v33 = vsel %vm206_vm2, %v18391_v61, %v2989_v9 }
 0x53f   :  { %18636 = vst [vmem:[#allocation49_spill] sm:$0xff] %v14447_v56  ;;  %v18386_v1 = vrot.slane %v14447_v56, 4  ;;  %18639 = vst [vmem:[#allocation41_spill] sm:$0xff] %v14467_v33  ;;  %v10348_v3 = vpop.f32.mrf.mxu1 }
 0x540   :  { %v11329_v15 = vpop.f32.mrf.mxu0 }
 0x541   :  { %v14461_v54 = vsel %vm206_vm2, %v2989_v9, %v18386_v1  ;;  %v10316_v1 = vadd.f32 %v14282_v46, %v14278_v18  ;;  %v10350_v13 = vpop.f32.mrf.mxu1  ;;  %v10246_v9 = vadd.f32 %v14260_v36, %v14258_v22  ;;  %v10322_v36 = vadd.f32 %v14296_v24, %v14294_v38 }
 0x542   :  { %v14455_v19 = vpop.f32.mrf.mxu0  ;;  %18638 = vst [vmem:[#allocation48_spill] sm:$0xff] %v14461_v54  ;;  %v10258_v38 = vadd.f32 %v14276_v40, %v14272_v37  ;;  %v10334_v24 = vadd.f32 %v14339_v26, %v14322_v6  ;;  %v10270_v37 = vadd.f32 %v14306_v48, %v14302_v59  ;;  %v18643_v40 = vld [vmem:[#allocation17_spill] sm:$0xff]  ;;  %v10276_v26 = vadd.f32 %v14318_v21, %v14316_v63 }
 0x543   :  { %18637 = vst [vmem:[#allocation50_spill] sm:$0xff] %v14455_v19  ;;  %v10351_v61 = vpop.f32.mrf.mxu1  ;;  %v2647_v15 = vadd.f32 %v10316_v1, %v10246_v9  ;;  %v10346_v63 = vadd.f32 %v14452_v58, %v14441_v25 }
 0x544   :  { %v11332_v53 = vpop.f32.mrf.mxu0 }
 0x545   :  { %v2752_v33 = vadd.f32 %v2751_v31, %v2647_v15  ;;  %v10252_v31 = vadd.f32 %v14266_v34, %v14264_v39  ;;  %v10337_v39 = vadd.f32 %v14376_v49, %v14350_v2  ;;  %v10340_v34 = vadd.f32 %v14408_v4, %v14393_v10 }
 0x546   :  { %v14471_v12 = vpop.f32.mrf.mxu0  ;;  %v10352_v10 = vadd.f32 %v10351_v61, %v10350_v13 }
 0x547   :  { %18640 = vst [vmem:[#allocation40_spill] sm:$0xff] %v14471_v12  ;;  %v2821_v18 = vmul.f32 %v14381_v0, %v2752_v33  ;;  %v2676_v21 = vadd.f32 %v10337_v39, %v14298_v41 }
 0x548   :  { %v11333_v27 = vpop.f32.mrf.mxu0 }
 0x549   :  { %v10319_v27 = vadd.f32 %v14290_v50, %v14286_v28  ;;  %v10325_v28 = vadd.f32 %v14304_v43, %v14300_v47  ;;  %v2846_v50 = vadd.f32 %v14399_v30, %v2821_v18 }
 0x54a   :  { %v14473_v56 = vpop.f32.mrf.mxu0  ;;  %v18647_v58 = vld [vmem:[#allocation50_spill] sm:$0xff] }
 0x54b   :  { %18641 = vst [vmem:[#allocation44_spill] sm:$0xff] %v14473_v56  ;;  %v2652_v46 = vadd.f32 %v10319_v27, %v14262_v17  ;;  %v10331_v17 = vadd.f32 %v14320_v16, %v14314_v7  ;;  %v2864_v16 = vadd.f32 %v2846_v50, %v18643_v40  ;;  %v18646_v27 = vld [vmem:[#allocation18_spill] sm:$0xff]  ;;  %v18651_v50 = vld [vmem:[#allocation15_spill] sm:$0xff] }
 0x54c   :  { %v11336_v19 = vpop.f32.mrf.mxu0 }
 0x54d   :  { %v10353_v19 = vpop.f32.mrf.mxu1  ;;  %v2757_v22 = vadd.f32 %v2756_v23, %v2652_v46  ;;  %v2668_v2 = vadd.f32 %v10331_v17, %v14284_v51  ;;  %v10288_v51 = vadd.f32 %v14368_v55, %v14357_v60  ;;  %v2882_v13 = vmax.f32 %v2864_v16, 0.0 }
 0x54e   :  { %v14477_v57 = vpop.f32.mrf.mxu0 }
 0x54f   :  { %18642 = vst [vmem:[#allocation43_spill] sm:$0xff] %v14477_v57  ;;  %v10354_v12 = vpop.f32.mrf.mxu1  ;;  %v2822_v43 = vmul.f32 %v14381_v0, %v2757_v22  ;;  %v18648_v22 = vld [vmem:[#allocation40_spill] sm:$0xff] }
 0x550   :  { %v11337_v53 = vpop.f32.mrf.mxu0 }
 0x551   :  { %v10356_v47 = vpop.f32.mrf.mxu1  ;;  %v2847_v4 = vadd.f32 %v14399_v30, %v2822_v43 }
 0x552   :  { %v14481_v54 = vpop.f32.mrf.mxu0 }
 0x553   :  { %v2865_v25 = vadd.f32 %v2847_v4, %v18646_v27 }
 0x554   :  { %v11340_v8 = vpop.f32.mrf.mxu0 }
 0x555   :  { %v10328_v8 = vadd.f32 %v14310_v62, %v14308_v35  ;;  %v10264_v35 = vadd.f32 %v14292_v20, %v14288_v42  ;;  %v2655_v62 = vadd.f32 %v10322_v36, %v10252_v31  ;;  %v10343_v42 = vadd.f32 %v14432_v29, %v14420_v14 }
 0x556   :  { %v14485_v56 = vpop.f32.mrf.mxu0  ;;  %v2679_v14 = vadd.f32 %v10340_v34, %v10270_v37  ;;  %v18649_v55 = vld [vmem:[#allocation43_spill] sm:$0xff]  ;;  %v14541_v31 = vmul.f32 %v2882_v13, %v18651_v50  ;;  %v2883_v37 = vmax.f32 %v2865_v25, 0.0 }
 0x557   :  { %v2663_v6 = vadd.f32 %v10328_v8, %v10258_v38  ;;  %v2760_v20 = vadd.f32 %v2759_v5, %v2655_v62  ;;  %v2671_v59 = vadd.f32 %v10334_v24, %v10264_v35  ;;  %v10355_v5 = vadd.f32 %v10354_v12, %v10353_v19  ;;  %v18653_v38 = vld [vmem:[#allocation46_spill] sm:$0xff] }
 0x558   :  { %v11341_v57 = vpop.f32.mrf.mxu0  ;;  %v2687_v19 = vadd.f32 %v10346_v63, %v10276_v26  ;;  %18652 = vst [vmem:[#allocation6_spill] sm:$0xff] %v14541_v31 }
 0x559   :  { %v10349_v57 = vadd.f32 %v10348_v3, %v10347_v44  ;;  %v2660_v3 = vadd.f32 %v10325_v28, %v14270_v52  ;;  %v10357_v44 = vpop.f32.mrf.mxu1  ;;  %v10282_v52 = vadd.f32 %v14328_v45, %v14326_v11  ;;  %v2823_v15 = vmul.f32 %v14381_v0, %v2760_v20  ;;  %v18645_v11 = vld [vmem:[#allocation47_spill] sm:$0xff]  ;;  %v18650_v28 = vld [vmem:[#allocation45_spill] sm:$0xff] }
 0x55a   :  { %v14491_v1 = vpop.f32.mrf.mxu0  ;;  %v10358_v33 = vadd.f32 %v10357_v44, %v10356_v47  ;;  %v3034_v45 = vrot.slane %v18645_v11, 6  ;;  %v2768_v60 = vadd.f32 %v18648_v22, %v2663_v6  ;;  %v2776_v12 = vadd.f32 %v18649_v55, %v2671_v59  ;;  %v18654_v47 = vld [vmem:[#allocation44_spill] sm:$0xff]  ;;  %v18662_v55 = vld [vmem:[#allocation5_spill] sm:$0xff] }
 0x55b   :  { %v2692_v48 = vadd.f32 %v10349_v57, %v14324_v32  ;;  %v18644_v32 = vld [vmem:[#allocation42_spill] sm:$0xff]  ;;  %v2765_v41 = vadd.f32 %v18647_v58, %v2660_v3  ;;  %v2695_v46 = vadd.f32 %v10352_v10, %v10282_v52  ;;  %v3033_v8 = vrot.slane %v18650_v28, 6  ;;  %v18656_v3 = vld [vmem:[#allocation49_spill] sm:$0xff] }
 0x55c   :  { %v11344_v23 = vpop.f32.mrf.mxu0  ;;  %v2684_v9 = vadd.f32 %v10343_v42, %v18644_v32  ;;  %v2700_v24 = vadd.f32 %v10355_v5, %v18653_v38  ;;  %v2848_v57 = vadd.f32 %v14399_v30, %v2823_v15  ;;  %v2773_v43 = vadd.f32 %v18654_v47, %v2668_v2  ;;  %v18657_v10 = vld [vmem:[#allocation26_spill] sm:$0xff]  ;;  %v18665_v38 = vld [vmem:[#allocation33_spill] sm:$0xff] }
 0x55d   :  { %v2703_v39 = vadd.f32 %v10358_v33, %v10288_v51  ;;  %v14553_v62 = vsel %vm252_vm0, %v3033_v8, %v3034_v45  ;;  %v2824_v40 = vmul.f32 %v14381_v0, %v2765_v41  ;;  %v3035_v6 = vrot.slane %v18656_v3, 6  ;;  %v18658_v52 = vld [vmem:[#allocation22_spill] sm:$0xff] }
 0x55e   :  { %v2791_v7 = vpop.f32.mrf.mxu0  ;;  %v2825_v26 = vmul.f32 %v14381_v0, %v2768_v60  ;;  %v2827_v42 = vmul.f32 %v14381_v0, %v2776_v12  ;;  %v2784_v20 = vadd.f32 %v14485_v56, %v2679_v14  ;;  %v2866_v63 = vadd.f32 %v2848_v57, %v18658_v52  ;;  %v18661_v14 = vld [vmem:[#allocation25_spill] sm:$0xff]  ;;  %v18666_v57 = vld [vmem:[#allocation31_spill] sm:$0xff] }
 0x55f   :  { %v2792_v2 = vadd.f32 %v2791_v7, %v2687_v19  ;;  %v2781_v51 = vadd.f32 %v14481_v54, %v2676_v21  ;;  %v2789_v13 = vadd.f32 %v14491_v1, %v2684_v9  ;;  %v2849_v7 = vadd.f32 %v14399_v30, %v2824_v40  ;;  %v18664_v19 = vld [vmem:[#allocation28_spill] sm:$0xff] }
 0x560   :  { %v11345_v49 = vpop.f32.mrf.mxu0  ;;  %v2850_v32 = vadd.f32 %v14399_v30, %v2825_v26  ;;  %v2829_v27 = vmul.f32 %v14381_v0, %v2784_v20  ;;  %v2884_v41 = vmax.f32 %v2866_v63, 0.0  ;;  %v18668_v40 = vld [vmem:[#allocation24_spill] sm:$0xff]  ;;  %v18675_v63 = vld [vmem:[#allocation30_spill] sm:$0xff] }
 0x561   :  { %v2831_v54 = vmul.f32 %v14381_v0, %v2792_v2  ;;  %v2830_v22 = vmul.f32 %v14381_v0, %v2789_v13  ;;  %v18672_v2 = vld [vmem:[#allocation34_spill] sm:$0xff] }
 0x562   :  { %v2796_v29 = vpop.f32.mrf.mxu0  ;;  %v2868_v47 = vadd.f32 %v2850_v32, %v18666_v57  ;;  %v18677_v32 = vld [vmem:[#allocation37_spill] sm:$0xff] }
 0x563   :  { %v2797_v61 = vadd.f32 %v2796_v29, %v2692_v48  ;;  %v3036_v48 = vrot.slane %v14541_v31, 6  ;;  %v2826_v29 = vmul.f32 %v14381_v0, %v2773_v43  ;;  %v18667_v43 = vld [vmem:[#allocation32_spill] sm:$0xff] }
 0x564   :  { %v11348_v53 = vpop.f32.mrf.mxu0 }
 0x565   :  { %v2832_v18 = vmul.f32 %v14381_v0, %v2797_v61  ;;  %v18659_v61 = vld [vmem:[#allocation11_spill] sm:$0xff]  ;;  %v2852_v53 = vadd.f32 %v14399_v30, %v2827_v42  ;;  %v18670_v42 = vld [vmem:[#allocation20_spill] sm:$0xff] }
 0x566   :  { %v2799_v36 = vpop.f32.mrf.mxu0  ;;  %v14569_v56 = vmul.f32 %v2883_v37, %v18659_v61  ;;  %v2856_v37 = vadd.f32 %v14399_v30, %v2831_v54  ;;  %v14605_v20 = vmul.f32 %v2884_v41, %v18670_v42 }
 0x567   :  { %v2857_v17 = vadd.f32 %v14399_v30, %v2832_v18  ;;  %v2800_v23 = vadd.f32 %v2799_v36, %v2695_v46  ;;  %v2851_v18 = vadd.f32 %v14399_v30, %v2826_v29  ;;  %v2828_v46 = vmul.f32 %v14381_v0, %v2781_v51 }
 0x568   :  { %v11349_v35 = vpop.f32.mrf.mxu0  ;;  %18660 = vst [vmem:[#allocation8_spill] sm:$0xff] %v14569_v56  ;;  %18671 = vst [vmem:[#allocation42_spill] sm:$0xff] %v14605_v20  ;;  %v3037_v51 = vrot.slane %v14569_v56, 6 }
 0x569   :  { %v2833_v16 = vmul.f32 %v14381_v0, %v2800_v23  ;;  %v2875_v4 = vadd.f32 %v2857_v17, %v18657_v10  ;;  %v14593_v23 = vsel %vm252_vm0, %v3035_v6, %v3036_v48  ;;  %v2870_v35 = vadd.f32 %v2852_v53, %v18667_v43 }
 0x56a   :  { %v2804_v49 = vpop.f32.mrf.mxu0  ;;  %v2853_v10 = vadd.f32 %v14399_v30, %v2828_v46  ;;  %v2874_v53 = vadd.f32 %v2856_v37, %v18677_v32  ;;  %v11710_v46 = vld [vmem:[%s18294_s4 + $0x1f8] sm:$0xff]  }
 0x56b   :  { %v2858_v44 = vadd.f32 %v14399_v30, %v2833_v16  ;;  %v2805_v59 = vadd.f32 %v2804_v49, %v2700_v24  ;;  %v2893_v1 = vmax.f32 %v2875_v4, 0.0  ;;  %v2867_v24 = vadd.f32 %v2849_v7, %v18665_v38 }
 0x56c   :  { %v11352_v5 = vpop.f32.mrf.mxu0  ;;  %v2869_v49 = vadd.f32 %v2851_v18, %v18672_v2  ;;  %v2855_v4 = vadd.f32 %v14399_v30, %v2830_v22  ;;  %v3038_v18 = vrot.slane %v14605_v20, 6  ;;  %v11711_v22 = vld [vmem:[%s18294_s4 + $0x1b8] sm:$0xff]   ;;  %v2892_v37 = vmax.f32 %v2874_v53, 0.0 }
 0x56d   :  { %v2876_v33 = vadd.f32 %v2858_v44, %v18661_v14  ;;  %v2834_v15 = vmul.f32 %v14381_v0, %v2805_v59  ;;  %v11707_v44 = vld [vmem:[%s18294_s4 + $0x200] sm:$0xff]   ;;  %v18673_v59 = vld [vmem:[#allocation12_spill] sm:$0xff]  ;;  %v2885_v7 = vmax.f32 %v2867_v24, 0.0  ;;  %v2886_v14 = vmax.f32 %v2868_v47, 0.0 }
 0x56e   :  { %v2807_v21 = vpop.f32.mrf.mxu0  ;;  %v11708_v5 = vld [vmem:[%s18294_s4 + $0x1c0] sm:$0xff]   ;;  %10448 = vmatprep.subr.bf16.mxu0 %v11707_v44  ;;  %v18688_v44 = vld [vmem:[#allocation16_spill] sm:$0xff] }
 0x56f   :  { %v2894_v9 = vmax.f32 %v2876_v33, 0.0  ;;  %v2859_v25 = vadd.f32 %v14399_v30, %v2834_v15  ;;  %v2808_v58 = vadd.f32 %v2807_v21, %v2703_v39  ;;  %v2854_v39 = vadd.f32 %v14399_v30, %v2829_v27  ;;  %v18676_v33 = vld [vmem:[#allocation36_spill] sm:$0xff]  ;;  %10449 = vmatpush3.bf16.msra.mxu0 %v11708_v5  ;;  %v18682_v24 = vld [vmem:[#allocation23_spill] sm:$0xff] }
 0x570   :  { %v11353_v60 = vpop.f32.mrf.mxu0  ;;  %v14650_v57 = vmul.f32 %v2886_v14, %v18682_v24  ;;  %v18684_v47 = vld [vmem:[#allocation27_spill] sm:$0xff]  ;;  %10450 = vmatprep.subr.bf16.mxu0 %v11710_v46 }
 0x571   :  { %v14583_v12 = vmul.f32 %v2894_v9, %v18662_v55  ;;  %v2877_v36 = vadd.f32 %v2859_v25, %v18664_v19  ;;  %v2835_v17 = vmul.f32 %v14381_v0, %v2808_v58  ;;  %v14601_v0 = vmul.f32 %v2893_v1, %v18668_v40  ;;  %v18678_v9 = vld [vmem:[#allocation38_spill] sm:$0xff]  ;;  %v18679_v58 = vld [vmem:[#allocation39_spill] sm:$0xff]  ;;  %v18680_v60 = vld [vmem:[#allocation9_spill] sm:$0xff] }
 0x572   :  { %v2872_v15 = vadd.f32 %v2854_v39, %v18676_v33  ;;  %v2887_v1 = vmax.f32 %v2869_v49, 0.0  ;;  %v2871_v25 = vadd.f32 %v2853_v10, %v18678_v9  ;;  %v2873_v41 = vadd.f32 %v2855_v4, %v18679_v58  ;;  %18683 = vst [vmem:[#allocation40_spill] sm:$0xff] %v14650_v57  ;;  %v11712_v49 = vld [vmem:[%s18294_s4 + $0x1f0] sm:$0xff]   ;;  %v18686_v10 = vld [vmem:[#allocation14_spill] sm:$0xff]  ;;  %v18692_v9 = vld [vmem:[#allocation35_spill] sm:$0xff] }
 0x573   :  { %18663 = vst [vmem:[#allocation13_spill] sm:$0xff] %v14583_v12  ;;  %18669 = vst [vmem:[#allocation17_spill] sm:$0xff] %v14601_v0  ;;  %v2895_v16 = vmax.f32 %v2877_v36, 0.0  ;;  %v2860_v26 = vadd.f32 %v14399_v30, %v2835_v17  ;;  %v3003_v13 = vrot.slane %v14583_v12, 4  ;;  %v2888_v30 = vmax.f32 %v2870_v35, 0.0  ;;  %10451 = vmatpush3.bf16.msra.mxu0 %v11711_v22  ;;  %v11713_v33 = vld [vmem:[%s18294_s4 + $0x1b0] sm:$0xff]  }
 0x574   :  { %v18398_v21 = vrot.slane %v14601_v0, 4  ;;  %v2890_v35 = vmax.f32 %v2872_v15, 0.0  ;;  %v14664_v4 = vmul.f32 %v2885_v7, %v18686_v10  ;;  %v2891_v5 = vmax.f32 %v2873_v41, 0.0  ;;  %10452 = vmatprep.subr.bf16.mxu0 %v11712_v49  ;;  %v11715_v46 = vld [vmem:[%s18294_s4 + $0x1a8] sm:$0xff]  }
 0x575   :  { %v14614_v52 = vmul.f32 %v2895_v16, %v18673_v59  ;;  %v2878_v29 = vadd.f32 %v2860_v26, %v18675_v63  ;;  %v14653_v43 = vmul.f32 %v2888_v30, %v18684_v47  ;;  %v3048_v26 = vrot.slane %v14583_v12, 6 }
 0x576   :  { %v14647_v38 = vsel %vm206_vm2, %v18398_v21, %v3003_v13  ;;  %18687 = vst [vmem:[#allocation46_spill] sm:$0xff] %v14664_v4  ;;  %v14667_v63 = vmul.f32 %v2887_v1, %v18688_v44  ;;  %v3040_v53 = vrot.slane %v14650_v57, 6  ;;  %v18694_v41 = vrot.slane %v18650_v28, 4 }
 0x577   :  { %18674 = vst [vmem:[#allocation18_spill] sm:$0xff] %v14614_v52  ;;  %v2896_v27 = vmax.f32 %v2878_v29, 0.0  ;;  %v3004_v54 = vrot.slane %v14614_v52, 4  ;;  %v3049_v36 = vrot.slane %v14614_v52, 6  ;;  %18685 = vst [vmem:[#allocation43_spill] sm:$0xff] %v14653_v43  ;;  %v2889_v29 = vmax.f32 %v2871_v25, 0.0  ;;  %10453 = vmatpush3.bf16.msra.mxu0 %v11713_v33 }
 0x578   :  { %18689 = vst [vmem:[#allocation44_spill] sm:$0xff] %v14667_v63  ;;  %v14694_v25 = vmul.f32 %v2892_v37, %v18692_v9  ;;  %v3042_v58 = vrot.slane %v14653_v43, 6  ;;  %v3064_v22 = vsel %vm252_vm0, %v3036_v48, %v3037_v51  ;;  %v18695_v37 = vld [vmem:[#allocation19_spill] sm:$0xff]  ;;  %v3039_v48 = vrot.slane %v14664_v4, 6 }
 0x579   :  { %v14636_v19 = vmul.f32 %v2896_v27, %v18680_v60  ;;  %v14641_v17 = vsel %vm206_vm2, %v3003_v13, %v3004_v54  ;;  %v3063_v13 = vsel %vm252_vm0, %v3037_v51, %v3038_v18  ;;  %v3052_v7 = vsel %vm252_vm0, %v3048_v26, %v3049_v36  ;;  %v18690_v27 = vld [vmem:[#allocation29_spill] sm:$0xff] }
 0x57a   :  { %v14691_v1 = vmul.f32 %v2890_v35, %v18690_v27  ;;  %18693 = vst [vmem:[#allocation22_spill] sm:$0xff] %v14694_v25  ;;  %v3072_v51 = vpack.c.bf16 %v3063_v13, %v3064_v22  ;;  %v3062_v13 = vsel %vm252_vm0, %v3038_v18, %v3039_v48  ;;  %v3091_v22 = vrot.slane %v14569_v56, 2 }
 0x57b   :  { %18681 = vst [vmem:[#allocation50_spill] sm:$0xff] %v14636_v19  ;;  %v3050_v16 = vrot.slane %v14636_v19, 6  ;;  %v3005_v2 = vrot.slane %v14636_v19, 4 }
 0x57c   :  { %18691 = vst [vmem:[#allocation26_spill] sm:$0xff] %v14691_v1 }
 0x57d   :  { %v3068_v14 = vsel %vm252_vm0, %v3050_v16, %v3033_v8  ;;  %v3051_v30 = vsel %vm252_vm0, %v3049_v36, %v3050_v16  ;;  %v14688_v8 = vsel %vm206_vm2, %v3004_v54, %v3005_v2  ;;  %v11714_v54 = vld [vmem:[%s18294_s4 + $0x1e8] sm:$0xff]   ;;  %v3066_v36 = vsel %vm252_vm0, %v3034_v45, %v3035_v6 }
 0x57e   :  { %v3070_v15 = vpack.c.bf16 %v14553_v62, %v3068_v14  ;;  %v3069_v32 = vpack.c.bf16 %v3051_v30, %v3052_v7  ;;  %v14701_v62 = vsel %vm206_vm2, %v3005_v2, %v18694_v41  ;;  %v14724_v16 = vmul.f32 %v2889_v29, %v18695_v37  ;;  %v18697_v2 = vld [vmem:[#allocation21_spill] sm:$0xff]  ;;  %10454 = vmatprep.subr.bf16.mxu0 %v11714_v54 }
 0x57f   :  { %v14727_v49 = vmul.f32 %v2891_v5, %v18697_v2  ;;  %v3041_v14 = vrot.slane %v14667_v63, 6  ;;  %v3071_v30 = vpack.c.bf16 %v14593_v23, %v3066_v36  ;;  %v3061_v6 = vsel %vm252_vm0, %v3039_v48, %v3040_v53  ;;  %10455 = vmatpush3.bf16.msra.mxu0 %v11715_v46  ;;  %v11716_v5 = vld [vmem:[%s18294_s4 + $0x1e0] sm:$0xff]  }
 0x580   :  { %3152 = vrot.lane.b32.xlu1 %v3070_v15, %s12019_s30  ;;  %3150 = vrot.lane.b32.xlu0 %v3069_v32, %s12019_s30  ;;  %18696 = vst [vmem:[#allocation25_spill] sm:$0xff] %v14724_v16  ;;  %v3044_v29 = vrot.slane %v14691_v1, 6  ;;  %v3046_v7 = vrot.slane %v14694_v25, 6  ;;  %v3043_v15 = vrot.slane %v14724_v16, 6  ;;  %v11717_v32 = vld [vmem:[%s18294_s4 + $0x1a0] sm:$0xff]   ;;  %v3073_v54 = vpack.c.bf16 %v3061_v6, %v3062_v13 }
 0x581   :  { %18698 = vst [vmem:[#allocation28_spill] sm:$0xff] %v14727_v49  ;;  %v3059_v45 = vsel %vm252_vm0, %v3041_v14, %v3042_v58  ;;  %v3060_v23 = vsel %vm252_vm0, %v3040_v53, %v3041_v14  ;;  %v3045_v33 = vrot.slane %v14727_v49, 6  ;;  %10456 = vmatprep.subr.bf16.mxu0 %v11716_v5  ;;  %v3090_v14 = vrot.slane %v14541_v31, 2 }
 0x582   :  { %v3074_v41 = vpack.c.bf16 %v3059_v45, %v3060_v23  ;;  %v3057_v53 = vsel %vm252_vm0, %v3043_v15, %v3044_v29  ;;  %v3058_v36 = vsel %vm252_vm0, %v3042_v58, %v3043_v15  ;;  %v3047_v48 = vrot.slane %v14601_v0, 6 }
 0x583   :  { %v3055_v46 = vsel %vm252_vm0, %v3045_v33, %v3046_v7  ;;  %10457 = vmatpush3.bf16.msra.mxu0 %v11717_v32  ;;  %v3056_v18 = vsel %vm252_vm0, %v3044_v29, %v3045_v33  ;;  %v3089_v45 = vrot.slane %v18656_v3, 2  ;;  %v3118_v6 = vsel %vm307_vm1, %v3090_v14, %v3091_v22 }
 0x584   :  { %3156 = vrot.lane.b32.xlu0 %v3072_v51, %s12019_s30  ;;  %3154 = vrot.lane.b32.xlu1 %v3071_v30, %s12019_s30  ;;  %v3076_v51 = vpack.c.bf16 %v3055_v46, %v3056_v18  ;;  %v3075_v30 = vpack.c.bf16 %v3057_v53, %v3058_v36  ;;  %v3053_v5 = vsel %vm252_vm0, %v3047_v48, %v3048_v26  ;;  %v3093_v29 = vrot.slane %v14664_v4, 2 }
 0x585   :  { %v3119_v58 = vsel %vm307_vm1, %v3089_v45, %v3090_v14  ;;  %v3054_v23 = vsel %vm252_vm0, %v3046_v7, %v3047_v48  ;;  %v3092_v13 = vrot.slane %v14605_v20, 2  ;;  %v3088_v33 = vrot.slane %v18645_v11, 2 }
 0x586   :  { %v3124_v15 = vpack.c.bf16 %v3118_v6, %v3119_v58  ;;  %v3077_v32 = vpack.c.bf16 %v3053_v5, %v3054_v23  ;;  %v3087_v26 = vrot.slane %v18650_v28, 2  ;;  %v3095_v46 = vrot.slane %v14667_v63, 2 }
 0x587   :  { %v3097_v53 = vrot.slane %v14724_v16, 2  ;;  %v3117_v7 = vsel %vm307_vm1, %v3091_v22, %v3092_v13  ;;  %v3096_v36 = vrot.slane %v14653_v43, 2  ;;  %v3094_v14 = vrot.slane %v14650_v57, 2 }
 0x588   :  { %3160 = vrot.lane.b32.xlu0 %v3074_v41, %s12019_s30  ;;  %3158 = vrot.lane.b32.xlu1 %v3073_v54, %s12019_s30  ;;  %v3116_v41 = vsel %vm307_vm1, %v3092_v13, %v3093_v29  ;;  %v3120_v54 = vsel %vm307_vm1, %v3088_v33, %v3089_v45  ;;  %v3121_v18 = vsel %vm307_vm1, %v3087_v26, %v3088_v33  ;;  %v3099_v6 = vrot.slane %v14727_v49, 2 }
 0x589   :  { %v3125_v48 = vpack.c.bf16 %v3116_v41, %v3117_v7  ;;  %v3114_v45 = vsel %vm307_vm1, %v3094_v14, %v3095_v46  ;;  %v3101_v5 = vrot.slane %v14601_v0, 2  ;;  %v3113_v22 = vsel %vm307_vm1, %v3095_v46, %v3096_v36 }
 0x58a   :  { %v3115_v58 = vsel %vm307_vm1, %v3093_v29, %v3094_v14  ;;  %v3100_v23 = vrot.slane %v14694_v25, 2  ;;  %v3098_v13 = vrot.slane %v14691_v1, 2  ;;  %v3104_v7 = vrot.slane %v14636_v19, 2 }
 0x58c   :  { %3164 = vrot.lane.b32.xlu0 %v3076_v51, %s12019_s30  ;;  %3162 = vrot.lane.b32.xlu1 %v3075_v30, %s12019_s30  ;;  %v3123_v51 = vpack.c.bf16 %v3120_v54, %v3121_v18  ;;  %v3112_v30 = vsel %vm307_vm1, %v3096_v36, %v3097_v53  ;;  %v3110_v41 = vsel %vm307_vm1, %v3098_v13, %v3099_v6  ;;  %v3103_v54 = vrot.slane %v14614_v52, 2 }
 0x58d   :  { %v3127_v33 = vpack.c.bf16 %v3112_v30, %v3113_v22  ;;  %v3109_v29 = vsel %vm307_vm1, %v3099_v6, %v3100_v23  ;;  %v3111_v46 = vsel %vm307_vm1, %v3097_v53, %v3098_v13  ;;  %v3102_v18 = vrot.slane %v14583_v12, 2 }
 0x58e   :  { %v3128_v14 = vpack.c.bf16 %v3110_v41, %v3111_v46  ;;  %v3024_v22 = vpack.c.bf16 %v14688_v8, %v14641_v17  ;;  %v18700_v46 = vld [vmem:[#allocation41_spill] sm:$0xff] }
 0x58f   :  { %v3106_v30 = vsel %vm307_vm1, %v3102_v18, %v3103_v54  ;;  %v3107_v53 = vsel %vm307_vm1, %v3101_v5, %v3102_v18  ;;  %v3025_v18 = vpack.c.bf16 %v18700_v46, %v14701_v62 }
 0x590   :  { %3179 = vrot.lane.b32.xlu0 %v3124_v15, %s12019_s30  ;;  %3166 = vrot.lane.b32.xlu1 %v3077_v32, %s12019_s30  ;;  %v3126_v15 = vpack.c.bf16 %v3114_v45, %v3115_v58  ;;  %v3108_v32 = vsel %vm307_vm1, %v3100_v23, %v3101_v5  ;;  %v3130_v6 = vpack.c.bf16 %v3106_v30, %v3107_v53  ;;  %v11709_v5 = vld [vmem:[%s18294_s4 + $0x238] sm:$0xff]  }
 0x591   :  { %v3129_v36 = vpack.c.bf16 %v3108_v32, %v3109_v29  ;;  %v18699_v29 = vmov 0.0   ;;  %v3080_v30 = vpack.c.bf16 %v14541_v31, %v18656_v3 }
 0x594   :  { %3181 = vrot.lane.b32.xlu0 %v3125_v48, %s12019_s30  ;;  %3177 = vrot.lane.b32.xlu1 %v3123_v51, %s12019_s30  ;;  %v3105_v48 = vsel %vm307_vm1, %v3103_v54, %v3104_v7  ;;  %v3122_v51 = vsel %vm307_vm1, %v3104_v7, %v3087_v26  ;;  %v14839_v26 = vpack.c.bf16 %v14636_v19, %v14614_v52  ;;  %v11718_v54 = vld [vmem:[%s18294_s4 + $0x230] sm:$0xff]   ;;  %v11721_v52 = vld [vmem:[%s18296_s7 + $0x198] sm:$0xff]  }
 0x595   :  { %v3131_v45 = vpack.c.bf16 %v3122_v51, %v3105_v48  ;;  %v11719_v48 = vld [vmem:[%s18294_s4 + $0x228] sm:$0xff]   ;;  %v2991_v51 = vrot.slane %v14541_v31, 4  ;;  %10525 = vmatprep.subr.bf16.mxu0 %v11721_v52  ;;  %v11736_v52 = vld [vmem:[%s18296_s7 + $0x1d8] sm:$0xff]  }
 0x598   :  { %3185 = vrot.lane.b32.xlu0 %v3127_v33, %s12019_s30  ;;  %3183 = vrot.lane.b32.xlu1 %v3126_v15, %s12019_s30  ;;  %v3079_v15 = vpack.c.bf16 %v18645_v11, %v18650_v28  ;;  %v11726_v11 = vld [vmem:[%s18296_s7 + $0x148] sm:$0xff]   ;;  %v11740_v28 = vld [vmem:[%s18296_s7 + $0x1d0] sm:$0xff]  }
 0x59c   :  { %3189 = vrot.lane.b32.xlu0 %v3129_v36, %s12019_s30  ;;  %3187 = vrot.lane.b32.xlu1 %v3128_v14, %s12019_s30 }
 0x5a0   :  { %3193 = vrot.lane.b32.xlu0 %v3131_v45, %s12019_s30  ;;  %3191 = vrot.lane.b32.xlu1 %v3130_v6, %s12019_s30 }
 0x5f2   :  { %v3153_v58 = vpop.permute.xlu1 %3152  ;;  %v14841_v23 = vpop.permute.xlu0 %3150 }
 0x5f3   :  { %v3197_v13 = vsel %vm1149_vm15, %v3024_v22, %v14841_v23  ;;  %v3232_v33 = vsel %vm1149_vm15, %v14839_v26, %v3153_v58  ;;  %v3201_v53 = vsel %vm1149_vm15, %v3025_v18, %v3153_v58  ;;  %v18702_v58 = vld [vmem:[#allocation48_spill] sm:$0xff] }
 0x5f4   :  { %3560 = vmatprep.mubr.bf16.mxu1 %v3232_v33 }
 0x5f5   :  { %3561 = vmatmul.mubr.bf16.vlgmr.msra.gmra.mxu1 %v3197_v13  ;;  %v18701_v13 = vrot.slane %v18656_v3, 4 }
 0x5f6   :  { %11355 = vmatpush3.bf16.msra.mxu1 %v11709_v5  ;;  %v3157_v32 = vpop.permute.xlu0 %3156  ;;  %v3155_v41 = vpop.permute.xlu1 %3154  ;;  %v11720_v5 = vld [vmem:[%s18294_s4 + $0x220] sm:$0xff]  }
 0x5f7   :  { %v3235_v7 = vsel %vm1149_vm15, %v3079_v15, %v3155_v41  ;;  %11356 = vmatprep.subr.bf16.mxu1 %v18699_v29  ;;  %v3238_v45 = vsel %vm1149_vm15, %v3080_v30, %v3157_v32  ;;  %v14881_v33 = vsel %vm206_vm2, %v18701_v13, %v2991_v51  ;;  %v2992_v13 = vrot.slane %v14569_v56, 4 }
 0x5f8   :  { %3568 = vmatprep.mubr.bf16.mxu1 %v3235_v7 }
 0x5fa   :  { %v14859_v36 = vpop.permute.xlu0 %3160  ;;  %v3159_v14 = vpop.permute.xlu1 %3158  ;;  %11357 = vmatpush3.bf16.msra.mxu1 %v11718_v54  ;;  %v3026_v54 = vpack.c.bf16 %v14881_v33, %v18702_v58 }
 0x5fb   :  { %11358 = vmatprep.subr.bf16.mxu1 %v18699_v29 }
 0x5fc   :  { %v3205_v35 = vsel %vm1149_vm15, %v3026_v54, %v3155_v41  ;;  %v14906_v41 = vsel %vm206_vm2, %v2991_v51, %v2992_v13  ;;  %v3082_v54 = vpack.c.bf16 %v14650_v57, %v14664_v4 }
 0x5fd   :  { %3569 = vmatmul.mubr.bf16.gmra.mxu1 %v3201_v53 }
 0x5fe   :  { %v14870_v6 = vpop.permute.xlu0 %3164  ;;  %3576 = vmatprep.mubr.bf16.mxu1 %v3238_v45  ;;  %v14872_v22 = vpop.permute.xlu1 %3162  ;;  %11359 = vmatpush3.bf16.msra.mxu1 %v11719_v48  ;;  %v2993_v48 = vrot.slane %v14605_v20, 4  ;;  %v3081_v45 = vpack.c.bf16 %v14605_v20, %v14569_v56  ;;  %v11735_v56 = vld [vmem:[%s18296_s7 + $0x218] sm:$0xff]  }
 0x5ff   :  { %11360 = vmatprep.subr.bf16.mxu1 %v18699_v29 }
 0x600   :  { %v3241_v39 = vsel %vm1149_vm15, %v3081_v45, %v3159_v14 }
 0x602   :  { %v3180_v7 = vpop.permute.xlu0 %3179  ;;  %v14886_v18 = vpop.permute.xlu1 %3166  ;;  %11361 = vmatpush3.bf16.msra.mxu1 %v11720_v5  ;;  %v14897_v5 = vsel %vm206_vm2, %v2992_v13, %v2993_v48 }
 0x603   :  { %v3262_v53 = vsel %vm1149_vm15, %v3080_v30, %v3180_v7  ;;  %10595 = vmatprep.subr.bf16.mxu1 %v11735_v56  ;;  %v11727_v56 = vld [vmem:[%s18296_s7 + $0x180] sm:$0xff]  }
 0x604   :  { %3665 = vmatprep.mubr.bf16.mxu0 %v3262_v53 }
 0x605   :  { %3577 = vmatmul.mubr.bf16.gmra.mxu1 %v3205_v35  ;;  %v3027_v35 = vpack.c.bf16 %v14897_v5, %v14906_v41 }
 0x606   :  { %v3182_v21 = vpop.permute.xlu0 %3181  ;;  %v3178_v19 = vpop.permute.xlu1 %3177  ;;  %3584 = vmatprep.mubr.bf16.mxu1 %v3241_v39  ;;  %v2995_v39 = vrot.slane %v14650_v57, 4 }
 0x607   :  { %v14900_v30 = vsel %vm1149_vm15, %v3079_v15, %v3178_v19  ;;  %v3265_v7 = vsel %vm1149_vm15, %v3081_v45, %v3182_v21  ;;  %v3209_v19 = vsel %vm1149_vm15, %v3027_v35, %v3157_v32  ;;  %v2994_v15 = vrot.slane %v14664_v4, 4 }
 0x608   :  { %3666 = vmatmul.mubr.bf16.vlgmr.msra.gmra.mxu0 %v14900_v30  ;;  %v3244_v45 = vsel %vm1149_vm15, %v3082_v54, %v14859_v36  ;;  %v2997_v35 = vrot.slane %v14653_v43, 4  ;;  %v2996_v4 = vrot.slane %v14667_v63, 4 }
 0x609   :  { %3673 = vmatprep.mubr.bf16.mxu0 %v3265_v7  ;;  %v14919_v51 = vsel %vm206_vm2, %v2994_v15, %v2995_v39  ;;  %v14924_v57 = vsel %vm206_vm2, %v2993_v48, %v2994_v15 }
 0x60a   :  { %v3184_v21 = vpop.permute.xlu1 %3183  ;;  %v3028_v32 = vpack.c.bf16 %v14919_v51, %v14924_v57  ;;  %v14937_v48 = vsel %vm206_vm2, %v2996_v4, %v2997_v35 }
 0x60b   :  { %v3268_v13 = vsel %vm1149_vm15, %v3082_v54, %v3184_v21  ;;  %v3015_v21 = vsel %vm206_vm2, %v2995_v39, %v2996_v4 }
 0x60d   :  { %3585 = vmatmul.mubr.bf16.gmra.mxu1 %v3209_v19  ;;  %v3083_v19 = vpack.c.bf16 %v14653_v43, %v14667_v63  ;;  %v2998_v63 = vrot.slane %v14724_v16, 4 }
 0x60e   :  { %3592 = vmatprep.mubr.bf16.mxu1 %v3244_v45  ;;  %v3213_v45 = vsel %vm1149_vm15, %v3028_v32, %v3159_v14  ;;  %v3029_v14 = vpack.c.bf16 %v14937_v48, %v3015_v21  ;;  %v2999_v32 = vrot.slane %v14691_v1, 4  ;;  %v3188_v43 = vpop.permute.xlu1 %3187 }
 0x60f   :  { %v3247_v54 = vsel %vm1149_vm15, %v3083_v19, %v14872_v22 }
 0x610   :  { %3674 = vmatmul.mubr.bf16.gmra.mxu0 %v3262_v53  ;;  %v3186_v53 = vpop.permute.xlu0 %3185  ;;  %v3012_v4 = vsel %vm206_vm2, %v2998_v63, %v2999_v32 }
 0x611   :  { %3681 = vmatprep.mubr.bf16.mxu0 %v3268_v13  ;;  %v3271_v15 = vsel %vm1149_vm15, %v3083_v19, %v3186_v53  ;;  %v3013_v19 = vsel %vm206_vm2, %v2997_v35, %v2998_v63 }
 0x612   :  { %v3030_v53 = vpack.c.bf16 %v3012_v4, %v3013_v19 }
 0x615   :  { %3593 = vmatmul.mubr.bf16.gmra.mxu1 %v3213_v45  ;;  %v3084_v45 = vpack.c.bf16 %v14691_v1, %v14724_v16  ;;  %v3190_v16 = vpop.permute.xlu0 %3189 }
 0x616   :  { %3600 = vmatprep.mubr.bf16.mxu1 %v3247_v54  ;;  %v3217_v54 = vsel %vm1149_vm15, %v3029_v14, %v14859_v36  ;;  %v3001_v36 = vrot.slane %v14694_v25, 4  ;;  %v3085_v14 = vpack.c.bf16 %v14694_v25, %v14727_v49 }
 0x617   :  { %v3274_v39 = vsel %vm1149_vm15, %v3084_v45, %v3188_v43 }
 0x618   :  { %3682 = vmatmul.mubr.bf16.gmra.mxu0 %v3265_v7  ;;  %v3250_v7 = vsel %vm1149_vm15, %v3084_v45, %v14870_v6  ;;  %v3253_v43 = vsel %vm1149_vm15, %v3085_v14, %v14886_v18 }
 0x619   :  { %3689 = vmatprep.mubr.bf16.mxu0 %v3271_v15 }
 0x61d   :  { %3601 = vmatmul.mubr.bf16.gmra.mxu1 %v3217_v54  ;;  %v3221_v54 = vsel %vm1149_vm15, %v3030_v53, %v14872_v22  ;;  %v3086_v22 = vpack.c.bf16 %v14583_v12, %v14601_v0 }
 0x61e   :  { %3608 = vmatprep.mubr.bf16.mxu1 %v3250_v7  ;;  %v3000_v7 = vrot.slane %v14727_v49, 4 }
 0x620   :  { %3690 = vmatmul.mubr.bf16.gmra.mxu0 %v3268_v13  ;;  %v3010_v63 = vsel %vm206_vm2, %v3000_v7, %v3001_v36  ;;  %v3277_v13 = vsel %vm1149_vm15, %v3085_v14, %v3190_v16  ;;  %v3011_v35 = vsel %vm206_vm2, %v2999_v32, %v3000_v7  ;;  %v3194_v7 = vpop.permute.xlu0 %3193 }
 0x621   :  { %3697 = vmatprep.mubr.bf16.mxu0 %v3274_v39  ;;  %v3031_v45 = vpack.c.bf16 %v3010_v63, %v3011_v35 }
 0x623   :  { %v3225_v53 = vsel %vm1149_vm15, %v3031_v45, %v14870_v6 }
 0x625   :  { %3609 = vmatmul.mubr.bf16.gmra.mxu1 %v3221_v54  ;;  %v3192_v54 = vpop.permute.xlu1 %3191 }
 0x626   :  { %3616 = vmatprep.mubr.bf16.mxu1 %v3253_v43  ;;  %v3256_v43 = vsel %vm1149_vm15, %v3086_v22, %v14841_v23  ;;  %v3280_v16 = vsel %vm1149_vm15, %v3086_v22, %v3192_v54  ;;  %v3283_v23 = vsel %vm1149_vm15, %v14839_v26, %v3194_v7  ;;  %v3134_v26 = vpack.c.bf16 %v3015_v21, %v14919_v51 }
 0x627   :  { %v18706_v51 = vpack.c.bf16 %v18702_v58, %v18700_v46 }
 0x628   :  { %3698 = vmatmul.mubr.bf16.gmra.mxu0 %v3271_v15  ;;  %v18703_v15 = vrot.slane %v14601_v0, 4  ;;  %v11725_v0 = vld [vmem:[%s18296_s7 + $0x188] sm:$0xff]  }
 0x629   :  { %3705 = vmatprep.mubr.bf16.mxu0 %v3277_v13 }
 0x62a   :  { %v3009_v32 = vsel %vm206_vm2, %v3001_v36, %v18703_v15 }
 0x62b   :  { %v3032_v14 = vpack.c.bf16 %v14647_v38, %v3009_v32 }
 0x62d   :  { %3617 = vmatmul.mubr.bf16.gmra.mxu1 %v3225_v53  ;;  %v3229_v6 = vsel %vm1149_vm15, %v3032_v14, %v14886_v18  ;;  %v3133_v18 = vpack.c.bf16 %v14924_v57, %v14897_v5  ;;  %v3136_v57 = vpack.c.bf16 %v3011_v35, %v3012_v4  ;;  %v3137_v5 = vpack.c.bf16 %v3009_v32, %v3010_v63 }
 0x62e   :  { %3624 = vmatprep.mubr.bf16.mxu1 %v3256_v43 }
 0x630   :  { %3706 = vmatmul.mubr.bf16.gmra.mxu0 %v3274_v39  ;;  %v3132_v39 = vpack.c.bf16 %v14906_v41, %v14881_v33  ;;  %v3135_v33 = vpack.c.bf16 %v3013_v19, %v14937_v48  ;;  %v18705_v41 = vpack.c.bf16 %v14701_v62, %v14688_v8 }
 0x631   :  { %3713 = vmatprep.mubr.bf16.mxu0 %v3280_v16 }
 0x635   :  { %3625 = vmatmul.mubr.bf16.gmra.mxu1 %v3229_v6 }
 0x636   :  { %11362 = vmatprep.mubr.msk.bf16.mxu1 %vm12017_vm5, %v18699_v29 }
 0x638   :  { %3714 = vmatmul.mubr.bf16.gmra.mxu0 %v3277_v13 }
 0x639   :  { %3721 = vmatprep.mubr.bf16.mxu0 %v3283_v23 }
 0x63d   :  { %11363 = vmatmul.mubr.msk.bf16.vlgmr.msra.gmra.mxu1 %vm1149_vm15, %v3132_v39 }
 0x63e   :  { %11366 = vmatprep.mubr.msk.bf16.mxu1 %vm12017_vm5, %v18699_v29  ;;  %10596 = vmatpush3.bf16.msra.mxu1 %v11736_v52  ;;  %v11728_v52 = vld [vmem:[%s18296_s7 + $0x140] sm:$0xff]  }
 0x640   :  { %3722 = vmatmul.mubr.bf16.gmra.mxu0 %v3280_v16 }
 0x641   :  { %3729 = vmatprep.mubr.bf16.mxu0 %v14900_v30  ;;  %v18704_v30 = vpack.c.bf16 %v14641_v17, %v14647_v38 }
 0x645   :  { %11367 = vmatmul.mubr.msk.bf16.gmra.mxu1 %vm1149_vm15, %v3133_v18 }
 0x646   :  { %11370 = vmatprep.mubr.msk.bf16.mxu1 %vm12017_vm5, %v18699_v29 }
 0x648   :  { %3730 = vmatmul.mubr.bf16.gmra.mxu0 %v3283_v23 }
 0x64d   :  { %11371 = vmatmul.mubr.msk.bf16.gmra.mxu1 %vm1149_vm15, %v3134_v26 }
 0x64e   :  { %11374 = vmatprep.mubr.msk.bf16.mxu1 %vm12017_vm5, %v18699_v29 }
 0x655   :  { %11375 = vmatmul.mubr.msk.bf16.gmra.mxu1 %vm1149_vm15, %v3135_v33 }
 0x656   :  { %11378 = vmatprep.mubr.msk.bf16.mxu1 %vm12017_vm5, %v18699_v29 }
 0x65d   :  { %11379 = vmatmul.mubr.msk.bf16.gmra.mxu1 %vm1149_vm15, %v3136_v57 }
 0x65e   :  { %11382 = vmatprep.mubr.msk.bf16.mxu1 %vm12017_vm5, %v18699_v29 }
 0x665   :  { %11383 = vmatmul.mubr.msk.bf16.gmra.mxu1 %vm1149_vm15, %v3137_v5 }
 0x666   :  { %11386 = vmatprep.mubr.msk.bf16.mxu1 %vm12017_vm5, %v18699_v29 }
 0x66d   :  { %11387 = vmatmul.mubr.msk.bf16.gmra.mxu1 %vm1149_vm15, %v18704_v30 }
 0x66e   :  { %11390 = vmatprep.mubr.msk.bf16.mxu1 %vm12017_vm5, %v18699_v29 }
 0x675   :  { %11391 = vmatmul.mubr.msk.bf16.gmra.mxu1 %vm1149_vm15, %v18705_v41 }
 0x676   :  { %11394 = vmatprep.mubr.msk.bf16.mxu1 %vm12017_vm5, %v18699_v29 }
 0x67d   :  { %11395 = vmatmul.mubr.msk.bf16.gmra.mxu1 %vm1149_vm15, %v18706_v51 }
 0x6b5   :  { %v10388_v48 = vpop.f32.mrf.mxu1 }
 0x6b7   :  { %v10389_v17 = vpop.f32.mrf.mxu1 }
 0x6b8   :  { %v10390_v38 = vadd.f32 %v10389_v17, %v10388_v48 }
 0x6b9   :  { %v10391_v21 = vpop.f32.mrf.mxu1 }
 0x6bb   :  { %v10392_v4 = vpop.f32.mrf.mxu1 }
 0x6bc   :  { %v10393_v14 = vadd.f32 %v10392_v4, %v10391_v21 }
 0x6bd   :  { %v10394_v19 = vpop.f32.mrf.mxu1 }
 0x6bf   :  { %v10395_v36 = vpop.f32.mrf.mxu1 }
 0x6c0   :  { %v10396_v63 = vadd.f32 %v10395_v36, %v10394_v19 }
 0x6c1   :  { %v15028_v13 = vpop.f32.mrf.mxu1 }
 0x6c3   :  { %v15030_v8 = vpop.f32.mrf.mxu1 }
 0x6c5   :  { %v10400_v62 = vpop.f32.mrf.mxu1 }
 0x6c7   :  { %v10401_v35 = vpop.f32.mrf.mxu1 }
 0x6c8   :  { %v15032_v45 = vadd.f32 %v10401_v35, %v10400_v62  ;;  %v10458_v22 = vpop.f32.mrf.mxu0 }
 0x6c9   :  { %v15034_v46 = vpop.f32.mrf.mxu1 }
 0x6ca   :  { %v10459_v58 = vpop.f32.mrf.mxu0 }
 0x6cb   :  { %v10460_v53 = vadd.f32 %v10459_v58, %v10458_v22  ;;  %v15036_v54 = vpop.f32.mrf.mxu1 }
 0x6cc   :  { %v10461_v43 = vpop.f32.mrf.mxu0 }
 0x6cd   :  { %v10406_v16 = vpop.f32.mrf.mxu1  ;;  %v15038_v15 = vadd.f32 %v10460_v53, %v10390_v38 }
 0x6ce   :  { %v10462_v32 = vpop.f32.mrf.mxu0 }
 0x6cf   :  { %v10463_v6 = vadd.f32 %v10462_v32, %v10461_v43  ;;  %v10407_v7 = vpop.f32.mrf.mxu1 }
 0x6d0   :  { %v15040_v23 = vadd.f32 %v10407_v7, %v10406_v16  ;;  %v10464_v39 = vpop.f32.mrf.mxu0 }
 0x6d1   :  { %v15042_v18 = vpop.f32.mrf.mxu1  ;;  %v15044_v26 = vadd.f32 %v10463_v6, %v10393_v14 }
 0x6d2   :  { %v10465_v33 = vpop.f32.mrf.mxu0 }
 0x6d3   :  { %v10466_v57 = vadd.f32 %v10465_v33, %v10464_v39  ;;  %v15046_v5 = vpop.f32.mrf.mxu1 }
 0x6d4   :  { %v15048_v30 = vpop.f32.mrf.mxu0 }
 0x6d5   :  { %v10412_v41 = vpop.f32.mrf.mxu1  ;;  %v15050_v51 = vadd.f32 %v10466_v57, %v10396_v63 }
 0x6d6   :  { %v15052_v48 = vpop.f32.mrf.mxu0 }
 0x6d7   :  { %v10413_v17 = vpop.f32.mrf.mxu1 }
 0x6d8   :  { %v15054_v38 = vadd.f32 %v10413_v17, %v10412_v41  ;;  %v15056_v21 = vpop.f32.mrf.mxu0 }
 0x6d9   :  { %v15058_v4 = vpop.f32.mrf.mxu1 }
 0x6da   :  { %v15060_v19 = vpop.f32.mrf.mxu0 }
 0x6db   :  { %v15062_v36 = vpop.f32.mrf.mxu1 }
 0x6dc   :  { %v15064_v62 = vpop.f32.mrf.mxu0 }
 0x6dd   :  { %v10418_v35 = vpop.f32.mrf.mxu1 }
 0x6de   :  { %v15066_v22 = vpop.f32.mrf.mxu0 }
 0x6df   :  { %v10419_v63 = vpop.f32.mrf.mxu1 }
 0x6e0   :  { %v15068_v58 = vadd.f32 %v10419_v63, %v10418_v35  ;;  %v15070_v53 = vpop.f32.mrf.mxu0 }
 0x6e1   :  { %v15072_v43 = vpop.f32.mrf.mxu1 }
 0x6e2   :  { %v15074_v16 = vpop.f32.mrf.mxu0 }
 0x6e3   :  { %v15076_v32 = vpop.f32.mrf.mxu1 }
 0x6e4   :  { %v15078_v14 = vpop.f32.mrf.mxu0 }
 0x6e5   :  { %v10424_v6 = vpop.f32.mrf.mxu1 }
 0x6e6   :  { %v15080_v39 = vpop.f32.mrf.mxu0 }
 0x6e7   :  { %v10425_v7 = vpop.f32.mrf.mxu1 }
 0x6e8   :  { %v15082_v33 = vadd.f32 %v10425_v7, %v10424_v6  ;;  %v15088_v17 = vpop.f32.mrf.mxu0  ;;  %v11722_v6 = vld [vmem:[%s18296_s7 + $0x158] sm:$0xff]   ;;  %v11723_v7 = vld [vmem:[%s18296_s7 + $0x190] sm:$0xff]  }
 0x6e9   :  { %v15084_v57 = vpop.f32.mrf.mxu1  ;;  %10526 = vmatpush3.bf16.msra.mxu0 %v11722_v6  ;;  %v11739_v6 = vld [vmem:[%s18296_s7 + $0x210] sm:$0xff]  }
 0x6ea   :  { %v15090_v49 = vpop.f32.mrf.mxu0  ;;  %10527 = vmatprep.subr.bf16.mxu0 %v11723_v7  ;;  %10597 = vmatprep.subr.bf16.mxu1 %v11739_v6  ;;  %v15155_v6 = vld [vmem:[%s18297_s5 + $0x1] ss:$0 sm:$0xff] }
 0x6eb   :  { %v15086_v41 = vpop.f32.mrf.mxu1  ;;  %10598 = vmatpush3.bf16.msra.mxu1 %v11740_v28  ;;  %v15164_v28 = vld [vmem:[%s18298_s6 + $0x1] ss:$0 sm:$0xff] }
 0x6ec   :  { %v15107_v20 = vpop.f32.mrf.mxu0 }
 0x6ed   :  { %v10430_v35 = vpop.f32.mrf.mxu1 }
 0x6ee   :  { %v15124_v3 = vpop.f32.mrf.mxu0 }
 0x6ef   :  { %v10431_v63 = vpop.f32.mrf.mxu1 }
 0x6f0   :  { %v15092_v25 = vadd.f32 %v10431_v63, %v10430_v35  ;;  %v11724_v35 = vld [vmem:[%s18296_s7 + $0x150] sm:$0xff]  }
 0x6f1   :  { %v15094_v1 = vpop.f32.mrf.mxu1  ;;  %10528 = vmatpush3.bf16.msra.mxu0 %v11724_v35 }
 0x6f2   :  { %18707 = vst [vmem:[#allocation33_spill] sm:$0xff] %v15092_v25  ;;  %10529 = vmatprep.subr.bf16.mxu0 %v11725_v0  ;;  %v11742_v0 = vld [vmem:[%s18296_s7 + $0x1c8] sm:$0xff]  }
 0x6f3   :  { %v15105_v12 = vpop.f32.mrf.mxu1 }
 0x6f5   :  { %v10436_v63 = vpop.f32.mrf.mxu1  ;;  %10530 = vmatpush3.bf16.msra.mxu0 %v11726_v11  ;;  %v11729_v11 = vld [vmem:[%s18296_s7 + $0x178] sm:$0xff]  }
 0x6f6   :  { %10531 = vmatprep.subr.bf16.mxu0 %v11727_v56  ;;  %v11730_v56 = vld [vmem:[%s18296_s7 + $0x138] sm:$0xff]  }
 0x6f7   :  { %v10437_v31 = vpop.f32.mrf.mxu1 }
 0x6f8   :  { %v15126_v7 = vadd.f32 %v10437_v31, %v10436_v63  ;;  %v11741_v31 = vld [vmem:[%s18296_s7 + $0x208] sm:$0xff]   ;;  %v15144_v63 = vpop.f32.mrf.mxu0 }
 0x6f9   :  { %v15134_v60 = vpop.f32.mrf.mxu1  ;;  %10599 = vmatprep.subr.bf16.mxu1 %v11741_v31  ;;  %10532 = vmatpush3.bf16.msra.mxu0 %v11728_v52 }
 0x6fa   :  { %18708 = vst [vmem:[#allocation31_spill] sm:$0xff] %v15126_v7  ;;  %18709 = vst [vmem:[#allocation32_spill] sm:$0xff] %v15134_v60  ;;  %v15166_v7 = vpop.f32.mrf.mxu0  ;;  %10600 = vmatpush3.bf16.msra.mxu1 %v11742_v0  ;;  %10533 = vmatprep.subr.bf16.mxu0 %v11729_v11  ;;  %v11732_v0 = vld [vmem:[%s18296_s7 + $0x130] sm:$0xff]  }
 0x6fb   :  { %v15142_v35 = vpop.f32.mrf.mxu1 }
 0x6fc   :  { %18710 = vst [vmem:[#allocation34_spill] sm:$0xff] %v15142_v35  ;;  %v15179_v52 = vpop.f32.mrf.mxu0 }
 0x6fd   :  { %v3772_v59 = vpop.f32.mrf.mxu1  ;;  %10534 = vmatpush3.bf16.msra.mxu0 %v11730_v56  ;;  %v18711_v56 = vld [vmem:[#allocation4_spill] sm:$0xff] }
 0x6fe   :  { %v3773_v55 = vadd.f32 %v3772_v59, %v15038_v15  ;;  %v11731_v59 = vld [vmem:[%s18296_s7 + $0x170] sm:$0xff]  }
 0x6ff   :  { %v11364_v40 = vpop.f32.mrf.mxu1  ;;  %10535 = vmatprep.subr.bf16.mxu0 %v11731_v59 }
 0x700   :  { %v3851_v9 = vmul.f32 %v15155_v6, %v3773_v55  ;;  %v10469_v55 = vadd.f32 %v15052_v48, %v15048_v30 }
 0x701   :  { %v3775_v35 = vpop.f32.mrf.mxu1  ;;  %10536 = vmatpush3.bf16.msra.mxu0 %v11732_v0  ;;  %v10478_v0 = vadd.f32 %v15074_v16, %v15070_v53  ;;  %v18713_v16 = vld [vmem:[#allocation10_spill] sm:$0xff] }
 0x702   :  { %v3877_v15 = vadd.f32 %v15164_v28, %v3851_v9  ;;  %v3776_v40 = vadd.f32 %v3775_v35, %v15044_v26  ;;  %v11733_v9 = vld [vmem:[%s18296_s7 + $0x168] sm:$0xff]   ;;  %v10399_v26 = vadd.f32 %v15030_v8, %v15028_v13  ;;  %v10472_v35 = vadd.f32 %v15060_v19, %v15056_v21  ;;  %v11737_v8 = vld [vmem:[%s18296_s7 + $0x160] sm:$0xff]  }
 0x703   :  { %v11365_v31 = vpop.f32.mrf.mxu1  ;;  %10537 = vmatprep.subr.bf16.mxu0 %v11733_v9 }
 0x704   :  { %v3895_v60 = vmax.f32 %v3877_v15, 0.0  ;;  %v3852_v2 = vmul.f32 %v15155_v6, %v3776_v40  ;;  %v15197_v31 = vpop.f32.mrf.mxu0  ;;  %v3679_v27 = vadd.f32 %v10469_v55, %v10399_v26  ;;  %v10475_v55 = vadd.f32 %v15066_v22, %v15064_v62 }
 0x705   :  { %v3780_v11 = vpop.f32.mrf.mxu1  ;;  %v3684_v9 = vadd.f32 %v10472_v35, %v15032_v45 }
 0x706   :  { %v3878_v30 = vadd.f32 %v15164_v28, %v3852_v2  ;;  %v3781_v48 = vadd.f32 %v3780_v11, %v15050_v51  ;;  %v15195_v15 = vmul.f32 %v3895_v60, %v18711_v56  ;;  %v11734_v2 = vld [vmem:[%s18296_s7 + $0x128] sm:$0xff]   ;;  %v10405_v60 = vadd.f32 %v15036_v54, %v15034_v46 }
 0x707   :  { %v11368_v40 = vpop.f32.mrf.mxu1  ;;  %v18712_v51 = vld [vmem:[#allocation7_spill] sm:$0xff]  ;;  %10538 = vmatpush3.bf16.msra.mxu0 %v11734_v2 }
 0x708   :  { %v3896_v59 = vmax.f32 %v3878_v30, 0.0  ;;  %v3853_v25 = vmul.f32 %v15155_v6, %v3781_v48  ;;  %v18419_v30 = vrot.slane %v15195_v15, 6  ;;  %v15216_v48 = vpop.f32.mrf.mxu0  ;;  %v18417_v62 = vrot.slane %v15195_v15, 2  ;;  %10539 = vmatprep.subr.bf16.mxu0 %v11737_v8 }
 0x709   :  { %v3783_v13 = vpop.f32.mrf.mxu1  ;;  %v18418_v45 = vrot.slane %v15195_v15, 4  ;;  %v10481_v8 = vadd.f32 %v15080_v39, %v15078_v14 }
 0x70a   :  { %v3914_v21 = vmul.f32 %v3896_v59, %v18712_v51  ;;  %v3879_v19 = vadd.f32 %v15164_v28, %v3853_v25  ;;  %v3784_v11 = vadd.f32 %v3783_v13, %v3679_v27  ;;  %v11738_v27 = vld [vmem:[%s18296_s7 + $0x120] sm:$0xff]  }
 0x70b   :  { %v11369_v26 = vpop.f32.mrf.mxu1  ;;  %10540 = vmatpush3.bf16.msra.mxu0 %v11738_v27  ;;  %v10484_v27 = vadd.f32 %v15090_v49, %v15088_v17 }
 0x70c   :  { %v3897_v40 = vmax.f32 %v3879_v19, 0.0  ;;  %v3854_v46 = vmul.f32 %v15155_v6, %v3784_v11  ;;  %v4050_v54 = vrot.slane %v3914_v21, 6  ;;  %v4104_v59 = vrot.slane %v3914_v21, 2  ;;  %11398 = vmatprep.subr.bf16.mxu0 %v18699_v29 }
 0x70d   :  { %v3788_v25 = vpop.f32.mrf.mxu1  ;;  %v4005_v22 = vrot.slane %v3914_v21, 4  ;;  %v15225_v53 = vpack.c.bf16 %v3914_v21, %v15195_v15  ;;  %v3687_v26 = vadd.f32 %v10475_v55, %v10405_v60  ;;  %v10411_v60 = vadd.f32 %v15046_v5, %v15042_v18 }
 0x70e   :  { %v3915_v35 = vmul.f32 %v3897_v40, %v18713_v16  ;;  %v3880_v13 = vadd.f32 %v15164_v28, %v3854_v46  ;;  %v3789_v19 = vadd.f32 %v3788_v25, %v3684_v9  ;;  %v15233_v2 = vsel %vm252_vm0, %v18419_v30, %v4050_v54  ;;  %v15249_v40 = vpop.f32.mrf.mxu0 }
 0x70f   :  { %v11372_v11 = vpop.f32.mrf.mxu1  ;;  %v15241_v21 = vsel %vm307_vm1, %v18417_v62, %v4104_v59  ;;  %v15247_v9 = vsel %vm206_vm2, %v18418_v45, %v4005_v22  ;;  %v3695_v18 = vadd.f32 %v10481_v8, %v10411_v60 }
 0x710   :  { %v3898_v46 = vmax.f32 %v3880_v13, 0.0  ;;  %v3855_v25 = vmul.f32 %v15155_v6, %v3789_v19  ;;  %v4051_v14 = vrot.slane %v3915_v35, 6  ;;  %v4105_v39 = vrot.slane %v3915_v35, 2 }
 0x711   :  { %v3791_v55 = vpop.f32.mrf.mxu1  ;;  %v3692_v11 = vadd.f32 %v10478_v0, %v15040_v23  ;;  %v4006_v62 = vrot.slane %v3915_v35, 4  ;;  %v15272_v0 = vpop.f32.mrf.mxu0 }
 0x712   :  { %v3916_v45 = vmul.f32 %v3898_v46, %v18651_v50  ;;  %v3881_v30 = vadd.f32 %v15164_v28, %v3855_v25  ;;  %v3792_v16 = vadd.f32 %v3791_v55, %v3687_v26  ;;  %v15260_v13 = vsel %vm252_vm0, %v4050_v54, %v4051_v14 }
 0x713   :  { %v11373_v19 = vpop.f32.mrf.mxu1  ;;  %v15266_v23 = vsel %vm307_vm1, %v4104_v59, %v4105_v39  ;;  %v15270_v5 = vsel %vm206_vm2, %v4005_v22, %v4006_v62 }
 0x714   :  { %v3899_v26 = vmax.f32 %v3881_v30, 0.0  ;;  %v3856_v46 = vmul.f32 %v15155_v6, %v3792_v16  ;;  %v4052_v54 = vrot.slane %v3916_v45, 6  ;;  %v4106_v25 = vrot.slane %v3916_v45, 2 }
 0x715   :  { %v3796_v55 = vpop.f32.mrf.mxu1  ;;  %v4007_v17 = vrot.slane %v3916_v45, 4  ;;  %v15279_v8 = vpack.c.bf16 %v3916_v45, %v3915_v35  ;;  %v10487_v16 = vadd.f32 %v15124_v3, %v15107_v20  ;;  %v3700_v20 = vadd.f32 %v10484_v27, %v15054_v38 }
 0x716   :  { %v3917_v22 = vmul.f32 %v3899_v26, %v18659_v61  ;;  %v3882_v60 = vadd.f32 %v15164_v28, %v3856_v46  ;;  %v3797_v19 = vadd.f32 %v3796_v55, %v3692_v11  ;;  %v15285_v30 = vsel %vm252_vm0, %v4051_v14, %v4052_v54  ;;  %v15299_v11 = vpop.f32.mrf.mxu0 }
 0x717   :  { %v11376_v50 = vpop.f32.mrf.mxu1  ;;  %v15293_v45 = vsel %vm307_vm1, %v4105_v39, %v4106_v25  ;;  %v15297_v35 = vsel %vm206_vm2, %v4006_v62, %v4007_v17 }
 0x718   :  { %v3900_v26 = vmax.f32 %v3882_v60, 0.0  ;;  %v3857_v14 = vmul.f32 %v15155_v6, %v3797_v19  ;;  %v4053_v46 = vrot.slane %v3917_v22, 6  ;;  %v4107_v55 = vrot.slane %v3917_v22, 2 }
 0x719   :  { %v10417_v50 = vadd.f32 %v15062_v36, %v15058_v4  ;;  %v3799_v3 = vpop.f32.mrf.mxu1  ;;  %v4008_v59 = vrot.slane %v3917_v22, 4  ;;  %v10490_v19 = vadd.f32 %v15166_v7, %v15144_v63 }
 0x71a   :  { %v3918_v62 = vmul.f32 %v3900_v26, %v18670_v42  ;;  %v3883_v49 = vadd.f32 %v15164_v28, %v3857_v14  ;;  %v3800_v61 = vadd.f32 %v3799_v3, %v3695_v18  ;;  %v15311_v60 = vsel %vm252_vm0, %v4052_v54, %v4053_v46  ;;  %v15323_v26 = vpop.f32.mrf.mxu0 }
 0x71b   :  { %v11377_v4 = vpop.f32.mrf.mxu1  ;;  %v3703_v36 = vadd.f32 %v10487_v16, %v10417_v50  ;;  %v15317_v38 = vsel %vm307_vm1, %v4106_v25, %v4107_v55  ;;  %v15321_v27 = vsel %vm206_vm2, %v4007_v17, %v4008_v59 }
 0x71c   :  { %v3901_v18 = vmax.f32 %v3883_v49, 0.0  ;;  %v3858_v14 = vmul.f32 %v15155_v6, %v3800_v61  ;;  %v4054_v54 = vrot.slane %v3918_v62, 6  ;;  %v4108_v63 = vrot.slane %v3918_v62, 2 }
 0x71d   :  { %v3804_v7 = vpop.f32.mrf.mxu1  ;;  %v4009_v16 = vrot.slane %v3918_v62, 4  ;;  %v15330_v50 = vpack.c.bf16 %v3918_v62, %v3917_v22  ;;  %v10493_v49 = vadd.f32 %v15197_v31, %v15179_v52  ;;  %v10423_v52 = vadd.f32 %v15076_v32, %v15072_v43 }
 0x71e   :  { %v3919_v17 = vmul.f32 %v3901_v18, %v18686_v10  ;;  %v3884_v4 = vadd.f32 %v15164_v28, %v3858_v14  ;;  %v3805_v39 = vadd.f32 %v3804_v7, %v3700_v20  ;;  %v15336_v61 = vsel %vm252_vm0, %v4053_v46, %v4054_v54  ;;  %v10501_v20 = vpop.f32.mrf.mxu0 }
 0x71f   :  { %v11380_v3 = vpop.f32.mrf.mxu1  ;;  %v15344_v22 = vsel %vm307_vm1, %v4107_v55, %v4108_v63  ;;  %v15348_v62 = vsel %vm206_vm2, %v4008_v59, %v4009_v16  ;;  %v3711_v32 = vadd.f32 %v10493_v49, %v10423_v52 }
 0x720   :  { %v3902_v18 = vmax.f32 %v3884_v4, 0.0  ;;  %v3859_v46 = vmul.f32 %v15155_v6, %v3805_v39  ;;  %v4055_v14 = vrot.slane %v3919_v17, 6  ;;  %v4109_v7 = vrot.slane %v3919_v17, 2 }
 0x721   :  { %v3807_v31 = vpop.f32.mrf.mxu1  ;;  %v3708_v3 = vadd.f32 %v10490_v19, %v15068_v58  ;;  %v4010_v25 = vrot.slane %v3919_v17, 4  ;;  %v10496_v4 = vadd.f32 %v15249_v40, %v15216_v48 }
 0x722   :  { %v3920_v42 = vmul.f32 %v3902_v18, %v18682_v24  ;;  %v3885_v59 = vadd.f32 %v15164_v28, %v3859_v46  ;;  %v3808_v10 = vadd.f32 %v3807_v31, %v3703_v36  ;;  %v15360_v39 = vsel %vm252_vm0, %v4054_v54, %v4055_v14  ;;  %v10503_v18 = vpop.f32.mrf.mxu0 }
 0x723   :  { %v11381_v43 = vpop.f32.mrf.mxu1  ;;  %v15366_v58 = vsel %vm307_vm1, %v4108_v63, %v4109_v7  ;;  %v15370_v19 = vsel %vm206_vm2, %v4009_v16, %v4010_v25 }
 0x724   :  { %18714 = vst [vmem:[#allocation30_spill] sm:$0xff] %v15370_v19  ;;  %v3903_v46 = vmax.f32 %v3885_v59, 0.0  ;;  %v3860_v36 = vmul.f32 %v15155_v6, %v3808_v10  ;;  %v4056_v31 = vrot.slane %v3920_v42, 6  ;;  %v4110_v48 = vrot.slane %v3920_v42, 2 }
 0x725   :  { %v3812_v55 = vpop.f32.mrf.mxu1  ;;  %v4011_v40 = vrot.slane %v3920_v42, 4  ;;  %v15377_v63 = vpack.c.bf16 %v3920_v42, %v3919_v17  ;;  %v10499_v59 = vadd.f32 %v15299_v11, %v15272_v0  ;;  %v10429_v0 = vadd.f32 %v15086_v41, %v15084_v57 }
 0x726   :  { %v3921_v52 = vmul.f32 %v3903_v46, %v18688_v44  ;;  %v3886_v16 = vadd.f32 %v15164_v28, %v3860_v36  ;;  %v3813_v43 = vadd.f32 %v3812_v55, %v3708_v3  ;;  %v15383_v10 = vsel %vm252_vm0, %v4055_v14, %v4056_v31  ;;  %v10504_v3 = vpop.f32.mrf.mxu0 }
 0x727   :  { %18715 = vst [vmem:[#allocation36_spill] sm:$0xff] %v15377_v63  ;;  %v11384_v54 = vpop.f32.mrf.mxu1  ;;  %v15391_v42 = vsel %vm307_vm1, %v4109_v7, %v4110_v48  ;;  %v15395_v17 = vsel %vm206_vm2, %v4010_v25, %v4011_v40  ;;  %v3719_v57 = vadd.f32 %v10499_v59, %v10429_v0 }
 0x728   :  { %18716 = vst [vmem:[#allocation37_spill] sm:$0xff] %v15395_v17  ;;  %v3904_v55 = vmax.f32 %v3886_v16, 0.0  ;;  %v3861_v14 = vmul.f32 %v15155_v6, %v3813_v43  ;;  %v4057_v46 = vrot.slane %v3921_v52, 6  ;;  %v4111_v36 = vrot.slane %v3921_v52, 2  ;;  %v18728_v17 = vld [vmem:[#allocation31_spill] sm:$0xff] }
 0x729   :  { %v3815_v11 = vpop.f32.mrf.mxu1  ;;  %v3716_v54 = vadd.f32 %v10496_v4, %v15082_v33  ;;  %v4012_v49 = vrot.slane %v3921_v52, 4  ;;  %v10502_v43 = vadd.f32 %v10501_v20, %v15323_v26  ;;  %v10506_v4 = vpop.f32.mrf.mxu0 }
 0x72a   :  { %v3922_v24 = vmul.f32 %v3904_v55, %v18684_v47  ;;  %v3887_v25 = vadd.f32 %v15164_v28, %v3861_v14  ;;  %v3816_v44 = vadd.f32 %v3815_v11, %v3711_v32  ;;  %v15407_v16 = vsel %vm252_vm0, %v4056_v31, %v4057_v46 }
 0x72b   :  { %v11385_v56 = vpop.f32.mrf.mxu1  ;;  %v15412_v33 = vsel %vm307_vm1, %v4110_v48, %v4111_v36  ;;  %v15416_v41 = vsel %vm206_vm2, %v4011_v40, %v4012_v49 }
 0x72c   :  { %18717 = vst [vmem:[#allocation38_spill] sm:$0xff] %v15416_v41  ;;  %v3905_v55 = vmax.f32 %v3887_v25, 0.0  ;;  %v3862_v32 = vmul.f32 %v15155_v6, %v3816_v44  ;;  %v4058_v14 = vrot.slane %v3922_v24, 6  ;;  %v4112_v26 = vrot.slane %v3922_v24, 2 }
 0x72d   :  { %v3820_v11 = vpop.f32.mrf.mxu1  ;;  %v4013_v56 = vrot.slane %v3922_v24, 4  ;;  %v15423_v48 = vpack.c.bf16 %v3922_v24, %v3921_v52  ;;  %v10505_v25 = vadd.f32 %v10504_v3, %v10503_v18  ;;  %v10507_v52 = vpop.f32.mrf.mxu0  ;;  %v10435_v18 = vadd.f32 %v15105_v12, %v15094_v1 }
 0x72e   :  { %v3923_v59 = vmul.f32 %v3905_v55, %v18695_v37  ;;  %v3888_v40 = vadd.f32 %v15164_v28, %v3862_v32  ;;  %v3821_v0 = vadd.f32 %v3820_v11, %v3716_v54  ;;  %v15429_v44 = vsel %vm252_vm0, %v4057_v46, %v4058_v14  ;;  %v18721_v37 = vld [vmem:[#allocation33_spill] sm:$0xff] }
 0x72f   :  { %18718 = vst [vmem:[#allocation39_spill] sm:$0xff] %v15423_v48  ;;  %v11388_v7 = vpop.f32.mrf.mxu1  ;;  %v15435_v47 = vsel %vm307_vm1, %v4111_v36, %v4112_v26  ;;  %v15439_v24 = vsel %vm206_vm2, %v4012_v49, %v4013_v56  ;;  %v18720_v36 = vld [vmem:[#allocation29_spill] sm:$0xff]  ;;  %v3724_v51 = vadd.f32 %v10502_v43, %v18721_v37  ;;  %v3727_v48 = vadd.f32 %v10505_v25, %v10435_v18 }
 0x730   :  { %18719 = vst [vmem:[#allocation41_spill] sm:$0xff] %v15439_v24  ;;  %v3906_v55 = vmax.f32 %v3888_v40, 0.0  ;;  %v3863_v54 = vmul.f32 %v15155_v6, %v3821_v0  ;;  %v4059_v32 = vrot.slane %v3923_v59, 6  ;;  %v4113_v46 = vrot.slane %v3923_v59, 2  ;;  %v18724_v25 = vld [vmem:[#allocation21_spill] sm:$0xff] }
 0x731   :  { %v3823_v3 = vpop.f32.mrf.mxu1  ;;  %v4014_v11 = vrot.slane %v3923_v59, 4 }
 0x732   :  { %v3924_v20 = vmul.f32 %v3906_v55, %v18720_v36  ;;  %v3889_v31 = vadd.f32 %v15164_v28, %v3863_v54  ;;  %v3824_v49 = vadd.f32 %v3823_v3, %v3719_v57  ;;  %v15450_v40 = vsel %vm252_vm0, %v4058_v14, %v4059_v32  ;;  %v10509_v55 = vpop.f32.mrf.mxu0 }
 0x733   :  { %v11389_v0 = vpop.f32.mrf.mxu1  ;;  %v15455_v12 = vsel %vm307_vm1, %v4112_v26, %v4113_v46  ;;  %v15459_v1 = vsel %vm206_vm2, %v4013_v56, %v4014_v11 }
 0x734   :  { %18722 = vst [vmem:[#allocation48_spill] sm:$0xff] %v15459_v1  ;;  %v3907_v7 = vmax.f32 %v3889_v31, 0.0  ;;  %v3864_v57 = vmul.f32 %v15155_v6, %v3824_v49  ;;  %v4060_v54 = vrot.slane %v3924_v20, 6  ;;  %v4114_v0 = vrot.slane %v3924_v20, 2 }
 0x735   :  { %v3828_v3 = vpop.f32.mrf.mxu1  ;;  %v4015_v37 = vrot.slane %v3924_v20, 4  ;;  %v15466_v26 = vpack.c.bf16 %v3924_v20, %v3923_v59  ;;  %v10508_v49 = vadd.f32 %v10507_v52, %v10506_v4  ;;  %v10510_v59 = vpop.f32.mrf.mxu0  ;;  %v18726_v4 = vld [vmem:[#allocation34_spill] sm:$0xff] }
 0x736   :  { %v3925_v18 = vmul.f32 %v3907_v7, %v18724_v25  ;;  %v3890_v56 = vadd.f32 %v15164_v28, %v3864_v57  ;;  %v3829_v36 = vadd.f32 %v3828_v3, %v3724_v51  ;;  %v15472_v31 = vsel %vm252_vm0, %v4059_v32, %v4060_v54  ;;  %v18725_v3 = vld [vmem:[#allocation32_spill] sm:$0xff] }
 0x737   :  { %18723 = vst [vmem:[#allocation33_spill] sm:$0xff] %v15466_v26  ;;  %v11392_v41 = vpop.f32.mrf.mxu1  ;;  %v15478_v19 = vsel %vm307_vm1, %v4113_v46, %v4114_v0  ;;  %v15482_v20 = vsel %vm206_vm2, %v4014_v11, %v4015_v37  ;;  %v18727_v46 = vld [vmem:[#allocation35_spill] sm:$0xff]  ;;  %v3732_v63 = vadd.f32 %v10508_v49, %v18728_v17 }
 0x738   :  { %v3908_v7 = vmax.f32 %v3890_v56, 0.0  ;;  %v3865_v51 = vmul.f32 %v15155_v6, %v3829_v36  ;;  %v4061_v57 = vrot.slane %v3925_v18, 6  ;;  %v4115_v32 = vrot.slane %v3925_v18, 2 }
 0x739   :  { %v10441_v41 = vadd.f32 %v18726_v4, %v18725_v3  ;;  %v3831_v52 = vpop.f32.mrf.mxu1  ;;  %v4016_v14 = vrot.slane %v3925_v18, 4  ;;  %v10511_v36 = vadd.f32 %v10510_v59, %v10509_v55 }
 0x73a   :  { %v3926_v25 = vmul.f32 %v3908_v7, %v18727_v46  ;;  %v3891_v26 = vadd.f32 %v15164_v28, %v3865_v51  ;;  %v3832_v11 = vadd.f32 %v3831_v52, %v3727_v48  ;;  %v15493_v56 = vsel %vm252_vm0, %v4060_v54, %v4061_v57 }
 0x73b   :  { %v11393_v24 = vpop.f32.mrf.mxu1  ;;  %v15498_v3 = vsel %vm307_vm1, %v4114_v0, %v4115_v32  ;;  %v15502_v4 = vsel %vm206_vm2, %v4015_v37, %v4016_v14  ;;  %v18730_v0 = vld [vmem:[#allocation24_spill] sm:$0xff]  ;;  %v3735_v46 = vadd.f32 %v10511_v36, %v10441_v41 }
 0x73c   :  { %18729 = vst [vmem:[#allocation32_spill] sm:$0xff] %v15502_v4  ;;  %v3909_v7 = vmax.f32 %v3891_v26, 0.0  ;;  %v3866_v51 = vmul.f32 %v15155_v6, %v3832_v11  ;;  %v4062_v48 = vrot.slane %v3926_v25, 6  ;;  %v4116_v55 = vrot.slane %v3926_v25, 2 }
 0x73d   :  { %v3836_v52 = vpop.f32.mrf.mxu1  ;;  %v4017_v24 = vrot.slane %v3926_v25, 4  ;;  %v15509_v49 = vpack.c.bf16 %v3926_v25, %v3925_v18 }
 0x73e   :  { %v3927_v59 = vmul.f32 %v3909_v7, %v18730_v0  ;;  %v3892_v37 = vadd.f32 %v15164_v28, %v3866_v51  ;;  %v3837_v43 = vadd.f32 %v3836_v52, %v3732_v63  ;;  %v15515_v26 = vsel %vm252_vm0, %v4061_v57, %v4062_v48  ;;  %v18731_v52 = vld [vmem:[#allocation5_spill] sm:$0xff] }
 0x73f   :  { %v11396_v11 = vpop.f32.mrf.mxu1  ;;  %v15521_v1 = vsel %vm307_vm1, %v4115_v32, %v4116_v55  ;;  %v15525_v25 = vsel %vm206_vm2, %v4016_v14, %v4017_v24 }
 0x740   :  { %v3910_v18 = vmax.f32 %v3892_v37, 0.0  ;;  %v3867_v63 = vmul.f32 %v15155_v6, %v3837_v43  ;;  %v4063_v7 = vrot.slane %v3927_v59, 6  ;;  %v4117_v51 = vrot.slane %v3927_v59, 2 }
 0x741   :  { %v3839_v57 = vpop.f32.mrf.mxu1  ;;  %v4018_v36 = vrot.slane %v3927_v59, 4 }
 0x742   :  { %v3928_v11 = vmul.f32 %v3910_v18, %v18731_v52  ;;  %v3893_v17 = vadd.f32 %v15164_v28, %v3867_v63  ;;  %v3840_v32 = vadd.f32 %v3839_v57, %v3735_v46  ;;  %v15534_v54 = vsel %vm252_vm0, %v4062_v48, %v4063_v7  ;;  %v11743_v48 = vld [vmem:[%s18296_s7 + $0x200] sm:$0xff]  }
 0x743   :  { %v11397_v14 = vpop.f32.mrf.mxu1  ;;  %v15538_v43 = vsel %vm307_vm1, %v4116_v55, %v4117_v51  ;;  %v15542_v37 = vsel %vm206_vm2, %v4017_v24, %v4018_v36  ;;  %v18734_v24 = vld [vmem:[#allocation12_spill] sm:$0xff]  ;;  %10601 = vmatprep.subr.bf16.mxu1 %v11743_v48  ;;  %v18735_v48 = vld [vmem:[#allocation9_spill] sm:$0xff] }
 0x744   :  { %18732 = vst [vmem:[#allocation34_spill] sm:$0xff] %v15542_v37  ;;  %v3911_v41 = vmax.f32 %v3893_v17, 0.0  ;;  %v3868_v0 = vmul.f32 %v15155_v6, %v3840_v32  ;;  %v4064_v18 = vrot.slane %v3928_v11, 6  ;;  %v4118_v63 = vrot.slane %v3928_v11, 2  ;;  %v11744_v32 = vld [vmem:[%s18296_s7 + $0x1c0] sm:$0xff]  }
 0x745   :  { %v4019_v57 = vrot.slane %v3928_v11, 4  ;;  %v15552_v14 = vpack.c.bf16 %v3928_v11, %v3927_v59  ;;  %10602 = vmatpush3.bf16.msra.mxu1 %v11744_v32 }
 0x746   :  { %v3929_v52 = vmul.f32 %v3911_v41, %v18734_v24  ;;  %v3894_v17 = vadd.f32 %v15164_v28, %v3868_v0  ;;  %v4069_v6 = vsel %vm252_vm0, %v4063_v7, %v4064_v18  ;;  %v15564_v4 = vsel %vm307_vm1, %v4117_v51, %v4118_v63  ;;  %v11746_v7 = vld [vmem:[%s18296_s7 + $0x1f8] sm:$0xff]  }
 0x747   :  { %18733 = vst [vmem:[#allocation31_spill] sm:$0xff] %v15552_v14  ;;  %v4093_v46 = vpack.c.bf16 %v4069_v6, %v15534_v54  ;;  %v15568_v59 = vsel %vm206_vm2, %v4018_v36, %v4019_v57  ;;  %v11747_v54 = vld [vmem:[%s18296_s7 + $0x1b8] sm:$0xff]   ;;  %10603 = vmatprep.subr.bf16.mxu1 %v11746_v7 }
 0x748   :  { %v3912_v41 = vmax.f32 %v3894_v17, 0.0  ;;  %v4065_v28 = vrot.slane %v3929_v52, 6  ;;  %v4119_v0 = vrot.slane %v3929_v52, 2  ;;  %v4020_v11 = vrot.slane %v3929_v52, 4 }
 0x749   :  { %10604 = vmatpush3.bf16.msra.mxu1 %v11747_v54  ;;  %v11749_v54 = vld [vmem:[%s18296_s7 + $0x1b0] sm:$0xff]  }
 0x74a   :  { %v3930_v6 = vmul.f32 %v3912_v41, %v18735_v48  ;;  %v4068_v36 = vsel %vm252_vm0, %v4064_v18, %v4065_v28  ;;  %v4122_v17 = vsel %vm307_vm1, %v4118_v63, %v4119_v0  ;;  %v15585_v32 = vsel %vm206_vm2, %v4019_v57, %v4020_v11  ;;  %v11748_v18 = vld [vmem:[%s18296_s7 + $0x1f0] sm:$0xff]  }
 0x74b   :  { %v4146_v55 = vpack.c.bf16 %v4122_v17, %v15564_v4  ;;  %v18736_v63 = vrot.slane %v15195_v15, 6  ;;  %v18737_v17 = vrot.slane %v15195_v15, 2  ;;  %10605 = vmatprep.subr.bf16.mxu1 %v11748_v18  ;;  %v18738_v48 = vrot.slane %v15195_v15, 4  ;;  %v11751_v15 = vld [vmem:[%s18296_s7 + $0x1a8] sm:$0xff]  }
 0x74c   :  { %v4066_v14 = vrot.slane %v3930_v6, 6  ;;  %v4120_v51 = vrot.slane %v3930_v6, 2  ;;  %v4021_v37 = vrot.slane %v3930_v6, 4  ;;  %v15590_v41 = vpack.c.bf16 %v3930_v6, %v3929_v52 }
 0x74d   :  { %10606 = vmatpush3.bf16.msra.mxu1 %v11749_v54  ;;  %v18741_v18 = vpack.c.bf16 %v15383_v10, %v15360_v39  ;;  %v18746_v39 = vpack.c.bf16 %v15266_v23, %v15241_v21  ;;  %v18747_v10 = vpack.c.bf16 %v15366_v58, %v15344_v22  ;;  %v18750_v21 = vpack.c.bf16 %v15498_v3, %v15478_v19 }
 0x74e   :  { %v4084_v57 = vsel %vm252_vm0, %v4066_v14, %v18736_v63  ;;  %v4067_v4 = vsel %vm252_vm0, %v4065_v28, %v4066_v14  ;;  %v4121_v7 = vsel %vm307_vm1, %v4119_v0, %v4120_v51  ;;  %v4138_v52 = vsel %vm307_vm1, %v4120_v51, %v18737_v17 }
 0x74f   :  { %v4086_v6 = vpack.c.bf16 %v15233_v2, %v4084_v57  ;;  %v4085_v24 = vpack.c.bf16 %v4067_v4, %v4068_v36  ;;  %v4147_v63 = vpack.c.bf16 %v4138_v52, %v4121_v7  ;;  %v15615_v14 = vsel %vm206_vm2, %v4021_v37, %v18738_v48  ;;  %v11750_v2 = vld [vmem:[%s18296_s7 + $0x1e8] sm:$0xff]   ;;  %v11753_v36 = vld [vmem:[%s18296_s7 + $0x1a0] sm:$0xff]  }
 0x750   :  { %v4041_v28 = vpack.c.bf16 %v15247_v9, %v15615_v14  ;;  %v15621_v0 = vsel %vm206_vm2, %v4020_v11, %v4021_v37  ;;  %10607 = vmatprep.subr.bf16.mxu1 %v11750_v2  ;;  %v11752_v11 = vld [vmem:[%s18296_s7 + $0x1e0] sm:$0xff]   ;;  %v18739_v48 = vpack.c.bf16 %v15285_v30, %v15260_v13  ;;  %v18742_v13 = vpack.c.bf16 %v15429_v44, %v15407_v16  ;;  %v11754_v44 = vld [vmem:[%s18296_s7 + $0x230] sm:$0xff]  }
 0x751   :  { %4168 = vrot.lane.b32.xlu1 %v4086_v6, %s12019_s30  ;;  %4166 = vrot.lane.b32.xlu0 %v4085_v24, %s12019_s30  ;;  %v4155_v51 = vpack.c.bf16 %v15615_v14, %v15621_v0  ;;  %v4040_v37 = vpack.c.bf16 %v15621_v0, %v15585_v32  ;;  %v18740_v24 = vpack.c.bf16 %v15336_v61, %v15311_v60 }
 0x752   :  { %10608 = vmatpush3.bf16.msra.mxu1 %v11751_v15  ;;  %v18743_v30 = vpack.c.bf16 %v15472_v31, %v15450_v40  ;;  %v18744_v60 = vpack.c.bf16 %v15515_v26, %v15493_v56  ;;  %v18745_v61 = vpack.c.bf16 %v15317_v38, %v15293_v45  ;;  %v18748_v16 = vpack.c.bf16 %v15412_v33, %v15391_v42  ;;  %v11755_v31 = vld [vmem:[%s18296_s7 + $0x228] sm:$0xff]  }
 0x753   :  { %10609 = vmatprep.subr.bf16.mxu1 %v11752_v11  ;;  %v18749_v45 = vpack.c.bf16 %v15455_v12, %v15435_v47  ;;  %v18751_v23 = vpack.c.bf16 %v15538_v43, %v15521_v1  ;;  %v11745_v47 = vld [vmem:[%s18296_s7 + $0x238] sm:$0xff]   ;;  %v18752_v7 = vpack.c.bf16 %v15297_v35, %v15270_v5 }
 0x755   :  { %4170 = vrot.lane.b32.xlu1 %v18739_v48, %s12019_s30  ;;  %4172 = vrot.lane.b32.xlu0 %v18740_v24, %s12019_s30  ;;  %v18755_v48 = vld [vmem:[#allocation37_spill] sm:$0xff] }
 0x756   :  { %10610 = vmatpush3.bf16.msra.mxu1 %v11753_v36 }
 0x759   :  { %4174 = vrot.lane.b32.xlu1 %v18741_v18, %s12019_s30  ;;  %4176 = vrot.lane.b32.xlu0 %v18742_v13, %s12019_s30  ;;  %v18758_v13 = vld [vmem:[#allocation39_spill] sm:$0xff] }
 0x75d   :  { %4178 = vrot.lane.b32.xlu1 %v18743_v30, %s12019_s30  ;;  %4180 = vrot.lane.b32.xlu0 %v18744_v60, %s12019_s30 }
 0x761   :  { %4182 = vrot.lane.b32.xlu1 %v4093_v46, %s12019_s30  ;;  %4195 = vrot.lane.b32.xlu0 %v18745_v61, %s12019_s30  ;;  %v11756_v46 = vld [vmem:[%s18296_s7 + $0x220] sm:$0xff]   ;;  %v18759_v61 = vld [vmem:[#allocation41_spill] sm:$0xff] }
 0x765   :  { %4193 = vrot.lane.b32.xlu1 %v18746_v39, %s12019_s30  ;;  %4197 = vrot.lane.b32.xlu0 %v18747_v10, %s12019_s30  ;;  %v18760_v39 = vld [vmem:[#allocation38_spill] sm:$0xff] }
 0x766   :  { %v18761_v10 = vpack.c.bf16 %v18759_v61, %v18760_v39 }
 0x769   :  { %4199 = vrot.lane.b32.xlu1 %v18748_v16, %s12019_s30  ;;  %4201 = vrot.lane.b32.xlu0 %v18749_v45, %s12019_s30 }
 0x76d   :  { %4203 = vrot.lane.b32.xlu1 %v18750_v21, %s12019_s30  ;;  %4205 = vrot.lane.b32.xlu0 %v18751_v23, %s12019_s30  ;;  %v18762_v21 = vld [vmem:[#allocation33_spill] sm:$0xff] }
 0x771   :  { %4207 = vrot.lane.b32.xlu1 %v4146_v55, %s12019_s30  ;;  %4209 = vrot.lane.b32.xlu0 %v4147_v63, %s12019_s30 }
 0x7c3   :  { %v4169_v38 = vpop.permute.xlu1 %4168  ;;  %v15696_v22 = vpop.permute.xlu0 %4166 }
 0x7c4   :  { %v4213_v58 = vsel %vm1149_vm15, %v4040_v37, %v15696_v22  ;;  %v4248_v19 = vsel %vm1149_vm15, %v15590_v41, %v4169_v38  ;;  %v4217_v56 = vsel %vm1149_vm15, %v4041_v28, %v4169_v38  ;;  %v18754_v37 = vld [vmem:[#allocation36_spill] sm:$0xff] }
 0x7c5   :  { %4576 = vmatprep.mubr.bf16.mxu0 %v4248_v19 }
 0x7c6   :  { %4577 = vmatmul.mubr.bf16.vlgmr.msra.gmra.mxu0 %v4213_v58 }
 0x7c7   :  { %11399 = vmatpush3.bf16.msra.mxu0 %v11745_v47  ;;  %v4171_v42 = vpop.permute.xlu1 %4170  ;;  %v4173_v33 = vpop.permute.xlu0 %4172  ;;  %v18763_v47 = vld [vmem:[#allocation48_spill] sm:$0xff] }
 0x7c8   :  { %v4251_v40 = vsel %vm1149_vm15, %v15225_v53, %v4171_v42  ;;  %11400 = vmatprep.subr.bf16.mxu0 %v18699_v29  ;;  %v4254_v3 = vsel %vm1149_vm15, %v15279_v8, %v4173_v33  ;;  %v4221_v17 = vsel %vm1149_vm15, %v18752_v7, %v4171_v42  ;;  %v18764_v58 = vpack.c.bf16 %v15482_v20, %v18763_v47 }
 0x7c9   :  { %4584 = vmatprep.mubr.bf16.mxu0 %v4251_v40  ;;  %v18765_v40 = vld [vmem:[#allocation32_spill] sm:$0xff]  ;;  %v18776_v7 = vpack.c.bf16 %v15585_v32, %v15568_v59 }
 0x7cb   :  { %v4175_v12 = vpop.permute.xlu1 %4174  ;;  %v4177_v1 = vpop.permute.xlu0 %4176  ;;  %11401 = vmatpush3.bf16.msra.mxu0 %v11754_v44 }
 0x7cc   :  { %11402 = vmatprep.subr.bf16.mxu0 %v18699_v29  ;;  %v4257_v52 = vsel %vm1149_vm15, %v15330_v50, %v4175_v12  ;;  %v4260_v11 = vsel %vm1149_vm15, %v18754_v37, %v4177_v1  ;;  %v4233_v16 = vsel %vm1149_vm15, %v18761_v10, %v4177_v1 }
 0x7ce   :  { %4585 = vmatmul.mubr.bf16.gmra.mxu0 %v4217_v56  ;;  %v18767_v56 = vld [vmem:[#allocation31_spill] sm:$0xff] }
 0x7cf   :  { %v4179_v26 = vpop.permute.xlu1 %4178  ;;  %4592 = vmatprep.mubr.bf16.mxu0 %v4254_v3  ;;  %v4181_v43 = vpop.permute.xlu0 %4180  ;;  %11403 = vmatpush3.bf16.msra.mxu0 %v11755_v31  ;;  %v4272_v3 = vsel %vm1149_vm15, %v18767_v56, %v15696_v22 }
 0x7d0   :  { %11404 = vmatprep.subr.bf16.mxu0 %v18699_v29  ;;  %v4263_v30 = vsel %vm1149_vm15, %v18758_v13, %v4179_v26  ;;  %v4266_v23 = vsel %vm1149_vm15, %v18762_v21, %v4181_v43  ;;  %v4237_v19 = vsel %vm1149_vm15, %v18764_v58, %v4179_v26 }
 0x7d3   :  { %v4183_v55 = vpop.permute.xlu1 %4182  ;;  %v4196_v57 = vpop.permute.xlu0 %4195  ;;  %11405 = vmatpush3.bf16.msra.mxu0 %v11756_v46 }
 0x7d4   :  { %v4278_v4 = vsel %vm1149_vm15, %v15279_v8, %v4196_v57  ;;  %v18753_v8 = vpack.c.bf16 %v15348_v62, %v15321_v27 }
 0x7d5   :  { %4681 = vmatprep.mubr.bf16.mxu1 %v4278_v4 }
 0x7d6   :  { %4593 = vmatmul.mubr.bf16.gmra.mxu0 %v4221_v17  ;;  %v4225_v2 = vsel %vm1149_vm15, %v18753_v8, %v4173_v33  ;;  %v4269_v33 = vsel %vm1149_vm15, %v15509_v49, %v4183_v55 }
 0x7d7   :  { %v4194_v54 = vpop.permute.xlu1 %4193  ;;  %4600 = vmatprep.mubr.bf16.mxu0 %v4257_v52  ;;  %v4198_v6 = vpop.permute.xlu0 %4197 }
 0x7d8   :  { %v4275_v63 = vsel %vm1149_vm15, %v15225_v53, %v4194_v54  ;;  %v4281_v28 = vsel %vm1149_vm15, %v15330_v50, %v4198_v6  ;;  %v18756_v50 = vld [vmem:[#allocation30_spill] sm:$0xff] }
 0x7d9   :  { %4682 = vmatmul.mubr.bf16.vlgmr.msra.gmra.mxu1 %v4275_v63  ;;  %v18757_v24 = vpack.c.bf16 %v18755_v48, %v18756_v50 }
 0x7da   :  { %4689 = vmatprep.mubr.bf16.mxu1 %v4281_v28 }
 0x7db   :  { %v4200_v15 = vpop.permute.xlu1 %4199  ;;  %v4229_v36 = vsel %vm1149_vm15, %v18757_v24, %v4175_v12  ;;  %v4202_v18 = vpop.permute.xlu0 %4201  ;;  %v18766_v12 = vpack.c.bf16 %v15525_v25, %v18765_v40 }
 0x7dc   :  { %v4284_v53 = vsel %vm1149_vm15, %v18754_v37, %v4200_v15  ;;  %v4287_v60 = vsel %vm1149_vm15, %v18758_v13, %v4202_v18 }
 0x7dd   :  { %v4241_v1 = vsel %vm1149_vm15, %v18766_v12, %v4181_v43  ;;  %v18770_v43 = vpack.c.bf16 %v15321_v27, %v15297_v35  ;;  %v18773_v35 = vpack.c.bf16 %v18763_v47, %v18759_v61  ;;  %v18774_v27 = vpack.c.bf16 %v18765_v40, %v15482_v20 }
 0x7de   :  { %4601 = vmatmul.mubr.bf16.gmra.mxu0 %v4225_v2  ;;  %v18777_v20 = vpack.c.bf16 %v15270_v5, %v15247_v9 }
 0x7df   :  { %4608 = vmatprep.mubr.bf16.mxu0 %v4260_v11  ;;  %v4204_v45 = vpop.permute.xlu1 %4203  ;;  %v4206_v42 = vpop.permute.xlu0 %4205 }
 0x7e0   :  { %v4290_v38 = vsel %vm1149_vm15, %v18762_v21, %v4204_v45  ;;  %v4293_v44 = vsel %vm1149_vm15, %v15509_v49, %v4206_v42  ;;  %v18768_v49 = vld [vmem:[#allocation34_spill] sm:$0xff] }
 0x7e1   :  { %4690 = vmatmul.mubr.bf16.gmra.mxu1 %v4278_v4  ;;  %v18769_v46 = vpack.c.bf16 %v15568_v59, %v18768_v49 }
 0x7e2   :  { %4697 = vmatprep.mubr.bf16.mxu1 %v4284_v53 }
 0x7e3   :  { %v4208_v31 = vpop.permute.xlu1 %4207  ;;  %v4245_v57 = vsel %vm1149_vm15, %v18769_v46, %v4183_v55  ;;  %v4210_v4 = vpop.permute.xlu0 %4209  ;;  %v18771_v55 = vpack.c.bf16 %v18756_v50, %v15348_v62  ;;  %v18775_v62 = vpack.c.bf16 %v18768_v49, %v15525_v25 }
 0x7e4   :  { %v4296_v26 = vsel %vm1149_vm15, %v18767_v56, %v4208_v31  ;;  %v4299_v22 = vsel %vm1149_vm15, %v15590_v41, %v4210_v4  ;;  %v18772_v41 = vpack.c.bf16 %v18760_v39, %v18755_v48 }
 0x7e6   :  { %4609 = vmatmul.mubr.bf16.gmra.mxu0 %v4229_v36 }
 0x7e7   :  { %4616 = vmatprep.mubr.bf16.mxu0 %v4263_v30 }
 0x7e9   :  { %4698 = vmatmul.mubr.bf16.gmra.mxu1 %v4281_v28 }
 0x7ea   :  { %4705 = vmatprep.mubr.bf16.mxu1 %v4287_v60 }
 0x7ee   :  { %4617 = vmatmul.mubr.bf16.gmra.mxu0 %v4233_v16 }
 0x7ef   :  { %4624 = vmatprep.mubr.bf16.mxu0 %v4266_v23 }
 0x7f1   :  { %4706 = vmatmul.mubr.bf16.gmra.mxu1 %v4284_v53 }
 0x7f2   :  { %4713 = vmatprep.mubr.bf16.mxu1 %v4290_v38 }
 0x7f6   :  { %4625 = vmatmul.mubr.bf16.gmra.mxu0 %v4237_v19 }
 0x7f7   :  { %4632 = vmatprep.mubr.bf16.mxu0 %v4269_v33 }
 0x7f9   :  { %4714 = vmatmul.mubr.bf16.gmra.mxu1 %v4287_v60 }
 0x7fa   :  { %4721 = vmatprep.mubr.bf16.mxu1 %v4293_v44 }
 0x7fe   :  { %4633 = vmatmul.mubr.bf16.gmra.mxu0 %v4241_v1 }
 0x7ff   :  { %4640 = vmatprep.mubr.bf16.mxu0 %v4272_v3 }
 0x801   :  { %4722 = vmatmul.mubr.bf16.gmra.mxu1 %v4290_v38 }
 0x802   :  { %4729 = vmatprep.mubr.bf16.mxu1 %v4296_v26 }
 0x806   :  { %4641 = vmatmul.mubr.bf16.gmra.mxu0 %v4245_v57 }
 0x807   :  { %11406 = vmatprep.mubr.msk.bf16.mxu0 %vm12017_vm5, %v18699_v29 }
 0x809   :  { %4730 = vmatmul.mubr.bf16.gmra.mxu1 %v4293_v44 }
 0x80a   :  { %4737 = vmatprep.mubr.bf16.mxu1 %v4299_v22 }
 0x80e   :  { %11407 = vmatmul.mubr.msk.bf16.vlgmr.msra.gmra.mxu0 %vm1149_vm15, %v18770_v43 }
 0x80f   :  { %11410 = vmatprep.mubr.msk.bf16.mxu0 %vm12017_vm5, %v18699_v29 }
 0x811   :  { %4738 = vmatmul.mubr.bf16.gmra.mxu1 %v4296_v26 }
 0x812   :  { %4745 = vmatprep.mubr.bf16.mxu1 %v4275_v63 }
 0x816   :  { %11411 = vmatmul.mubr.msk.bf16.gmra.mxu0 %vm1149_vm15, %v18771_v55 }
 0x817   :  { %11414 = vmatprep.mubr.msk.bf16.mxu0 %vm12017_vm5, %v18699_v29 }
 0x819   :  { %4746 = vmatmul.mubr.bf16.gmra.mxu1 %v4299_v22 }
 0x81e   :  { %11415 = vmatmul.mubr.msk.bf16.gmra.mxu0 %vm1149_vm15, %v18772_v41 }
 0x81f   :  { %11418 = vmatprep.mubr.msk.bf16.mxu0 %vm12017_vm5, %v18699_v29 }
 0x826   :  { %11419 = vmatmul.mubr.msk.bf16.gmra.mxu0 %vm1149_vm15, %v18773_v35 }
 0x827   :  { %11422 = vmatprep.mubr.msk.bf16.mxu0 %vm12017_vm5, %v18699_v29 }
 0x82e   :  { %11423 = vmatmul.mubr.msk.bf16.gmra.mxu0 %vm1149_vm15, %v18774_v27 }
 0x82f   :  { %11426 = vmatprep.mubr.msk.bf16.mxu0 %vm12017_vm5, %v18699_v29 }
 0x836   :  { %11427 = vmatmul.mubr.msk.bf16.gmra.mxu0 %vm1149_vm15, %v18775_v62 }
 0x837   :  { %11430 = vmatprep.mubr.msk.bf16.mxu0 %vm12017_vm5, %v18699_v29 }
 0x83e   :  { %11431 = vmatmul.mubr.msk.bf16.gmra.mxu0 %vm1149_vm15, %v18776_v7 }
 0x83f   :  { %11434 = vmatprep.mubr.msk.bf16.mxu0 %vm12017_vm5, %v18699_v29 }
 0x846   :  { %11435 = vmatmul.mubr.msk.bf16.gmra.mxu0 %vm1149_vm15, %v4155_v51 }
 0x847   :  { %11438 = vmatprep.mubr.msk.bf16.mxu0 %vm12017_vm5, %v18699_v29 }
 0x84e   :  { %11439 = vmatmul.mubr.msk.bf16.gmra.mxu0 %vm1149_vm15, %v18777_v20 }
 0x886   :  { %v10541_v25 = vpop.f32.mrf.mxu0 }
 0x888   :  { %v10542_v59 = vpop.f32.mrf.mxu0 }
 0x889   :  { %v10543_v32 = vadd.f32 %v10542_v59, %v10541_v25 }
 0x88a   :  { %v10544_v17 = vpop.f32.mrf.mxu0 }
 0x88c   :  { %v10545_v52 = vpop.f32.mrf.mxu0 }
 0x88d   :  { %v10546_v24 = vadd.f32 %v10545_v52, %v10544_v17  ;;  %v11757_v52 = vld [vmem:[%s18294_s4 + $0x2b8] sm:$0xff]  }
 0x88e   :  { %v10547_v54 = vpop.f32.mrf.mxu0  ;;  %10678 = vmatprep.subr.bf16.mxu1 %v11757_v52  ;;  %v11765_v52 = vld [vmem:[%s18294_s4 + $0x298] sm:$0xff]  }
 0x890   :  { %v10548_v6 = vpop.f32.mrf.mxu0 }
 0x891   :  { %v10549_v63 = vadd.f32 %v10548_v6, %v10547_v54  ;;  %v11758_v54 = vld [vmem:[%s18294_s4 + $0x278] sm:$0xff]   ;;  %v11759_v6 = vld [vmem:[%s18294_s4 + $0x2b0] sm:$0xff]  }
 0x892   :  { %v15835_v28 = vpop.f32.mrf.mxu0  ;;  %10679 = vmatpush3.bf16.msra.mxu1 %v11758_v54 }
 0x893   :  { %10680 = vmatprep.subr.bf16.mxu1 %v11759_v6  ;;  %v15976_v6 = vld [vmem:[%s18300_s9 + $0x1] ss:$0 sm:$0xff] }
 0x894   :  { %v15837_v14 = vpop.f32.mrf.mxu0 }
 0x896   :  { %v10553_v0 = vpop.f32.mrf.mxu0 }
 0x898   :  { %v10554_v51 = vpop.f32.mrf.mxu0 }
 0x899   :  { %v15839_v8 = vadd.f32 %v10554_v51, %v10553_v0  ;;  %v10611_v2 = vpop.f32.mrf.mxu1  ;;  %v11760_v51 = vld [vmem:[%s18294_s4 + $0x270] sm:$0xff]  }
 0x89a   :  { %v15841_v9 = vpop.f32.mrf.mxu0  ;;  %10681 = vmatpush3.bf16.msra.mxu1 %v11760_v51 }
 0x89b   :  { %v10612_v5 = vpop.f32.mrf.mxu1 }
 0x89c   :  { %v10613_v15 = vadd.f32 %v10612_v5, %v10611_v2  ;;  %v15843_v37 = vpop.f32.mrf.mxu0  ;;  %v11761_v5 = vld [vmem:[%s18294_s4 + $0x2a8] sm:$0xff]  }
 0x89d   :  { %v10614_v11 = vpop.f32.mrf.mxu1  ;;  %10682 = vmatprep.subr.bf16.mxu1 %v11761_v5 }
 0x89e   :  { %v10559_v53 = vpop.f32.mrf.mxu0  ;;  %v15845_v48 = vadd.f32 %v10613_v15, %v10543_v32  ;;  %v11771_v15 = vld [vmem:[%s18294_s4 + $0x338] sm:$0xff]  }
 0x89f   :  { %v10615_v50 = vpop.f32.mrf.mxu1  ;;  %10748 = vmatprep.subr.bf16.mxu0 %v11771_v15  ;;  %v11767_v15 = vld [vmem:[%s18294_s4 + $0x290] sm:$0xff]  }
 0x8a0   :  { %v10616_v36 = vadd.f32 %v10615_v50, %v10614_v11  ;;  %v10560_v18 = vpop.f32.mrf.mxu0  ;;  %v11772_v50 = vld [vmem:[%s18294_s4 + $0x2f8] sm:$0xff]  }
 0x8a1   :  { %v15847_v13 = vadd.f32 %v10560_v18, %v10559_v53  ;;  %v10617_v30 = vpop.f32.mrf.mxu1  ;;  %v11762_v18 = vld [vmem:[%s18294_s4 + $0x268] sm:$0xff]   ;;  %10749 = vmatpush3.bf16.msra.mxu0 %v11772_v50 }
 0x8a2   :  { %v15849_v60 = vpop.f32.mrf.mxu0  ;;  %v15851_v61 = vadd.f32 %v10616_v36, %v10546_v24  ;;  %v11775_v36 = vld [vmem:[%s18294_s4 + $0x330] sm:$0xff]   ;;  %10683 = vmatpush3.bf16.msra.mxu1 %v11762_v18 }
 0x8a3   :  { %v10618_v39 = vpop.f32.mrf.mxu1  ;;  %10750 = vmatprep.subr.bf16.mxu0 %v11775_v36 }
 0x8a4   :  { %v10619_v10 = vadd.f32 %v10618_v39, %v10617_v30  ;;  %v15853_v16 = vpop.f32.mrf.mxu0  ;;  %v11776_v30 = vld [vmem:[%s18294_s4 + $0x2f0] sm:$0xff]  }
 0x8a5   :  { %v15855_v45 = vpop.f32.mrf.mxu1  ;;  %10751 = vmatpush3.bf16.msra.mxu0 %v11776_v30 }
 0x8a6   :  { %v10565_v21 = vpop.f32.mrf.mxu0  ;;  %v15857_v23 = vadd.f32 %v10619_v10, %v10549_v63  ;;  %v11763_v10 = vld [vmem:[%s18294_s4 + $0x2a0] sm:$0xff]  }
 0x8a7   :  { %v15859_v38 = vpop.f32.mrf.mxu1  ;;  %10684 = vmatprep.subr.bf16.mxu1 %v11763_v10 }
 0x8a8   :  { %v10566_v47 = vpop.f32.mrf.mxu0 }
 0x8a9   :  { %v15861_v58 = vadd.f32 %v10566_v47, %v10565_v21  ;;  %v15863_v19 = vpop.f32.mrf.mxu1  ;;  %v11777_v21 = vld [vmem:[%s18294_s4 + $0x328] sm:$0xff]  }
 0x8aa   :  { %v15865_v42 = vpop.f32.mrf.mxu0  ;;  %10752 = vmatprep.subr.bf16.mxu0 %v11777_v21  ;;  %v11768_v21 = vld [vmem:[%s18294_s4 + $0x250] sm:$0xff]  }
 0x8ab   :  { %v15867_v33 = vpop.f32.mrf.mxu1 }
 0x8ac   :  { %v15869_v44 = vpop.f32.mrf.mxu0 }
 0x8ad   :  { %v15871_v40 = vpop.f32.mrf.mxu1 }
 0x8ae   :  { %v10571_v12 = vpop.f32.mrf.mxu0 }
 0x8af   :  { %v15873_v1 = vpop.f32.mrf.mxu1 }
 0x8b0   :  { %v10572_v31 = vpop.f32.mrf.mxu0 }
 0x8b1   :  { %v15875_v56 = vadd.f32 %v10572_v31, %v10571_v12  ;;  %v15877_v3 = vpop.f32.mrf.mxu1  ;;  %v15958_v31 = vld [vmem:[%s18299_s8 + $0x1] ss:$0 sm:$0xff] }
 0x8b2   :  { %v15879_v26 = vpop.f32.mrf.mxu0 }
 0x8b3   :  { %v15881_v49 = vpop.f32.mrf.mxu1 }
 0x8b4   :  { %v15883_v46 = vpop.f32.mrf.mxu0 }
 0x8b5   :  { %v15885_v57 = vpop.f32.mrf.mxu1 }
 0x8b6   :  { %v10577_v4 = vpop.f32.mrf.mxu0 }
 0x8b7   :  { %v15887_v22 = vpop.f32.mrf.mxu1 }
 0x8b8   :  { %v10578_v43 = vpop.f32.mrf.mxu0 }
 0x8b9   :  { %v15889_v55 = vadd.f32 %v10578_v43, %v10577_v4  ;;  %v15891_v41 = vpop.f32.mrf.mxu1  ;;  %v11764_v43 = vld [vmem:[%s18294_s4 + $0x260] sm:$0xff]  }
 0x8ba   :  { %v15893_v35 = vpop.f32.mrf.mxu0  ;;  %10685 = vmatpush3.bf16.msra.mxu1 %v11764_v43 }
 0x8bb   :  { %18778 = vst [vmem:[#allocation36_spill] sm:$0xff] %v15889_v55  ;;  %v15897_v62 = vpop.f32.mrf.mxu1  ;;  %10686 = vmatprep.subr.bf16.mxu1 %v11765_v52  ;;  %v18781_v52 = vld [vmem:[#allocation47_spill] sm:$0xff] }
 0x8bc   :  { %v15895_v27 = vpop.f32.mrf.mxu0 }
 0x8bd   :  { %v15899_v25 = vpop.f32.mrf.mxu1 }
 0x8be   :  { %v10583_v7 = vpop.f32.mrf.mxu0 }
 0x8bf   :  { %v15916_v63 = vpop.f32.mrf.mxu1 }
 0x8c0   :  { %v10584_v20 = vpop.f32.mrf.mxu0 }
 0x8c1   :  { %v15901_v59 = vadd.f32 %v10584_v20, %v10583_v7  ;;  %v15927_v11 = vpop.f32.mrf.mxu1  ;;  %v11778_v7 = vld [vmem:[%s18294_s4 + $0x2e8] sm:$0xff]  }
 0x8c2   :  { %v15903_v32 = vpop.f32.mrf.mxu0  ;;  %10753 = vmatpush3.bf16.msra.mxu0 %v11778_v7  ;;  %v18780_v7 = vld [vmem:[#allocation45_spill] sm:$0xff] }
 0x8c3   :  { %v15953_v47 = vpop.f32.mrf.mxu1 }
 0x8c4   :  { %v15905_v17 = vpop.f32.mrf.mxu0 }
 0x8c5   :  { %v15970_v54 = vpop.f32.mrf.mxu1 }
 0x8c6   :  { %v10589_v0 = vpop.f32.mrf.mxu0 }
 0x8c7   :  { %v15985_v50 = vpop.f32.mrf.mxu1 }
 0x8c8   :  { %v10590_v2 = vpop.f32.mrf.mxu0 }
 0x8c9   :  { %v15929_v53 = vadd.f32 %v10590_v2, %v10589_v0  ;;  %v11766_v2 = vld [vmem:[%s18294_s4 + $0x258] sm:$0xff]   ;;  %v15997_v43 = vpop.f32.mrf.mxu1 }
 0x8ca   :  { %v15934_v24 = vpop.f32.mrf.mxu0  ;;  %10687 = vmatpush3.bf16.msra.mxu1 %v11766_v2 }
 0x8cb   :  { %18779 = vst [vmem:[#allocation37_spill] sm:$0xff] %v15929_v53  ;;  %10688 = vmatprep.subr.bf16.mxu1 %v11767_v15 }
 0x8cc   :  { %v15945_v39 = vpop.f32.mrf.mxu0 }
 0x8ce   :  { %v4788_v12 = vpop.f32.mrf.mxu0  ;;  %10689 = vmatpush3.bf16.msra.mxu1 %v11768_v21 }
 0x8cf   :  { %v4789_v4 = vadd.f32 %v4788_v12, %v15845_v48 }
 0x8d0   :  { %v11408_v20 = vpop.f32.mrf.mxu0 }
 0x8d1   :  { %v4867_v48 = vmul.f32 %v15958_v31, %v4789_v4  ;;  %v11769_v4 = vld [vmem:[%s18294_s4 + $0x288] sm:$0xff]  }
 0x8d2   :  { %v4791_v0 = vpop.f32.mrf.mxu0  ;;  %10690 = vmatprep.subr.bf16.mxu1 %v11769_v4 }
 0x8d3   :  { %v4792_v51 = vadd.f32 %v4791_v0, %v15851_v61  ;;  %v4893_v36 = vadd.f32 %v15976_v6, %v4867_v48 }
 0x8d4   :  { %v11409_v5 = vpop.f32.mrf.mxu0 }
 0x8d5   :  { %v4868_v18 = vmul.f32 %v15958_v31, %v4792_v51  ;;  %v4911_v20 = vadd.f32 %v4893_v36, %v18780_v7  ;;  %v11770_v5 = vld [vmem:[%s18294_s4 + $0x248] sm:$0xff]   ;;  %v16009_v36 = vpop.f32.mrf.mxu1 }
 0x8d6   :  { %v4796_v30 = vpop.f32.mrf.mxu0  ;;  %v18783_v7 = vld [vmem:[#allocation7_spill] sm:$0xff]  ;;  %10691 = vmatpush3.bf16.msra.mxu1 %v11770_v5 }
 0x8d7   :  { %v4894_v61 = vadd.f32 %v15976_v6, %v4868_v18  ;;  %v4797_v10 = vadd.f32 %v4796_v30, %v15857_v23  ;;  %v11773_v18 = vld [vmem:[%s18294_s4 + $0x280] sm:$0xff]   ;;  %v4929_v30 = vmax.f32 %v4911_v20, 0.0 }
 0x8d8   :  { %v11412_v12 = vpop.f32.mrf.mxu0  ;;  %10692 = vmatprep.subr.bf16.mxu1 %v11773_v18  ;;  %v18787_v20 = vld [vmem:[#allocation10_spill] sm:$0xff] }
 0x8d9   :  { %v4912_v48 = vadd.f32 %v4894_v61, %v18781_v52  ;;  %v4869_v0 = vmul.f32 %v15958_v31, %v4797_v10  ;;  %v18782_v61 = vld [vmem:[#allocation49_spill] sm:$0xff] }
 0x8da   :  { %v4799_v23 = vpop.f32.mrf.mxu0 }
 0x8db   :  { %v4930_v51 = vmax.f32 %v4912_v48, 0.0  ;;  %v4895_v2 = vadd.f32 %v15976_v6, %v4869_v0  ;;  %v11774_v48 = vld [vmem:[%s18294_s4 + $0x240] sm:$0xff]   ;;  %v16018_v0 = vpop.f32.mrf.mxu1 }
 0x8dc   :  { %v11413_v15 = vpop.f32.mrf.mxu0  ;;  %10693 = vmatpush3.bf16.msra.mxu1 %v11774_v48 }
 0x8dd   :  { %v4913_v10 = vadd.f32 %v4895_v2, %v18782_v61  ;;  %v16013_v52 = vmul.f32 %v4930_v51, %v18783_v7  ;;  %v18785_v15 = vld [vmem:[#allocation4_spill] sm:$0xff]  ;;  %11442 = vmatprep.subr.bf16.mxu1 %v18699_v29 }
 0x8de   :  { %v4804_v12 = vpop.f32.mrf.mxu0  ;;  %v16021_v53 = vmul.f32 %v4929_v30, %v18785_v15 }
 0x8df   :  { %18784 = vst [vmem:[#allocation30_spill] sm:$0xff] %v16013_v52  ;;  %v4931_v21 = vmax.f32 %v4913_v10, 0.0  ;;  %v5039_v51 = vrot.slane %v16013_v52, 4  ;;  %v16029_v10 = vpop.f32.mrf.mxu1 }
 0x8e0   :  { %v11416_v4 = vpop.f32.mrf.mxu0  ;;  %18786 = vst [vmem:[#allocation39_spill] sm:$0xff] %v16021_v53  ;;  %v18454_v18 = vrot.slane %v16021_v53, 4 }
 0x8e1   :  { %v16024_v55 = vmul.f32 %v4931_v21, %v18787_v20  ;;  %v10653_v20 = vpop.f32.mrf.mxu1 }
 0x8e2   :  { %v4807_v2 = vpop.f32.mrf.mxu0  ;;  %v16044_v21 = vsel %vm206_vm2, %v18454_v18, %v5039_v51 }
 0x8e3   :  { %18788 = vst [vmem:[#allocation41_spill] sm:$0xff] %v16024_v55  ;;  %v18449_v5 = vrot.slane %v16024_v55, 4  ;;  %18791 = vst [vmem:[#allocation48_spill] sm:$0xff] %v16044_v21  ;;  %v10654_v29 = vpop.f32.mrf.mxu1 }
 0x8e4   :  { %v11417_v61 = vpop.f32.mrf.mxu0 }
 0x8e5   :  { %v16038_v30 = vsel %vm206_vm2, %v5039_v51, %v18449_v5  ;;  %v10622_v5 = vadd.f32 %v15859_v38, %v15855_v45  ;;  %v10656_v53 = vpop.f32.mrf.mxu1  ;;  %v10552_v51 = vadd.f32 %v15837_v14, %v15835_v28  ;;  %v10628_v14 = vadd.f32 %v15873_v1, %v15871_v40 }
 0x8e6   :  { %v16032_v4 = vpop.f32.mrf.mxu0  ;;  %18790 = vst [vmem:[#allocation33_spill] sm:$0xff] %v16038_v30  ;;  %v10564_v40 = vadd.f32 %v15853_v16, %v15849_v60  ;;  %v10640_v1 = vadd.f32 %v15916_v63, %v15899_v25  ;;  %v10576_v60 = vadd.f32 %v15883_v46, %v15879_v26  ;;  %v18795_v16 = vld [vmem:[#allocation6_spill] sm:$0xff]  ;;  %v10582_v63 = vadd.f32 %v15895_v27, %v15893_v35 }
 0x8e7   :  { %18789 = vst [vmem:[#allocation38_spill] sm:$0xff] %v16032_v4  ;;  %v10657_v18 = vpop.f32.mrf.mxu1  ;;  %v4695_v61 = vadd.f32 %v10622_v5, %v10552_v51  ;;  %v10652_v35 = vadd.f32 %v16029_v10, %v16018_v0 }
 0x8e8   :  { %v11420_v48 = vpop.f32.mrf.mxu0 }
 0x8e9   :  { %v4800_v21 = vadd.f32 %v4799_v23, %v4695_v61  ;;  %v10558_v23 = vadd.f32 %v15843_v37, %v15841_v9  ;;  %v10643_v9 = vadd.f32 %v15953_v47, %v15927_v11  ;;  %v10646_v37 = vadd.f32 %v15985_v50, %v15970_v54 }
 0x8ea   :  { %v16048_v7 = vpop.f32.mrf.mxu0  ;;  %v10658_v54 = vadd.f32 %v10657_v18, %v10656_v53 }
 0x8eb   :  { %18792 = vst [vmem:[#allocation32_spill] sm:$0xff] %v16048_v7  ;;  %v4870_v45 = vmul.f32 %v15958_v31, %v4800_v21  ;;  %v4724_v27 = vadd.f32 %v10643_v9, %v15875_v56 }
 0x8ec   :  { %v11421_v15 = vpop.f32.mrf.mxu0 }
 0x8ed   :  { %v10625_v15 = vadd.f32 %v15867_v33, %v15863_v19  ;;  %v10631_v19 = vadd.f32 %v15881_v49, %v15877_v3  ;;  %v4896_v33 = vadd.f32 %v15976_v6, %v4870_v45 }
 0x8ee   :  { %v16050_v55 = vpop.f32.mrf.mxu0  ;;  %v18799_v10 = vld [vmem:[#allocation38_spill] sm:$0xff] }
 0x8ef   :  { %18793 = vst [vmem:[#allocation31_spill] sm:$0xff] %v16050_v55  ;;  %v4700_v38 = vadd.f32 %v10625_v15, %v15839_v8  ;;  %v10637_v8 = vadd.f32 %v15897_v62, %v15891_v41  ;;  %v4914_v62 = vadd.f32 %v4896_v33, %v18795_v16  ;;  %v18798_v15 = vld [vmem:[#allocation8_spill] sm:$0xff]  ;;  %v18803_v33 = vld [vmem:[#allocation15_spill] sm:$0xff] }
 0x8f0   :  { %v11424_v4 = vpop.f32.mrf.mxu0 }
 0x8f1   :  { %v10659_v4 = vpop.f32.mrf.mxu1  ;;  %v4805_v28 = vadd.f32 %v4804_v12, %v4700_v38  ;;  %v4716_v11 = vadd.f32 %v10637_v8, %v15861_v58  ;;  %v10594_v58 = vadd.f32 %v15945_v39, %v15934_v24  ;;  %v4932_v53 = vmax.f32 %v4914_v62, 0.0 }
 0x8f2   :  { %v16054_v52 = vpop.f32.mrf.mxu0 }
 0x8f3   :  { %18794 = vst [vmem:[#allocation34_spill] sm:$0xff] %v16054_v52  ;;  %v10660_v7 = vpop.f32.mrf.mxu1  ;;  %v4871_v49 = vmul.f32 %v15958_v31, %v4805_v28  ;;  %v18800_v28 = vld [vmem:[#allocation32_spill] sm:$0xff] }
 0x8f4   :  { %v11425_v48 = vpop.f32.mrf.mxu0 }
 0x8f5   :  { %v10662_v3 = vpop.f32.mrf.mxu1  ;;  %v4897_v50 = vadd.f32 %v15976_v6, %v4871_v49 }
 0x8f6   :  { %v16058_v30 = vpop.f32.mrf.mxu0 }
 0x8f7   :  { %v4915_v0 = vadd.f32 %v4897_v50, %v18798_v15 }
 0x8f8   :  { %v11428_v34 = vpop.f32.mrf.mxu0 }
 0x8f9   :  { %v10634_v34 = vadd.f32 %v15887_v22, %v15885_v57  ;;  %v10570_v57 = vadd.f32 %v15869_v44, %v15865_v42  ;;  %v4703_v22 = vadd.f32 %v10628_v14, %v10558_v23  ;;  %v10649_v42 = vadd.f32 %v16009_v36, %v15997_v43 }
 0x8fa   :  { %v16062_v55 = vpop.f32.mrf.mxu0  ;;  %v4727_v43 = vadd.f32 %v10646_v37, %v10576_v60  ;;  %v18801_v39 = vld [vmem:[#allocation34_spill] sm:$0xff]  ;;  %v16118_v23 = vmul.f32 %v4932_v53, %v18803_v33  ;;  %v4933_v60 = vmax.f32 %v4915_v0, 0.0 }
 0x8fb   :  { %v4711_v25 = vadd.f32 %v10634_v34, %v10564_v40  ;;  %v4808_v44 = vadd.f32 %v4807_v2, %v4703_v22  ;;  %v4719_v26 = vadd.f32 %v10640_v1, %v10570_v57  ;;  %v10661_v2 = vadd.f32 %v10660_v7, %v10659_v4  ;;  %v18805_v40 = vld [vmem:[#allocation37_spill] sm:$0xff] }
 0x8fc   :  { %v11429_v52 = vpop.f32.mrf.mxu0  ;;  %v4735_v4 = vadd.f32 %v10652_v35, %v10582_v63  ;;  %18804 = vst [vmem:[#allocation45_spill] sm:$0xff] %v16118_v23 }
 0x8fd   :  { %v10655_v52 = vadd.f32 %v10654_v29, %v10653_v20  ;;  %v4708_v29 = vadd.f32 %v10631_v19, %v15847_v13  ;;  %v10663_v20 = vpop.f32.mrf.mxu1  ;;  %v10588_v13 = vadd.f32 %v15905_v17, %v15903_v32  ;;  %v4872_v61 = vmul.f32 %v15958_v31, %v4808_v44  ;;  %v18797_v32 = vld [vmem:[#allocation30_spill] sm:$0xff]  ;;  %v18802_v19 = vld [vmem:[#allocation39_spill] sm:$0xff] }
 0x8fe   :  { %v16068_v5 = vpop.f32.mrf.mxu0  ;;  %v10664_v21 = vadd.f32 %v10663_v20, %v10662_v3  ;;  %v5084_v17 = vrot.slane %v18797_v32, 6  ;;  %v4816_v24 = vadd.f32 %v18800_v28, %v4711_v25  ;;  %v4824_v7 = vadd.f32 %v18801_v39, %v4719_v26  ;;  %v18806_v3 = vld [vmem:[#allocation31_spill] sm:$0xff]  ;;  %v18814_v39 = vld [vmem:[#allocation5_spill] sm:$0xff] }
 0x8ff   :  { %v4740_v46 = vadd.f32 %v10655_v52, %v15901_v59  ;;  %v18796_v59 = vld [vmem:[#allocation36_spill] sm:$0xff]  ;;  %v4813_v56 = vadd.f32 %v18799_v10, %v4708_v29  ;;  %v4743_v38 = vadd.f32 %v10658_v54, %v10588_v13  ;;  %v5083_v34 = vrot.slane %v18802_v19, 6  ;;  %v18808_v29 = vld [vmem:[#allocation41_spill] sm:$0xff]  ;;  %v18810_v13 = vld [vmem:[#allocation42_spill] sm:$0xff] }
 0x900   :  { %v11432_v12 = vpop.f32.mrf.mxu0  ;;  %v4732_v51 = vadd.f32 %v10649_v42, %v18796_v59  ;;  %v4748_v1 = vadd.f32 %v10661_v2, %v18805_v40  ;;  %v4898_v52 = vadd.f32 %v15976_v6, %v4872_v61  ;;  %v4821_v49 = vadd.f32 %v18806_v3, %v4716_v11  ;;  %v18809_v54 = vld [vmem:[#allocation17_spill] sm:$0xff]  ;;  %v18817_v40 = vld [vmem:[#allocation46_spill] sm:$0xff] }
 0x901   :  { %v4751_v9 = vadd.f32 %v10664_v21, %v10594_v58  ;;  %v16130_v22 = vsel %vm252_vm0, %v5083_v34, %v5084_v17  ;;  %v4873_v16 = vmul.f32 %v15958_v31, %v4813_v56  ;;  %v5085_v25 = vrot.slane %v18808_v29, 6 }
 0x902   :  { %v4839_v41 = vpop.f32.mrf.mxu0  ;;  %v4874_v63 = vmul.f32 %v15958_v31, %v4816_v24  ;;  %v4876_v42 = vmul.f32 %v15958_v31, %v4824_v7  ;;  %v4832_v44 = vadd.f32 %v16062_v55, %v4727_v43  ;;  %v4916_v35 = vadd.f32 %v4898_v52, %v18810_v13  ;;  %v18813_v43 = vld [vmem:[#allocation13_spill] sm:$0xff]  ;;  %v18818_v52 = vld [vmem:[#allocation40_spill] sm:$0xff] }
 0x903   :  { %v4840_v11 = vadd.f32 %v4839_v41, %v4735_v4  ;;  %v4829_v58 = vadd.f32 %v16058_v30, %v4724_v27  ;;  %v4837_v53 = vadd.f32 %v16068_v5, %v4732_v51  ;;  %v4899_v41 = vadd.f32 %v15976_v6, %v4873_v16  ;;  %v18816_v4 = vld [vmem:[#allocation18_spill] sm:$0xff]  ;;  %v18820_v16 = vld [vmem:[#allocation24_spill] sm:$0xff] }
 0x904   :  { %v11433_v47 = vpop.f32.mrf.mxu0  ;;  %v4900_v59 = vadd.f32 %v15976_v6, %v4874_v63  ;;  %v4878_v15 = vmul.f32 %v15958_v31, %v4832_v44  ;;  %v4934_v56 = vmax.f32 %v4916_v35, 0.0  ;;  %v18827_v35 = vld [vmem:[#allocation50_spill] sm:$0xff] }
 0x905   :  { %v4880_v30 = vmul.f32 %v15958_v31, %v4840_v11  ;;  %v4879_v28 = vmul.f32 %v15958_v31, %v4837_v53  ;;  %v18824_v11 = vld [vmem:[#allocation44_spill] sm:$0xff] }
 0x906   :  { %v4844_v36 = vpop.f32.mrf.mxu0  ;;  %v4918_v3 = vadd.f32 %v4900_v59, %v18818_v52  ;;  %v18829_v59 = vld [vmem:[#allocation22_spill] sm:$0xff] }
 0x907   :  { %v4845_v18 = vadd.f32 %v4844_v36, %v4740_v46  ;;  %v5086_v46 = vrot.slane %v16118_v23, 6  ;;  %v4875_v36 = vmul.f32 %v15958_v31, %v4821_v49  ;;  %v18819_v49 = vld [vmem:[#allocation43_spill] sm:$0xff] }
 0x908   :  { %v11436_v48 = vpop.f32.mrf.mxu0 }
 0x909   :  { %v4881_v45 = vmul.f32 %v15958_v31, %v4845_v18  ;;  %v18811_v18 = vld [vmem:[#allocation11_spill] sm:$0xff]  ;;  %v4902_v48 = vadd.f32 %v15976_v6, %v4876_v42  ;;  %v18822_v42 = vld [vmem:[#allocation20_spill] sm:$0xff] }
 0x90a   :  { %v4847_v14 = vpop.f32.mrf.mxu0  ;;  %v16146_v55 = vmul.f32 %v4933_v60, %v18811_v18  ;;  %v4906_v60 = vadd.f32 %v15976_v6, %v4880_v30  ;;  %v16182_v44 = vmul.f32 %v4934_v56, %v18822_v42 }
 0x90b   :  { %v4907_v8 = vadd.f32 %v15976_v6, %v4881_v45  ;;  %v4848_v12 = vadd.f32 %v4847_v14, %v4743_v38  ;;  %v4901_v45 = vadd.f32 %v15976_v6, %v4875_v36  ;;  %v4877_v38 = vmul.f32 %v15958_v31, %v4829_v58 }
 0x90c   :  { %v11437_v57 = vpop.f32.mrf.mxu0  ;;  %18812 = vst [vmem:[#allocation47_spill] sm:$0xff] %v16146_v55  ;;  %18823 = vst [vmem:[#allocation36_spill] sm:$0xff] %v16182_v44  ;;  %v5087_v58 = vrot.slane %v16146_v55, 6 }
 0x90d   :  { %v4882_v62 = vmul.f32 %v15958_v31, %v4848_v12  ;;  %v4925_v50 = vadd.f32 %v4907_v8, %v18809_v54  ;;  %v16170_v12 = vsel %vm252_vm0, %v5085_v25, %v5086_v46  ;;  %v4920_v57 = vadd.f32 %v4902_v48, %v18819_v49 }
 0x90e   :  { %v4852_v47 = vpop.f32.mrf.mxu0  ;;  %v4903_v54 = vadd.f32 %v15976_v6, %v4877_v38  ;;  %v4924_v48 = vadd.f32 %v4906_v60, %v18829_v59  ;;  %v11782_v38 = vld [vmem:[%s18294_s4 + $0x318] sm:$0xff]  }
 0x90f   :  { %v4908_v20 = vadd.f32 %v15976_v6, %v4882_v62  ;;  %v4853_v26 = vadd.f32 %v4852_v47, %v4748_v1  ;;  %v4943_v5 = vmax.f32 %v4925_v50, 0.0  ;;  %v4917_v1 = vadd.f32 %v4899_v41, %v18817_v40 }
 0x910   :  { %v11440_v2 = vpop.f32.mrf.mxu0  ;;  %v4919_v47 = vadd.f32 %v4901_v45, %v18824_v11  ;;  %v4905_v50 = vadd.f32 %v15976_v6, %v4879_v28  ;;  %v5088_v45 = vrot.slane %v16182_v44, 6  ;;  %v11783_v28 = vld [vmem:[%s18294_s4 + $0x2d8] sm:$0xff]   ;;  %v4942_v60 = vmax.f32 %v4924_v48, 0.0 }
 0x911   :  { %v4926_v21 = vadd.f32 %v4908_v20, %v18813_v43  ;;  %v4883_v61 = vmul.f32 %v15958_v31, %v4853_v26  ;;  %v11779_v20 = vld [vmem:[%s18294_s4 + $0x320] sm:$0xff]   ;;  %v18825_v26 = vld [vmem:[#allocation12_spill] sm:$0xff]  ;;  %v4935_v41 = vmax.f32 %v4917_v1, 0.0  ;;  %v4936_v43 = vmax.f32 %v4918_v3, 0.0 }
 0x912   :  { %v4855_v27 = vpop.f32.mrf.mxu0  ;;  %v11780_v2 = vld [vmem:[%s18294_s4 + $0x2e0] sm:$0xff]   ;;  %10754 = vmatprep.subr.bf16.mxu0 %v11779_v20  ;;  %v18840_v20 = vld [vmem:[#allocation16_spill] sm:$0xff] }
 0x913   :  { %v4944_v51 = vmax.f32 %v4926_v21, 0.0  ;;  %v4909_v0 = vadd.f32 %v15976_v6, %v4883_v61  ;;  %v4856_v10 = vadd.f32 %v4855_v27, %v4751_v9  ;;  %v4904_v9 = vadd.f32 %v15976_v6, %v4878_v15  ;;  %v18828_v21 = vld [vmem:[#allocation26_spill] sm:$0xff]  ;;  %10755 = vmatpush3.bf16.msra.mxu0 %v11780_v2  ;;  %v18834_v1 = vld [vmem:[#allocation23_spill] sm:$0xff] }
 0x914   :  { %v11441_v24 = vpop.f32.mrf.mxu0  ;;  %v16227_v52 = vmul.f32 %v4936_v43, %v18834_v1  ;;  %v18836_v3 = vld [vmem:[#allocation27_spill] sm:$0xff]  ;;  %10756 = vmatprep.subr.bf16.mxu0 %v11782_v38 }
 0x915   :  { %v16160_v7 = vmul.f32 %v4944_v51, %v18814_v39  ;;  %v4927_v14 = vadd.f32 %v4909_v0, %v18816_v4  ;;  %v4884_v8 = vmul.f32 %v15958_v31, %v4856_v10  ;;  %v16178_v31 = vmul.f32 %v4943_v5, %v18820_v16  ;;  %v18830_v51 = vld [vmem:[#allocation25_spill] sm:$0xff]  ;;  %v18831_v10 = vld [vmem:[#allocation28_spill] sm:$0xff] }
 0x916   :  { %v4922_v61 = vadd.f32 %v4904_v9, %v18828_v21  ;;  %v4937_v5 = vmax.f32 %v4919_v47, 0.0  ;;  %v4921_v0 = vadd.f32 %v4903_v54, %v18830_v51  ;;  %v4923_v56 = vadd.f32 %v4905_v50, %v18831_v10  ;;  %v18832_v24 = vld [vmem:[#allocation9_spill] sm:$0xff]  ;;  %18835 = vst [vmem:[#allocation32_spill] sm:$0xff] %v16227_v52  ;;  %v18838_v54 = vld [vmem:[#allocation14_spill] sm:$0xff]  ;;  %v11786_v38 = vld [vmem:[%s18294_s4 + $0x308] sm:$0xff]  }
 0x917   :  { %18815 = vst [vmem:[#allocation49_spill] sm:$0xff] %v16160_v7  ;;  %18821 = vst [vmem:[#allocation6_spill] sm:$0xff] %v16178_v31  ;;  %v4945_v62 = vmax.f32 %v4927_v14, 0.0  ;;  %v4910_v63 = vadd.f32 %v15976_v6, %v4884_v8  ;;  %v5053_v53 = vrot.slane %v16160_v7, 4  ;;  %v4938_v6 = vmax.f32 %v4920_v57, 0.0  ;;  %10757 = vmatpush3.bf16.msra.mxu0 %v11783_v28  ;;  %v11784_v47 = vld [vmem:[%s18294_s4 + $0x310] sm:$0xff]  }
 0x918   :  { %v18460_v27 = vrot.slane %v16178_v31, 4  ;;  %v4940_v57 = vmax.f32 %v4922_v61, 0.0  ;;  %v16241_v50 = vmul.f32 %v4935_v41, %v18838_v54  ;;  %v4941_v2 = vmax.f32 %v4923_v56, 0.0  ;;  %10758 = vmatprep.subr.bf16.mxu0 %v11784_v47  ;;  %v11785_v21 = vld [vmem:[%s18294_s4 + $0x2d0] sm:$0xff]   ;;  %v11787_v28 = vld [vmem:[%s18294_s4 + $0x2c8] sm:$0xff]  }
 0x919   :  { %v16191_v13 = vmul.f32 %v4945_v62, %v18825_v26  ;;  %v4928_v36 = vadd.f32 %v4910_v63, %v18827_v35  ;;  %v16230_v49 = vmul.f32 %v4938_v6, %v18836_v3  ;;  %v5098_v63 = vrot.slane %v16160_v7, 6 }
 0x91a   :  { %v16224_v40 = vsel %vm206_vm2, %v18460_v27, %v5053_v53  ;;  %18839 = vst [vmem:[#allocation37_spill] sm:$0xff] %v16241_v50  ;;  %v16244_v35 = vmul.f32 %v4937_v5, %v18840_v20  ;;  %v5090_v48 = vrot.slane %v16227_v52, 6  ;;  %v18843_v5 = vld [vmem:[#allocation29_spill] sm:$0xff] }
 0x91b   :  { %18826 = vst [vmem:[#allocation8_spill] sm:$0xff] %v16191_v13  ;;  %v4946_v15 = vmax.f32 %v4928_v36, 0.0  ;;  %v5054_v30 = vrot.slane %v16191_v13, 4  ;;  %v5099_v14 = vrot.slane %v16191_v13, 6  ;;  %18837 = vst [vmem:[#allocation34_spill] sm:$0xff] %v16230_v49  ;;  %v4939_v36 = vmax.f32 %v4921_v0, 0.0  ;;  %10759 = vmatpush3.bf16.msra.mxu0 %v11785_v21 }
 0x91c   :  { %18841 = vst [vmem:[#allocation31_spill] sm:$0xff] %v16244_v35  ;;  %v16270_v51 = vmul.f32 %v4940_v57, %v18843_v5  ;;  %v18845_v0 = vld [vmem:[#allocation35_spill] sm:$0xff]  ;;  %v5092_v56 = vrot.slane %v16230_v49, 6  ;;  %10760 = vmatprep.subr.bf16.mxu0 %v11786_v38 }
 0x91d   :  { %v16213_v4 = vmul.f32 %v4946_v15, %v18832_v24  ;;  %v16218_v8 = vsel %vm206_vm2, %v5053_v53, %v5054_v30  ;;  %v5113_v53 = vsel %vm252_vm0, %v5087_v58, %v5088_v45  ;;  %v5102_v41 = vsel %vm252_vm0, %v5098_v63, %v5099_v14 }
 0x91e   :  { %18844 = vst [vmem:[#allocation3_spill] sm:$0xff] %v16270_v51  ;;  %v16273_v10 = vmul.f32 %v4942_v60, %v18845_v0  ;;  %v18847_v60 = vld [vmem:[#allocation19_spill] sm:$0xff] }
 0x91f   :  { %18833 = vst [vmem:[#allocation38_spill] sm:$0xff] %v16213_v4  ;;  %v5100_v62 = vrot.slane %v16213_v4, 6  ;;  %v5055_v11 = vrot.slane %v16213_v4, 4  ;;  %10761 = vmatpush3.bf16.msra.mxu0 %v11787_v28 }
 0x920   :  { %18846 = vst [vmem:[#allocation17_spill] sm:$0xff] %v16273_v10 }
 0x921   :  { %v5118_v43 = vsel %vm252_vm0, %v5100_v62, %v5083_v34  ;;  %v5101_v6 = vsel %vm252_vm0, %v5099_v14, %v5100_v62  ;;  %v18842_v34 = vrot.slane %v18802_v19, 4  ;;  %v5114_v14 = vsel %vm252_vm0, %v5086_v46, %v5087_v58 }
 0x922   :  { %v5120_v61 = vpack.c.bf16 %v16130_v22, %v5118_v43  ;;  %v5119_v59 = vpack.c.bf16 %v5101_v6, %v5102_v41  ;;  %v16278_v22 = vsel %vm206_vm2, %v5054_v30, %v5055_v11  ;;  %v5116_v30 = vsel %vm252_vm0, %v5084_v17, %v5085_v25 }
 0x923   :  { %v16267_v15 = vsel %vm206_vm2, %v5055_v11, %v18842_v34  ;;  %v16301_v62 = vmul.f32 %v4939_v36, %v18847_v60  ;;  %v18849_v11 = vld [vmem:[#allocation21_spill] sm:$0xff]  ;;  %v5091_v43 = vrot.slane %v16244_v35, 6  ;;  %v5089_v6 = vrot.slane %v16241_v50, 6 }
 0x924   :  { %5202 = vrot.lane.b32.xlu1 %v5120_v61, %s12019_s30  ;;  %5200 = vrot.lane.b32.xlu0 %v5119_v59, %s12019_s30  ;;  %v16304_v47 = vmul.f32 %v4941_v2, %v18849_v11  ;;  %v5121_v17 = vpack.c.bf16 %v16170_v12, %v5116_v30  ;;  %v5122_v25 = vpack.c.bf16 %v5113_v53, %v5114_v14  ;;  %v5094_v36 = vrot.slane %v16270_v51, 6  ;;  %v11788_v2 = vld [vmem:[%s18294_s4 + $0x300] sm:$0xff]  }
 0x925   :  { %18848 = vst [vmem:[#allocation42_spill] sm:$0xff] %v16301_v62  ;;  %v5109_v46 = vsel %vm252_vm0, %v5091_v43, %v5092_v56  ;;  %v5111_v58 = vsel %vm252_vm0, %v5089_v6, %v5090_v48  ;;  %v5096_v41 = vrot.slane %v16273_v10, 6  ;;  %v5110_v12 = vsel %vm252_vm0, %v5090_v48, %v5091_v43  ;;  %10762 = vmatprep.subr.bf16.mxu0 %v11788_v2  ;;  %v11789_v59 = vld [vmem:[%s18294_s4 + $0x2c0] sm:$0xff]  }
 0x926   :  { %18850 = vst [vmem:[#allocation13_spill] sm:$0xff] %v16304_v47  ;;  %v5112_v53 = vsel %vm252_vm0, %v5088_v45, %v5089_v6  ;;  %v5095_v21 = vrot.slane %v16304_v47, 6  ;;  %v5093_v61 = vrot.slane %v16301_v62, 6  ;;  %v5124_v34 = vpack.c.bf16 %v5109_v46, %v5110_v12  ;;  %10763 = vmatpush3.bf16.msra.mxu0 %v11789_v59 }
 0x927   :  { %v5123_v38 = vpack.c.bf16 %v5111_v58, %v5112_v53  ;;  %v5141_v30 = vrot.slane %v16146_v55, 2  ;;  %v5140_v43 = vrot.slane %v16118_v23, 2  ;;  %v5097_v6 = vrot.slane %v16178_v31, 6 }
 0x928   :  { %5204 = vrot.lane.b32.xlu1 %v5121_v17, %s12019_s30  ;;  %5206 = vrot.lane.b32.xlu0 %v5122_v25, %s12019_s30  ;;  %v5105_v28 = vsel %vm252_vm0, %v5095_v21, %v5096_v41  ;;  %v5107_v48 = vsel %vm252_vm0, %v5093_v61, %v5094_v36  ;;  %v5106_v45 = vsel %vm252_vm0, %v5094_v36, %v5095_v21  ;;  %v5139_v46 = vrot.slane %v18808_v29, 2 }
 0x929   :  { %v5108_v14 = vsel %vm252_vm0, %v5092_v56, %v5093_v61  ;;  %v5126_v17 = vpack.c.bf16 %v5105_v28, %v5106_v45  ;;  %v5168_v58 = vsel %vm307_vm1, %v5140_v43, %v5141_v30  ;;  %v5103_v2 = vsel %vm252_vm0, %v5097_v6, %v5098_v63 }
 0x92a   :  { %v5125_v25 = vpack.c.bf16 %v5107_v48, %v5108_v14  ;;  %v5143_v36 = vrot.slane %v16241_v50, 2  ;;  %v5169_v56 = vsel %vm307_vm1, %v5139_v46, %v5140_v43  ;;  %v5104_v12 = vsel %vm252_vm0, %v5096_v41, %v5097_v6 }
 0x92b   :  { %v5142_v53 = vrot.slane %v16182_v44, 2  ;;  %v5138_v21 = vrot.slane %v18797_v32, 2  ;;  %v5174_v61 = vpack.c.bf16 %v5168_v58, %v5169_v56  ;;  %v5127_v59 = vpack.c.bf16 %v5103_v2, %v5104_v12 }
 0x92c   :  { %5210 = vrot.lane.b32.xlu0 %v5124_v34, %s12019_s30  ;;  %5208 = vrot.lane.b32.xlu1 %v5123_v38, %s12019_s30  ;;  %v5137_v63 = vrot.slane %v18802_v19, 2  ;;  %v5145_v28 = vrot.slane %v16244_v35, 2  ;;  %v5147_v48 = vrot.slane %v16301_v62, 2  ;;  %v5146_v14 = vrot.slane %v16230_v49, 2 }
 0x92d   :  { %v5166_v34 = vsel %vm307_vm1, %v5142_v53, %v5143_v36  ;;  %v5170_v38 = vsel %vm307_vm1, %v5138_v21, %v5139_v46  ;;  %v5167_v41 = vsel %vm307_vm1, %v5141_v30, %v5142_v53  ;;  %v5144_v43 = vrot.slane %v16227_v52, 2 }
 0x92e   :  { %v5171_v45 = vsel %vm307_vm1, %v5137_v63, %v5138_v21  ;;  %v5175_v6 = vpack.c.bf16 %v5166_v34, %v5167_v41  ;;  %v5149_v58 = vrot.slane %v16304_v47, 2  ;;  %v5151_v2 = vrot.slane %v16178_v31, 2 }
 0x92f   :  { %v5164_v46 = vsel %vm307_vm1, %v5144_v43, %v5145_v28  ;;  %v5163_v30 = vsel %vm307_vm1, %v5145_v28, %v5146_v14  ;;  %v5165_v56 = vsel %vm307_vm1, %v5143_v36, %v5144_v43  ;;  %v5150_v12 = vrot.slane %v16273_v10, 2 }
 0x930   :  { %5214 = vrot.lane.b32.xlu0 %v5126_v17, %s12019_s30  ;;  %5212 = vrot.lane.b32.xlu1 %v5125_v25, %s12019_s30  ;;  %v5173_v17 = vpack.c.bf16 %v5170_v38, %v5171_v45  ;;  %v5162_v25 = vsel %vm307_vm1, %v5146_v14, %v5147_v48  ;;  %v5148_v53 = vrot.slane %v16270_v51, 2  ;;  %v5153_v38 = vrot.slane %v16191_v13, 2 }
 0x931   :  { %v5177_v21 = vpack.c.bf16 %v5162_v25, %v5163_v30  ;;  %v5154_v41 = vrot.slane %v16213_v4, 2  ;;  %v5159_v36 = vsel %vm307_vm1, %v5149_v58, %v5150_v12  ;;  %v5152_v45 = vrot.slane %v16160_v7, 2 }
 0x932   :  { %v5160_v34 = vsel %vm307_vm1, %v5148_v53, %v5149_v58  ;;  %v5161_v28 = vsel %vm307_vm1, %v5147_v48, %v5148_v53  ;;  %v5074_v30 = vpack.c.bf16 %v16278_v22, %v16218_v8 }
 0x933   :  { %v5178_v43 = vpack.c.bf16 %v5160_v34, %v5161_v28  ;;  %v5156_v25 = vsel %vm307_vm1, %v5152_v45, %v5153_v38  ;;  %v5157_v48 = vsel %vm307_vm1, %v5151_v2, %v5152_v45  ;;  %v18852_v28 = vld [vmem:[#allocation48_spill] sm:$0xff] }
 0x934   :  { %5229 = vrot.lane.b32.xlu0 %v5174_v61, %s12019_s30  ;;  %5216 = vrot.lane.b32.xlu1 %v5127_v59, %s12019_s30  ;;  %v5176_v61 = vpack.c.bf16 %v5164_v46, %v5165_v56  ;;  %v5158_v59 = vsel %vm307_vm1, %v5150_v12, %v5151_v2  ;;  %v5180_v58 = vpack.c.bf16 %v5156_v25, %v5157_v48  ;;  %v11781_v2 = vld [vmem:[%s18294_s4 + $0x358] sm:$0xff]  }
 0x935   :  { %v5179_v14 = vpack.c.bf16 %v5158_v59, %v5159_v36  ;;  %v18851_v36 = vmov 0.0   ;;  %v5075_v45 = vpack.c.bf16 %v18852_v28, %v16267_v15  ;;  %v5130_v25 = vpack.c.bf16 %v16118_v23, %v18808_v29 }
 0x938   :  { %5231 = vrot.lane.b32.xlu0 %v5175_v6, %s12019_s30  ;;  %5227 = vrot.lane.b32.xlu1 %v5173_v17, %s12019_s30  ;;  %v5155_v6 = vsel %vm307_vm1, %v5153_v38, %v5154_v41  ;;  %v5172_v17 = vsel %vm307_vm1, %v5154_v41, %v5137_v63  ;;  %v16416_v63 = vpack.c.bf16 %v16213_v4, %v16191_v13  ;;  %v11790_v38 = vld [vmem:[%s18294_s4 + $0x350] sm:$0xff]  }
 0x939   :  { %v5181_v46 = vpack.c.bf16 %v5172_v17, %v5155_v6  ;;  %v11791_v6 = vld [vmem:[%s18294_s4 + $0x348] sm:$0xff]   ;;  %v5041_v17 = vrot.slane %v16118_v23, 4 }
 0x93c   :  { %5235 = vrot.lane.b32.xlu0 %v5177_v21, %s12019_s30  ;;  %5233 = vrot.lane.b32.xlu1 %v5176_v61, %s12019_s30  ;;  %v5129_v61 = vpack.c.bf16 %v18797_v32, %v18802_v19  ;;  %v11798_v32 = vld [vmem:[%s18296_s7 + $0x268] sm:$0xff]   ;;  %v11812_v19 = vld [vmem:[%s18296_s7 + $0x2f0] sm:$0xff]  }
 0x940   :  { %5239 = vrot.lane.b32.xlu0 %v5179_v14, %s12019_s30  ;;  %5237 = vrot.lane.b32.xlu1 %v5178_v43, %s12019_s30 }
 0x944   :  { %5243 = vrot.lane.b32.xlu0 %v5181_v46, %s12019_s30  ;;  %5241 = vrot.lane.b32.xlu1 %v5180_v58, %s12019_s30 }
 0x996   :  { %v5203_v56 = vpop.permute.xlu1 %5202  ;;  %v16418_v12 = vpop.permute.xlu0 %5200 }
 0x997   :  { %v5247_v53 = vsel %vm1149_vm15, %v5074_v30, %v16418_v12  ;;  %v5282_v21 = vsel %vm1149_vm15, %v16416_v63, %v5203_v56  ;;  %v5251_v48 = vsel %vm1149_vm15, %v5075_v45, %v5203_v56  ;;  %v18854_v56 = vld [vmem:[#allocation33_spill] sm:$0xff] }
 0x998   :  { %5610 = vmatprep.mubr.bf16.mxu1 %v5282_v21 }
 0x999   :  { %5611 = vmatmul.mubr.bf16.vlgmr.msra.gmra.mxu1 %v5247_v53  ;;  %v18853_v53 = vrot.slane %v18808_v29, 4 }
 0x99a   :  { %11443 = vmatpush3.bf16.msra.mxu1 %v11781_v2  ;;  %v5205_v59 = vpop.permute.xlu1 %5204  ;;  %v5207_v34 = vpop.permute.xlu0 %5206  ;;  %v11792_v2 = vld [vmem:[%s18294_s4 + $0x340] sm:$0xff]  }
 0x99b   :  { %v5285_v41 = vsel %vm1149_vm15, %v5129_v61, %v5205_v59  ;;  %11444 = vmatprep.subr.bf16.mxu1 %v18851_v36  ;;  %v5288_v46 = vsel %vm1149_vm15, %v5130_v25, %v5207_v34  ;;  %v16458_v21 = vsel %vm206_vm2, %v18853_v53, %v5041_v17  ;;  %v5042_v53 = vrot.slane %v16146_v55, 4 }
 0x99c   :  { %5618 = vmatprep.mubr.bf16.mxu1 %v5285_v41 }
 0x99e   :  { %v16436_v14 = vpop.permute.xlu0 %5210  ;;  %v5209_v43 = vpop.permute.xlu1 %5208  ;;  %11445 = vmatpush3.bf16.msra.mxu1 %v11790_v38  ;;  %v5076_v38 = vpack.c.bf16 %v16458_v21, %v18854_v56 }
 0x99f   :  { %11446 = vmatprep.subr.bf16.mxu1 %v18851_v36 }
 0x9a0   :  { %v5255_v57 = vsel %vm1149_vm15, %v5076_v38, %v5205_v59  ;;  %v16483_v59 = vsel %vm206_vm2, %v5041_v17, %v5042_v53  ;;  %v5132_v38 = vpack.c.bf16 %v16227_v52, %v16241_v50 }
 0x9a1   :  { %5619 = vmatmul.mubr.bf16.gmra.mxu1 %v5251_v48 }
 0x9a2   :  { %5626 = vmatprep.mubr.bf16.mxu1 %v5288_v46  ;;  %v16447_v58 = vpop.permute.xlu0 %5214  ;;  %v16449_v30 = vpop.permute.xlu1 %5212  ;;  %11447 = vmatpush3.bf16.msra.mxu1 %v11791_v6  ;;  %v5043_v6 = vrot.slane %v16182_v44, 4  ;;  %v5131_v46 = vpack.c.bf16 %v16182_v44, %v16146_v55  ;;  %v11797_v44 = vld [vmem:[%s18296_s7 + $0x2a8] sm:$0xff]   ;;  %v11807_v55 = vld [vmem:[%s18296_s7 + $0x338] sm:$0xff]  }
 0x9a3   :  { %11448 = vmatprep.subr.bf16.mxu1 %v18851_v36 }
 0x9a4   :  { %v5291_v9 = vsel %vm1149_vm15, %v5131_v46, %v5209_v43 }
 0x9a6   :  { %v5230_v41 = vpop.permute.xlu0 %5229  ;;  %v16463_v45 = vpop.permute.xlu1 %5216  ;;  %11449 = vmatpush3.bf16.msra.mxu1 %v11792_v2  ;;  %v16474_v2 = vsel %vm206_vm2, %v5042_v53, %v5043_v6 }
 0x9a7   :  { %v5312_v48 = vsel %vm1149_vm15, %v5130_v25, %v5230_v41  ;;  %10901 = vmatprep.subr.bf16.mxu1 %v11807_v55  ;;  %v11799_v55 = vld [vmem:[%s18296_s7 + $0x2a0] sm:$0xff]  }
 0x9a8   :  { %5715 = vmatprep.mubr.bf16.mxu0 %v5312_v48 }
 0x9a9   :  { %5627 = vmatmul.mubr.bf16.gmra.mxu1 %v5255_v57  ;;  %v5045_v57 = vrot.slane %v16227_v52, 4  ;;  %v5046_v52 = vrot.slane %v16244_v35, 4 }
 0x9aa   :  { %v5232_v27 = vpop.permute.xlu0 %5231  ;;  %5634 = vmatprep.mubr.bf16.mxu1 %v5291_v9  ;;  %v5228_v4 = vpop.permute.xlu1 %5227  ;;  %v5077_v9 = vpack.c.bf16 %v16474_v2, %v16483_v59 }
 0x9ab   :  { %v16477_v25 = vsel %vm1149_vm15, %v5129_v61, %v5228_v4  ;;  %v5315_v41 = vsel %vm1149_vm15, %v5131_v46, %v5232_v27  ;;  %v5044_v61 = vrot.slane %v16241_v50, 4  ;;  %v5294_v46 = vsel %vm1149_vm15, %v5132_v38, %v16436_v14 }
 0x9ac   :  { %5716 = vmatmul.mubr.bf16.vlgmr.msra.gmra.mxu0 %v16477_v25  ;;  %v5259_v4 = vsel %vm1149_vm15, %v5077_v9, %v5207_v34  ;;  %v5047_v9 = vrot.slane %v16230_v49, 4 }
 0x9ad   :  { %5723 = vmatprep.mubr.bf16.mxu0 %v5315_v41  ;;  %v16496_v17 = vsel %vm206_vm2, %v5044_v61, %v5045_v57  ;;  %v16501_v13 = vsel %vm206_vm2, %v5043_v6, %v5044_v61 }
 0x9ae   :  { %v5234_v27 = vpop.permute.xlu1 %5233  ;;  %v5078_v34 = vpack.c.bf16 %v16496_v17, %v16501_v13  ;;  %v16514_v6 = vsel %vm206_vm2, %v5046_v52, %v5047_v9 }
 0x9af   :  { %v5318_v53 = vsel %vm1149_vm15, %v5132_v38, %v5234_v27  ;;  %v5065_v27 = vsel %vm206_vm2, %v5045_v57, %v5046_v52 }
 0x9b1   :  { %5635 = vmatmul.mubr.bf16.gmra.mxu1 %v5259_v4  ;;  %v5133_v4 = vpack.c.bf16 %v16230_v49, %v16244_v35  ;;  %v5048_v49 = vrot.slane %v16301_v62, 4 }
 0x9b2   :  { %5642 = vmatprep.mubr.bf16.mxu1 %v5294_v46  ;;  %v5263_v46 = vsel %vm1149_vm15, %v5078_v34, %v5209_v43  ;;  %v5079_v43 = vpack.c.bf16 %v16514_v6, %v5065_v27  ;;  %v5049_v34 = vrot.slane %v16270_v51, 4  ;;  %v5238_v35 = vpop.permute.xlu1 %5237 }
 0x9b3   :  { %v5297_v38 = vsel %vm1149_vm15, %v5133_v4, %v16449_v30 }
 0x9b4   :  { %5724 = vmatmul.mubr.bf16.gmra.mxu0 %v5312_v48  ;;  %v5236_v48 = vpop.permute.xlu0 %5235  ;;  %v5062_v52 = vsel %vm206_vm2, %v5048_v49, %v5049_v34 }
 0x9b5   :  { %5731 = vmatprep.mubr.bf16.mxu0 %v5318_v53  ;;  %v5321_v61 = vsel %vm1149_vm15, %v5133_v4, %v5236_v48  ;;  %v5063_v4 = vsel %vm206_vm2, %v5047_v9, %v5048_v49 }
 0x9b6   :  { %v5080_v48 = vpack.c.bf16 %v5062_v52, %v5063_v4 }
 0x9b9   :  { %5643 = vmatmul.mubr.bf16.gmra.mxu1 %v5263_v46  ;;  %v5134_v46 = vpack.c.bf16 %v16270_v51, %v16301_v62  ;;  %v5240_v51 = vpop.permute.xlu0 %5239 }
 0x9ba   :  { %5650 = vmatprep.mubr.bf16.mxu1 %v5297_v38  ;;  %v5267_v38 = vsel %vm1149_vm15, %v5079_v43, %v16436_v14  ;;  %v5051_v14 = vrot.slane %v16273_v10, 4  ;;  %v5135_v43 = vpack.c.bf16 %v16273_v10, %v16304_v47 }
 0x9bb   :  { %v5324_v57 = vsel %vm1149_vm15, %v5134_v46, %v5238_v35 }
 0x9bc   :  { %5732 = vmatmul.mubr.bf16.gmra.mxu0 %v5315_v41  ;;  %v5300_v41 = vsel %vm1149_vm15, %v5134_v46, %v16447_v58  ;;  %v5303_v35 = vsel %vm1149_vm15, %v5135_v43, %v16463_v45 }
 0x9bd   :  { %5739 = vmatprep.mubr.bf16.mxu0 %v5321_v61 }
 0x9c1   :  { %5651 = vmatmul.mubr.bf16.gmra.mxu1 %v5267_v38  ;;  %v5271_v38 = vsel %vm1149_vm15, %v5080_v48, %v16449_v30  ;;  %v5136_v30 = vpack.c.bf16 %v16160_v7, %v16178_v31 }
 0x9c2   :  { %5658 = vmatprep.mubr.bf16.mxu1 %v5300_v41  ;;  %v5050_v41 = vrot.slane %v16304_v47, 4  ;;  %v11793_v47 = vld [vmem:[%s18296_s7 + $0x2b8] sm:$0xff]  }
 0x9c3   :  { %10831 = vmatprep.subr.bf16.mxu0 %v11793_v47  ;;  %v11808_v47 = vld [vmem:[%s18296_s7 + $0x2f8] sm:$0xff]  }
 0x9c4   :  { %5740 = vmatmul.mubr.bf16.gmra.mxu0 %v5318_v53  ;;  %v5060_v49 = vsel %vm206_vm2, %v5050_v41, %v5051_v14  ;;  %v5327_v53 = vsel %vm1149_vm15, %v5135_v43, %v5240_v51  ;;  %v5061_v9 = vsel %vm206_vm2, %v5049_v34, %v5050_v41  ;;  %v5244_v41 = vpop.permute.xlu0 %5243 }
 0x9c5   :  { %5747 = vmatprep.mubr.bf16.mxu0 %v5324_v57  ;;  %v5081_v46 = vpack.c.bf16 %v5060_v49, %v5061_v9 }
 0x9c7   :  { %v5275_v48 = vsel %vm1149_vm15, %v5081_v46, %v16447_v58 }
 0x9c9   :  { %5659 = vmatmul.mubr.bf16.gmra.mxu1 %v5271_v38  ;;  %v5242_v38 = vpop.permute.xlu1 %5241 }
 0x9ca   :  { %5666 = vmatprep.mubr.bf16.mxu1 %v5303_v35  ;;  %v5306_v35 = vsel %vm1149_vm15, %v5136_v30, %v16418_v12  ;;  %v5330_v51 = vsel %vm1149_vm15, %v5136_v30, %v5242_v38  ;;  %v5333_v12 = vsel %vm1149_vm15, %v16416_v63, %v5244_v41  ;;  %v5184_v63 = vpack.c.bf16 %v5065_v27, %v16496_v17 }
 0x9cb   :  { %v18858_v17 = vpack.c.bf16 %v18854_v56, %v18852_v28 }
 0x9cc   :  { %5748 = vmatmul.mubr.bf16.gmra.mxu0 %v5321_v61  ;;  %v18855_v61 = vrot.slane %v16178_v31, 4 }
 0x9cd   :  { %5755 = vmatprep.mubr.bf16.mxu0 %v5327_v53 }
 0x9ce   :  { %v5059_v34 = vsel %vm206_vm2, %v5051_v14, %v18855_v61 }
 0x9cf   :  { %v5082_v43 = vpack.c.bf16 %v16224_v40, %v5059_v34 }
 0x9d1   :  { %5667 = vmatmul.mubr.bf16.gmra.mxu1 %v5275_v48  ;;  %v5279_v58 = vsel %vm1149_vm15, %v5082_v43, %v16463_v45  ;;  %v5183_v45 = vpack.c.bf16 %v16501_v13, %v16474_v2  ;;  %v5186_v13 = vpack.c.bf16 %v5061_v9, %v5062_v52  ;;  %v5187_v2 = vpack.c.bf16 %v5059_v34, %v5060_v49 }
 0x9d2   :  { %5674 = vmatprep.mubr.bf16.mxu1 %v5306_v35 }
 0x9d4   :  { %5756 = vmatmul.mubr.bf16.gmra.mxu0 %v5324_v57  ;;  %v5182_v57 = vpack.c.bf16 %v16483_v59, %v16458_v21  ;;  %v5185_v21 = vpack.c.bf16 %v5063_v4, %v16514_v6  ;;  %v18857_v59 = vpack.c.bf16 %v16267_v15, %v16278_v22 }
 0x9d5   :  { %5763 = vmatprep.mubr.bf16.mxu0 %v5330_v51 }
 0x9d9   :  { %5675 = vmatmul.mubr.bf16.gmra.mxu1 %v5279_v58 }
 0x9da   :  { %11450 = vmatprep.mubr.msk.bf16.mxu1 %vm12017_vm5, %v18851_v36 }
 0x9dc   :  { %5764 = vmatmul.mubr.bf16.gmra.mxu0 %v5327_v53 }
 0x9dd   :  { %5771 = vmatprep.mubr.bf16.mxu0 %v5333_v12 }
 0x9e1   :  { %11451 = vmatmul.mubr.msk.bf16.vlgmr.msra.gmra.mxu1 %vm1149_vm15, %v5182_v57 }
 0x9e2   :  { %11454 = vmatprep.mubr.msk.bf16.mxu1 %vm12017_vm5, %v18851_v36  ;;  %10902 = vmatpush3.bf16.msra.mxu1 %v11808_v47  ;;  %v11800_v47 = vld [vmem:[%s18296_s7 + $0x260] sm:$0xff]  }
 0x9e4   :  { %5772 = vmatmul.mubr.bf16.gmra.mxu0 %v5330_v51 }
 0x9e5   :  { %5779 = vmatprep.mubr.bf16.mxu0 %v16477_v25  ;;  %v18856_v25 = vpack.c.bf16 %v16218_v8, %v16224_v40 }
 0x9e9   :  { %11455 = vmatmul.mubr.msk.bf16.gmra.mxu1 %vm1149_vm15, %v5183_v45 }
 0x9ea   :  { %11458 = vmatprep.mubr.msk.bf16.mxu1 %vm12017_vm5, %v18851_v36 }
 0x9ec   :  { %5780 = vmatmul.mubr.bf16.gmra.mxu0 %v5333_v12 }
 0x9f1   :  { %11459 = vmatmul.mubr.msk.bf16.gmra.mxu1 %vm1149_vm15, %v5184_v63 }
 0x9f2   :  { %11462 = vmatprep.mubr.msk.bf16.mxu1 %vm12017_vm5, %v18851_v36 }
 0x9f9   :  { %11463 = vmatmul.mubr.msk.bf16.gmra.mxu1 %vm1149_vm15, %v5185_v21 }
 0x9fa   :  { %11466 = vmatprep.mubr.msk.bf16.mxu1 %vm12017_vm5, %v18851_v36 }
 0xa01   :  { %11467 = vmatmul.mubr.msk.bf16.gmra.mxu1 %vm1149_vm15, %v5186_v13 }
 0xa02   :  { %11470 = vmatprep.mubr.msk.bf16.mxu1 %vm12017_vm5, %v18851_v36 }
 0xa09   :  { %11471 = vmatmul.mubr.msk.bf16.gmra.mxu1 %vm1149_vm15, %v5187_v2 }
 0xa0a   :  { %11474 = vmatprep.mubr.msk.bf16.mxu1 %vm12017_vm5, %v18851_v36 }
 0xa11   :  { %11475 = vmatmul.mubr.msk.bf16.gmra.mxu1 %vm1149_vm15, %v18856_v25 }
 0xa12   :  { %11478 = vmatprep.mubr.msk.bf16.mxu1 %vm12017_vm5, %v18851_v36 }
 0xa19   :  { %11479 = vmatmul.mubr.msk.bf16.gmra.mxu1 %vm1149_vm15, %v18857_v59 }
 0xa1a   :  { %11482 = vmatprep.mubr.msk.bf16.mxu1 %vm12017_vm5, %v18851_v36 }
 0xa21   :  { %11483 = vmatmul.mubr.msk.bf16.gmra.mxu1 %vm1149_vm15, %v18858_v17 }
 0xa59   :  { %v10694_v6 = vpop.f32.mrf.mxu1 }
 0xa5b   :  { %v10695_v8 = vpop.f32.mrf.mxu1 }
 0xa5c   :  { %v10696_v40 = vadd.f32 %v10695_v8, %v10694_v6 }
 0xa5d   :  { %v10697_v27 = vpop.f32.mrf.mxu1 }
 0xa5f   :  { %v10698_v52 = vpop.f32.mrf.mxu1 }
 0xa60   :  { %v10699_v43 = vadd.f32 %v10698_v52, %v10697_v27 }
 0xa61   :  { %v10700_v4 = vpop.f32.mrf.mxu1 }
 0xa63   :  { %v10701_v14 = vpop.f32.mrf.mxu1 }
 0xa64   :  { %v10702_v49 = vadd.f32 %v10701_v14, %v10700_v4 }
 0xa65   :  { %v16605_v53 = vpop.f32.mrf.mxu1 }
 0xa67   :  { %v16607_v15 = vpop.f32.mrf.mxu1 }
 0xa69   :  { %v10706_v22 = vpop.f32.mrf.mxu1 }
 0xa6b   :  { %v10707_v9 = vpop.f32.mrf.mxu1 }
 0xa6c   :  { %v16609_v46 = vadd.f32 %v10707_v9, %v10706_v22  ;;  %v10764_v30 = vpop.f32.mrf.mxu0 }
 0xa6d   :  { %v16611_v28 = vpop.f32.mrf.mxu1 }
 0xa6e   :  { %v10765_v56 = vpop.f32.mrf.mxu0 }
 0xa6f   :  { %v10766_v48 = vadd.f32 %v10765_v56, %v10764_v30  ;;  %v16613_v38 = vpop.f32.mrf.mxu1 }
 0xa70   :  { %v10767_v35 = vpop.f32.mrf.mxu0 }
 0xa71   :  { %v10712_v51 = vpop.f32.mrf.mxu1  ;;  %v16615_v61 = vadd.f32 %v10766_v48, %v10696_v40 }
 0xa72   :  { %v10768_v34 = vpop.f32.mrf.mxu0 }
 0xa73   :  { %v10769_v58 = vadd.f32 %v10768_v34, %v10767_v35  ;;  %v10713_v41 = vpop.f32.mrf.mxu1 }
 0xa74   :  { %v16617_v12 = vadd.f32 %v10713_v41, %v10712_v51  ;;  %v10770_v57 = vpop.f32.mrf.mxu0 }
 0xa75   :  { %v16619_v45 = vpop.f32.mrf.mxu1  ;;  %v16621_v63 = vadd.f32 %v10769_v58, %v10699_v43 }
 0xa76   :  { %v10771_v21 = vpop.f32.mrf.mxu0 }
 0xa77   :  { %v10772_v13 = vadd.f32 %v10771_v21, %v10770_v57  ;;  %v16623_v2 = vpop.f32.mrf.mxu1 }
 0xa78   :  { %v16625_v25 = vpop.f32.mrf.mxu0 }
 0xa79   :  { %v10718_v59 = vpop.f32.mrf.mxu1  ;;  %v16627_v17 = vadd.f32 %v10772_v13, %v10702_v49 }
 0xa7a   :  { %v16629_v6 = vpop.f32.mrf.mxu0 }
 0xa7b   :  { %v10719_v8 = vpop.f32.mrf.mxu1 }
 0xa7c   :  { %v16631_v40 = vadd.f32 %v10719_v8, %v10718_v59  ;;  %v16633_v27 = vpop.f32.mrf.mxu0 }
 0xa7d   :  { %v16635_v52 = vpop.f32.mrf.mxu1 }
 0xa7e   :  { %v16637_v4 = vpop.f32.mrf.mxu0 }
 0xa7f   :  { %v16639_v14 = vpop.f32.mrf.mxu1 }
 0xa80   :  { %v16641_v22 = vpop.f32.mrf.mxu0 }
 0xa81   :  { %v10724_v9 = vpop.f32.mrf.mxu1 }
 0xa82   :  { %v16643_v30 = vpop.f32.mrf.mxu0 }
 0xa83   :  { %v10725_v49 = vpop.f32.mrf.mxu1 }
 0xa84   :  { %v16645_v56 = vadd.f32 %v10725_v49, %v10724_v9  ;;  %v16647_v48 = vpop.f32.mrf.mxu0 }
 0xa85   :  { %v16649_v35 = vpop.f32.mrf.mxu1 }
 0xa86   :  { %v16651_v51 = vpop.f32.mrf.mxu0 }
 0xa87   :  { %v16653_v34 = vpop.f32.mrf.mxu1 }
 0xa88   :  { %v16655_v43 = vpop.f32.mrf.mxu0 }
 0xa89   :  { %v10730_v58 = vpop.f32.mrf.mxu1 }
 0xa8a   :  { %v16657_v57 = vpop.f32.mrf.mxu0 }
 0xa8b   :  { %v10731_v41 = vpop.f32.mrf.mxu1 }
 0xa8c   :  { %v16659_v21 = vadd.f32 %v10731_v41, %v10730_v58  ;;  %v16665_v8 = vpop.f32.mrf.mxu0  ;;  %v11794_v58 = vld [vmem:[%s18296_s7 + $0x278] sm:$0xff]   ;;  %v11795_v41 = vld [vmem:[%s18296_s7 + $0x2b0] sm:$0xff]  }
 0xa8d   :  { %v16661_v13 = vpop.f32.mrf.mxu1  ;;  %10832 = vmatpush3.bf16.msra.mxu0 %v11794_v58  ;;  %v11811_v58 = vld [vmem:[%s18296_s7 + $0x330] sm:$0xff]  }
 0xa8e   :  { %v16667_v7 = vpop.f32.mrf.mxu0  ;;  %10833 = vmatprep.subr.bf16.mxu0 %v11795_v41  ;;  %10903 = vmatprep.subr.bf16.mxu1 %v11811_v58  ;;  %v16732_v58 = vld [vmem:[%s18297_s5 + $0x2] ss:$0 sm:$0xff] }
 0xa8f   :  { %v16663_v59 = vpop.f32.mrf.mxu1  ;;  %10904 = vmatpush3.bf16.msra.mxu1 %v11812_v19  ;;  %v16741_v19 = vld [vmem:[%s18298_s6 + $0x2] ss:$0 sm:$0xff] }
 0xa90   :  { %v16684_v50 = vpop.f32.mrf.mxu0 }
 0xa91   :  { %v10736_v9 = vpop.f32.mrf.mxu1 }
 0xa92   :  { %v16701_v29 = vpop.f32.mrf.mxu0 }
 0xa93   :  { %v10737_v49 = vpop.f32.mrf.mxu1 }
 0xa94   :  { %v16669_v31 = vadd.f32 %v10737_v49, %v10736_v9  ;;  %v11796_v9 = vld [vmem:[%s18296_s7 + $0x270] sm:$0xff]  }
 0xa95   :  { %v16671_v10 = vpop.f32.mrf.mxu1  ;;  %10834 = vmatpush3.bf16.msra.mxu0 %v11796_v9 }
 0xa96   :  { %18859 = vst [vmem:[#allocation18_spill] sm:$0xff] %v16669_v31  ;;  %10835 = vmatprep.subr.bf16.mxu0 %v11797_v44  ;;  %v11814_v44 = vld [vmem:[%s18296_s7 + $0x2e8] sm:$0xff]  }
 0xa97   :  { %v16682_v62 = vpop.f32.mrf.mxu1 }
 0xa99   :  { %v10742_v49 = vpop.f32.mrf.mxu1  ;;  %10836 = vmatpush3.bf16.msra.mxu0 %v11798_v32  ;;  %v11801_v32 = vld [vmem:[%s18296_s7 + $0x298] sm:$0xff]  }
 0xa9a   :  { %10837 = vmatprep.subr.bf16.mxu0 %v11799_v55  ;;  %v11802_v55 = vld [vmem:[%s18296_s7 + $0x258] sm:$0xff]  }
 0xa9b   :  { %v10743_v23 = vpop.f32.mrf.mxu1 }
 0xa9c   :  { %v16703_v41 = vadd.f32 %v10743_v23, %v10742_v49  ;;  %v11813_v23 = vld [vmem:[%s18296_s7 + $0x328] sm:$0xff]   ;;  %v16721_v49 = vpop.f32.mrf.mxu0 }
 0xa9d   :  { %v16711_v24 = vpop.f32.mrf.mxu1  ;;  %10905 = vmatprep.subr.bf16.mxu1 %v11813_v23  ;;  %10838 = vmatpush3.bf16.msra.mxu0 %v11800_v47 }
 0xa9e   :  { %18860 = vst [vmem:[#allocation46_spill] sm:$0xff] %v16703_v41  ;;  %18861 = vst [vmem:[#allocation40_spill] sm:$0xff] %v16711_v24  ;;  %v16743_v41 = vpop.f32.mrf.mxu0  ;;  %10906 = vmatpush3.bf16.msra.mxu1 %v11814_v44  ;;  %10839 = vmatprep.subr.bf16.mxu0 %v11801_v32  ;;  %v11804_v44 = vld [vmem:[%s18296_s7 + $0x250] sm:$0xff]  }
 0xa9f   :  { %v16719_v9 = vpop.f32.mrf.mxu1 }
 0xaa0   :  { %18862 = vst [vmem:[#allocation43_spill] sm:$0xff] %v16719_v9  ;;  %v16756_v47 = vpop.f32.mrf.mxu0 }
 0xaa1   :  { %v5822_v26 = vpop.f32.mrf.mxu1  ;;  %10840 = vmatpush3.bf16.msra.mxu0 %v11802_v55  ;;  %v18863_v55 = vld [vmem:[#allocation4_spill] sm:$0xff] }
 0xaa2   :  { %v5823_v39 = vadd.f32 %v5822_v26, %v16615_v61  ;;  %v11803_v26 = vld [vmem:[%s18296_s7 + $0x290] sm:$0xff]  }
 0xaa3   :  { %v11452_v16 = vpop.f32.mrf.mxu1  ;;  %10841 = vmatprep.subr.bf16.mxu0 %v11803_v26 }
 0xaa4   :  { %v5901_v0 = vmul.f32 %v16732_v58, %v5823_v39  ;;  %v10775_v39 = vadd.f32 %v16629_v6, %v16625_v25 }
 0xaa5   :  { %v5825_v9 = vpop.f32.mrf.mxu1  ;;  %10842 = vmatpush3.bf16.msra.mxu0 %v11804_v44  ;;  %v10784_v44 = vadd.f32 %v16651_v51, %v16647_v48  ;;  %v18865_v51 = vld [vmem:[#allocation10_spill] sm:$0xff] }
 0xaa6   :  { %v5927_v61 = vadd.f32 %v16741_v19, %v5901_v0  ;;  %v5826_v16 = vadd.f32 %v5825_v9, %v16621_v63  ;;  %v11805_v0 = vld [vmem:[%s18296_s7 + $0x288] sm:$0xff]   ;;  %v10705_v63 = vadd.f32 %v16607_v15, %v16605_v53  ;;  %v10778_v9 = vadd.f32 %v16637_v4, %v16633_v27  ;;  %v11809_v15 = vld [vmem:[%s18296_s7 + $0x280] sm:$0xff]  }
 0xaa7   :  { %v11453_v23 = vpop.f32.mrf.mxu1  ;;  %10843 = vmatprep.subr.bf16.mxu0 %v11805_v0 }
 0xaa8   :  { %v5945_v24 = vmax.f32 %v5927_v61, 0.0  ;;  %v5902_v11 = vmul.f32 %v16732_v58, %v5826_v16  ;;  %v16774_v23 = vpop.f32.mrf.mxu0  ;;  %v5729_v5 = vadd.f32 %v10775_v39, %v10705_v63  ;;  %v10781_v39 = vadd.f32 %v16643_v30, %v16641_v22 }
 0xaa9   :  { %v5830_v32 = vpop.f32.mrf.mxu1  ;;  %v5734_v0 = vadd.f32 %v10778_v9, %v16609_v46 }
 0xaaa   :  { %v5928_v25 = vadd.f32 %v16741_v19, %v5902_v11  ;;  %v5831_v6 = vadd.f32 %v5830_v32, %v16627_v17  ;;  %v16772_v61 = vmul.f32 %v5945_v24, %v18863_v55  ;;  %v11806_v11 = vld [vmem:[%s18296_s7 + $0x248] sm:$0xff]   ;;  %v10711_v24 = vadd.f32 %v16613_v38, %v16611_v28 }
 0xaab   :  { %v11456_v16 = vpop.f32.mrf.mxu1  ;;  %v18864_v17 = vld [vmem:[#allocation7_spill] sm:$0xff]  ;;  %10844 = vmatpush3.bf16.msra.mxu0 %v11806_v11 }
 0xaac   :  { %v5946_v26 = vmax.f32 %v5928_v25, 0.0  ;;  %v5903_v31 = vmul.f32 %v16732_v58, %v5831_v6  ;;  %v18481_v25 = vrot.slane %v16772_v61, 6  ;;  %v16793_v6 = vpop.f32.mrf.mxu0  ;;  %v18479_v22 = vrot.slane %v16772_v61, 2  ;;  %10845 = vmatprep.subr.bf16.mxu0 %v11809_v15 }
 0xaad   :  { %v5833_v53 = vpop.f32.mrf.mxu1  ;;  %v18480_v46 = vrot.slane %v16772_v61, 4  ;;  %v10787_v15 = vadd.f32 %v16657_v57, %v16655_v43 }
 0xaae   :  { %v5964_v27 = vmul.f32 %v5946_v26, %v18864_v17  ;;  %v5929_v4 = vadd.f32 %v16741_v19, %v5903_v31  ;;  %v5834_v32 = vadd.f32 %v5833_v53, %v5729_v5  ;;  %v11810_v31 = vld [vmem:[%s18296_s7 + $0x240] sm:$0xff]  }
 0xaaf   :  { %v11457_v63 = vpop.f32.mrf.mxu1  ;;  %10846 = vmatpush3.bf16.msra.mxu0 %v11810_v31  ;;  %v10790_v31 = vadd.f32 %v16667_v7, %v16665_v8 }
 0xab0   :  { %v5947_v16 = vmax.f32 %v5929_v4, 0.0  ;;  %v5904_v28 = vmul.f32 %v16732_v58, %v5834_v32  ;;  %v6100_v38 = vrot.slane %v5964_v27, 6  ;;  %v6154_v26 = vrot.slane %v5964_v27, 2  ;;  %11486 = vmatprep.subr.bf16.mxu0 %v18851_v36 }
 0xab1   :  { %v5838_v5 = vpop.f32.mrf.mxu1  ;;  %v6055_v30 = vrot.slane %v5964_v27, 4  ;;  %v16802_v48 = vpack.c.bf16 %v5964_v27, %v16772_v61  ;;  %v5737_v63 = vadd.f32 %v10781_v39, %v10711_v24  ;;  %v10717_v24 = vadd.f32 %v16623_v2, %v16619_v45 }
 0xab2   :  { %v5965_v9 = vmul.f32 %v5947_v16, %v18865_v51  ;;  %v5930_v53 = vadd.f32 %v16741_v19, %v5904_v28  ;;  %v5839_v4 = vadd.f32 %v5838_v5, %v5734_v0  ;;  %v16810_v11 = vsel %vm252_vm0, %v18481_v25, %v6100_v38  ;;  %v16826_v16 = vpop.f32.mrf.mxu0 }
 0xab3   :  { %v11460_v32 = vpop.f32.mrf.mxu1  ;;  %v16818_v27 = vsel %vm307_vm1, %v18479_v22, %v6154_v26  ;;  %v16824_v0 = vsel %vm206_vm2, %v18480_v46, %v6055_v30  ;;  %v5745_v45 = vadd.f32 %v10787_v15, %v10717_v24 }
 0xab4   :  { %v5948_v28 = vmax.f32 %v5930_v53, 0.0  ;;  %v5905_v5 = vmul.f32 %v16732_v58, %v5839_v4  ;;  %v6101_v43 = vrot.slane %v5965_v9, 6  ;;  %v6155_v57 = vrot.slane %v5965_v9, 2 }
 0xab5   :  { %v5841_v39 = vpop.f32.mrf.mxu1  ;;  %v5742_v32 = vadd.f32 %v10784_v44, %v16617_v12  ;;  %v6056_v22 = vrot.slane %v5965_v9, 4  ;;  %v16849_v44 = vpop.f32.mrf.mxu0 }
 0xab6   :  { %v5966_v46 = vmul.f32 %v5948_v28, %v18803_v33  ;;  %v5931_v25 = vadd.f32 %v16741_v19, %v5905_v5  ;;  %v5842_v51 = vadd.f32 %v5841_v39, %v5737_v63  ;;  %v16837_v53 = vsel %vm252_vm0, %v6100_v38, %v6101_v43 }
 0xab7   :  { %v11461_v4 = vpop.f32.mrf.mxu1  ;;  %v16843_v12 = vsel %vm307_vm1, %v6154_v26, %v6155_v57  ;;  %v16847_v2 = vsel %vm206_vm2, %v6055_v30, %v6056_v22 }
 0xab8   :  { %v5949_v63 = vmax.f32 %v5931_v25, 0.0  ;;  %v5906_v28 = vmul.f32 %v16732_v58, %v5842_v51  ;;  %v6102_v38 = vrot.slane %v5966_v46, 6  ;;  %v6156_v5 = vrot.slane %v5966_v46, 2 }
 0xab9   :  { %v5846_v39 = vpop.f32.mrf.mxu1  ;;  %v6057_v8 = vrot.slane %v5966_v46, 4  ;;  %v16856_v15 = vpack.c.bf16 %v5966_v46, %v5965_v9  ;;  %v10793_v51 = vadd.f32 %v16701_v29, %v16684_v50  ;;  %v5750_v50 = vadd.f32 %v10790_v31, %v16631_v40 }
 0xaba   :  { %v5967_v30 = vmul.f32 %v5949_v63, %v18811_v18  ;;  %v5932_v24 = vadd.f32 %v16741_v19, %v5906_v28  ;;  %v5847_v4 = vadd.f32 %v5846_v39, %v5742_v32  ;;  %v16862_v25 = vsel %vm252_vm0, %v6101_v43, %v6102_v38  ;;  %v16876_v32 = vpop.f32.mrf.mxu0 }
 0xabb   :  { %v11464_v33 = vpop.f32.mrf.mxu1  ;;  %v16870_v46 = vsel %vm307_vm1, %v6155_v57, %v6156_v5  ;;  %v16874_v9 = vsel %vm206_vm2, %v6056_v22, %v6057_v8 }
 0xabc   :  { %v5950_v63 = vmax.f32 %v5932_v24, 0.0  ;;  %v5907_v43 = vmul.f32 %v16732_v58, %v5847_v4  ;;  %v6103_v28 = vrot.slane %v5967_v30, 6  ;;  %v6157_v39 = vrot.slane %v5967_v30, 2 }
 0xabd   :  { %v10723_v33 = vadd.f32 %v16639_v14, %v16635_v52  ;;  %v5849_v29 = vpop.f32.mrf.mxu1  ;;  %v6058_v26 = vrot.slane %v5967_v30, 4  ;;  %v10796_v4 = vadd.f32 %v16743_v41, %v16721_v49 }
 0xabe   :  { %v5968_v22 = vmul.f32 %v5950_v63, %v18822_v42  ;;  %v5933_v7 = vadd.f32 %v16741_v19, %v5907_v43  ;;  %v5850_v18 = vadd.f32 %v5849_v29, %v5745_v45  ;;  %v16888_v24 = vsel %vm252_vm0, %v6102_v38, %v6103_v28  ;;  %v16900_v63 = vpop.f32.mrf.mxu0 }
 0xabf   :  { %v11465_v52 = vpop.f32.mrf.mxu1  ;;  %v5753_v14 = vadd.f32 %v10793_v51, %v10723_v33  ;;  %v16894_v40 = vsel %vm307_vm1, %v6156_v5, %v6157_v39  ;;  %v16898_v31 = vsel %vm206_vm2, %v6057_v8, %v6058_v26 }
 0xac0   :  { %v5951_v45 = vmax.f32 %v5933_v7, 0.0  ;;  %v5908_v43 = vmul.f32 %v16732_v58, %v5850_v18  ;;  %v6104_v38 = vrot.slane %v5968_v22, 6  ;;  %v6158_v49 = vrot.slane %v5968_v22, 2 }
 0xac1   :  { %v5854_v41 = vpop.f32.mrf.mxu1  ;;  %v6059_v51 = vrot.slane %v5968_v22, 4  ;;  %v16907_v33 = vpack.c.bf16 %v5968_v22, %v5967_v30  ;;  %v10799_v7 = vadd.f32 %v16774_v23, %v16756_v47  ;;  %v10729_v47 = vadd.f32 %v16653_v34, %v16649_v35 }
 0xac2   :  { %v5969_v8 = vmul.f32 %v5951_v45, %v18838_v54  ;;  %v5934_v52 = vadd.f32 %v16741_v19, %v5908_v43  ;;  %v5855_v57 = vadd.f32 %v5854_v41, %v5750_v50  ;;  %v16913_v18 = vsel %vm252_vm0, %v6103_v28, %v6104_v38  ;;  %v10807_v50 = vpop.f32.mrf.mxu0 }
 0xac3   :  { %v11468_v29 = vpop.f32.mrf.mxu1  ;;  %v16921_v30 = vsel %vm307_vm1, %v6157_v39, %v6158_v49  ;;  %v16925_v22 = vsel %vm206_vm2, %v6058_v26, %v6059_v51  ;;  %v5761_v34 = vadd.f32 %v10799_v7, %v10729_v47 }
 0xac4   :  { %v5952_v45 = vmax.f32 %v5934_v52, 0.0  ;;  %v5909_v28 = vmul.f32 %v16732_v58, %v5855_v57  ;;  %v6105_v43 = vrot.slane %v5969_v8, 6  ;;  %v6159_v41 = vrot.slane %v5969_v8, 2 }
 0xac5   :  { %v5857_v23 = vpop.f32.mrf.mxu1  ;;  %v5758_v29 = vadd.f32 %v10796_v4, %v16645_v56  ;;  %v6060_v5 = vrot.slane %v5969_v8, 4  ;;  %v10802_v52 = vadd.f32 %v16826_v16, %v16793_v6 }
 0xac6   :  { %v5970_v42 = vmul.f32 %v5952_v45, %v18834_v1  ;;  %v5935_v26 = vadd.f32 %v16741_v19, %v5909_v28  ;;  %v5858_v54 = vadd.f32 %v5857_v23, %v5753_v14  ;;  %v16937_v57 = vsel %vm252_vm0, %v6104_v38, %v6105_v43  ;;  %v10809_v45 = vpop.f32.mrf.mxu0 }
 0xac7   :  { %v11469_v35 = vpop.f32.mrf.mxu1  ;;  %v16943_v56 = vsel %vm307_vm1, %v6158_v49, %v6159_v41  ;;  %v16947_v4 = vsel %vm206_vm2, %v6059_v51, %v6060_v5 }
 0xac8   :  { %18866 = vst [vmem:[#allocation44_spill] sm:$0xff] %v16947_v4  ;;  %v5953_v28 = vmax.f32 %v5935_v26, 0.0  ;;  %v5910_v14 = vmul.f32 %v16732_v58, %v5858_v54  ;;  %v6106_v23 = vrot.slane %v5970_v42, 6  ;;  %v6160_v6 = vrot.slane %v5970_v42, 2 }
 0xac9   :  { %v5862_v39 = vpop.f32.mrf.mxu1  ;;  %v6061_v16 = vrot.slane %v5970_v42, 4  ;;  %v16954_v49 = vpack.c.bf16 %v5970_v42, %v5969_v8  ;;  %v10805_v26 = vadd.f32 %v16876_v32, %v16849_v44  ;;  %v10735_v44 = vadd.f32 %v16663_v59, %v16661_v13 }
 0xaca   :  { %v5971_v47 = vmul.f32 %v5953_v28, %v18840_v20  ;;  %v5936_v51 = vadd.f32 %v16741_v19, %v5910_v14  ;;  %v5863_v35 = vadd.f32 %v5862_v39, %v5758_v29  ;;  %v16960_v54 = vsel %vm252_vm0, %v6105_v43, %v6106_v23  ;;  %v10810_v29 = vpop.f32.mrf.mxu0 }
 0xacb   :  { %18867 = vst [vmem:[#allocation50_spill] sm:$0xff] %v16954_v49  ;;  %v11472_v38 = vpop.f32.mrf.mxu1  ;;  %v16968_v42 = vsel %vm307_vm1, %v6159_v41, %v6160_v6  ;;  %v16972_v8 = vsel %vm206_vm2, %v6060_v5, %v6061_v16  ;;  %v5769_v13 = vadd.f32 %v10805_v26, %v10735_v44 }
 0xacc   :  { %18868 = vst [vmem:[#allocation26_spill] sm:$0xff] %v16972_v8  ;;  %v5954_v39 = vmax.f32 %v5936_v51, 0.0  ;;  %v5911_v43 = vmul.f32 %v16732_v58, %v5863_v35  ;;  %v6107_v28 = vrot.slane %v5971_v47, 6  ;;  %v6161_v14 = vrot.slane %v5971_v47, 2  ;;  %v18880_v8 = vld [vmem:[#allocation46_spill] sm:$0xff] }
 0xacd   :  { %v5865_v32 = vpop.f32.mrf.mxu1  ;;  %v5766_v38 = vadd.f32 %v10802_v52, %v16659_v21  ;;  %v6062_v7 = vrot.slane %v5971_v47, 4  ;;  %v10808_v35 = vadd.f32 %v10807_v50, %v16900_v63  ;;  %v10812_v52 = vpop.f32.mrf.mxu0 }
 0xace   :  { %v5972_v1 = vmul.f32 %v5954_v39, %v18836_v3  ;;  %v5937_v5 = vadd.f32 %v16741_v19, %v5911_v43  ;;  %v5866_v20 = vadd.f32 %v5865_v32, %v5761_v34  ;;  %v16984_v51 = vsel %vm252_vm0, %v6106_v23, %v6107_v28 }
 0xacf   :  { %v11473_v17 = vpop.f32.mrf.mxu1  ;;  %v16989_v21 = vsel %vm307_vm1, %v6160_v6, %v6161_v14  ;;  %v16993_v59 = vsel %vm206_vm2, %v6061_v16, %v6062_v7 }
 0xad0   :  { %18869 = vst [vmem:[#allocation22_spill] sm:$0xff] %v16993_v59  ;;  %v5955_v39 = vmax.f32 %v5937_v5, 0.0  ;;  %v5912_v34 = vmul.f32 %v16732_v58, %v5866_v20  ;;  %v6108_v43 = vrot.slane %v5972_v1, 6  ;;  %v6162_v63 = vrot.slane %v5972_v1, 2 }
 0xad1   :  { %v5870_v32 = vpop.f32.mrf.mxu1  ;;  %v6063_v17 = vrot.slane %v5972_v1, 4  ;;  %v17000_v6 = vpack.c.bf16 %v5972_v1, %v5971_v47  ;;  %v10811_v5 = vadd.f32 %v10810_v29, %v10809_v45  ;;  %v10813_v47 = vpop.f32.mrf.mxu0  ;;  %v10741_v45 = vadd.f32 %v16682_v62, %v16671_v10 }
 0xad2   :  { %v5973_v26 = vmul.f32 %v5955_v39, %v18847_v60  ;;  %v5938_v16 = vadd.f32 %v16741_v19, %v5912_v34  ;;  %v5871_v44 = vadd.f32 %v5870_v32, %v5766_v38  ;;  %v17006_v20 = vsel %vm252_vm0, %v6107_v28, %v6108_v43  ;;  %v18873_v60 = vld [vmem:[#allocation18_spill] sm:$0xff] }
 0xad3   :  { %18870 = vst [vmem:[#allocation25_spill] sm:$0xff] %v17000_v6  ;;  %v11476_v41 = vpop.f32.mrf.mxu1  ;;  %v17012_v3 = vsel %vm307_vm1, %v6161_v14, %v6162_v63  ;;  %v17016_v1 = vsel %vm206_vm2, %v6062_v7, %v6063_v17  ;;  %v18872_v14 = vld [vmem:[#allocation29_spill] sm:$0xff]  ;;  %v5774_v55 = vadd.f32 %v10808_v35, %v18873_v60  ;;  %v5777_v6 = vadd.f32 %v10811_v5, %v10741_v45 }
 0xad4   :  { %18871 = vst [vmem:[#allocation28_spill] sm:$0xff] %v17016_v1  ;;  %v5956_v39 = vmax.f32 %v5938_v16, 0.0  ;;  %v5913_v38 = vmul.f32 %v16732_v58, %v5871_v44  ;;  %v6109_v34 = vrot.slane %v5973_v26, 6  ;;  %v6163_v28 = vrot.slane %v5973_v26, 2  ;;  %v18876_v5 = vld [vmem:[#allocation21_spill] sm:$0xff] }
 0xad5   :  { %v5873_v29 = vpop.f32.mrf.mxu1  ;;  %v6064_v32 = vrot.slane %v5973_v26, 4 }
 0xad6   :  { %v5974_v50 = vmul.f32 %v5956_v39, %v18872_v14  ;;  %v5939_v23 = vadd.f32 %v16741_v19, %v5913_v38  ;;  %v5874_v7 = vadd.f32 %v5873_v29, %v5769_v13  ;;  %v17027_v16 = vsel %vm252_vm0, %v6108_v43, %v6109_v34  ;;  %v10815_v39 = vpop.f32.mrf.mxu0 }
 0xad7   :  { %v11477_v44 = vpop.f32.mrf.mxu1  ;;  %v17032_v10 = vsel %vm307_vm1, %v6162_v63, %v6163_v28  ;;  %v17036_v62 = vsel %vm206_vm2, %v6063_v17, %v6064_v32 }
 0xad8   :  { %18874 = vst [vmem:[#allocation48_spill] sm:$0xff] %v17036_v62  ;;  %v5957_v41 = vmax.f32 %v5939_v23, 0.0  ;;  %v5914_v13 = vmul.f32 %v16732_v58, %v5874_v7  ;;  %v6110_v38 = vrot.slane %v5974_v50, 6  ;;  %v6164_v44 = vrot.slane %v5974_v50, 2 }
 0xad9   :  { %v5878_v29 = vpop.f32.mrf.mxu1  ;;  %v6065_v60 = vrot.slane %v5974_v50, 4  ;;  %v17043_v63 = vpack.c.bf16 %v5974_v50, %v5973_v26  ;;  %v10814_v7 = vadd.f32 %v10813_v47, %v10812_v52  ;;  %v10816_v26 = vpop.f32.mrf.mxu0  ;;  %v18878_v52 = vld [vmem:[#allocation43_spill] sm:$0xff] }
 0xada   :  { %v5975_v45 = vmul.f32 %v5957_v41, %v18876_v5  ;;  %v5940_v17 = vadd.f32 %v16741_v19, %v5914_v13  ;;  %v5879_v14 = vadd.f32 %v5878_v29, %v5774_v55  ;;  %v17049_v23 = vsel %vm252_vm0, %v6109_v34, %v6110_v38  ;;  %v18877_v29 = vld [vmem:[#allocation40_spill] sm:$0xff] }
 0xadb   :  { %18875 = vst [vmem:[#allocation33_spill] sm:$0xff] %v17043_v63  ;;  %v11480_v59 = vpop.f32.mrf.mxu1  ;;  %v17055_v4 = vsel %vm307_vm1, %v6163_v28, %v6164_v44  ;;  %v17059_v50 = vsel %vm206_vm2, %v6064_v32, %v6065_v60  ;;  %v18879_v28 = vld [vmem:[#allocation35_spill] sm:$0xff]  ;;  %v5782_v49 = vadd.f32 %v10814_v7, %v18880_v8 }
 0xadc   :  { %v5958_v41 = vmax.f32 %v5940_v17, 0.0  ;;  %v5915_v55 = vmul.f32 %v16732_v58, %v5879_v14  ;;  %v6111_v13 = vrot.slane %v5975_v45, 6  ;;  %v6165_v34 = vrot.slane %v5975_v45, 2 }
 0xadd   :  { %v10747_v59 = vadd.f32 %v18878_v52, %v18877_v29  ;;  %v5881_v47 = vpop.f32.mrf.mxu1  ;;  %v6066_v43 = vrot.slane %v5975_v45, 4  ;;  %v10817_v14 = vadd.f32 %v10816_v26, %v10815_v39 }
 0xade   :  { %v5976_v5 = vmul.f32 %v5958_v41, %v18879_v28  ;;  %v5941_v63 = vadd.f32 %v16741_v19, %v5915_v55  ;;  %v5882_v32 = vadd.f32 %v5881_v47, %v5777_v6  ;;  %v17070_v17 = vsel %vm252_vm0, %v6110_v38, %v6111_v13 }
 0xadf   :  { %v11481_v1 = vpop.f32.mrf.mxu1  ;;  %v17075_v29 = vsel %vm307_vm1, %v6164_v44, %v6165_v34  ;;  %v17079_v52 = vsel %vm206_vm2, %v6065_v60, %v6066_v43  ;;  %v18882_v44 = vld [vmem:[#allocation24_spill] sm:$0xff]  ;;  %v5785_v28 = vadd.f32 %v10817_v14, %v10747_v59 }
 0xae0   :  { %18881 = vst [vmem:[#allocation18_spill] sm:$0xff] %v17079_v52  ;;  %v5959_v41 = vmax.f32 %v5941_v63, 0.0  ;;  %v5916_v55 = vmul.f32 %v16732_v58, %v5882_v32  ;;  %v6112_v6 = vrot.slane %v5976_v5, 6  ;;  %v6166_v39 = vrot.slane %v5976_v5, 2 }
 0xae1   :  { %v5886_v47 = vpop.f32.mrf.mxu1  ;;  %v6067_v1 = vrot.slane %v5976_v5, 4  ;;  %v17086_v7 = vpack.c.bf16 %v5976_v5, %v5975_v45 }
 0xae2   :  { %v5977_v26 = vmul.f32 %v5959_v41, %v18882_v44  ;;  %v5942_v60 = vadd.f32 %v16741_v19, %v5916_v55  ;;  %v5887_v35 = vadd.f32 %v5886_v47, %v5782_v49  ;;  %v17092_v63 = vsel %vm252_vm0, %v6111_v13, %v6112_v6  ;;  %v18883_v47 = vld [vmem:[#allocation5_spill] sm:$0xff] }
 0xae3   :  { %v11484_v32 = vpop.f32.mrf.mxu1  ;;  %v17098_v62 = vsel %vm307_vm1, %v6165_v34, %v6166_v39  ;;  %v17102_v5 = vsel %vm206_vm2, %v6066_v43, %v6067_v1 }
 0xae4   :  { %v5960_v45 = vmax.f32 %v5942_v60, 0.0  ;;  %v5917_v49 = vmul.f32 %v16732_v58, %v5887_v35  ;;  %v6113_v41 = vrot.slane %v5977_v26, 6  ;;  %v6167_v55 = vrot.slane %v5977_v26, 2 }
 0xae5   :  { %v5889_v13 = vpop.f32.mrf.mxu1  ;;  %v6068_v14 = vrot.slane %v5977_v26, 4 }
 0xae6   :  { %v5978_v32 = vmul.f32 %v5960_v45, %v18883_v47  ;;  %v5943_v8 = vadd.f32 %v16741_v19, %v5917_v49  ;;  %v5890_v34 = vadd.f32 %v5889_v13, %v5785_v28  ;;  %v17111_v38 = vsel %vm252_vm0, %v6112_v6, %v6113_v41  ;;  %v11815_v6 = vld [vmem:[%s18296_s7 + $0x320] sm:$0xff]  }
 0xae7   :  { %v11485_v43 = vpop.f32.mrf.mxu1  ;;  %v17115_v35 = vsel %vm307_vm1, %v6166_v39, %v6167_v55  ;;  %v17119_v60 = vsel %vm206_vm2, %v6067_v1, %v6068_v14  ;;  %v18886_v1 = vld [vmem:[#allocation12_spill] sm:$0xff]  ;;  %10907 = vmatprep.subr.bf16.mxu1 %v11815_v6  ;;  %v18887_v6 = vld [vmem:[#allocation9_spill] sm:$0xff] }
 0xae8   :  { %18884 = vst [vmem:[#allocation40_spill] sm:$0xff] %v17119_v60  ;;  %v5961_v59 = vmax.f32 %v5943_v8, 0.0  ;;  %v5918_v44 = vmul.f32 %v16732_v58, %v5890_v34  ;;  %v6114_v45 = vrot.slane %v5978_v32, 6  ;;  %v6168_v49 = vrot.slane %v5978_v32, 2  ;;  %v11816_v34 = vld [vmem:[%s18296_s7 + $0x2e0] sm:$0xff]  }
 0xae9   :  { %v6069_v13 = vrot.slane %v5978_v32, 4  ;;  %v17129_v43 = vpack.c.bf16 %v5978_v32, %v5977_v26  ;;  %10908 = vmatpush3.bf16.msra.mxu1 %v11816_v34 }
 0xaea   :  { %v5979_v47 = vmul.f32 %v5961_v59, %v18886_v1  ;;  %v5944_v8 = vadd.f32 %v16741_v19, %v5918_v44  ;;  %v6119_v58 = vsel %vm252_vm0, %v6113_v41, %v6114_v45  ;;  %v17141_v52 = vsel %vm307_vm1, %v6167_v55, %v6168_v49  ;;  %v11818_v41 = vld [vmem:[%s18296_s7 + $0x318] sm:$0xff]  }
 0xaeb   :  { %18885 = vst [vmem:[#allocation43_spill] sm:$0xff] %v17129_v43  ;;  %v6143_v28 = vpack.c.bf16 %v6119_v58, %v17111_v38  ;;  %v17145_v26 = vsel %vm206_vm2, %v6068_v14, %v6069_v13  ;;  %v11819_v38 = vld [vmem:[%s18296_s7 + $0x2d8] sm:$0xff]   ;;  %10909 = vmatprep.subr.bf16.mxu1 %v11818_v41 }
 0xaec   :  { %v5962_v59 = vmax.f32 %v5944_v8, 0.0  ;;  %v6115_v19 = vrot.slane %v5979_v47, 6  ;;  %v6169_v44 = vrot.slane %v5979_v47, 2  ;;  %v6070_v32 = vrot.slane %v5979_v47, 4 }
 0xaed   :  { %10910 = vmatpush3.bf16.msra.mxu1 %v11819_v38  ;;  %v11821_v38 = vld [vmem:[%s18296_s7 + $0x2d0] sm:$0xff]  }
 0xaee   :  { %v5980_v58 = vmul.f32 %v5962_v59, %v18887_v6  ;;  %v6118_v14 = vsel %vm252_vm0, %v6114_v45, %v6115_v19  ;;  %v6172_v8 = vsel %vm307_vm1, %v6168_v49, %v6169_v44  ;;  %v17162_v34 = vsel %vm206_vm2, %v6069_v13, %v6070_v32  ;;  %v11820_v45 = vld [vmem:[%s18296_s7 + $0x310] sm:$0xff]  }
 0xaef   :  { %v6196_v39 = vpack.c.bf16 %v6172_v8, %v17141_v52  ;;  %v18888_v49 = vrot.slane %v16772_v61, 6  ;;  %v18889_v8 = vrot.slane %v16772_v61, 2  ;;  %10911 = vmatprep.subr.bf16.mxu1 %v11820_v45  ;;  %v18890_v6 = vrot.slane %v16772_v61, 4  ;;  %v11823_v61 = vld [vmem:[%s18296_s7 + $0x2c8] sm:$0xff]  }
 0xaf0   :  { %v6116_v43 = vrot.slane %v5980_v58, 6  ;;  %v6170_v55 = vrot.slane %v5980_v58, 2  ;;  %v6071_v60 = vrot.slane %v5980_v58, 4  ;;  %v17167_v59 = vpack.c.bf16 %v5980_v58, %v5979_v47 }
 0xaf1   :  { %10912 = vmatpush3.bf16.msra.mxu1 %v11821_v38 }
 0xaf2   :  { %v6134_v13 = vsel %vm252_vm0, %v6116_v43, %v18888_v49  ;;  %v6117_v52 = vsel %vm252_vm0, %v6115_v19, %v6116_v43  ;;  %v6171_v41 = vsel %vm307_vm1, %v6169_v44, %v6170_v55  ;;  %v6188_v47 = vsel %vm307_vm1, %v6170_v55, %v18889_v8 }
 0xaf3   :  { %v6136_v58 = vpack.c.bf16 %v16810_v11, %v6134_v13  ;;  %v6135_v1 = vpack.c.bf16 %v6117_v52, %v6118_v14  ;;  %v6197_v49 = vpack.c.bf16 %v6188_v47, %v6171_v41  ;;  %v17192_v43 = vsel %vm206_vm2, %v6071_v60, %v18890_v6  ;;  %v11822_v11 = vld [vmem:[%s18296_s7 + $0x308] sm:$0xff]   ;;  %v11825_v6 = vld [vmem:[%s18296_s7 + $0x2c0] sm:$0xff]  }
 0xaf4   :  { %v6091_v19 = vpack.c.bf16 %v16824_v0, %v17192_v43  ;;  %v17198_v44 = vsel %vm206_vm2, %v6070_v32, %v6071_v60  ;;  %10913 = vmatprep.subr.bf16.mxu1 %v11822_v11  ;;  %v11824_v60 = vld [vmem:[%s18296_s7 + $0x300] sm:$0xff]   ;;  %v18891_v32 = vpack.c.bf16 %v16862_v25, %v16837_v53  ;;  %v18893_v14 = vpack.c.bf16 %v16960_v54, %v16937_v57 }
 0xaf5   :  { %6218 = vrot.lane.b32.xlu1 %v6136_v58, %s12019_s30  ;;  %6216 = vrot.lane.b32.xlu0 %v6135_v1, %s12019_s30  ;;  %v6205_v55 = vpack.c.bf16 %v17192_v43, %v17198_v44  ;;  %v6090_v37 = vpack.c.bf16 %v17198_v44, %v17162_v34  ;;  %v18892_v1 = vpack.c.bf16 %v16913_v18, %v16888_v24  ;;  %vm9221_vm0 = vcmask 50176  }
 0xaf6   :  { %10914 = vmatpush3.bf16.msra.mxu1 %v11823_v61  ;;  %v18894_v53 = vpack.c.bf16 %v17006_v20, %v16984_v51  ;;  %v18895_v25 = vpack.c.bf16 %v17049_v23, %v17027_v16  ;;  %v18896_v24 = vpack.c.bf16 %v17092_v63, %v17070_v17  ;;  %v18897_v18 = vpack.c.bf16 %v16894_v40, %v16870_v46  ;;  %v11826_v20 = vld [vmem:[%s18296_s7 + $0x350] sm:$0xff]   ;;  %v11827_v23 = vld [vmem:[%s18296_s7 + $0x348] sm:$0xff]   ;;  %v18906_v61 = vld [vmem:[#allocation50_spill] sm:$0xff] }
 0xaf7   :  { %10915 = vmatprep.subr.bf16.mxu1 %v11824_v60  ;;  %v18898_v57 = vpack.c.bf16 %v16843_v12, %v16818_v27  ;;  %v18899_v54 = vpack.c.bf16 %v16943_v56, %v16921_v30  ;;  %v18900_v51 = vpack.c.bf16 %v16989_v21, %v16968_v42  ;;  %v18901_v46 = vpack.c.bf16 %v17032_v10, %v17012_v3  ;;  %v11817_v3 = vld [vmem:[%s18296_s7 + $0x358] sm:$0xff]  }
 0xaf8   :  { %v18902_v27 = vpack.c.bf16 %v17075_v29, %v17055_v4  ;;  %v18903_v12 = vpack.c.bf16 %v17115_v35, %v17098_v62  ;;  %v18904_v52 = vpack.c.bf16 %v16874_v9, %v16847_v2  ;;  %v18907_v60 = vld [vmem:[#allocation26_spill] sm:$0xff]  ;;  %vm9247_vm1 = vcmask 517120  }
 0xaf9   :  { %6220 = vrot.lane.b32.xlu1 %v18891_v32, %s12019_s30  ;;  %6222 = vrot.lane.b32.xlu0 %v18892_v1, %s12019_s30  ;;  %vm9264_vm2 = vcmask 56320  }
 0xafa   :  { %10916 = vmatpush3.bf16.msra.mxu1 %v11825_v6 }
 0xafb   :  { %11530 = vmatprep.subr.bf16.mxu1 %v18851_v36 }
 0xafd   :  { %6224 = vrot.lane.b32.xlu1 %v18893_v14, %s12019_s30  ;;  %6226 = vrot.lane.b32.xlu0 %v18894_v53, %s12019_s30  ;;  %v18910_v14 = vld [vmem:[#allocation25_spill] sm:$0xff] }
 0xb01   :  { %6228 = vrot.lane.b32.xlu1 %v18895_v25, %s12019_s30  ;;  %6230 = vrot.lane.b32.xlu0 %v18896_v24, %s12019_s30  ;;  %v18911_v24 = vld [vmem:[#allocation28_spill] sm:$0xff] }
 0xb05   :  { %6232 = vrot.lane.b32.xlu1 %v6143_v28, %s12019_s30  ;;  %6245 = vrot.lane.b32.xlu0 %v18897_v18, %s12019_s30  ;;  %v11828_v28 = vld [vmem:[%s18296_s7 + $0x340] sm:$0xff]  }
 0xb06   :  { %v18912_v18 = vld [vmem:[#allocation22_spill] sm:$0xff] }
 0xb09   :  { %6243 = vrot.lane.b32.xlu1 %v18898_v57, %s12019_s30  ;;  %6247 = vrot.lane.b32.xlu0 %v18899_v54, %s12019_s30  ;;  %v18913_v57 = vpack.c.bf16 %v18911_v24, %v18912_v18 }
 0xb0d   :  { %6249 = vrot.lane.b32.xlu1 %v18900_v51, %s12019_s30  ;;  %6251 = vrot.lane.b32.xlu0 %v18901_v46, %s12019_s30  ;;  %v18914_v46 = vld [vmem:[#allocation33_spill] sm:$0xff] }
 0xb11   :  { %6253 = vrot.lane.b32.xlu1 %v18902_v27, %s12019_s30  ;;  %6255 = vrot.lane.b32.xlu0 %v18903_v12, %s12019_s30 }
 0xb15   :  { %6257 = vrot.lane.b32.xlu1 %v6196_v39, %s12019_s30  ;;  %6259 = vrot.lane.b32.xlu0 %v6197_v49, %s12019_s30 }
 0xb67   :  { %v6219_v40 = vpop.permute.xlu1 %6218  ;;  %v17274_v30 = vpop.permute.xlu0 %6216 }
 0xb68   :  { %v6263_v56 = vsel %vm1149_vm15, %v6090_v37, %v17274_v30  ;;  %v6298_v4 = vsel %vm1149_vm15, %v17167_v59, %v6219_v40  ;;  %v6267_v17 = vsel %vm1149_vm15, %v6091_v19, %v6219_v40  ;;  %v18915_v40 = vld [vmem:[#allocation48_spill] sm:$0xff] }
 0xb69   :  { %6626 = vmatprep.mubr.bf16.mxu0 %v6298_v4 }
 0xb6a   :  { %6627 = vmatmul.mubr.bf16.vlgmr.msra.gmra.mxu0 %v6263_v56 }
 0xb6b   :  { %11487 = vmatpush3.bf16.msra.mxu0 %v11817_v3  ;;  %v6221_v42 = vpop.permute.xlu1 %6220  ;;  %v6223_v21 = vpop.permute.xlu0 %6222  ;;  %v18916_v3 = vpack.c.bf16 %v17059_v50, %v18915_v40 }
 0xb6c   :  { %v6301_v16 = vsel %vm1149_vm15, %v16802_v48, %v6221_v42  ;;  %11488 = vmatprep.subr.bf16.mxu0 %v18851_v36  ;;  %v6304_v29 = vsel %vm1149_vm15, %v16856_v15, %v6223_v21  ;;  %v6271_v41 = vsel %vm1149_vm15, %v18904_v52, %v6221_v42 }
 0xb6d   :  { %6634 = vmatprep.mubr.bf16.mxu0 %v6301_v16 }
 0xb6f   :  { %v6225_v10 = vpop.permute.xlu1 %6224  ;;  %v6227_v62 = vpop.permute.xlu0 %6226  ;;  %11489 = vmatpush3.bf16.msra.mxu0 %v11826_v20  ;;  %v18917_v20 = vld [vmem:[#allocation18_spill] sm:$0xff] }
 0xb70   :  { %11490 = vmatprep.subr.bf16.mxu0 %v18851_v36  ;;  %v6307_v8 = vsel %vm1149_vm15, %v16907_v33, %v6225_v10  ;;  %v6310_v37 = vsel %vm1149_vm15, %v18906_v61, %v6227_v62  ;;  %v6283_v54 = vsel %vm1149_vm15, %v18913_v57, %v6227_v62  ;;  %v18918_v16 = vpack.c.bf16 %v17102_v5, %v18917_v20 }
 0xb72   :  { %6635 = vmatmul.mubr.bf16.gmra.mxu0 %v6267_v17 }
 0xb73   :  { %6642 = vmatprep.mubr.bf16.mxu0 %v6304_v29  ;;  %v6229_v63 = vpop.permute.xlu1 %6228  ;;  %v6231_v35 = vpop.permute.xlu0 %6230  ;;  %11491 = vmatpush3.bf16.msra.mxu0 %v11827_v23  ;;  %v18919_v23 = vld [vmem:[#allocation43_spill] sm:$0xff] }
 0xb74   :  { %11492 = vmatprep.subr.bf16.mxu0 %v18851_v36  ;;  %v6313_v53 = vsel %vm1149_vm15, %v18910_v14, %v6229_v63  ;;  %v6316_v27 = vsel %vm1149_vm15, %v18914_v46, %v6231_v35  ;;  %v6287_v56 = vsel %vm1149_vm15, %v18916_v3, %v6229_v63  ;;  %v6322_v17 = vsel %vm1149_vm15, %v18919_v23, %v17274_v30 }
 0xb77   :  { %v6233_v39 = vpop.permute.xlu1 %6232  ;;  %v6246_v45 = vpop.permute.xlu0 %6245  ;;  %11493 = vmatpush3.bf16.msra.mxu0 %v11828_v28 }
 0xb78   :  { %v6328_v13 = vsel %vm1149_vm15, %v16856_v15, %v6246_v45  ;;  %v18905_v15 = vpack.c.bf16 %v16925_v22, %v16898_v31  ;;  %v6319_v42 = vsel %vm1149_vm15, %v17086_v7, %v6233_v39 }
 0xb79   :  { %6731 = vmatprep.mubr.bf16.mxu1 %v6328_v13 }
 0xb7a   :  { %6643 = vmatmul.mubr.bf16.gmra.mxu0 %v6271_v41  ;;  %v6275_v19 = vsel %vm1149_vm15, %v18905_v15, %v6223_v21  ;;  %v18928_v41 = vpack.c.bf16 %v17162_v34, %v17145_v26 }
 0xb7b   :  { %6650 = vmatprep.mubr.bf16.mxu0 %v6307_v8  ;;  %v6244_v47 = vpop.permute.xlu1 %6243  ;;  %v6248_v38 = vpop.permute.xlu0 %6247 }
 0xb7c   :  { %v6325_v58 = vsel %vm1149_vm15, %v16802_v48, %v6244_v47  ;;  %v6331_v49 = vsel %vm1149_vm15, %v16907_v33, %v6248_v38  ;;  %v18908_v33 = vld [vmem:[#allocation44_spill] sm:$0xff] }
 0xb7d   :  { %6732 = vmatmul.mubr.bf16.vlgmr.msra.gmra.mxu1 %v6325_v58  ;;  %v18909_v32 = vpack.c.bf16 %v18907_v60, %v18908_v33 }
 0xb7e   :  { %6739 = vmatprep.mubr.bf16.mxu1 %v6331_v49 }
 0xb7f   :  { %v6250_v11 = vpop.permute.xlu1 %6249  ;;  %v6279_v1 = vsel %vm1149_vm15, %v18909_v32, %v6225_v10  ;;  %v6252_v6 = vpop.permute.xlu0 %6251  ;;  %v6291_v10 = vsel %vm1149_vm15, %v18918_v16, %v6231_v35  ;;  %v18922_v35 = vpack.c.bf16 %v16898_v31, %v16874_v9  ;;  %v11829_v9 = vld [vmem:[%s18301_s10 + $0x18] sm:$0xff]   ;;  %v18924_v31 = vpack.c.bf16 %v18912_v18, %v18907_v60 }
 0xb80   :  { %v6334_v48 = vsel %vm1149_vm15, %v18906_v61, %v6250_v11  ;;  %v6337_v25 = vsel %vm1149_vm15, %v18910_v14, %v6252_v6  ;;  %11531 = vmatpush3.bf16.msra.mxu1 %v11829_v9 }
 0xb81   :  { %11532 = vmatprep.subr.bf16.mxu1 %v18851_v36 }
 0xb82   :  { %6651 = vmatmul.mubr.bf16.gmra.mxu0 %v6275_v19 }
 0xb83   :  { %6658 = vmatprep.mubr.bf16.mxu0 %v6310_v37  ;;  %v6254_v51 = vpop.permute.xlu1 %6253  ;;  %v6256_v4 = vpop.permute.xlu0 %6255 }
 0xb84   :  { %v6340_v12 = vsel %vm1149_vm15, %v18914_v46, %v6254_v51  ;;  %v6343_v21 = vsel %vm1149_vm15, %v17086_v7, %v6256_v4  ;;  %v18920_v7 = vld [vmem:[#allocation40_spill] sm:$0xff] }
 0xb85   :  { %6740 = vmatmul.mubr.bf16.gmra.mxu1 %v6328_v13  ;;  %v18921_v63 = vpack.c.bf16 %v17145_v26, %v18920_v7  ;;  %v18926_v13 = vpack.c.bf16 %v18917_v20, %v17059_v50  ;;  %v18927_v52 = vpack.c.bf16 %v18920_v7, %v17102_v5  ;;  %v11831_v50 = vld [vmem:[%s18301_s10 + $0x8] sm:$0xff]   ;;  %v18929_v5 = vpack.c.bf16 %v16847_v2, %v16824_v0  ;;  %v11832_v26 = vld [vmem:[%s18301_s10] sm:$0xff]  }
 0xb86   :  { %6747 = vmatprep.mubr.bf16.mxu1 %v6334_v48 }
 0xb87   :  { %v6258_v62 = vpop.permute.xlu1 %6257  ;;  %v6295_v28 = vsel %vm1149_vm15, %v18921_v63, %v6233_v39  ;;  %v6260_v45 = vpop.permute.xlu0 %6259  ;;  %v18923_v39 = vpack.c.bf16 %v18908_v33, %v16925_v22  ;;  %v18925_v22 = vpack.c.bf16 %v18915_v40, %v18911_v24 }
 0xb88   :  { %v6346_v29 = vsel %vm1149_vm15, %v18919_v23, %v6258_v62  ;;  %v6349_v30 = vsel %vm1149_vm15, %v17167_v59, %v6260_v45  ;;  %v11830_v59 = vld [vmem:[%s18301_s10 + $0x10] sm:$0xff]  }
 0xb89   :  { %11533 = vmatpush3.bf16.msra.mxu1 %v11830_v59 }
 0xb8a   :  { %6659 = vmatmul.mubr.bf16.gmra.mxu0 %v6279_v1  ;;  %11534 = vmatprep.subr.bf16.mxu1 %v18851_v36 }
 0xb8b   :  { %6666 = vmatprep.mubr.bf16.mxu0 %v6313_v53 }
 0xb8d   :  { %6748 = vmatmul.mubr.bf16.gmra.mxu1 %v6331_v49 }
 0xb8e   :  { %6755 = vmatprep.mubr.bf16.mxu1 %v6337_v25  ;;  %11535 = vmatpush3.bf16.msra.mxu1 %v11831_v50 }
 0xb8f   :  { %11536 = vmatprep.subr.bf16.mxu1 %v18851_v36 }
 0xb92   :  { %6667 = vmatmul.mubr.bf16.gmra.mxu0 %v6283_v54  ;;  %11537 = vmatpush3.bf16.msra.mxu1 %v11832_v26 }
 0xb93   :  { %6674 = vmatprep.mubr.bf16.mxu0 %v6316_v27 }
 0xb95   :  { %6756 = vmatmul.mubr.bf16.gmra.mxu1 %v6334_v48 }
 0xb96   :  { %6763 = vmatprep.mubr.bf16.mxu1 %v6340_v12 }
 0xb9a   :  { %6675 = vmatmul.mubr.bf16.gmra.mxu0 %v6287_v56 }
 0xb9b   :  { %6682 = vmatprep.mubr.bf16.mxu0 %v6319_v42 }
 0xb9d   :  { %6764 = vmatmul.mubr.bf16.gmra.mxu1 %v6337_v25 }
 0xb9e   :  { %6771 = vmatprep.mubr.bf16.mxu1 %v6343_v21 }
 0xba2   :  { %6683 = vmatmul.mubr.bf16.gmra.mxu0 %v6291_v10 }
 0xba3   :  { %6690 = vmatprep.mubr.bf16.mxu0 %v6322_v17 }
 0xba5   :  { %6772 = vmatmul.mubr.bf16.gmra.mxu1 %v6340_v12 }
 0xba6   :  { %6779 = vmatprep.mubr.bf16.mxu1 %v6346_v29 }
 0xbaa   :  { %6691 = vmatmul.mubr.bf16.gmra.mxu0 %v6295_v28 }
 0xbab   :  { %11494 = vmatprep.mubr.msk.bf16.mxu0 %vm12017_vm5, %v18851_v36 }
 0xbad   :  { %6780 = vmatmul.mubr.bf16.gmra.mxu1 %v6343_v21 }
 0xbae   :  { %6787 = vmatprep.mubr.bf16.mxu1 %v6349_v30 }
 0xbb2   :  { %11495 = vmatmul.mubr.msk.bf16.vlgmr.msra.gmra.mxu0 %vm1149_vm15, %v18922_v35 }
 0xbb3   :  { %11498 = vmatprep.mubr.msk.bf16.mxu0 %vm12017_vm5, %v18851_v36 }
 0xbb5   :  { %6788 = vmatmul.mubr.bf16.gmra.mxu1 %v6346_v29 }
 0xbb6   :  { %6795 = vmatprep.mubr.bf16.mxu1 %v6325_v58 }
 0xbba   :  { %11499 = vmatmul.mubr.msk.bf16.gmra.mxu0 %vm1149_vm15, %v18923_v39 }
 0xbbb   :  { %11502 = vmatprep.mubr.msk.bf16.mxu0 %vm12017_vm5, %v18851_v36 }
 0xbbd   :  { %6796 = vmatmul.mubr.bf16.gmra.mxu1 %v6349_v30 }
 0xbbe   :  { %11538 = vmatprep.mubr.msk.bf16.mxu1 %vm12017_vm5, %v18851_v36 }
 0xbc2   :  { %11503 = vmatmul.mubr.msk.bf16.gmra.mxu0 %vm1149_vm15, %v18924_v31 }
 0xbc3   :  { %11506 = vmatprep.mubr.msk.bf16.mxu0 %vm12017_vm5, %v18851_v36 }
 0xbca   :  { %11507 = vmatmul.mubr.msk.bf16.gmra.mxu0 %vm1149_vm15, %v18925_v22 }
 0xbcb   :  { %11510 = vmatprep.mubr.msk.bf16.mxu0 %vm12017_vm5, %v18851_v36 }
 0xbd2   :  { %11511 = vmatmul.mubr.msk.bf16.gmra.mxu0 %vm1149_vm15, %v18926_v13 }
 0xbd3   :  { %11514 = vmatprep.mubr.msk.bf16.mxu0 %vm12017_vm5, %v18851_v36 }
 0xbda   :  { %11515 = vmatmul.mubr.msk.bf16.gmra.mxu0 %vm1149_vm15, %v18927_v52 }
 0xbdb   :  { %11518 = vmatprep.mubr.msk.bf16.mxu0 %vm12017_vm5, %v18851_v36 }
 0xbe2   :  { %11519 = vmatmul.mubr.msk.bf16.gmra.mxu0 %vm1149_vm15, %v18928_v41 }
 0xbe3   :  { %11522 = vmatprep.mubr.msk.bf16.mxu0 %vm12017_vm5, %v18851_v36 }
 0xbea   :  { %11523 = vmatmul.mubr.msk.bf16.gmra.mxu0 %vm1149_vm15, %v6205_v55 }
 0xbeb   :  { %11526 = vmatprep.mubr.msk.bf16.mxu0 %vm12017_vm5, %v18851_v36 }
 0xbf2   :  { %11527 = vmatmul.mubr.msk.bf16.gmra.mxu0 %vm1149_vm15, %v18929_v5 }
 0xc2a   :  { %v10847_v34 = vpop.f32.mrf.mxu0 }
 0xc2c   :  { %v10848_v8 = vpop.f32.mrf.mxu0 }
 0xc2d   :  { %v17430_v47 = vadd.f32 %v10848_v8, %v10847_v34 }
 0xc2e   :  { %v10850_v43 = vpop.f32.mrf.mxu0 }
 0xc30   :  { %v10851_v44 = vpop.f32.mrf.mxu0 }
 0xc31   :  { %v17432_v55 = vadd.f32 %v10851_v44, %v10850_v43 }
 0xc32   :  { %v10853_v38 = vpop.f32.mrf.mxu0 }
 0xc34   :  { %v10854_v58 = vpop.f32.mrf.mxu0 }
 0xc35   :  { %v17434_v49 = vadd.f32 %v10854_v58, %v10853_v38 }
 0xc36   :  { %v10856_v0 = vpop.f32.mrf.mxu0 }
 0xc38   :  { %v10857_v2 = vpop.f32.mrf.mxu0 }
 0xc39   :  { %v17436_v15 = vadd.f32 %v10857_v2, %v10856_v0 }
 0xc3a   :  { %v10859_v19 = vpop.f32.mrf.mxu0 }
 0xc3c   :  { %v10860_v11 = vpop.f32.mrf.mxu0 }
 0xc3d   :  { %v17438_v61 = vadd.f32 %v10860_v11, %v10859_v19  ;;  %v10917_v37 = vpop.f32.mrf.mxu1 }
 0xc3e   :  { %v10862_v48 = vpop.f32.mrf.mxu0 }
 0xc3f   :  { %v10918_v60 = vpop.f32.mrf.mxu1 }
 0xc40   :  { %v10863_v33 = vpop.f32.mrf.mxu0  ;;  %v10919_v0 = vadd.f32 %v10918_v60, %v10917_v37  ;;  %v17499_v60 = vld [vmem:[%s18300_s9 + $0x2] ss:$0 sm:$0xff] }
 0xc41   :  { %v17440_v32 = vadd.f32 %v10863_v33, %v10862_v48  ;;  %v10920_v1 = vpop.f32.mrf.mxu1 }
 0xc42   :  { %v10865_v6 = vpop.f32.mrf.mxu0 }
 0xc43   :  { %v10921_v14 = vpop.f32.mrf.mxu1 }
 0xc44   :  { %v10866_v53 = vpop.f32.mrf.mxu0  ;;  %v10922_v33 = vadd.f32 %v10921_v14, %v10920_v1 }
 0xc45   :  { %v17442_v25 = vadd.f32 %v10866_v53, %v10865_v6  ;;  %v10923_v24 = vpop.f32.mrf.mxu1 }
 0xc46   :  { %v10868_v18 = vpop.f32.mrf.mxu0 }
 0xc47   :  { %v10924_v57 = vpop.f32.mrf.mxu1 }
 0xc48   :  { %v10869_v54 = vpop.f32.mrf.mxu0  ;;  %v10925_v1 = vadd.f32 %v10924_v57, %v10923_v24 }
 0xc49   :  { %v17444_v51 = vadd.f32 %v10869_v54, %v10868_v18  ;;  %v10926_v46 = vpop.f32.mrf.mxu1  ;;  %v6734_v18 = vadd.f32 %v10919_v0, %v17430_v47  ;;  %v6737_v47 = vadd.f32 %v10922_v33, %v17432_v55 }
 0xc4a   :  { %v10871_v27 = vpop.f32.mrf.mxu0  ;;  %v6742_v24 = vadd.f32 %v10925_v1, %v17434_v49  ;;  %v18933_v1 = vld [vmem:[#allocation7_spill] sm:$0xff] }
 0xc4b   :  { %v10927_v12 = vpop.f32.mrf.mxu1 }
 0xc4c   :  { %v10872_v40 = vpop.f32.mrf.mxu0 }
 0xc4d   :  { %v17446_v3 = vadd.f32 %v10872_v40, %v10871_v27  ;;  %v17448_v56 = vpop.f32.mrf.mxu1  ;;  %v17494_v27 = vld [vmem:[%s18299_s8 + $0x2] ss:$0 sm:$0xff] }
 0xc4e   :  { %v10874_v4 = vpop.f32.mrf.mxu0 }
 0xc4f   :  { %v10930_v42 = vpop.f32.mrf.mxu1 }
 0xc50   :  { %v10875_v21 = vpop.f32.mrf.mxu0  ;;  %v10931_v55 = vadd.f32 %v10930_v42, %v17448_v56 }
 0xc51   :  { %v17450_v20 = vadd.f32 %v10875_v21, %v10874_v4  ;;  %v17452_v16 = vpop.f32.mrf.mxu1 }
 0xc52   :  { %v10877_v10 = vpop.f32.mrf.mxu0  ;;  %v6750_v56 = vadd.f32 %v10931_v55, %v17438_v61 }
 0xc53   :  { %v17454_v62 = vpop.f32.mrf.mxu1 }
 0xc54   :  { %v10878_v23 = vpop.f32.mrf.mxu0 }
 0xc55   :  { %v17456_v17 = vadd.f32 %v10878_v23, %v10877_v10  ;;  %v17458_v29 = vpop.f32.mrf.mxu1 }
 0xc56   :  { %v10880_v7 = vpop.f32.mrf.mxu0 }
 0xc57   :  { %v17460_v63 = vpop.f32.mrf.mxu1 }
 0xc58   :  { %v10881_v28 = vpop.f32.mrf.mxu0 }
 0xc59   :  { %v17462_v45 = vadd.f32 %v10881_v28, %v10880_v7  ;;  %v17464_v30 = vpop.f32.mrf.mxu1  ;;  %v10928_v28 = vadd.f32 %v10927_v12, %v10926_v46 }
 0xc5a   :  { %v10883_v35 = vpop.f32.mrf.mxu0 }
 0xc5b   :  { %v17466_v9 = vpop.f32.mrf.mxu1  ;;  %v6745_v0 = vadd.f32 %v10928_v28, %v17436_v15 }
 0xc5c   :  { %v10884_v39 = vpop.f32.mrf.mxu0 }
 0xc5d   :  { %v17468_v31 = vadd.f32 %v10884_v39, %v10883_v35  ;;  %v17470_v13 = vpop.f32.mrf.mxu1  ;;  %v18930_v39 = vld [vmem:[#allocation39_spill] sm:$0xff] }
 0xc5e   :  { %v10886_v22 = vpop.f32.mrf.mxu0 }
 0xc5f   :  { %v17474_v5 = vpop.f32.mrf.mxu1 }
 0xc60   :  { %v10887_v59 = vpop.f32.mrf.mxu0 }
 0xc61   :  { %v17472_v52 = vadd.f32 %v10887_v59, %v10886_v22  ;;  %v17478_v43 = vpop.f32.mrf.mxu1 }
 0xc62   :  { %v10889_v50 = vpop.f32.mrf.mxu0 }
 0xc63   :  { %v17482_v2 = vpop.f32.mrf.mxu1 }
 0xc64   :  { %v10890_v41 = vpop.f32.mrf.mxu0 }
 0xc65   :  { %v17476_v26 = vadd.f32 %v10890_v41, %v10889_v50  ;;  %v17486_v6 = vpop.f32.mrf.mxu1 }
 0xc66   :  { %v10892_v34 = vpop.f32.mrf.mxu0 }
 0xc67   :  { %v17501_v14 = vpop.f32.mrf.mxu1 }
 0xc68   :  { %v10893_v8 = vpop.f32.mrf.mxu0 }
 0xc69   :  { %v17480_v44 = vadd.f32 %v10893_v8, %v10892_v34  ;;  %v17506_v35 = vpop.f32.mrf.mxu1 }
 0xc6a   :  { %v10895_v38 = vpop.f32.mrf.mxu0 }
 0xc6b   :  { %v17513_v8 = vpop.f32.mrf.mxu1 }
 0xc6c   :  { %v10896_v58 = vpop.f32.mrf.mxu0 }
 0xc6d   :  { %v17484_v19 = vadd.f32 %v10896_v58, %v10895_v38  ;;  %v18931_v58 = vld [vmem:[#allocation30_spill] sm:$0xff]  ;;  %v17522_v42 = vpop.f32.mrf.mxu1 }
 0xc6e   :  { %v10898_v11 = vpop.f32.mrf.mxu0 }
 0xc6f   :  { %v17531_v61 = vpop.f32.mrf.mxu1 }
 0xc70   :  { %v10899_v48 = vpop.f32.mrf.mxu0 }
 0xc71   :  { %v17488_v53 = vadd.f32 %v10899_v48, %v10898_v11 }
 0xc72   :  { %v6838_v54 = vpop.f32.mrf.mxu0 }
 0xc73   :  { %v6839_v37 = vadd.f32 %v6838_v54, %v6734_v18  ;;  %v10934_v18 = vadd.f32 %v17454_v62, %v17452_v16  ;;  %v10937_v16 = vadd.f32 %v17460_v63, %v17458_v29  ;;  %v10940_v63 = vadd.f32 %v17466_v9, %v17464_v30 }
 0xc74   :  { %v11496_v40 = vpop.f32.mrf.mxu0  ;;  %v10943_v30 = vadd.f32 %v17474_v5, %v17470_v13  ;;  %v10946_v13 = vadd.f32 %v17482_v2, %v17478_v43  ;;  %v10949_v43 = vadd.f32 %v17501_v14, %v17486_v6  ;;  %v10952_v6 = vadd.f32 %v17513_v8, %v17506_v35 }
 0xc75   :  { %v6917_v4 = vmul.f32 %v17494_v27, %v6839_v37  ;;  %v18932_v37 = vld [vmem:[#allocation4_spill] sm:$0xff]  ;;  %v10955_v35 = vadd.f32 %v17531_v61, %v17522_v42 }
 0xc76   :  { %v6841_v21 = vpop.f32.mrf.mxu0 }
 0xc77   :  { %v6943_v10 = vadd.f32 %v17499_v60, %v6917_v4  ;;  %v6842_v23 = vadd.f32 %v6841_v21, %v6737_v47  ;;  %v18934_v47 = vld [vmem:[#allocation41_spill] sm:$0xff] }
 0xc78   :  { %v11497_v7 = vpop.f32.mrf.mxu0 }
 0xc79   :  { %v6961_v22 = vadd.f32 %v6943_v10, %v18930_v39  ;;  %v6918_v59 = vmul.f32 %v17494_v27, %v6842_v23 }
 0xc7a   :  { %v6846_v57 = vpop.f32.mrf.mxu0 }
 0xc7b   :  { %v6944_v50 = vadd.f32 %v17499_v60, %v6918_v59  ;;  %v6847_v41 = vadd.f32 %v6846_v57, %v6742_v24  ;;  %v6979_v38 = vmax.f32 %v6961_v22, 0.0  ;;  %v18935_v22 = vld [vmem:[#allocation45_spill] sm:$0xff]  ;;  %v6753_v57 = vadd.f32 %v10934_v18, %v17440_v32 }
 0xc7c   :  { %v11500_v34 = vpop.f32.mrf.mxu0 }
 0xc7d   :  { %v6962_v46 = vadd.f32 %v6944_v50, %v18931_v58  ;;  %v6919_v12 = vmul.f32 %v17494_v27, %v6847_v41  ;;  %v6997_v40 = vmul.f32 %v6979_v38, %v18932_v37  ;;  %v6758_v38 = vadd.f32 %v10937_v16, %v17442_v25  ;;  %v17543_v58 = vpop.f32.mrf.mxu1  ;;  %v18940_v16 = vld [vmem:[#allocation11_spill] sm:$0xff] }
 0xc7e   :  { %v6849_v11 = vpop.f32.mrf.mxu0 }
 0xc7f   :  { %v6980_v48 = vmax.f32 %v6962_v46, 0.0  ;;  %v6945_v49 = vadd.f32 %v17499_v60, %v6919_v12  ;;  %v6850_v33 = vadd.f32 %v6849_v11, %v6745_v0  ;;  %v18936_v46 = vld [vmem:[#allocation10_spill] sm:$0xff]  ;;  %v18937_v0 = vld [vmem:[#allocation15_spill] sm:$0xff]  ;;  %v10957_v25 = vpop.f32.mrf.mxu1 }
 0xc80   :  { %v11501_v54 = vpop.f32.mrf.mxu0  ;;  %v18938_v11 = vld [vmem:[#allocation47_spill] sm:$0xff]  ;;  %v10958_v42 = vadd.f32 %v10957_v25, %v17543_v58 }
 0xc81   :  { %v6998_v4 = vmul.f32 %v6980_v48, %v18933_v1  ;;  %v6963_v21 = vadd.f32 %v6945_v49, %v18934_v47  ;;  %v6920_v15 = vmul.f32 %v17494_v27, %v6850_v33  ;;  %v6761_v47 = vadd.f32 %v10940_v63, %v17444_v51  ;;  %v18942_v51 = vld [vmem:[#allocation37_spill] sm:$0xff]  ;;  %v18943_v63 = vld [vmem:[#allocation32_spill] sm:$0xff] }
 0xc82   :  { %v6854_v10 = vpop.f32.mrf.mxu0 }
 0xc83   :  { %v7015_v23 = vpack.c.bf16 %v6998_v4, %v6997_v40  ;;  %v6946_v7 = vadd.f32 %v17499_v60, %v6920_v15  ;;  %v6855_v28 = vadd.f32 %v6854_v10, %v6750_v56  ;;  %v6981_v39 = vmax.f32 %v6963_v21, 0.0  ;;  %v18939_v40 = vld [vmem:[#allocation36_spill] sm:$0xff] }
 0xc84   :  { %v11504_v62 = vpop.f32.mrf.mxu0 }
 0xc85   :  { %v6964_v59 = vadd.f32 %v6946_v7, %v18935_v22  ;;  %v6921_v24 = vmul.f32 %v17494_v27, %v6855_v28  ;;  %11539 = vmatmul.mubr.msk.bf16.vlgmr.msra.gmra.mxu1 %vm1149_vm15, %v7015_v23  ;;  %v6999_v12 = vmul.f32 %v6981_v39, %v18936_v46  ;;  %v6766_v7 = vadd.f32 %v10943_v30, %v17446_v3  ;;  %v10959_v28 = vpop.f32.mrf.mxu1  ;;  %v18941_v39 = vld [vmem:[#allocation20_spill] sm:$0xff] }
 0xc86   :  { %v6857_v50 = vpop.f32.mrf.mxu0  ;;  %11542 = vmatprep.mubr.msk.bf16.mxu1 %vm12017_vm5, %v18851_v36  ;;  %v6769_v46 = vadd.f32 %v10946_v13, %v17450_v20  ;;  %v18946_v20 = vld [vmem:[#allocation31_spill] sm:$0xff] }
 0xc87   :  { %v6982_v41 = vmax.f32 %v6964_v59, 0.0  ;;  %v6947_v55 = vadd.f32 %v17499_v60, %v6921_v24  ;;  %v6858_v29 = vadd.f32 %v6857_v50, %v6753_v57 }
 0xc88   :  { %v11505_v34 = vpop.f32.mrf.mxu0 }
 0xc89   :  { %v7000_v32 = vmul.f32 %v6982_v41, %v18937_v0  ;;  %v6965_v48 = vadd.f32 %v6947_v55, %v18938_v11  ;;  %v6922_v49 = vmul.f32 %v17494_v27, %v6858_v29  ;;  %v10960_v29 = vpop.f32.mrf.mxu1 }
 0xc8a   :  { %v6862_v33 = vpop.f32.mrf.mxu0 }
 0xc8b   :  { %v7016_v18 = vpack.c.bf16 %v7000_v32, %v6999_v12  ;;  %v6948_v54 = vadd.f32 %v17499_v60, %v6922_v49  ;;  %v6863_v56 = vadd.f32 %v6862_v33, %v6758_v38  ;;  %v6983_v37 = vmax.f32 %v6965_v48, 0.0  ;;  %v10962_v49 = vpop.f32.mrf.mxu1  ;;  %v18944_v33 = vld [vmem:[#allocation14_spill] sm:$0xff] }
 0xc8c   :  { %v11508_v9 = vpop.f32.mrf.mxu0  ;;  %v6774_v48 = vadd.f32 %v10949_v43, %v17456_v17 }
 0xc8d   :  { %v6966_v1 = vadd.f32 %v6948_v54, %v18939_v40  ;;  %v6923_v4 = vmul.f32 %v17494_v27, %v6863_v56  ;;  %11543 = vmatmul.mubr.msk.bf16.gmra.mxu1 %vm1149_vm15, %v7016_v18  ;;  %v7001_v62 = vmul.f32 %v6983_v37, %v18940_v16  ;;  %v18945_v54 = vld [vmem:[#allocation23_spill] sm:$0xff] }
 0xc8e   :  { %v6865_v21 = vpop.f32.mrf.mxu0  ;;  %11546 = vmatprep.mubr.msk.bf16.mxu1 %vm12017_vm5, %v18851_v36 }
 0xc8f   :  { %v6984_v15 = vmax.f32 %v6966_v1, 0.0  ;;  %v6949_v10 = vadd.f32 %v17499_v60, %v6923_v4  ;;  %v6866_v23 = vadd.f32 %v6865_v21, %v6761_v47  ;;  %v10963_v47 = vpop.f32.mrf.mxu1  ;;  %v18947_v21 = vld [vmem:[#allocation34_spill] sm:$0xff] }
 0xc90   :  { %v11509_v5 = vpop.f32.mrf.mxu0 }
 0xc91   :  { %v7002_v22 = vmul.f32 %v6984_v15, %v18941_v39  ;;  %v6967_v59 = vadd.f32 %v6949_v10, %v18942_v51  ;;  %v6924_v24 = vmul.f32 %v17494_v27, %v6866_v23  ;;  %v6777_v23 = vadd.f32 %v10952_v6, %v17462_v45  ;;  %v10965_v39 = vpop.f32.mrf.mxu1 }
 0xc92   :  { %v6870_v57 = vpop.f32.mrf.mxu0 }
 0xc93   :  { %v7017_v50 = vpack.c.bf16 %v7002_v22, %v7001_v62  ;;  %v6950_v41 = vadd.f32 %v17499_v60, %v6924_v24  ;;  %v6871_v55 = vadd.f32 %v6870_v57, %v6766_v7  ;;  %v6985_v3 = vmax.f32 %v6967_v59, 0.0  ;;  %v18948_v22 = vld [vmem:[#allocation16_spill] sm:$0xff]  ;;  %v18949_v59 = vld [vmem:[#allocation27_spill] sm:$0xff]  ;;  %v18950_v57 = vld [vmem:[#allocation42_spill] sm:$0xff]  ;;  %v10966_v58 = vpop.f32.mrf.mxu1 }
 0xc94   :  { %v11512_v2 = vpop.f32.mrf.mxu0  ;;  %v6782_v62 = vadd.f32 %v10955_v35, %v17468_v31 }
 0xc95   :  { %v6968_v34 = vadd.f32 %v6950_v41, %v18943_v63  ;;  %v6925_v38 = vmul.f32 %v17494_v27, %v6871_v55  ;;  %11547 = vmatmul.mubr.msk.bf16.gmra.mxu1 %vm1149_vm15, %v7017_v50  ;;  %v7003_v18 = vmul.f32 %v6985_v3, %v18944_v33  ;;  %v10961_v3 = vadd.f32 %v10960_v29, %v10959_v28 }
 0xc96   :  { %v6873_v12 = vpop.f32.mrf.mxu0  ;;  %11550 = vmatprep.mubr.msk.bf16.mxu1 %vm12017_vm5, %v18851_v36  ;;  %v10964_v28 = vadd.f32 %v10963_v47, %v10962_v49 }
 0xc97   :  { %v6986_v0 = vmax.f32 %v6968_v34, 0.0  ;;  %v6951_v32 = vadd.f32 %v17499_v60, %v6925_v38  ;;  %v6874_v11 = vadd.f32 %v6873_v12, %v6769_v46  ;;  %v18951_v34 = vld [vmem:[#allocation3_spill] sm:$0xff]  ;;  %v6785_v46 = vadd.f32 %v10958_v42, %v17472_v52 }
 0xc98   :  { %v11513_v14 = vpop.f32.mrf.mxu0  ;;  %v6790_v6 = vadd.f32 %v10961_v3, %v17476_v26 }
 0xc99   :  { %v7004_v56 = vmul.f32 %v6986_v0, %v18945_v54  ;;  %v6969_v30 = vadd.f32 %v6951_v32, %v18946_v20  ;;  %v6926_v9 = vmul.f32 %v17494_v27, %v6874_v11  ;;  %v10968_v14 = vpop.f32.mrf.mxu1 }
 0xc9a   :  { %v6878_v37 = vpop.f32.mrf.mxu0 }
 0xc9b   :  { %v7018_v40 = vpack.c.bf16 %v7004_v56, %v7003_v18  ;;  %v6952_v1 = vadd.f32 %v17499_v60, %v6926_v9  ;;  %v6879_v4 = vadd.f32 %v6878_v37, %v6774_v48  ;;  %v6987_v17 = vmax.f32 %v6969_v30, 0.0  ;;  %v18952_v48 = vld [vmem:[#allocation19_spill] sm:$0xff]  ;;  %v18953_v18 = vld [vmem:[#allocation29_spill] sm:$0xff]  ;;  %v10969_v49 = vpop.f32.mrf.mxu1 }
 0xc9c   :  { %v11516_v8 = vpop.f32.mrf.mxu0  ;;  %v18954_v56 = vld [vmem:[#allocation13_spill] sm:$0xff] }
 0xc9d   :  { %v6970_v15 = vadd.f32 %v6952_v1, %v18947_v21  ;;  %v6927_v10 = vmul.f32 %v17494_v27, %v6879_v4  ;;  %11551 = vmatmul.mubr.msk.bf16.gmra.mxu1 %vm1149_vm15, %v7018_v40  ;;  %v7005_v51 = vmul.f32 %v6987_v17, %v18948_v22  ;;  %v10967_v1 = vadd.f32 %v10966_v58, %v10965_v39  ;;  %v18955_v8 = vld [vmem:[#allocation17_spill] sm:$0xff]  ;;  %v18958_v39 = vld [vmem:[#allocation6_spill] sm:$0xff] }
 0xc9e   :  { %v6881_v13 = vpop.f32.mrf.mxu0  ;;  %11554 = vmatprep.mubr.msk.bf16.mxu1 %vm12017_vm5, %v18851_v36  ;;  %v6793_v17 = vadd.f32 %v10964_v28, %v17480_v44 }
 0xc9f   :  { %v6988_v5 = vmax.f32 %v6970_v15, 0.0  ;;  %v6953_v7 = vadd.f32 %v17499_v60, %v6927_v10  ;;  %v6882_v16 = vadd.f32 %v6881_v13, %v6777_v23  ;;  %v10970_v13 = vadd.f32 %v10969_v49, %v10968_v14  ;;  %v11842_v49 = vld [vmem:[%s18302_s12 + $0x20] sm:$0xff]  }
 0xca0   :  { %v11517_v61 = vpop.f32.mrf.mxu0 }
 0xca1   :  { %v7006_v24 = vmul.f32 %v6988_v5, %v18949_v59  ;;  %v6971_v45 = vadd.f32 %v6953_v7, %v18950_v57  ;;  %v6928_v50 = vmul.f32 %v17494_v27, %v6882_v16  ;;  %v6798_v7 = vadd.f32 %v10967_v1, %v17484_v19  ;;  %v18956_v16 = vld [vmem:[#allocation21_spill] sm:$0xff]  ;;  %v18957_v61 = vld [vmem:[#allocation35_spill] sm:$0xff] }
 0xca2   :  { %v6886_v41 = vpop.f32.mrf.mxu0  ;;  %v6801_v19 = vadd.f32 %v10970_v13, %v17488_v53  ;;  %v11840_v1 = vld [vmem:[%s18302_s12 + $0x60] sm:$0xff]   ;;  %v11852_v13 = vld [vmem:[%s18302_s12 + $0x48] sm:$0xff]  }
 0xca3   :  { %v7019_v55 = vpack.c.bf16 %v7006_v24, %v7005_v51  ;;  %v6954_v43 = vadd.f32 %v17499_v60, %v6928_v50  ;;  %v6887_v2 = vadd.f32 %v6886_v41, %v6782_v62  ;;  %v6989_v25 = vmax.f32 %v6971_v45, 0.0  ;;  %v18959_v41 = vld [vmem:[#allocation49_spill] sm:$0xff] }
 0xca4   :  { %v11520_v63 = vpop.f32.mrf.mxu0 }
 0xca5   :  { %v6972_v31 = vadd.f32 %v6954_v43, %v18951_v34  ;;  %v6929_v38 = vmul.f32 %v17494_v27, %v6887_v2  ;;  %11555 = vmatmul.mubr.msk.bf16.gmra.mxu1 %vm1149_vm15, %v7019_v55  ;;  %v7007_v33 = vmul.f32 %v6989_v25, %v18952_v48  ;;  %v18960_v34 = vld [vmem:[#allocation24_spill] sm:$0xff] }
 0xca6   :  { %v6889_v12 = vpop.f32.mrf.mxu0  ;;  %11558 = vmatprep.mubr.msk.bf16.mxu1 %vm12017_vm5, %v18851_v36  ;;  %v18964_v48 = vld [vmem:[#allocation12_spill] sm:$0xff] }
 0xca7   :  { %v6990_v0 = vmax.f32 %v6972_v31, 0.0  ;;  %v6955_v32 = vadd.f32 %v17499_v60, %v6929_v38  ;;  %v6890_v11 = vadd.f32 %v6889_v12, %v6785_v46  ;;  %v18961_v38 = vld [vmem:[#allocation5_spill] sm:$0xff]  ;;  %v18962_v12 = vld [vmem:[#allocation8_spill] sm:$0xff] }
 0xca8   :  { %v11521_v29 = vpop.f32.mrf.mxu0 }
 0xca9   :  { %v7008_v54 = vmul.f32 %v6990_v0, %v18953_v18  ;;  %v6973_v20 = vadd.f32 %v6955_v32, %v18954_v56  ;;  %v6930_v52 = vmul.f32 %v17494_v27, %v6890_v11  ;;  %v18963_v29 = vld [vmem:[#allocation38_spill] sm:$0xff]  ;;  %v18965_v18 = vld [vmem:[#allocation9_spill] sm:$0xff] }
 0xcaa   :  { %v6894_v30 = vpop.f32.mrf.mxu0 }
 0xcab   :  { %v7020_v9 = vpack.c.bf16 %v7008_v54, %v7007_v33  ;;  %v6956_v37 = vadd.f32 %v17499_v60, %v6930_v52  ;;  %v6895_v40 = vadd.f32 %v6894_v30, %v6790_v6  ;;  %v6991_v35 = vmax.f32 %v6973_v20, 0.0  ;;  %v11835_v20 = vld [vmem:[%s18302_s12 + $0x70] sm:$0xff]   ;;  %v11837_v30 = vld [vmem:[%s18302_s12 + $0x68] sm:$0xff]  }
 0xcac   :  { %v11524_v4 = vpop.f32.mrf.mxu0  ;;  %v11836_v52 = vld [vmem:[%s18302_s12 + $0x30] sm:$0xff]  }
 0xcad   :  { %v6974_v26 = vadd.f32 %v6956_v37, %v18955_v8  ;;  %v6931_v47 = vmul.f32 %v17494_v27, %v6895_v40  ;;  %11559 = vmatmul.mubr.msk.bf16.gmra.mxu1 %vm1149_vm15, %v7020_v9  ;;  %v7009_v42 = vmul.f32 %v6991_v35, %v18956_v16  ;;  %v11838_v9 = vld [vmem:[%s18302_s12 + $0x28] sm:$0xff]   ;;  %v11839_v37 = vld [vmem:[%s18302_s12 + $0xf8] sm:$0xff]   ;;  %v11843_v4 = vld [vmem:[%s18302_s12 + $0xf0] sm:$0xff]  }
 0xcae   :  { %v6897_v21 = vpop.f32.mrf.mxu0  ;;  %11562 = vmatprep.mubr.msk.bf16.mxu1 %vm12017_vm5, %v18851_v36  ;;  %v11841_v40 = vld [vmem:[%s18302_s12 + $0xb8] sm:$0xff]   ;;  %11019 = vmatprep.subr.bf16.mxu1 %v11839_v37  ;;  %v11845_v35 = vld [vmem:[%s18302_s12 + $0xb0] sm:$0xff]  }
 0xcaf   :  { %v6992_v15 = vmax.f32 %v6974_v26, 0.0  ;;  %v6957_v10 = vadd.f32 %v17499_v60, %v6931_v47  ;;  %v6898_v23 = vadd.f32 %v6897_v21, %v6793_v17  ;;  %11020 = vmatpush3.bf16.msra.mxu1 %v11841_v40  ;;  %v11844_v8 = vld [vmem:[%s18302_s12 + $0x58] sm:$0xff]   ;;  %v11847_v26 = vld [vmem:[%s18302_s12 + $0xe8] sm:$0xff]   ;;  %v11848_v21 = vld [vmem:[%s18302_s12 + $0x50] sm:$0xff]  }
 0xcb0   :  { %v11525_v5 = vpop.f32.mrf.mxu0  ;;  %11021 = vmatprep.subr.bf16.mxu1 %v11843_v4  ;;  %v11846_v47 = vld [vmem:[%s18302_s12 + $0x18] sm:$0xff]   ;;  %v11849_v17 = vld [vmem:[%s18302_s12 + $0xa8] sm:$0xff]  }
 0xcb1   :  { %v7010_v62 = vmul.f32 %v6992_v15, %v18957_v61  ;;  %v6975_v22 = vadd.f32 %v6957_v10, %v18958_v39  ;;  %v6932_v44 = vmul.f32 %v17494_v27, %v6898_v23  ;;  %v11851_v15 = vld [vmem:[%s18302_s12 + $0xe0] sm:$0xff]   ;;  %v11850_v10 = vld [vmem:[%s18302_s12 + $0x10] sm:$0xff]   ;;  %v11855_v5 = vld [vmem:[%s18302_s12 + $0xd8] sm:$0xff]  }
 0xcb2   :  { %v6902_v51 = vpop.f32.mrf.mxu0  ;;  %v11853_v23 = vld [vmem:[%s18302_s12 + $0xa0] sm:$0xff]   ;;  %v11857_v16 = vld [vmem:[%s18302_s12 + $0x98] sm:$0xff]   ;;  %v11859_v61 = vld [vmem:[%s18302_s12 + $0xd0] sm:$0xff]  }
 0xcb3   :  { %v7021_v59 = vpack.c.bf16 %v7010_v62, %v7009_v42  ;;  %v6958_v24 = vadd.f32 %v17499_v60, %v6932_v44  ;;  %v6903_v57 = vadd.f32 %v6902_v51, %v6798_v7  ;;  %v6993_v50 = vmax.f32 %v6975_v22, 0.0  ;;  %11022 = vmatpush3.bf16.msra.mxu1 %v11845_v35  ;;  %v11854_v7 = vld [vmem:[%s18302_s12 + $0x8] sm:$0xff]   ;;  %v11856_v42 = vld [vmem:[%s18302_s12 + $0x40] sm:$0xff]  }
 0xcb4   :  { %v11528_v45 = vpop.f32.mrf.mxu0  ;;  %11023 = vmatprep.subr.bf16.mxu1 %v11847_v26  ;;  %v11858_v62 = vld [vmem:[%s18302_s12] sm:$0xff]  }
 0xcb5   :  { %v6976_v55 = vadd.f32 %v6958_v24, %v18959_v41  ;;  %v6933_v43 = vmul.f32 %v17494_v27, %v6903_v57  ;;  %11563 = vmatmul.mubr.msk.bf16.gmra.mxu1 %vm1149_vm15, %v7021_v59  ;;  %v7011_v31 = vmul.f32 %v6993_v50, %v18960_v34  ;;  %v17729_v59 = vld [vmem:[%s18303_s11] ss:$0 sm:$0xff]  ;;  %v11860_v57 = vld [vmem:[%s18302_s12 + $0x90] sm:$0xff]   ;;  %v11861_v41 = vld [vmem:[%s18302_s12 + $0xc8] sm:$0xff]   ;;  %s12020_s11 = smov 7  }
 0xcb6   :  { %v6905_v2 = vpop.f32.mrf.mxu0  ;;  %11566 = vmatprep.mubr.msk.bf16.mxu1 %vm12017_vm5, %v18851_v36 }
 0xcb7   :  { %v6994_v3 = vmax.f32 %v6976_v55, 0.0  ;;  %v6959_v63 = vadd.f32 %v17499_v60, %v6933_v43  ;;  %v6906_v58 = vadd.f32 %v6905_v2, %v6801_v19  ;;  %11024 = vmatpush3.bf16.msra.mxu1 %v11849_v17  ;;  %v11862_v55 = vld [vmem:[%s18302_s12 + $0x178] sm:$0xff]   ;;  %v11863_v2 = vld [vmem:[%s18302_s12 + $0x88] sm:$0xff]  }
 0xcb8   :  { %v11529_v25 = vpop.f32.mrf.mxu0  ;;  %11025 = vmatprep.subr.bf16.mxu1 %v11851_v15 }
 0xcb9   :  { %v7012_v46 = vmul.f32 %v6994_v3, %v18961_v38  ;;  %v6977_v0 = vadd.f32 %v6959_v63, %v18962_v12  ;;  %v6934_v32 = vmul.f32 %v17494_v27, %v6906_v58  ;;  %v11833_v27 = vld [vmem:[%s18302_s12 + $0x78] sm:$0xff]   ;;  %v11865_v3 = vld [vmem:[%s18302_s12 + $0xc0] sm:$0xff]  }
 0xcba   :  { %10997 = vmatprep.subr.bf16.mxu0 %v11833_v27  ;;  %v11867_v38 = vld [vmem:[%s18302_s12 + $0x80] sm:$0xff]  }
 0xcbb   :  { %v7022_v11 = vpack.c.bf16 %v7012_v46, %v7011_v31  ;;  %v6960_v53 = vadd.f32 %v17499_v60, %v6934_v32  ;;  %v6995_v28 = vmax.f32 %v6977_v0, 0.0  ;;  %v11834_v60 = vld [vmem:[%s18302_s12 + $0x38] sm:$0xff]   ;;  %11026 = vmatpush3.bf16.msra.mxu1 %v11853_v23 }
 0xcbc   :  { %10998 = vmatpush3.bf16.msra.mxu0 %v11834_v60  ;;  %11027 = vmatprep.subr.bf16.mxu1 %v11855_v5  ;;  %v11870_v0 = vld [vmem:[%s18302_s12 + $0x1f8] sm:$0xff]  }
 0xcbd   :  { %v6978_v6 = vadd.f32 %v6960_v53, %v18963_v29  ;;  %11567 = vmatmul.mubr.msk.bf16.gmra.mxu1 %vm1149_vm15, %v7022_v11  ;;  %v7013_v33 = vmul.f32 %v6995_v28, %v18964_v48  ;;  %10999 = vmatprep.subr.bf16.mxu0 %v11835_v20 }
 0xcbe   :  { %11570 = vmatprep.mubr.msk.bf16.mxu1 %vm12017_vm5, %v18851_v36 }
 0xcbf   :  { %v6996_v14 = vmax.f32 %v6978_v6, 0.0  ;;  %11028 = vmatpush3.bf16.msra.mxu1 %v11857_v16 }
 0xcc0   :  { %11000 = vmatpush3.bf16.msra.mxu0 %v11836_v52  ;;  %11029 = vmatprep.subr.bf16.mxu1 %v11859_v61 }
 0xcc1   :  { %v7014_v54 = vmul.f32 %v6996_v14, %v18965_v18  ;;  %11001 = vmatprep.subr.bf16.mxu0 %v11837_v30 }
 0xcc3   :  { %v7023_v56 = vpack.c.bf16 %v7014_v54, %v7013_v33  ;;  %11030 = vmatpush3.bf16.msra.mxu1 %v11860_v57 }
 0xcc4   :  { %11002 = vmatpush3.bf16.msra.mxu0 %v11838_v9  ;;  %11031 = vmatprep.subr.bf16.mxu1 %v11861_v41 }
 0xcc5   :  { %11571 = vmatmul.mubr.msk.bf16.gmra.mxu1 %vm1149_vm15, %v7023_v56  ;;  %11003 = vmatprep.subr.bf16.mxu0 %v11840_v1 }
 0xcc7   :  { %11032 = vmatpush3.bf16.msra.mxu1 %v11863_v2 }
 0xcc8   :  { %11004 = vmatpush3.bf16.msra.mxu0 %v11842_v49  ;;  %11033 = vmatprep.subr.bf16.mxu1 %v11865_v3 }
 0xcc9   :  { %11005 = vmatprep.subr.bf16.mxu0 %v11844_v8 }
 0xccb   :  { %11034 = vmatpush3.bf16.msra.mxu1 %v11867_v38 }
 0xccc   :  { %11006 = vmatpush3.bf16.msra.mxu0 %v11846_v47  ;;  %11063 = vmatprep.subr.bf16.mxu1 %v11870_v0 }
 0xccd   :  { %11007 = vmatprep.subr.bf16.mxu0 %v11848_v21 }
 0xcd0   :  { %11008 = vmatpush3.bf16.msra.mxu0 %v11850_v10 }
 0xcd1   :  { %11009 = vmatprep.subr.bf16.mxu0 %v11852_v13 }
 0xcd4   :  { %11010 = vmatpush3.bf16.msra.mxu0 %v11854_v7 }
 0xcd5   :  { %11011 = vmatprep.subr.bf16.mxu0 %v11856_v42 }
 0xcd8   :  { %11012 = vmatpush3.bf16.msra.mxu0 %v11858_v62 }
 0xcd9   :  { %11041 = vmatprep.subr.bf16.mxu0 %v11862_v55 }
 0xd45   :  { %v7124_v39 = vpop.f32.mrf.mxu1 }
 0xd47   :  { %v11540_v22 = vpop.f32.mrf.mxu1 }
 0xd49   :  { %v7126_v44 = vpop.f32.mrf.mxu1 }
 0xd4b   :  { %v11541_v51 = vpop.f32.mrf.mxu1 }
 0xd4d   :  { %v7130_v24 = vpop.f32.mrf.mxu1 }
 0xd4e   :  { %v7131_v50 = vadd.f32 %v17729_v59, %v7130_v24 }
 0xd4f   :  { %v11544_v45 = vpop.f32.mrf.mxu1 }
 0xd50   :  { %v7191_v58 = vmax.f32 %v7131_v50, 0.0 }
 0xd51   :  { %v7133_v43 = vpop.f32.mrf.mxu1 }
 0xd52   :  { %v7134_v19 = vadd.f32 %v17729_v59, %v7133_v43 }
 0xd53   :  { %v11545_v63 = vpop.f32.mrf.mxu1 }
 0xd54   :  { %v7192_v25 = vmax.f32 %v7134_v19, 0.0 }
 0xd55   :  { %v7138_v34 = vpop.f32.mrf.mxu1 }
 0xd56   :  { %v17748_v31 = vpack.c.bf16 %v7192_v25, %v7191_v58  ;;  %v7139_v46 = vadd.f32 %v17729_v59, %v7138_v34 }
 0xd57   :  { %v11548_v12 = vpop.f32.mrf.mxu1 }
 0xd58   :  { %v7217_v32 = vrot.slane %v17748_v31, 3  ;;  %v7213_v11 = vrot.slane %v17748_v31, 1  ;;  %v7193_v29 = vmax.f32 %v7139_v46, 0.0  ;;  %v7221_v48 = vrot.slane %v17748_v31, 5 }
 0xd59   :  { %v7141_v53 = vpop.f32.mrf.mxu1 }
 0xd5a   :  { %v7142_v28 = vadd.f32 %v17729_v59, %v7141_v53  ;;  %7218 = vrot.lane.b32.xlu1 %v7217_v32, %s12019_s30  ;;  %7214 = vrot.lane.b32.xlu0 %v7213_v11, %s12019_s30 }
 0xd5b   :  { %v11549_v6 = vpop.f32.mrf.mxu1 }
 0xd5c   :  { %v7194_v14 = vmax.f32 %v7142_v28, 0.0 }
 0xd5d   :  { %v7146_v33 = vpop.f32.mrf.mxu1 }
 0xd5e   :  { %v17763_v18 = vpack.c.bf16 %v7194_v14, %v7193_v29  ;;  %7222 = vrot.lane.b32.xlu0 %v7221_v48, %s12019_s30  ;;  %v7147_v54 = vadd.f32 %v17729_v59, %v7146_v33 }
 0xd5f   :  { %v11552_v56 = vpop.f32.mrf.mxu1 }
 0xd60   :  { %v7230_v27 = vrot.slane %v17763_v18, 3  ;;  %v7226_v60 = vrot.slane %v17763_v18, 1  ;;  %v7195_v30 = vmax.f32 %v7147_v54, 0.0  ;;  %v7234_v40 = vrot.slane %v17763_v18, 5 }
 0xd61   :  { %v7149_v20 = vpop.f32.mrf.mxu1 }
 0xd62   :  { %v7150_v52 = vadd.f32 %v17729_v59, %v7149_v20  ;;  %7231 = vrot.lane.b32.xlu0 %v7230_v27, %s12019_s30  ;;  %7227 = vrot.lane.b32.xlu1 %v7226_v60, %s12019_s30 }
 0xd63   :  { %v11553_v9 = vpop.f32.mrf.mxu1 }
 0xd64   :  { %v7196_v37 = vmax.f32 %v7150_v52, 0.0  ;;  %v7216_v52 = vrot.slane %v17748_v31, 2 }
 0xd65   :  { %v7154_v1 = vpop.f32.mrf.mxu1 }
 0xd66   :  { %v17773_v4 = vpack.c.bf16 %v7196_v37, %v7195_v30  ;;  %7235 = vrot.lane.b32.xlu1 %v7234_v40, %s12019_s30  ;;  %v7155_v49 = vadd.f32 %v17729_v59, %v7154_v1 }
 0xd67   :  { %v11556_v35 = vpop.f32.mrf.mxu1 }
 0xd68   :  { %v7243_v8 = vrot.slane %v17773_v4, 3  ;;  %v7239_v26 = vrot.slane %v17773_v4, 7  ;;  %v7197_v21 = vmax.f32 %v7155_v49, 0.0  ;;  %v7270_v23 = vrot.slane %v17773_v4, 1  ;;  %v11864_v35 = vld [vmem:[%s18302_s12 + $0x138] sm:$0xff]  }
 0xd69   :  { %v7157_v47 = vpop.f32.mrf.mxu1 }
 0xd6a   :  { %v7158_v17 = vadd.f32 %v17729_v59, %v7157_v47  ;;  %7244 = vrot.lane.b32.xlu1 %v7243_v8, %s12019_s30  ;;  %7240 = vrot.lane.b32.xlu0 %v7239_v26, %s12019_s30  ;;  %v11866_v8 = vld [vmem:[%s18302_s12 + $0x170] sm:$0xff]   ;;  %v7220_v47 = vrot.slane %v17748_v31, 4 }
 0xd6b   :  { %v11557_v15 = vpop.f32.mrf.mxu1 }
 0xd6c   :  { %v7198_v10 = vmax.f32 %v7158_v17, 0.0  ;;  %v11868_v17 = vld [vmem:[%s18302_s12 + $0x130] sm:$0xff]   ;;  %v11869_v15 = vld [vmem:[%s18302_s12 + $0x168] sm:$0xff]  }
 0xd6d   :  { %v7162_v13 = vpop.f32.mrf.mxu1 }
 0xd6e   :  { %v17783_v5 = vpack.c.bf16 %v7198_v10, %v7197_v21  ;;  %7271 = vrot.lane.b32.xlu0 %v7270_v23, %s12019_s30  ;;  %v7163_v7 = vadd.f32 %v17729_v59, %v7162_v13  ;;  %v7225_v21 = vrot.slane %v17763_v18, 6 }
 0xd6f   :  { %v11560_v16 = vpop.f32.mrf.mxu1 }
 0xd70   :  { %v7279_v42 = vrot.slane %v17783_v5, 7  ;;  %v7275_v61 = vrot.slane %v17783_v5, 3  ;;  %v7199_v22 = vmax.f32 %v7163_v7, 0.0  ;;  %v7282_v24 = vrot.slane %v17783_v5, 1  ;;  %v11872_v16 = vld [vmem:[%s18302_s12 + $0x1b8] sm:$0xff]  }
 0xd71   :  { %v7165_v62 = vpop.f32.mrf.mxu1 }
 0xd72   :  { %v7166_v39 = vadd.f32 %v17729_v59, %v7165_v62  ;;  %7280 = vrot.lane.b32.xlu0 %v7279_v42, %s12019_s30  ;;  %7276 = vrot.lane.b32.xlu1 %v7275_v61, %s12019_s30  ;;  %v7233_v61 = vrot.slane %v17763_v18, 4  ;;  %v11873_v62 = vld [vmem:[%s18302_s12 + $0x160] sm:$0xff]  }
 0xd73   :  { %v11561_v44 = vpop.f32.mrf.mxu1 }
 0xd74   :  { %v7200_v51 = vmax.f32 %v7166_v39, 0.0  ;;  %v11874_v39 = vld [vmem:[%s18302_s12 + $0x1f0] sm:$0xff]  }
 0xd75   :  { %v7170_v57 = vpop.f32.mrf.mxu1 }
 0xd76   :  { %v17793_v45 = vpack.c.bf16 %v7200_v51, %v7199_v22  ;;  %7283 = vrot.lane.b32.xlu1 %v7282_v24, %s12019_s30  ;;  %v7171_v50 = vadd.f32 %v17729_v59, %v7170_v57  ;;  %v11875_v24 = vld [vmem:[%s18302_s12 + $0x120] sm:$0xff]   ;;  %v11876_v57 = vld [vmem:[%s18302_s12 + $0x1b0] sm:$0xff]  }
 0xd77   :  { %v11564_v41 = vpop.f32.mrf.mxu1 }
 0xd78   :  { %v7291_v55 = vrot.slane %v17793_v45, 5  ;;  %v7287_v43 = vrot.slane %v17793_v45, 3  ;;  %v7201_v3 = vmax.f32 %v7171_v50, 0.0  ;;  %v7294_v25 = vrot.slane %v17793_v45, 1  ;;  %v11877_v41 = vld [vmem:[%s18302_s12 + $0x158] sm:$0xff]  }
 0xd79   :  { %v7173_v19 = vpop.f32.mrf.mxu1  ;;  %v7242_v50 = vrot.slane %v17773_v4, 2 }
 0xd7a   :  { %v7174_v2 = vadd.f32 %v17729_v59, %v7173_v19  ;;  %7292 = vrot.lane.b32.xlu1 %v7291_v55, %s12019_s30  ;;  %7288 = vrot.lane.b32.xlu0 %v7287_v43, %s12019_s30  ;;  %v11878_v55 = vld [vmem:[%s18302_s12 + $0x1e8] sm:$0xff]  }
 0xd7b   :  { %v11565_v63 = vpop.f32.mrf.mxu1 }
 0xd7c   :  { %v7202_v58 = vmax.f32 %v7174_v2, 0.0  ;;  %v11880_v63 = vld [vmem:[%s18302_s12 + $0x1a8] sm:$0xff]  }
 0xd7d   :  { %v7178_v34 = vpop.f32.mrf.mxu1 }
 0xd7e   :  { %v17803_v38 = vpack.c.bf16 %v7202_v58, %v7201_v3  ;;  %7295 = vrot.lane.b32.xlu0 %v7294_v25, %s12019_s30  ;;  %v7179_v46 = vadd.f32 %v17729_v59, %v7178_v34  ;;  %v11879_v3 = vld [vmem:[%s18302_s12 + $0x118] sm:$0xff]   ;;  %v11881_v58 = vld [vmem:[%s18302_s12 + $0x150] sm:$0xff]   ;;  %v11882_v25 = vld [vmem:[%s18302_s12 + $0x1e0] sm:$0xff]  }
 0xd7f   :  { %v11568_v12 = vpop.f32.mrf.mxu1  ;;  %v11883_v34 = vld [vmem:[%s18302_s12 + $0x110] sm:$0xff]  }
 0xd80   :  { %v7326_v0 = vrot.slane %v17803_v38, 1  ;;  %v7299_v32 = vrot.slane %v17803_v38, 3  ;;  %v7203_v28 = vmax.f32 %v7179_v46, 0.0  ;;  %v7329_v14 = vrot.slane %v17803_v38, 5  ;;  %v11884_v46 = vld [vmem:[%s18302_s12 + $0x1a0] sm:$0xff]   ;;  %v11885_v12 = vld [vmem:[%s18302_s12 + $0x148] sm:$0xff]  }
 0xd81   :  { %v7181_v11 = vpop.f32.mrf.mxu1 }
 0xd82   :  { %v7182_v53 = vadd.f32 %v17729_v59, %v7181_v11  ;;  %7327 = vrot.lane.b32.xlu0 %v7326_v0, %s12019_s30  ;;  %7300 = vrot.lane.b32.xlu1 %v7299_v32, %s12019_s30  ;;  %v11886_v0 = vld [vmem:[%s18302_s12 + $0x1d8] sm:$0xff]   ;;  %v11887_v32 = vld [vmem:[%s18302_s12 + $0x108] sm:$0xff]  }
 0xd83   :  { %v11569_v29 = vpop.f32.mrf.mxu1  ;;  %v11888_v11 = vld [vmem:[%s18302_s12 + $0x198] sm:$0xff]  }
 0xd84   :  { %v7204_v6 = vmax.f32 %v7182_v53, 0.0  ;;  %v11889_v53 = vld [vmem:[%s18302_s12 + $0x140] sm:$0xff]  }
 0xd85   :  { %v7186_v48 = vpop.f32.mrf.mxu1 }
 0xd86   :  { %v17813_v33 = vpack.c.bf16 %v7204_v6, %v7203_v28  ;;  %7330 = vrot.lane.b32.xlu1 %v7329_v14, %s12019_s30  ;;  %v11890_v28 = vld [vmem:[%s18302_s12 + $0x1d0] sm:$0xff]   ;;  %v7229_v6 = vrot.slane %v17763_v18, 2  ;;  %v11891_v14 = vld [vmem:[%s18302_s12 + $0x100] sm:$0xff]   ;;  %v11894_v18 = vld [vmem:[%s18302_s12 + $0x278] sm:$0xff]  }
 0xd87   :  { %v11572_v54 = vpop.f32.mrf.mxu1  ;;  %v11892_v48 = vld [vmem:[%s18302_s12 + $0x190] sm:$0xff]  }
 0xd88   :  { %v7337_v56 = vrot.slane %v17813_v33, 1  ;;  %v7334_v27 = vrot.slane %v17813_v33, 7  ;;  %v7341_v20 = vrot.slane %v17813_v33, 3 }
 0xd89   :  { %v7188_v59 = vpop.f32.mrf.mxu1 }
 0xd8a   :  { %7338 = vrot.lane.b32.xlu1 %v7337_v56, %s12019_s30  ;;  %7335 = vrot.lane.b32.xlu0 %v7334_v27, %s12019_s30  ;;  %v11893_v56 = vld [vmem:[%s18302_s12 + $0x1c8] sm:$0xff]   ;;  %v7274_v59 = vrot.slane %v17783_v5, 2 }
 0xd8b   :  { %v11573_v60 = vpop.f32.mrf.mxu1 }
 0xd8e   :  { %7342 = vrot.lane.b32.xlu1 %v7341_v20, %s12019_s30  ;;  %v11895_v20 = vld [vmem:[%s18302_s12 + $0x188] sm:$0xff]  }
 0xdcc   :  { %v7219_v30 = vpop.permute.xlu1 %7218  ;;  %v7215_v9 = vpop.permute.xlu0 %7214 }
 0xdcd   :  { %v7251_v37 = vsel %vm1149_vm15, %v7216_v52, %v7219_v30  ;;  %v7248_v40 = vsel %vm1149_vm15, %v17748_v31, %v7215_v9  ;;  %v11871_v31 = vld [vmem:[%s18302_s12 + $0x128] sm:$0xff]   ;;  %v11896_v52 = vld [vmem:[%s18302_s12 + $0x238] sm:$0xff]   ;;  %v11897_v9 = vld [vmem:[%s18302_s12 + $0x1c0] sm:$0xff]  }
 0xdce   :  { %v7731_v1 = vrot.slane %v7251_v37, 2  ;;  %v7730_v49 = vrot.slane %v7248_v40, 2  ;;  %v11898_v37 = vld [vmem:[%s18302_s12 + $0x270] sm:$0xff]  }
 0xdd0   :  { %8812 = vmatprep.mubr.bf16.mxu0 %v7731_v1  ;;  %v7223_v26 = vpop.permute.xlu0 %7222 }
 0xdd1   :  { %8813 = vmatmul.mubr.bf16.vlgmr.msra.gmra.mxu0 %v7730_v49  ;;  %v7254_v10 = vsel %vm1149_vm15, %v7220_v47, %v7223_v26  ;;  %v7238_v49 = vrot.slane %v17773_v4, 6  ;;  %v11901_v47 = vld [vmem:[%s18302_s12 + $0x268] sm:$0xff]  }
 0xdd2   :  { %11042 = vmatpush3.bf16.msra.mxu0 %v11864_v35  ;;  %v7732_v42 = vrot.slane %v7254_v10, 2  ;;  %v11899_v35 = vld [vmem:[%s18302_s12 + $0x180] sm:$0xff]   ;;  %v11903_v10 = vld [vmem:[%s18302_s12 + $0x228] sm:$0xff]  }
 0xdd3   :  { %11043 = vmatprep.subr.bf16.mxu0 %v11866_v8  ;;  %v11900_v8 = vld [vmem:[%s18302_s12 + $0x230] sm:$0xff]  }
 0xdd4   :  { %v7228_v23 = vpop.permute.xlu1 %7227  ;;  %v7232_v29 = vpop.permute.xlu0 %7231 }
 0xdd5   :  { %v7257_v13 = vsel %vm1149_vm15, %v7225_v21, %v7228_v23  ;;  %v7260_v27 = vsel %vm1149_vm15, %v7229_v6, %v7232_v29  ;;  %v11904_v23 = vld [vmem:[%s18302_s12 + $0x2b8] sm:$0xff]   ;;  %v11930_v6 = vld [vmem:[%s18302_s12 + $0x370] sm:$0xff]  }
 0xdd6   :  { %v7733_v7 = vrot.slane %v7257_v13, 2  ;;  %11044 = vmatpush3.bf16.msra.mxu0 %v11868_v17  ;;  %v7734_v30 = vrot.slane %v7260_v27, 2  ;;  %v11902_v17 = vld [vmem:[%s18302_s12 + $0x2f8] sm:$0xff]  }
 0xdd7   :  { %11045 = vmatprep.subr.bf16.mxu0 %v11869_v15 }
 0xdd8   :  { %v7236_v22 = vpop.permute.xlu1 %7235  ;;  %8852 = vmatprep.mubr.bf16.mxu1 %v7733_v7  ;;  %v11905_v7 = vld [vmem:[%s18302_s12 + $0x260] sm:$0xff]  }
 0xdd9   :  { %v7263_v44 = vsel %vm1149_vm15, %v7233_v61, %v7236_v22  ;;  %8853 = vmatmul.mubr.bf16.vlgmr.msra.gmra.mxu1 %v7732_v42  ;;  %v11907_v42 = vld [vmem:[%s18302_s12 + $0x220] sm:$0xff]   ;;  %v11908_v61 = vld [vmem:[%s18302_s12 + $0x2b0] sm:$0xff]   ;;  %v11911_v22 = vld [vmem:[%s18302_s12 + $0x218] sm:$0xff]  }
 0xdda   :  { %v7735_v51 = vrot.slane %v7263_v44, 2  ;;  %11046 = vmatpush3.bf16.msra.mxu0 %v11871_v31  ;;  %11064 = vmatpush3.bf16.msra.mxu1 %v11872_v16  ;;  %v11906_v31 = vld [vmem:[%s18302_s12 + $0x2f0] sm:$0xff]   ;;  %v11912_v44 = vld [vmem:[%s18302_s12 + $0x2a8] sm:$0xff]  }
 0xddb   :  { %11047 = vmatprep.subr.bf16.mxu0 %v11873_v62  ;;  %11065 = vmatprep.subr.bf16.mxu1 %v11874_v39  ;;  %v11909_v62 = vld [vmem:[%s18302_s12 + $0x258] sm:$0xff]   ;;  %v11910_v39 = vld [vmem:[%s18302_s12 + $0x2e8] sm:$0xff]  }
 0xddc   :  { %8892 = vmatprep.mubr.bf16.mxu0 %v7735_v51  ;;  %v7245_v43 = vpop.permute.xlu1 %7244  ;;  %v7241_v40 = vpop.permute.xlu0 %7240  ;;  %v11913_v51 = vld [vmem:[%s18302_s12 + $0x250] sm:$0xff]  }
 0xddd   :  { %v7269_v19 = vsel %vm1149_vm15, %v7242_v50, %v7245_v43  ;;  %v7266_v21 = vsel %vm1149_vm15, %v7238_v49, %v7241_v40  ;;  %v11916_v50 = vld [vmem:[%s18302_s12 + $0x2a0] sm:$0xff]   ;;  %v11919_v43 = vld [vmem:[%s18302_s12 + $0x208] sm:$0xff]  }
 0xdde   :  { %v7737_v2 = vrot.slane %v7269_v19, 2  ;;  %11048 = vmatpush3.bf16.msra.mxu0 %v11875_v24  ;;  %11066 = vmatpush3.bf16.msra.mxu1 %v11876_v57  ;;  %v7736_v13 = vrot.slane %v7266_v21, 2  ;;  %v11914_v24 = vld [vmem:[%s18302_s12 + $0x2e0] sm:$0xff]   ;;  %v11915_v57 = vld [vmem:[%s18302_s12 + $0x210] sm:$0xff]   ;;  %v11920_v19 = vld [vmem:[%s18302_s12 + $0x298] sm:$0xff]  }
 0xddf   :  { %11049 = vmatprep.subr.bf16.mxu0 %v11877_v41  ;;  %11067 = vmatprep.subr.bf16.mxu1 %v11878_v55  ;;  %v11917_v41 = vld [vmem:[%s18302_s12 + $0x248] sm:$0xff]   ;;  %v11918_v55 = vld [vmem:[%s18302_s12 + $0x2d8] sm:$0xff]   ;;  %v11937_v40 = vld [vmem:[%s18302_s12 + $0x360] sm:$0xff]  }
 0xde0   :  { %8932 = vmatprep.mubr.bf16.mxu1 %v7737_v2  ;;  %v11921_v2 = vld [vmem:[%s18302_s12 + $0x240] sm:$0xff]   ;;  %v11944_v21 = vld [vmem:[%s18302_s12 + $0x3a8] sm:$0xff]  }
 0xde2   :  { %11050 = vmatpush3.bf16.msra.mxu0 %v11879_v3  ;;  %11068 = vmatpush3.bf16.msra.mxu1 %v11880_v63  ;;  %v11922_v3 = vld [vmem:[%s18302_s12 + $0x2d0] sm:$0xff]   ;;  %v7272_v63 = vpop.permute.xlu0 %7271 }
 0xde3   :  { %11051 = vmatprep.subr.bf16.mxu0 %v11881_v58  ;;  %11069 = vmatprep.subr.bf16.mxu1 %v11882_v25  ;;  %v11923_v58 = vld [vmem:[%s18302_s12 + $0x200] sm:$0xff]   ;;  %v11924_v25 = vld [vmem:[%s18302_s12 + $0x290] sm:$0xff]  }
 0xde4   :  { %v7277_v54 = vpop.permute.xlu1 %7276 }
 0xde5   :  { %v7307_v60 = vsel %vm1149_vm15, %v7274_v59, %v7277_v54  ;;  %v7278_v54 = vrot.slane %v17783_v5, 4  ;;  %v11933_v59 = vld [vmem:[%s18302_s12 + $0x368] sm:$0xff]  }
 0xde6   :  { %11052 = vmatpush3.bf16.msra.mxu0 %v11883_v34  ;;  %11070 = vmatpush3.bf16.msra.mxu1 %v11884_v46  ;;  %v9878_v1 = vrot.slane %v7307_v60, 6  ;;  %v11925_v46 = vld [vmem:[%s18302_s12 + $0x2c8] sm:$0xff]  }
 0xde7   :  { %11053 = vmatprep.subr.bf16.mxu0 %v11885_v12  ;;  %11071 = vmatprep.subr.bf16.mxu1 %v11886_v0  ;;  %v11926_v12 = vld [vmem:[%s18302_s12 + $0x378] sm:$0xff]   ;;  %v7304_v0 = vsel %vm1149_vm15, %v17773_v4, %v7272_v63  ;;  %v11929_v4 = vld [vmem:[%s18302_s12 + $0x2c0] sm:$0xff]   ;;  %v11962_v63 = vld [vmem:[%s18302_s12 + $0x470] sm:$0xff]  }
 0xde8   :  { %v7284_v26 = vpop.permute.xlu1 %7283  ;;  %v9877_v29 = vrot.slane %v7304_v0, 6  ;;  %v11965_v0 = vld [vmem:[%s18302_s12 + $0x468] sm:$0xff]  }
 0xde9   :  { %v7313_v15 = vsel %vm1149_vm15, %v17783_v5, %v7284_v26  ;;  %v11934_v5 = vld [vmem:[%s18302_s12 + $0x3f8] sm:$0xff]  }
 0xdea   :  { %11054 = vmatpush3.bf16.msra.mxu0 %v11887_v32  ;;  %11072 = vmatpush3.bf16.msra.mxu1 %v11888_v11  ;;  %v9880_v16 = vrot.slane %v7313_v15, 6  ;;  %v7290_v32 = vrot.slane %v17793_v45, 4  ;;  %v11941_v26 = vld [vmem:[%s18302_s12 + $0x358] sm:$0xff]   ;;  %v11945_v15 = vld [vmem:[%s18302_s12 + $0x350] sm:$0xff]  }
 0xdeb   :  { %11055 = vmatprep.subr.bf16.mxu0 %v11889_v53  ;;  %11073 = vmatprep.subr.bf16.mxu1 %v11890_v28  ;;  %v11927_v53 = vld [vmem:[%s18302_s12 + $0x288] sm:$0xff]   ;;  %v11928_v28 = vld [vmem:[%s18302_s12 + $0x338] sm:$0xff]  }
 0xdec   :  { %v7293_v34 = vpop.permute.xlu1 %7292 }
 0xded   :  { %v7319_v11 = vsel %vm1149_vm15, %v7290_v32, %v7293_v34  ;;  %v11963_v34 = vld [vmem:[%s18302_s12 + $0x380] sm:$0xff]   ;;  %v11966_v32 = vld [vmem:[%s18302_s12 + $0x4f8] sm:$0xff]  }
 0xdee   :  { %11056 = vmatpush3.bf16.msra.mxu0 %v11891_v14  ;;  %11074 = vmatpush3.bf16.msra.mxu1 %v11892_v48  ;;  %v7281_v14 = vpop.permute.xlu0 %7280  ;;  %v9882_v48 = vrot.slane %v7319_v11, 6 }
 0xdef   :  { %11075 = vmatprep.subr.bf16.mxu1 %v11893_v56  ;;  %11085 = vmatprep.subr.bf16.mxu0 %v11894_v18  ;;  %v11931_v56 = vld [vmem:[%s18302_s12 + $0x280] sm:$0xff]   ;;  %v11932_v18 = vld [vmem:[%s18302_s12 + $0x330] sm:$0xff]   ;;  %v7310_v60 = vsel %vm1149_vm15, %v7278_v54, %v7281_v14 }
 0xdf0   :  { %v11972_v54 = vld [vmem:[%s18302_s12 + $0x4b0] sm:$0xff]  }
 0xdf1   :  { %8893 = vmatmul.mubr.bf16.vlgmr.msra.gmra.mxu0 %v7734_v30  ;;  %v11935_v30 = vld [vmem:[%s18302_s12 + $0x328] sm:$0xff]  }
 0xdf2   :  { %11076 = vmatpush3.bf16.msra.mxu1 %v11895_v20  ;;  %11086 = vmatpush3.bf16.msra.mxu0 %v11896_v52  ;;  %v7298_v20 = vrot.slane %v17803_v38, 2 }
 0xdf3   :  { %8972 = vmatprep.mubr.bf16.mxu0 %v9878_v1  ;;  %11077 = vmatprep.subr.bf16.mxu1 %v11897_v9  ;;  %v11936_v9 = vld [vmem:[%s18302_s12 + $0x3b8] sm:$0xff]   ;;  %v11938_v1 = vld [vmem:[%s18302_s12 + $0x3f0] sm:$0xff]  }
 0xdf4   :  { %11087 = vmatprep.subr.bf16.mxu0 %v11898_v37  ;;  %v7301_v27 = vpop.permute.xlu1 %7300  ;;  %v9879_v37 = vrot.slane %v7310_v60, 6  ;;  %v11978_v60 = vld [vmem:[%s18302_s12 + $0x4e0] sm:$0xff]  }
 0xdf5   :  { %v7325_v52 = vsel %vm1149_vm15, %v7298_v20, %v7301_v27  ;;  %v11975_v27 = vld [vmem:[%s18302_s12 + $0x418] sm:$0xff]  }
 0xdf6   :  { %11078 = vmatpush3.bf16.msra.mxu1 %v11899_v35  ;;  %11088 = vmatpush3.bf16.msra.mxu0 %v11900_v8  ;;  %v9884_v49 = vrot.slane %v7325_v52, 6  ;;  %v11939_v35 = vld [vmem:[%s18302_s12 + $0x320] sm:$0xff]   ;;  %v11940_v8 = vld [vmem:[%s18302_s12 + $0x3b0] sm:$0xff]  }
 0xdf7   :  { %11089 = vmatprep.subr.bf16.mxu0 %v11901_v47  ;;  %11107 = vmatprep.subr.bf16.mxu1 %v11902_v17  ;;  %v11942_v47 = vld [vmem:[%s18302_s12 + $0x3e8] sm:$0xff]   ;;  %v11943_v17 = vld [vmem:[%s18302_s12 + $0x318] sm:$0xff]   ;;  %v11979_v52 = vld [vmem:[%s18302_s12 + $0x410] sm:$0xff]  }
 0xdf9   :  { %8933 = vmatmul.mubr.bf16.vlgmr.msra.gmra.mxu1 %v7736_v13  ;;  %v11948_v13 = vld [vmem:[%s18302_s12 + $0x3a0] sm:$0xff]  }
 0xdfa   :  { %11090 = vmatpush3.bf16.msra.mxu0 %v11903_v10  ;;  %11108 = vmatpush3.bf16.msra.mxu1 %v11904_v23  ;;  %v11946_v10 = vld [vmem:[%s18302_s12 + $0x3e0] sm:$0xff]   ;;  %v11947_v23 = vld [vmem:[%s18302_s12 + $0x310] sm:$0xff]  }
 0xdfb   :  { %9012 = vmatprep.mubr.bf16.mxu1 %v9880_v16  ;;  %11091 = vmatprep.subr.bf16.mxu0 %v11905_v7  ;;  %v11949_v7 = vld [vmem:[%s18302_s12 + $0x348] sm:$0xff]  }
 0xdfc   :  { %11109 = vmatprep.subr.bf16.mxu1 %v11906_v31  ;;  %v11950_v31 = vld [vmem:[%s18302_s12 + $0x3d8] sm:$0xff]   ;;  %v11951_v16 = vld [vmem:[%s18302_s12 + $0x308] sm:$0xff]  }
 0xdfe   :  { %11092 = vmatpush3.bf16.msra.mxu0 %v11907_v42  ;;  %11110 = vmatpush3.bf16.msra.mxu1 %v11908_v61  ;;  %v11952_v42 = vld [vmem:[%s18302_s12 + $0x398] sm:$0xff]   ;;  %v11953_v61 = vld [vmem:[%s18302_s12 + $0x340] sm:$0xff]  }
 0xdff   :  { %11093 = vmatprep.subr.bf16.mxu0 %v11909_v62  ;;  %11111 = vmatprep.subr.bf16.mxu1 %v11910_v39  ;;  %v11954_v62 = vld [vmem:[%s18302_s12 + $0x3d0] sm:$0xff]   ;;  %v7289_v39 = vpop.permute.xlu0 %7288 }
 0xe02   :  { %11094 = vmatpush3.bf16.msra.mxu0 %v11911_v22  ;;  %11112 = vmatpush3.bf16.msra.mxu1 %v11912_v44  ;;  %v7286_v22 = vrot.slane %v17793_v45, 2  ;;  %v11955_v44 = vld [vmem:[%s18302_s12 + $0x300] sm:$0xff]  }
 0xe03   :  { %11095 = vmatprep.subr.bf16.mxu0 %v11913_v51  ;;  %11113 = vmatprep.subr.bf16.mxu1 %v11914_v24  ;;  %v11956_v51 = vld [vmem:[%s18302_s12 + $0x390] sm:$0xff]   ;;  %v7331_v24 = vpop.permute.xlu1 %7330 }
 0xe06   :  { %11096 = vmatpush3.bf16.msra.mxu0 %v11915_v57  ;;  %11114 = vmatpush3.bf16.msra.mxu1 %v11916_v50  ;;  %v11957_v57 = vld [vmem:[%s18302_s12 + $0x3c8] sm:$0xff]   ;;  %v11958_v50 = vld [vmem:[%s18302_s12 + $0x478] sm:$0xff]  }
 0xe07   :  { %11097 = vmatprep.subr.bf16.mxu0 %v11917_v41  ;;  %11115 = vmatprep.subr.bf16.mxu1 %v11918_v55  ;;  %v7316_v41 = vsel %vm1149_vm15, %v7286_v22, %v7289_v39  ;;  %v7348_v55 = vsel %vm1149_vm15, %v7298_v20, %v7331_v24  ;;  %v10053_v20 = vld [vmem:[%s18304_s14] ss:$0 sm:$0xff]  ;;  %v11997_v22 = vld [vmem:[%s18302_s12 + $0x518] sm:$0xff]  }
 0xe08   :  { %9239 = vrot.lane.b32.xlu0 %v10053_v20, %s12020_s11  ;;  %v11996_v39 = vld [vmem:[%s18302_s12 + $0x520] sm:$0xff]  }
 0xe0a   :  { %11098 = vmatpush3.bf16.msra.mxu0 %v11919_v43  ;;  %11116 = vmatpush3.bf16.msra.mxu1 %v11920_v19  ;;  %v11959_v43 = vld [vmem:[%s18302_s12 + $0x388] sm:$0xff]   ;;  %v11960_v19 = vld [vmem:[%s18302_s12 + $0x438] sm:$0xff]  }
 0xe0b   :  { %11099 = vmatprep.subr.bf16.mxu0 %v11921_v2  ;;  %11117 = vmatprep.subr.bf16.mxu1 %v11922_v3  ;;  %v9881_v2 = vrot.slane %v7316_v41, 6  ;;  %v11961_v3 = vld [vmem:[%s18302_s12 + $0x3c0] sm:$0xff]  }
 0xe0e   :  { %11100 = vmatpush3.bf16.msra.mxu0 %v11923_v58  ;;  %11118 = vmatpush3.bf16.msra.mxu1 %v11924_v25  ;;  %v7296_v58 = vpop.permute.xlu0 %7295  ;;  %v7747_v25 = vrot.slane %v7348_v55, 2 }
 0xe0f   :  { %11119 = vmatprep.subr.bf16.mxu1 %v11925_v46  ;;  %11129 = vmatprep.subr.bf16.mxu0 %v11926_v12  ;;  %v11964_v46 = vld [vmem:[%s18302_s12 + $0x430] sm:$0xff]   ;;  %v7339_v12 = vpop.permute.xlu1 %7338  ;;  %v7322_v11 = vsel %vm1149_vm15, %v17793_v45, %v7296_v58  ;;  %v11969_v45 = vld [vmem:[%s18302_s12 + $0x460] sm:$0xff]  }
 0xe11   :  { %8973 = vmatmul.mubr.bf16.vlgmr.msra.gmra.mxu0 %v9877_v29  ;;  %v11968_v29 = vld [vmem:[%s18302_s12 + $0x4b8] sm:$0xff]  }
 0xe12   :  { %11120 = vmatpush3.bf16.msra.mxu1 %v11927_v53  ;;  %11130 = vmatpush3.bf16.msra.mxu0 %v11928_v28  ;;  %v7354_v53 = vsel %vm1149_vm15, %v17813_v33, %v7339_v12  ;;  %v11967_v28 = vld [vmem:[%s18302_s12 + $0x428] sm:$0xff]  }
 0xe13   :  { %9052 = vmatprep.mubr.bf16.mxu0 %v9882_v48  ;;  %11121 = vmatprep.subr.bf16.mxu1 %v11929_v4  ;;  %v9883_v4 = vrot.slane %v7322_v11, 6  ;;  %v7749_v14 = vrot.slane %v7354_v53, 2  ;;  %v11971_v48 = vld [vmem:[%s18302_s12 + $0x420] sm:$0xff]   ;;  %v7343_v24 = vpop.permute.xlu1 %7342 }
 0xe14   :  { %11131 = vmatprep.subr.bf16.mxu0 %v11930_v6  ;;  %v11970_v6 = vld [vmem:[%s18302_s12 + $0x4f0] sm:$0xff]  }
 0xe16   :  { %11122 = vmatpush3.bf16.msra.mxu1 %v11931_v56  ;;  %11132 = vmatpush3.bf16.msra.mxu0 %v11932_v18  ;;  %v11973_v56 = vld [vmem:[%s18302_s12 + $0x458] sm:$0xff]   ;;  %v11974_v18 = vld [vmem:[%s18302_s12 + $0x4e8] sm:$0xff]  }
 0xe17   :  { %11133 = vmatprep.subr.bf16.mxu0 %v11933_v59  ;;  %11151 = vmatprep.subr.bf16.mxu1 %v11934_v5  ;;  %v11976_v59 = vld [vmem:[%s18302_s12 + $0x4a8] sm:$0xff]   ;;  %v11977_v5 = vld [vmem:[%s18302_s12 + $0x450] sm:$0xff]  }
 0xe19   :  { %9013 = vmatmul.mubr.bf16.vlgmr.msra.gmra.mxu1 %v9879_v37  ;;  %v11982_v37 = vld [vmem:[%s18302_s12 + $0x4d8] sm:$0xff]  }
 0xe1a   :  { %11134 = vmatpush3.bf16.msra.mxu0 %v11935_v30  ;;  %11152 = vmatpush3.bf16.msra.mxu1 %v11936_v9  ;;  %v11980_v30 = vld [vmem:[%s18302_s12 + $0x4a0] sm:$0xff]   ;;  %v11981_v9 = vld [vmem:[%s18302_s12 + $0x448] sm:$0xff]  }
 0xe1b   :  { %9092 = vmatprep.mubr.bf16.mxu1 %v9884_v49  ;;  %11135 = vmatprep.subr.bf16.mxu0 %v11937_v40  ;;  %v11983_v40 = vld [vmem:[%s18302_s12 + $0x408] sm:$0xff]   ;;  %v11985_v49 = vld [vmem:[%s18302_s12 + $0x440] sm:$0xff]  }
 0xe1c   :  { %11153 = vmatprep.subr.bf16.mxu1 %v11938_v1  ;;  %v11984_v1 = vld [vmem:[%s18302_s12 + $0x498] sm:$0xff]  }
 0xe1e   :  { %11136 = vmatpush3.bf16.msra.mxu0 %v11939_v35  ;;  %11154 = vmatpush3.bf16.msra.mxu1 %v11940_v8  ;;  %v11986_v35 = vld [vmem:[%s18302_s12 + $0x4d0] sm:$0xff]   ;;  %v7328_v8 = vpop.permute.xlu0 %7327 }
 0xe1f   :  { %11137 = vmatprep.subr.bf16.mxu0 %v11941_v26  ;;  %11155 = vmatprep.subr.bf16.mxu1 %v11942_v47  ;;  %v11987_v26 = vld [vmem:[%s18302_s12 + $0x400] sm:$0xff]   ;;  %v11988_v47 = vld [vmem:[%s18302_s12 + $0x490] sm:$0xff]  }
 0xe22   :  { %11138 = vmatpush3.bf16.msra.mxu0 %v11943_v17  ;;  %11156 = vmatpush3.bf16.msra.mxu1 %v11944_v21  ;;  %v11989_v17 = vld [vmem:[%s18302_s12 + $0x4c8] sm:$0xff]   ;;  %v7346_v21 = vsel %vm1149_vm15, %v17803_v38, %v7328_v8  ;;  %v7333_v38 = vrot.slane %v17813_v33, 6 }
 0xe23   :  { %11139 = vmatprep.subr.bf16.mxu0 %v11945_v15  ;;  %11157 = vmatprep.subr.bf16.mxu1 %v11946_v10  ;;  %v11990_v15 = vld [vmem:[%s18302_s12 + $0x488] sm:$0xff]   ;;  %v11991_v10 = vld [vmem:[%s18302_s12 + $0x538] sm:$0xff]  }
 0xe26   :  { %11140 = vmatpush3.bf16.msra.mxu0 %v11947_v23  ;;  %11158 = vmatpush3.bf16.msra.mxu1 %v11948_v13  ;;  %v7746_v23 = vrot.slane %v7346_v21, 2  ;;  %v11992_v13 = vld [vmem:[%s18302_s12 + $0x4c0] sm:$0xff]  }
 0xe27   :  { %11141 = vmatprep.subr.bf16.mxu0 %v11949_v7  ;;  %11159 = vmatprep.subr.bf16.mxu1 %v11950_v31  ;;  %v7336_v7 = vpop.permute.xlu0 %7335  ;;  %v11993_v31 = vld [vmem:[%s18302_s12 + $0x480] sm:$0xff]  }
 0xe2a   :  { %11142 = vmatpush3.bf16.msra.mxu0 %v11951_v16  ;;  %11160 = vmatpush3.bf16.msra.mxu1 %v11952_v42  ;;  %v11994_v16 = vld [vmem:[%s18302_s12 + $0x530] sm:$0xff]   ;;  %v7351_v42 = vsel %vm1149_vm15, %v7333_v38, %v7336_v7 }
 0xe2b   :  { %11143 = vmatprep.subr.bf16.mxu0 %v11953_v61  ;;  %11161 = vmatprep.subr.bf16.mxu1 %v11954_v62  ;;  %v11995_v61 = vld [vmem:[%s18302_s12 + $0x528] sm:$0xff]   ;;  %v7748_v62 = vrot.slane %v7351_v42, 2 }
 0xe2e   :  { %11144 = vmatpush3.bf16.msra.mxu0 %v11955_v44  ;;  %11162 = vmatpush3.bf16.msra.mxu1 %v11956_v51  ;;  %v11998_v44 = vld [vmem:[%s18302_s12 + $0x510] sm:$0xff]   ;;  %v11999_v51 = vld [vmem:[%s18302_s12 + $0x508] sm:$0xff]  }
 0xe2f   :  { %11163 = vmatprep.subr.bf16.mxu1 %v11957_v57  ;;  %11173 = vmatprep.subr.bf16.mxu0 %v11958_v50  ;;  %v7340_v57 = vrot.slane %v17813_v33, 2  ;;  %v12000_v50 = vld [vmem:[%s18302_s12 + $0x500] sm:$0xff]   ;;  %s12021_s12 = smov 121  }
 0xe30   :  { %v9876_v33 = vld [vmem:[%s18305_s13] ss:$0 sm:$0xff] }
 0xe31   :  { %9053 = vmatmul.mubr.bf16.vlgmr.msra.gmra.mxu0 %v9881_v2  ;;  %v7357_v41 = vsel %vm1149_vm15, %v7340_v57, %v7343_v24 }
 0xe32   :  { %11164 = vmatpush3.bf16.msra.mxu1 %v11959_v43  ;;  %11174 = vmatpush3.bf16.msra.mxu0 %v11960_v19  ;;  %v7750_v55 = vrot.slane %v7357_v41, 2 }
 0xe33   :  { %9132 = vmatprep.mubr.bf16.mxu0 %v7747_v25  ;;  %11165 = vmatprep.subr.bf16.mxu1 %v11961_v3 }
 0xe34   :  { %11175 = vmatprep.subr.bf16.mxu0 %v11962_v63 }
 0xe36   :  { %11166 = vmatpush3.bf16.msra.mxu1 %v11963_v34  ;;  %11176 = vmatpush3.bf16.msra.mxu0 %v11964_v46 }
 0xe37   :  { %11177 = vmatprep.subr.bf16.mxu0 %v11965_v0  ;;  %11195 = vmatprep.subr.bf16.mxu1 %v11966_v32 }
 0xe39   :  { %9093 = vmatmul.mubr.bf16.vlgmr.msra.gmra.mxu1 %v9883_v4 }
 0xe3a   :  { %11178 = vmatpush3.bf16.msra.mxu0 %v11967_v28  ;;  %11196 = vmatpush3.bf16.msra.mxu1 %v11968_v29 }
 0xe3b   :  { %9172 = vmatprep.mubr.bf16.mxu1 %v7749_v14  ;;  %11179 = vmatprep.subr.bf16.mxu0 %v11969_v45 }
 0xe3c   :  { %11197 = vmatprep.subr.bf16.mxu1 %v11970_v6 }
 0xe3e   :  { %11180 = vmatpush3.bf16.msra.mxu0 %v11971_v48  ;;  %11198 = vmatpush3.bf16.msra.mxu1 %v11972_v54 }
 0xe3f   :  { %11181 = vmatprep.subr.bf16.mxu0 %v11973_v56  ;;  %11199 = vmatprep.subr.bf16.mxu1 %v11974_v18 }
 0xe42   :  { %11182 = vmatpush3.bf16.msra.mxu0 %v11975_v27  ;;  %11200 = vmatpush3.bf16.msra.mxu1 %v11976_v59 }
 0xe43   :  { %11183 = vmatprep.subr.bf16.mxu0 %v11977_v5  ;;  %11201 = vmatprep.subr.bf16.mxu1 %v11978_v60 }
 0xe46   :  { %11184 = vmatpush3.bf16.msra.mxu0 %v11979_v52  ;;  %11202 = vmatpush3.bf16.msra.mxu1 %v11980_v30 }
 0xe47   :  { %11185 = vmatprep.subr.bf16.mxu0 %v11981_v9  ;;  %11203 = vmatprep.subr.bf16.mxu1 %v11982_v37 }
 0xe4a   :  { %11186 = vmatpush3.bf16.msra.mxu0 %v11983_v40  ;;  %11204 = vmatpush3.bf16.msra.mxu1 %v11984_v1 }
 0xe4b   :  { %11187 = vmatprep.subr.bf16.mxu0 %v11985_v49  ;;  %11205 = vmatprep.subr.bf16.mxu1 %v11986_v35 }
 0xe4e   :  { %11188 = vmatpush3.bf16.msra.mxu0 %v11987_v26  ;;  %11206 = vmatpush3.bf16.msra.mxu1 %v11988_v47 }
 0xe4f   :  { %11207 = vmatprep.subr.bf16.mxu1 %v11989_v17  ;;  %11574 = vmatprep.subr.bf16.mxu0 %v18851_v36 }
 0xe51   :  { %9133 = vmatmul.mubr.bf16.vlgmr.msra.gmra.mxu0 %v7746_v23 }
 0xe52   :  { %11208 = vmatpush3.bf16.msra.mxu1 %v11990_v15  ;;  %11575 = vmatpush3.bf16.msra.mxu0 %v11991_v10 }
 0xe53   :  { %11209 = vmatprep.subr.bf16.mxu1 %v11992_v13  ;;  %11576 = vmatprep.subr.bf16.mxu0 %v18851_v36 }
 0xe54   :  { %11590 = vmatprep.mubr.msk.bf16.mxu0 %vm12017_vm5, %v18851_v36 }
 0xe56   :  { %11210 = vmatpush3.bf16.msra.mxu1 %v11993_v31  ;;  %11577 = vmatpush3.bf16.msra.mxu0 %v11994_v16 }
 0xe57   :  { %11578 = vmatprep.subr.bf16.mxu0 %v18851_v36 }
 0xe59   :  { %9173 = vmatmul.mubr.bf16.vlgmr.msra.gmra.mxu1 %v7748_v62 }
 0xe5a   :  { %11579 = vmatpush3.bf16.msra.mxu0 %v11995_v61 }
 0xe5b   :  { %11580 = vmatprep.subr.bf16.mxu0 %v18851_v36 }
 0xe5e   :  { %11581 = vmatpush3.bf16.msra.mxu0 %v11996_v39 }
 0xe5f   :  { %11582 = vmatprep.subr.bf16.mxu0 %v18851_v36 }
 0xe62   :  { %11583 = vmatpush3.bf16.msra.mxu0 %v11997_v22 }
 0xe63   :  { %11584 = vmatprep.subr.bf16.mxu0 %v18851_v36 }
 0xe66   :  { %11585 = vmatpush3.bf16.msra.mxu0 %v11998_v44 }
 0xe67   :  { %11586 = vmatprep.subr.bf16.mxu0 %v18851_v36 }
 0xe6a   :  { %11587 = vmatpush3.bf16.msra.mxu0 %v11999_v51 }
 0xe6b   :  { %11588 = vmatprep.subr.bf16.mxu0 %v18851_v36 }
 0xe6e   :  { %11589 = vmatpush3.bf16.msra.mxu0 %v12000_v50 }
 0xe71   :  { %11591 = vmatmul.mubr.bf16.vlgmr.msra.gmra.mxu0 %v7750_v55 }
 0xe91   :  { %v11013_v43 = vpop.f32.mrf.mxu0 }
 0xe93   :  { %v11014_v19 = vpop.f32.mrf.mxu0 }
 0xe94   :  { %v11015_v2 = vadd.f32 %v11014_v19, %v11013_v43  ;;  %v9240_v43 = vpop.permute.xlu0 %9239 }
 0xe95   :  { %v11016_v3 = vpop.f32.mrf.mxu0 }
 0xe96   :  { %v8815_v34 = vadd.f32 %v11015_v2, %v9876_v33 }
 0xe97   :  { %v11017_v63 = vpop.f32.mrf.mxu0 }
 0xe99   :  { %v11035_v58 = vpop.f32.mrf.mxu1 }
 0xe9b   :  { %v11036_v25 = vpop.f32.mrf.mxu1 }
 0xe9c   :  { %v11037_v46 = vadd.f32 %v11036_v25, %v11035_v58  ;;  %v21_v58 = vstv %s18306_s15 }
 0xe9d   :  { %v11038_v12 = vpop.f32.mrf.mxu1  ;;  %22 = vst [vmem:[#allocation2] sm:$0x1] %v21_v58 }
 0xe9e   :  { %v8855_v36 = vadd.f32 %v11037_v46, %v8815_v34 }
 0xe9f   :  { %v11039_v0 = vpop.f32.mrf.mxu1 }
 0xeb1   :  { %v11057_v32 = vpop.f32.mrf.mxu0 }
 0xeb3   :  { %v11058_v11 = vpop.f32.mrf.mxu0 }
 0xeb4   :  { %v11059_v53 = vadd.f32 %v11058_v11, %v11057_v32  ;;  %v10054_v11 = vld [vmem:[#allocation2] ss:$0 sm:$0xff] }
 0xeb5   :  { %v11060_v28 = vpop.f32.mrf.mxu0 }
 0xeb6   :  { %v8895_v29 = vadd.f32 %v11059_v53, %v8855_v36 }
 0xeb7   :  { %v11061_v4 = vpop.f32.mrf.mxu0 }
 0xeb9   :  { %v11079_v45 = vpop.f32.mrf.mxu1 }
 0xebb   :  { %v11080_v6 = vpop.f32.mrf.mxu1 }
 0xebc   :  { %v11081_v14 = vadd.f32 %v11080_v6, %v11079_v45 }
 0xebd   :  { %v11082_v48 = vpop.f32.mrf.mxu1 }
 0xebe   :  { %v8935_v54 = vadd.f32 %v11081_v14, %v8895_v29 }
 0xebf   :  { %v11083_v56 = vpop.f32.mrf.mxu1 }
 0xed1   :  { %v11101_v18 = vpop.f32.mrf.mxu0 }
 0xed3   :  { %v11102_v27 = vpop.f32.mrf.mxu0 }
 0xed4   :  { %v11103_v59 = vadd.f32 %v11102_v27, %v11101_v18 }
 0xed5   :  { %v11104_v5 = vpop.f32.mrf.mxu0 }
 0xed6   :  { %v8975_v60 = vadd.f32 %v11103_v59, %v8935_v54 }
 0xed7   :  { %v11105_v20 = vpop.f32.mrf.mxu0 }
 0xed9   :  { %v11123_v52 = vpop.f32.mrf.mxu1 }
 0xedb   :  { %v11124_v30 = vpop.f32.mrf.mxu1 }
 0xedc   :  { %v11125_v9 = vadd.f32 %v11124_v30, %v11123_v52 }
 0xedd   :  { %v11126_v37 = vpop.f32.mrf.mxu1 }
 0xede   :  { %v9015_v40 = vadd.f32 %v11125_v9, %v8975_v60 }
 0xedf   :  { %v11127_v1 = vpop.f32.mrf.mxu1 }
 0xef1   :  { %v11145_v49 = vpop.f32.mrf.mxu0 }
 0xef3   :  { %v11146_v35 = vpop.f32.mrf.mxu0 }
 0xef4   :  { %v11147_v61 = vadd.f32 %v11146_v35, %v11145_v49 }
 0xef5   :  { %v11148_v8 = vpop.f32.mrf.mxu0 }
 0xef6   :  { %v9055_v39 = vadd.f32 %v11147_v61, %v9015_v40 }
 0xef7   :  { %v11149_v26 = vpop.f32.mrf.mxu0 }
 0xef9   :  { %v11167_v47 = vpop.f32.mrf.mxu1 }
 0xefb   :  { %v11168_v17 = vpop.f32.mrf.mxu1 }
 0xefc   :  { %v11169_v62 = vadd.f32 %v11168_v17, %v11167_v47 }
 0xefd   :  { %v11170_v21 = vpop.f32.mrf.mxu1 }
 0xefe   :  { %v9095_v44 = vadd.f32 %v11169_v62, %v9055_v39 }
 0xeff   :  { %v11171_v15 = vpop.f32.mrf.mxu1 }
 0xf11   :  { %v11189_v10 = vpop.f32.mrf.mxu0 }
 0xf13   :  { %v11190_v23 = vpop.f32.mrf.mxu0 }
 0xf14   :  { %v11191_v22 = vadd.f32 %v11190_v23, %v11189_v10 }
 0xf15   :  { %v11192_v13 = vpop.f32.mrf.mxu0 }
 0xf16   :  { %v9135_v24 = vadd.f32 %v11191_v22, %v9095_v44 }
 0xf17   :  { %v11193_v7 = vpop.f32.mrf.mxu0 }
 0xf19   :  { %v11211_v38 = vpop.f32.mrf.mxu1 }
 0xf1b   :  { %v11212_v31 = vpop.f32.mrf.mxu1 }
 0xf1c   :  { %v11213_v51 = vadd.f32 %v11212_v31, %v11211_v38 }
 0xf1d   :  { %v11214_v16 = vpop.f32.mrf.mxu1 }
 0xf1e   :  { %v9175_v57 = vadd.f32 %v11213_v51, %v9135_v24 }
 0xf1f   :  { %v11215_v42 = vpop.f32.mrf.mxu1 }
 0xf31   :  { %v9214_v50 = vpop.f32.mrf.mxu0 }
 0xf32   :  { %v9215_v41 = vadd.f32 %v9214_v50, %v9175_v57 }
 0xf33   :  { %v11592_v55 = vpop.f32.mrf.mxu0 }
 0xf34   :  { %v9220_v19 = vmax.f32 %v9215_v41, 0.0  ;;  %v9222_v2 = vsel %vm9221_vm0, %v9215_v41, -inf }
 0xf35   :  { %v9217_v3 = vpop.f32.mrf.mxu0  ;;  %9223 = vmax.xlane.f32.xlu0 %v9222_v2 }
 0xf36   :  { %v9242_v63 = vmul.f32 %v9240_v43, %v9220_v19 }
 0xf37   :  { %v11593_v33 = vpop.f32.mrf.mxu0 }
 0xf38   :  { %9244 = vrot.lane.b32.xlu1 %v9242_v63, %s12021_s12 }
 0xfaa   :  { %v9245_v25 = vpop.permute.xlu1 %9244 }
 0xfab   :  { %v9248_v34 = vsel %vm9247_vm1, %v9245_v25, 0.0 }
 0xfac   :  { %9249 = vadd.xlane.f32.xlu1 %v9248_v34 }
 0xfbe   :  { %v9224_v46 = vpop.xlane.xlu0 %9223 }
 0xfbf   :  { %v9225_v12 = vsub.f32 %v9215_v41, %v9224_v46 }
 0xfc1   :  { %v9226_v36 = vmul.f32 1.442695, %v9225_v12 }
 0xfc3   :  { %12001 = vpow2.f32 %v9226_v36 }
 0xfd0   :  { %v12002_v0 = vpop.eup %12001 }
 0xfd1   :  { %v9228_v32 = vsel %vm9221_vm0, %v12002_v0, 0.0 }
 0xfd2   :  { %9229 = vadd.xlane.f32.xlu0 %v9228_v32 }
0x1035   :  { %v9250_v53 = vpop.xlane.xlu1 %9249 }
0x1036   :  { %v9258_v28 = vadd.f32 %v10054_v11, %v9250_v53 }
0x1038   :  { %12003 = vtanh.f32 %v9258_v28 }
0x1045   :  { %v12004_v29 = vpop.eup %12003 }
0x1046   :  { %9261 = vrot.lane.b32.xlu0 %v12004_v29, %s12020_s11 }
0x105b   :  { %v9230_v4 = vpop.xlane.xlu0 %9229 }
0x105c   :  { %12005 = vrcp.f32 %v9230_v4 }
0x1069   :  { %v12006_v45 = vpop.eup %12005 }
0x106a   :  { %v9232_v6 = vmul.f32 %v12006_v45, %v12002_v0 }
0x10b8   :  { %v9262_v14 = vpop.permute.xlu0 %9261 }
0x10b9   :  { %v9265_v48 = vsel %vm9264_vm2, %v9232_v6, %v9262_v14 }
0x10ba   :  { %9267 = vst.msk [vmem:[%s18307_s16] sm:$0x3] %vm9266_vm3, %v9265_v48 }

</bundles_post_ra>
